<compile_context>
chip_gen: v5e
topology: v5e:2x2
jax: 0.10.0
libtpu: 0.0.40
codegen_flags: <defaults>
</compile_context>

<pallas_src>
import functools

import jax
import jax.numpy as jnp
import ml_dtypes
import numpy as np
from jax.experimental import pallas as pl
from jax.experimental.pallas import tpu as pltpu


def _round_up(x, m):
    return (x + m - 1) // m * m


def _layer_meta(h, w):
    """Per layer l (0..3): (H_l, W_l, wbuf_l, S_l).

    Flat padded layout of a layer's input: a 2-D (rows, channels) buffer made of row
    blocks of physical width wbuf_l.  Image i (of the bb batch-stacked images) owns row
    blocks [i*S_l, (i+1)*S_l): block 0 is the zero top pad, blocks 1..H_l hold the
    activation rows (zero left pad at col 0, pixels at cols 1..W_l, zero right pad),
    block H_l+1 is the zero bottom pad.  SAME zero padding of the 3x3 conv therefore
    falls out for free and tap (kh, kw) is the contiguous row slice at offset
    kh*wbuf_l + kw.  The conv output for (i, h, w) lands at row (i*S_l + h)*wbuf_l + w.
    """
    meta = []
    for l in range(4):
        h_l, w_l = h // (2 ** l), w // (2 ** l)
        meta.append((h_l, w_l, _round_up(w_l + 2, 16), h_l + 2))
    return tuple(meta)


# -----------------------------------------------------------------------------
# Kernel: all 4 conv blocks fused; inter-layer activations live in VMEM (bf16).
# -----------------------------------------------------------------------------
def _convnet_kernel(x_ref, w1_ref, b1_ref, w2_ref, b2_ref, w3_ref, b3_ref,
                    w4_ref, b4_ref, out_ref, p2_ref, p3_ref, p4_ref, pool_ref,
                    *, bb, meta):
    # Zero the inter-layer buffers: positions the scatter never writes act as the next
    # layer's SAME zero padding.  (Full memset every step: scratch is per-core and the
    # padding must be valid for every grid step on every core.)
    for ref in (p2_ref, p3_ref, p4_ref):
        ref[...] = jnp.zeros(ref.shape, ref.dtype)

    srcs = (x_ref, p2_ref, p3_ref, p4_ref)
    wrefs = (w1_ref, w2_ref, w3_ref, w4_ref)
    brefs = (b1_ref, b2_ref, b3_ref, b4_ref)
    dsts = (p2_ref, p3_ref, p4_ref, None)

    for l in range(4):
        h_l, w_l, wbuf, s_img = meta[l]
        src, w_ref, b_ref = srcs[l], wrefs[l], brefs[l]
        cin = w_ref.shape[0] // 9
        # conv-output rows (covers all bb images; pad/garbage rows are masked by never
        # being scattered to the next layer).
        m = ((bb - 1) * s_img + h_l) * wbuf

        # --- 3x3 conv (BN scale folded into W) as ONE matmul: K-concatenated taps ---
        taps = [src[pl.ds(kh * wbuf + kw, m), :]          # (m, cin) bf16, contiguous rows
                for kh in range(3) for kw in range(3)]
        lhs = jnp.concatenate(taps, axis=1)               # (m, 9*cin) bf16
        acc = jnp.dot(lhs, w_ref[...],
                      preferred_element_type=jnp.float32)  # (m, hid) f32 on the MXU
        y = jnp.maximum(acc + b_ref[...], 0.0)             # folded BN bias + ReLU (f32)

        # --- 2x2/2 max-pool: two shifted elementwise maxima (no strided access) ---
        yh = jnp.maximum(y[: m - 1, :], y[1:, :])                    # horizontal pair max
        yv = jnp.maximum(yh[: m - 1 - wbuf, :], yh[wbuf:, :])        # vertical pair max
        # Pooled value P_i[h2, w2] sits at yv row (i*s_img + 2*h2)*wbuf + 2*w2.
        pool_ref[pl.ds(0, m - 1 - wbuf), :] = yv                     # stage in f32 scratch

        # --- compact (stride-1) scatter into the next layer / final feature gather ---
        h_n, w_n = h_l // 2, w_l // 2
        if l < 3:
            dst = dsts[l]
            _, _, wbuf_n, s_n = meta[l + 1]
            for i in range(bb):
                for h2 in range(h_n):
                    blk = pool_ref[pl.ds((i * s_img + 2 * h2) * wbuf, w_n, stride=2), :]
                    dst[pl.ds((i * s_n + 1 + h2) * wbuf_n + 1, w_n), :] = (
                        blk.astype(dst.dtype))
        else:
            for i in range(bb):
                for h2 in range(h_n):
                    blk = pool_ref[pl.ds((i * s_img + 2 * h2) * wbuf, w_n, stride=2), :]
                    out_ref[i, pl.ds(h2 * w_n, w_n), :] = blk.astype(out_ref.dtype)


# -----------------------------------------------------------------------------
# Wrapper (layout plumbing only: transpose + zero-pad + batch stacking + cast).
# -----------------------------------------------------------------------------
@jax.jit
def _forward_impl(x_nchw, wmats, biases):
    b, c, h, w = x_nchw.shape
    assert h % 16 == 0 and w % 16 == 0, "H and W must be divisible by 16"
    hid = wmats[0].shape[1]
    c_pad = wmats[0].shape[0] // 9
    meta = _layer_meta(h, w)
    hf, wf = h // 16, w // 16

    # Batch blocking: bb images per grid step, grid kept >= 2 when possible (v7x megacore).
    bb = 1
    for cand in (8, 4, 2):
        if b % cand == 0 and b // cand >= 2:
            bb = cand
            break
    n_steps = b // bb

    h1, w1, wbuf1, s1 = meta[0]
    # Flat padded, batch-stacked layer-1 input (bf16).
    x = jnp.transpose(x_nchw, (0, 2, 3, 1))                                   # NHWC
    x = jnp.pad(x, ((0, 0), (1, 1), (1, wbuf1 - w - 1), (0, c_pad - c)))      # SAME pads
    x = x.reshape(b, s1 * wbuf1, c_pad)
    x = x.reshape(n_steps, bb * s1 * wbuf1, c_pad)                            # stack bb imgs
    x = jnp.pad(x, ((0, 0), (0, wbuf1), (0, 0)))                              # read-over guard
    x_flat = x.astype(jnp.bfloat16)
    r1 = x_flat.shape[1]

    in_specs = [pl.BlockSpec((None, r1, c_pad), lambda g: (g, 0, 0))]
    args = [x_flat]
    for wm, bi in zip(wmats, biases):
        in_specs.append(pl.BlockSpec(wm.shape, lambda g: (0, 0)))
        in_specs.append(pl.BlockSpec(bi.shape, lambda g: (0, 0)))
        args += [wm, bi]

    def buf_rows(l):
        h_l, _, wbuf_l, s_l = meta[l]
        return (bb * s_l + 1) * wbuf_l

    pool_rows = max(((bb - 1) * (meta[l][0] + 2) + meta[l][0]) * meta[l][2]
                    for l in range(4))

    scratch = [
        pltpu.VMEM((buf_rows(1), hid), jnp.bfloat16),
        pltpu.VMEM((buf_rows(2), hid), jnp.bfloat16),
        pltpu.VMEM((buf_rows(3), hid), jnp.bfloat16),
        pltpu.VMEM((pool_rows, hid), jnp.float32),
    ]

    # Rough VMEM plan -> explicit compiler limit (keeps v7x's 64 MiB budget honest).
    xblk = r1 * c_pad * 2
    oblk = bb * hf * wf * hid * 4
    wblk = sum(int(np.prod(wm.shape)) * 2 + int(np.prod(bi.shape)) * 4
               for wm, bi in zip(wmats, biases))
    sblk = sum(buf_rows(l) * hid * 2 for l in (1, 2, 3)) + pool_rows * hid * 4
    plan = 2 * (xblk + oblk) + wblk + sblk
    vmem_limit = int(min(64 * 2 ** 20, max(32 * 2 ** 20, 2 * plan)))

    out = pl.pallas_call(
        functools.partial(_convnet_kernel, bb=bb, meta=meta),
        out_shape=jax.ShapeDtypeStruct((b, hf * wf, hid), jnp.float32),
        grid=(n_steps,),
        in_specs=in_specs,
        out_specs=pl.BlockSpec((bb, hf * wf, hid), lambda g: (g, 0, 0)),
        scratch_shapes=scratch,
        compiler_params=pltpu.CompilerParams(
            dimension_semantics=("parallel",),
            vmem_limit_bytes=vmem_limit),
    )(*args)

    # Match PyTorch: encoder output is NCHW, then x.view(B, -1) (channel-major flatten).
    if hf * wf == 1:
        return out.reshape(b, hid)          # no extra HBM pass needed
    return jnp.transpose(out, (0, 2, 1)).reshape(b, -1)


def convnet_forward(x_nchw, params):
    wmats = tuple(p["wmat"] for p in params)
    biases = tuple(p["bias"] for p in params)
    return _forward_impl(x_nchw, wmats, biases)


# -----------------------------------------------------------------------------
# Deterministic parameters (ConvBase(hidden, channels)); inference BN folded into
# a per-channel scale (into the weights) + bias.
# -----------------------------------------------------------------------------
def init_params(key, channels=3, hidden=64, layers=4, eps=1e-5):
    params = []
    c_in = channels
    for _ in range(layers):
        key, k_w, k_b, k_g = jax.random.split(key, 4)
        fan_in = 9 * c_in
        w = jax.random.normal(k_w, (3, 3, c_in, hidden), jnp.float32) / np.sqrt(fan_in)
        b_conv = jax.random.uniform(k_b, (hidden,), jnp.float32, -0.1, 0.1)
        gamma = jax.random.uniform(k_g, (hidden,), jnp.float32, 0.5, 1.5)
        beta = jnp.zeros((hidden,), jnp.float32)
        running_mean = jnp.zeros((hidden,), jnp.float32)
        running_var = jnp.ones((hidden,), jnp.float32)
        # TODO(synk): train-mode BatchNorm (batch statistics) is not implemented.
        scale = gamma / jnp.sqrt(running_var + eps)
        w_folded = (w * scale).astype(jnp.bfloat16)            # BN scale folded into W
        bias = ((b_conv - running_mean) * scale + beta).reshape(1, hidden)

        c_pad = _round_up(c_in, 8)                             # lane/K alignment (3 -> 8)
        wmat = jnp.zeros((3, 3, c_pad, hidden), jnp.bfloat16)
        wmat = wmat.at[:, :, :c_in, :].set(w_folded)
        params.append({
            "wmat": wmat.reshape(9 * c_pad, hidden),                   # kernel weights (bf16)
            "bias": bias.astype(jnp.float32),                          # kernel bias (f32)
            "w_hwio_np": np.asarray(w_folded.astype(jnp.float32)),     # NumPy-reference weights
            "bias_np": np.asarray(bias, np.float32),
        })
        c_in = hidden
    return params


# -----------------------------------------------------------------------------
# Pure-NumPy reference with explicit bf16 rounding at the same points as the kernel
# (XLA cannot elide these rounds, unlike astype(bf16).astype(f32) round-trips).
# -----------------------------------------------------------------------------
def _bf16_round_np(a):
    return np.asarray(a, np.float32).astype(ml_dtypes.bfloat16).astype(np.float32)


def reference_forward(x_nchw, params):
    x = np.transpose(np.asarray(x_nchw, np.float32), (0, 2, 3, 1))            # NHWC f32
    for layer in params:
        wt = layer["w_hwio_np"]                                               # bf16 values, f32 dtype
        bi = layer["bias_np"][0]
        xb = _bf16_round_np(x)                                                # bf16 conv operands
        n, hc, wc, _ = xb.shape
        xp = np.pad(xb, ((0, 0), (1, 1), (1, 1), (0, 0)))
        z = np.zeros((n, hc, wc, wt.shape[-1]), np.float32)                   # f32 accumulation
        for kh in range(3):
            for kw in range(3):
                z += xp[:, kh:kh + hc, kw:kw + wc, :] @ wt[kh, kw]
        y = np.maximum(z + bi, 0.0)                                           # bias + ReLU (f32)
        x = y.reshape(n, hc // 2, 2, wc // 2, 2, -1).max(axis=(2, 4))         # 2x2/2 max pool
    x = np.transpose(x, (0, 3, 1, 2))                                         # NCHW
    return x.reshape(x.shape[0], -1)                                          # channel-major flatten


if __name__ == "__main__":
    key = jax.random.PRNGKey(0)
    k_x, k_p = jax.random.split(key)

    # Small shapes consistent with the module (x_dim=3 input channels), NCHW.
    B, C, H, W = 4, 3, 16, 16
    x = jax.random.normal(k_x, (B, C, H, W), jnp.float32)
    params = init_params(k_p, channels=C, hidden=64, layers=4)

    out = jax.block_until_ready(convnet_forward(x, params))
    ref = reference_forward(np.asarray(x), params)

    assert out.shape == ref.shape == (B, 64), (out.shape, ref.shape)
    np.testing.assert_allclose(np.asarray(out), ref, rtol=2e-3, atol=2e-3)

    print("KERNEL_OK")
</pallas_src>

<mosaic_0001>
module attributes {stable_mosaic.version = 11 : i64} {
  func.func @_convnet_kernel(%arg0: i32, %arg1: memref<1x1184x8xbf16, #tpu.memory_space<vmem>>, %arg2: memref<72x64xbf16, #tpu.memory_space<vmem>>, %arg3: memref<1x64xf32, #tpu.memory_space<vmem>>, %arg4: memref<576x64xbf16, #tpu.memory_space<vmem>>, %arg5: memref<1x64xf32, #tpu.memory_space<vmem>>, %arg6: memref<576x64xbf16, #tpu.memory_space<vmem>>, %arg7: memref<1x64xf32, #tpu.memory_space<vmem>>, %arg8: memref<576x64xbf16, #tpu.memory_space<vmem>>, %arg9: memref<1x64xf32, #tpu.memory_space<vmem>>, %arg10: memref<2x1x64xf32, #tpu.memory_space<vmem>>, %arg11: memref<336x64xbf16, #tpu.memory_space<vmem>>, %arg12: memref<208x64xbf16, #tpu.memory_space<vmem>>, %arg13: memref<144x64xbf16, #tpu.memory_space<vmem>>, %arg14: memref<1088x64xf32, #tpu.memory_space<vmem>>) attributes {dimension_semantics = [#tpu.dimension_semantics<parallel>], iteration_bounds = array<i64: 2>, scalar_prefetch = 0 : i64, scratch_operands = 4 : i64, tpu.core_type = #tpu.core_type<tc>, window_params = [{transform_indices = @transform_0, window_bounds = array<i64: 1, 1184, 8>}, {pipeline_mode = #tpu.pipeline_mode<synchronous>, transform_indices = @transform_1, window_bounds = array<i64: 72, 64>}, {pipeline_mode = #tpu.pipeline_mode<synchronous>, transform_indices = @transform_2, window_bounds = array<i64: 1, 64>}, {pipeline_mode = #tpu.pipeline_mode<synchronous>, transform_indices = @transform_3, window_bounds = array<i64: 576, 64>}, {pipeline_mode = #tpu.pipeline_mode<synchronous>, transform_indices = @transform_4, window_bounds = array<i64: 1, 64>}, {pipeline_mode = #tpu.pipeline_mode<synchronous>, transform_indices = @transform_5, window_bounds = array<i64: 576, 64>}, {pipeline_mode = #tpu.pipeline_mode<synchronous>, transform_indices = @transform_6, window_bounds = array<i64: 1, 64>}, {pipeline_mode = #tpu.pipeline_mode<synchronous>, transform_indices = @transform_7, window_bounds = array<i64: 576, 64>}, {pipeline_mode = #tpu.pipeline_mode<synchronous>, transform_indices = @transform_8, window_bounds = array<i64: 1, 64>}, {transform_indices = @transform_9, window_bounds = array<i64: 2, 1, 64>}]} {
    %cst = arith.constant 0.000000e+00 : bf16
    %0 = vector.broadcast %cst : bf16 to vector<336x64xbf16>
    %c0 = arith.constant 0 : index
    %c0_0 = arith.constant 0 : index
    %1 = vector.load %arg11[%c0, %c0_0] : memref<336x64xbf16, #tpu.memory_space<vmem>>, vector<336x64xbf16>
    tpu.vector_store %arg11[%c0, %c0_0], %0 {strides = array<i32>} : memref<336x64xbf16, #tpu.memory_space<vmem>>, vector<336x64xbf16>,
    %cst_1 = arith.constant 0.000000e+00 : bf16
    %2 = vector.broadcast %cst_1 : bf16 to vector<208x64xbf16>
    %c0_2 = arith.constant 0 : index
    %c0_3 = arith.constant 0 : index
    %3 = vector.load %arg12[%c0_2, %c0_3] : memref<208x64xbf16, #tpu.memory_space<vmem>>, vector<208x64xbf16>
    tpu.vector_store %arg12[%c0_2, %c0_3], %2 {strides = array<i32>} : memref<208x64xbf16, #tpu.memory_space<vmem>>, vector<208x64xbf16>,
    %cst_4 = arith.constant 0.000000e+00 : bf16
    %4 = vector.broadcast %cst_4 : bf16 to vector<144x64xbf16>
    %c0_5 = arith.constant 0 : index
    %c0_6 = arith.constant 0 : index
    %5 = vector.load %arg13[%c0_5, %c0_6] : memref<144x64xbf16, #tpu.memory_space<vmem>>, vector<144x64xbf16>
    tpu.vector_store %arg13[%c0_5, %c0_6], %4 {strides = array<i32>} : memref<144x64xbf16, #tpu.memory_space<vmem>>, vector<144x64xbf16>,
    %c0_7 = arith.constant 0 : index
    %c0_8 = arith.constant 0 : index
    %c0_9 = arith.constant 0 : index
    %6 = vector.load %arg1[%c0_7, %c0_8, %c0_9] : memref<1x1184x8xbf16, #tpu.memory_space<vmem>>, vector<1x1088x8xbf16>
    %7 = vector.shape_cast %6 : vector<1x1088x8xbf16> to vector<1088x8xbf16>
    %c0_10 = arith.constant 0 : index
    %c1 = arith.constant 1 : index
    %c0_11 = arith.constant 0 : index
    %8 = vector.load %arg1[%c0_10, %c1, %c0_11] : memref<1x1184x8xbf16, #tpu.memory_space<vmem>>, vector<1x1088x8xbf16>
    %9 = vector.shape_cast %8 : vector<1x1088x8xbf16> to vector<1088x8xbf16>
    %c0_12 = arith.constant 0 : index
    %c2 = arith.constant 2 : index
    %c0_13 = arith.constant 0 : index
    %10 = vector.load %arg1[%c0_12, %c2, %c0_13] : memref<1x1184x8xbf16, #tpu.memory_space<vmem>>, vector<1x1088x8xbf16>
    %11 = vector.shape_cast %10 : vector<1x1088x8xbf16> to vector<1088x8xbf16>
    %c0_14 = arith.constant 0 : index
    %c32 = arith.constant 32 : index
    %c0_15 = arith.constant 0 : index
    %12 = vector.load %arg1[%c0_14, %c32, %c0_15] : memref<1x1184x8xbf16, #tpu.memory_space<vmem>>, vector<1x1088x8xbf16>
    %13 = vector.shape_cast %12 : vector<1x1088x8xbf16> to vector<1088x8xbf16>
    %c0_16 = arith.constant 0 : index
    %c33 = arith.constant 33 : index
    %c0_17 = arith.constant 0 : index
    %14 = vector.load %arg1[%c0_16, %c33, %c0_17] : memref<1x1184x8xbf16, #tpu.memory_space<vmem>>, vector<1x1088x8xbf16>
    %15 = vector.shape_cast %14 : vector<1x1088x8xbf16> to vector<1088x8xbf16>
    %c0_18 = arith.constant 0 : index
    %c34 = arith.constant 34 : index
    %c0_19 = arith.constant 0 : index
    %16 = vector.load %arg1[%c0_18, %c34, %c0_19] : memref<1x1184x8xbf16, #tpu.memory_space<vmem>>, vector<1x1088x8xbf16>
    %17 = vector.shape_cast %16 : vector<1x1088x8xbf16> to vector<1088x8xbf16>
    %c0_20 = arith.constant 0 : index
    %c64 = arith.constant 64 : index
    %c0_21 = arith.constant 0 : index
    %18 = vector.load %arg1[%c0_20, %c64, %c0_21] : memref<1x1184x8xbf16, #tpu.memory_space<vmem>>, vector<1x1088x8xbf16>
    %19 = vector.shape_cast %18 : vector<1x1088x8xbf16> to vector<1088x8xbf16>
    %c0_22 = arith.constant 0 : index
    %c65 = arith.constant 65 : index
    %c0_23 = arith.constant 0 : index
    %20 = vector.load %arg1[%c0_22, %c65, %c0_23] : memref<1x1184x8xbf16, #tpu.memory_space<vmem>>, vector<1x1088x8xbf16>
    %21 = vector.shape_cast %20 : vector<1x1088x8xbf16> to vector<1088x8xbf16>
    %c0_24 = arith.constant 0 : index
    %c66 = arith.constant 66 : index
    %c0_25 = arith.constant 0 : index
    %22 = vector.load %arg1[%c0_24, %c66, %c0_25] : memref<1x1184x8xbf16, #tpu.memory_space<vmem>>, vector<1x1088x8xbf16>
    %23 = vector.shape_cast %22 : vector<1x1088x8xbf16> to vector<1088x8xbf16>
    %24 = tpu.concatenate %7, %9, %11, %13, %15, %17, %19, %21, %23 in 1 : vector<1088x8xbf16>, vector<1088x8xbf16>, vector<1088x8xbf16>, vector<1088x8xbf16>, vector<1088x8xbf16>, vector<1088x8xbf16>, vector<1088x8xbf16>, vector<1088x8xbf16>, vector<1088x8xbf16> -> vector<1088x72xbf16>
    %c0_26 = arith.constant 0 : index
    %c0_27 = arith.constant 0 : index
    %25 = vector.load %arg2[%c0_26, %c0_27] : memref<72x64xbf16, #tpu.memory_space<vmem>>, vector<72x64xbf16>
    %cst_28 = arith.constant dense<0.000000e+00> : vector<1088x64xf32>
    %26 = tpu.matmul %24, %25, %cst_28 {dimension_numbers = #tpu.dot_dimension_numbers<[1], [0], [0], [1], [0, 0, 1, 1], [], []>} : vector<1088x72xbf16>, vector<72x64xbf16>, vector<1088x64xf32> -> vector<1088x64xf32>
    %c0_29 = arith.constant 0 : index
    %c0_30 = arith.constant 0 : index
    %27 = vector.load %arg3[%c0_29, %c0_30] : memref<1x64xf32, #tpu.memory_space<vmem>>, vector<1x64xf32>
    %28 = vector.broadcast %27 : vector<1x64xf32> to vector<1088x64xf32>
    %29 = arith.addf %26, %28 : vector<1088x64xf32>
    %cst_31 = arith.constant 0.000000e+00 : f32
    %30 = vector.broadcast %cst_31 : f32 to vector<1088x64xf32>
    %31 = arith.maximumf %29, %30 : vector<1088x64xf32>
    %32 = vector.extract_strided_slice %31 {offsets = [0, 0], sizes = [1087, 64], strides = [1, 1]} : vector<1088x64xf32> to vector<1087x64xf32>
    %33 = vector.extract_strided_slice %31 {offsets = [1, 0], sizes = [1087, 64], strides = [1, 1]} : vector<1088x64xf32> to vector<1087x64xf32>
    %34 = arith.maximumf %32, %33 : vector<1087x64xf32>
    %35 = vector.extract_strided_slice %34 {offsets = [0, 0], sizes = [1055, 64], strides = [1, 1]} : vector<1087x64xf32> to vector<1055x64xf32>
    %36 = vector.extract_strided_slice %34 {offsets = [32, 0], sizes = [1055, 64], strides = [1, 1]} : vector<1087x64xf32> to vector<1055x64xf32>
    %37 = arith.maximumf %35, %36 : vector<1055x64xf32>
    %c0_32 = arith.constant 0 : index
    %c0_33 = arith.constant 0 : index
    %38 = vector.load %arg14[%c0_32, %c0_33] : memref<1088x64xf32, #tpu.memory_space<vmem>>, vector<1055x64xf32>
    tpu.vector_store %arg14[%c0_32, %c0_33], %37 {strides = array<i32>} : memref<1088x64xf32, #tpu.memory_space<vmem>>, vector<1055x64xf32>,
    %c0_34 = arith.constant 0 : index
    %c0_35 = arith.constant 0 : index
    %39 = tpu.strided_load %arg14[%c0_34, %c0_35] {strides = array<i32: 2, 1>} : memref<1088x64xf32, #tpu.memory_space<vmem>>, vector<8x64xf32>
    %40 = arith.truncf %39 : vector<8x64xf32> to vector<8x64xbf16>
    %c17 = arith.constant 17 : index
    %c0_36 = arith.constant 0 : index
    %41 = vector.load %arg11[%c17, %c0_36] : memref<336x64xbf16, #tpu.memory_space<vmem>>, vector<8x64xbf16>
    tpu.vector_store %arg11[%c17, %c0_36], %40 {strides = array<i32>} : memref<336x64xbf16, #tpu.memory_space<vmem>>, vector<8x64xbf16>,
    %c64_37 = arith.constant 64 : index
    %c0_38 = arith.constant 0 : index
    %42 = tpu.strided_load %arg14[%c64_37, %c0_38] {strides = array<i32: 2, 1>} : memref<1088x64xf32, #tpu.memory_space<vmem>>, vector<8x64xf32>
    %43 = arith.truncf %42 : vector<8x64xf32> to vector<8x64xbf16>
    %c33_39 = arith.constant 33 : index
    %c0_40 = arith.constant 0 : index
    %44 = vector.load %arg11[%c33_39, %c0_40] : memref<336x64xbf16, #tpu.memory_space<vmem>>, vector<8x64xbf16>
    tpu.vector_store %arg11[%c33_39, %c0_40], %43 {strides = array<i32>} : memref<336x64xbf16, #tpu.memory_space<vmem>>, vector<8x64xbf16>,
    %c128 = arith.constant 128 : index
    %c0_41 = arith.constant 0 : index
    %45 = tpu.strided_load %arg14[%c128, %c0_41] {strides = array<i32: 2, 1>} : memref<1088x64xf32, #tpu.memory_space<vmem>>, vector<8x64xf32>
    %46 = arith.truncf %45 : vector<8x64xf32> to vector<8x64xbf16>
    %c49 = arith.constant 49 : index
    %c0_42 = arith.constant 0 : index
    %47 = vector.load %arg11[%c49, %c0_42] : memref<336x64xbf16, #tpu.memory_space<vmem>>, vector<8x64xbf16>
    tpu.vector_store %arg11[%c49, %c0_42], %46 {strides = array<i32>} : memref<336x64xbf16, #tpu.memory_space<vmem>>, vector<8x64xbf16>,
    %c192 = arith.constant 192 : index
    %c0_43 = arith.constant 0 : index
    %48 = tpu.strided_load %arg14[%c192, %c0_43] {strides = array<i32: 2, 1>} : memref<1088x64xf32, #tpu.memory_space<vmem>>, vector<8x64xf32>
    %49 = arith.truncf %48 : vector<8x64xf32> to vector<8x64xbf16>
    %c65_44 = arith.constant 65 : index
    %c0_45 = arith.constant 0 : index
    %50 = vector.load %arg11[%c65_44, %c0_45] : memref<336x64xbf16, #tpu.memory_space<vmem>>, vector<8x64xbf16>
    tpu.vector_store %arg11[%c65_44, %c0_45], %49 {strides = array<i32>} : memref<336x64xbf16, #tpu.memory_space<vmem>>, vector<8x64xbf16>,
    %c256 = arith.constant 256 : index
    %c0_46 = arith.constant 0 : index
    %51 = tpu.strided_load %arg14[%c256, %c0_46] {strides = array<i32: 2, 1>} : memref<1088x64xf32, #tpu.memory_space<vmem>>, vector<8x64xf32>
    %52 = arith.truncf %51 : vector<8x64xf32> to vector<8x64xbf16>
    %c81 = arith.constant 81 : index
    %c0_47 = arith.constant 0 : index
    %53 = vector.load %arg11[%c81, %c0_47] : memref<336x64xbf16, #tpu.memory_space<vmem>>, vector<8x64xbf16>
    tpu.vector_store %arg11[%c81, %c0_47], %52 {strides = array<i32>} : memref<336x64xbf16, #tpu.memory_space<vmem>>, vector<8x64xbf16>,
    %c320 = arith.constant 320 : index
    %c0_48 = arith.constant 0 : index
    %54 = tpu.strided_load %arg14[%c320, %c0_48] {strides = array<i32: 2, 1>} : memref<1088x64xf32, #tpu.memory_space<vmem>>, vector<8x64xf32>
    %55 = arith.truncf %54 : vector<8x64xf32> to vector<8x64xbf16>
    %c97 = arith.constant 97 : index
    %c0_49 = arith.constant 0 : index
    %56 = vector.load %arg11[%c97, %c0_49] : memref<336x64xbf16, #tpu.memory_space<vmem>>, vector<8x64xbf16>
    tpu.vector_store %arg11[%c97, %c0_49], %55 {strides = array<i32>} : memref<336x64xbf16, #tpu.memory_space<vmem>>, vector<8x64xbf16>,
    %c384 = arith.constant 384 : index
    %c0_50 = arith.constant 0 : index
    %57 = tpu.strided_load %arg14[%c384, %c0_50] {strides = array<i32: 2, 1>} : memref<1088x64xf32, #tpu.memory_space<vmem>>, vector<8x64xf32>
    %58 = arith.truncf %57 : vector<8x64xf32> to vector<8x64xbf16>
    %c113 = arith.constant 113 : index
    %c0_51 = arith.constant 0 : index
    %59 = vector.load %arg11[%c113, %c0_51] : memref<336x64xbf16, #tpu.memory_space<vmem>>, vector<8x64xbf16>
    tpu.vector_store %arg11[%c113, %c0_51], %58 {strides = array<i32>} : memref<336x64xbf16, #tpu.memory_space<vmem>>, vector<8x64xbf16>,
    %c448 = arith.constant 448 : index
    %c0_52 = arith.constant 0 : index
    %60 = tpu.strided_load %arg14[%c448, %c0_52] {strides = array<i32: 2, 1>} : memref<1088x64xf32, #tpu.memory_space<vmem>>, vector<8x64xf32>
    %61 = arith.truncf %60 : vector<8x64xf32> to vector<8x64xbf16>
    %c129 = arith.constant 129 : index
    %c0_53 = arith.constant 0 : index
    %62 = vector.load %arg11[%c129, %c0_53] : memref<336x64xbf16, #tpu.memory_space<vmem>>, vector<8x64xbf16>
    tpu.vector_store %arg11[%c129, %c0_53], %61 {strides = array<i32>} : memref<336x64xbf16, #tpu.memory_space<vmem>>, vector<8x64xbf16>,
    %c576 = arith.constant 576 : index
    %c0_54 = arith.constant 0 : index
    %63 = tpu.strided_load %arg14[%c576, %c0_54] {strides = array<i32: 2, 1>} : memref<1088x64xf32, #tpu.memory_space<vmem>>, vector<8x64xf32>
    %64 = arith.truncf %63 : vector<8x64xf32> to vector<8x64xbf16>
    %c177 = arith.constant 177 : index
    %c0_55 = arith.constant 0 : index
    %65 = vector.load %arg11[%c177, %c0_55] : memref<336x64xbf16, #tpu.memory_space<vmem>>, vector<8x64xbf16>
    tpu.vector_store %arg11[%c177, %c0_55], %64 {strides = array<i32>} : memref<336x64xbf16, #tpu.memory_space<vmem>>, vector<8x64xbf16>,
    %c640 = arith.constant 640 : index
    %c0_56 = arith.constant 0 : index
    %66 = tpu.strided_load %arg14[%c640, %c0_56] {strides = array<i32: 2, 1>} : memref<1088x64xf32, #tpu.memory_space<vmem>>, vector<8x64xf32>
    %67 = arith.truncf %66 : vector<8x64xf32> to vector<8x64xbf16>
    %c193 = arith.constant 193 : index
    %c0_57 = arith.constant 0 : index
    %68 = vector.load %arg11[%c193, %c0_57] : memref<336x64xbf16, #tpu.memory_space<vmem>>, vector<8x64xbf16>
    tpu.vector_store %arg11[%c193, %c0_57], %67 {strides = array<i32>} : memref<336x64xbf16, #tpu.memory_space<vmem>>, vector<8x64xbf16>,
    %c704 = arith.constant 704 : index
    %c0_58 = arith.constant 0 : index
    %69 = tpu.strided_load %arg14[%c704, %c0_58] {strides = array<i32: 2, 1>} : memref<1088x64xf32, #tpu.memory_space<vmem>>, vector<8x64xf32>
    %70 = arith.truncf %69 : vector<8x64xf32> to vector<8x64xbf16>
    %c209 = arith.constant 209 : index
    %c0_59 = arith.constant 0 : index
    %71 = vector.load %arg11[%c209, %c0_59] : memref<336x64xbf16, #tpu.memory_space<vmem>>, vector<8x64xbf16>
    tpu.vector_store %arg11[%c209, %c0_59], %70 {strides = array<i32>} : memref<336x64xbf16, #tpu.memory_space<vmem>>, vector<8x64xbf16>,
    %c768 = arith.constant 768 : index
    %c0_60 = arith.constant 0 : index
    %72 = tpu.strided_load %arg14[%c768, %c0_60] {strides = array<i32: 2, 1>} : memref<1088x64xf32, #tpu.memory_space<vmem>>, vector<8x64xf32>
    %73 = arith.truncf %72 : vector<8x64xf32> to vector<8x64xbf16>
    %c225 = arith.constant 225 : index
    %c0_61 = arith.constant 0 : index
    %74 = vector.load %arg11[%c225, %c0_61] : memref<336x64xbf16, #tpu.memory_space<vmem>>, vector<8x64xbf16>
    tpu.vector_store %arg11[%c225, %c0_61], %73 {strides = array<i32>} : memref<336x64xbf16, #tpu.memory_space<vmem>>, vector<8x64xbf16>,
    %c832 = arith.constant 832 : index
    %c0_62 = arith.constant 0 : index
    %75 = tpu.strided_load %arg14[%c832, %c0_62] {strides = array<i32: 2, 1>} : memref<1088x64xf32, #tpu.memory_space<vmem>>, vector<8x64xf32>
    %76 = arith.truncf %75 : vector<8x64xf32> to vector<8x64xbf16>
    %c241 = arith.constant 241 : index
    %c0_63 = arith.constant 0 : index
    %77 = vector.load %arg11[%c241, %c0_63] : memref<336x64xbf16, #tpu.memory_space<vmem>>, vector<8x64xbf16>
    tpu.vector_store %arg11[%c241, %c0_63], %76 {strides = array<i32>} : memref<336x64xbf16, #tpu.memory_space<vmem>>, vector<8x64xbf16>,
    %c896 = arith.constant 896 : index
    %c0_64 = arith.constant 0 : index
    %78 = tpu.strided_load %arg14[%c896, %c0_64] {strides = array<i32: 2, 1>} : memref<1088x64xf32, #tpu.memory_space<vmem>>, vector<8x64xf32>
    %79 = arith.truncf %78 : vector<8x64xf32> to vector<8x64xbf16>
    %c257 = arith.constant 257 : index
    %c0_65 = arith.constant 0 : index
    %80 = vector.load %arg11[%c257, %c0_65] : memref<336x64xbf16, #tpu.memory_space<vmem>>, vector<8x64xbf16>
    tpu.vector_store %arg11[%c257, %c0_65], %79 {strides = array<i32>} : memref<336x64xbf16, #tpu.memory_space<vmem>>, vector<8x64xbf16>,
    %c960 = arith.constant 960 : index
    %c0_66 = arith.constant 0 : index
    %81 = tpu.strided_load %arg14[%c960, %c0_66] {strides = array<i32: 2, 1>} : memref<1088x64xf32, #tpu.memory_space<vmem>>, vector<8x64xf32>
    %82 = arith.truncf %81 : vector<8x64xf32> to vector<8x64xbf16>
    %c273 = arith.constant 273 : index
    %c0_67 = arith.constant 0 : index
    %83 = vector.load %arg11[%c273, %c0_67] : memref<336x64xbf16, #tpu.memory_space<vmem>>, vector<8x64xbf16>
    tpu.vector_store %arg11[%c273, %c0_67], %82 {strides = array<i32>} : memref<336x64xbf16, #tpu.memory_space<vmem>>, vector<8x64xbf16>,
    %c1024 = arith.constant 1024 : index
    %c0_68 = arith.constant 0 : index
    %84 = tpu.strided_load %arg14[%c1024, %c0_68] {strides = array<i32: 2, 1>} : memref<1088x64xf32, #tpu.memory_space<vmem>>, vector<8x64xf32>
    %85 = arith.truncf %84 : vector<8x64xf32> to vector<8x64xbf16>
    %c289 = arith.constant 289 : index
    %c0_69 = arith.constant 0 : index
    %86 = vector.load %arg11[%c289, %c0_69] : memref<336x64xbf16, #tpu.memory_space<vmem>>, vector<8x64xbf16>
    tpu.vector_store %arg11[%c289, %c0_69], %85 {strides = array<i32>} : memref<336x64xbf16, #tpu.memory_space<vmem>>, vector<8x64xbf16>,
    %c0_70 = arith.constant 0 : index
    %c0_71 = arith.constant 0 : index
    %87 = vector.load %arg11[%c0_70, %c0_71] : memref<336x64xbf16, #tpu.memory_space<vmem>>, vector<288x64xbf16>
    %c1_72 = arith.constant 1 : index
    %c0_73 = arith.constant 0 : index
    %88 = vector.load %arg11[%c1_72, %c0_73] : memref<336x64xbf16, #tpu.memory_space<vmem>>, vector<288x64xbf16>
    %c2_74 = arith.constant 2 : index
    %c0_75 = arith.constant 0 : index
    %89 = vector.load %arg11[%c2_74, %c0_75] : memref<336x64xbf16, #tpu.memory_space<vmem>>, vector<288x64xbf16>
    %c16 = arith.constant 16 : index
    %c0_76 = arith.constant 0 : index
    %90 = vector.load %arg11[%c16, %c0_76] : memref<336x64xbf16, #tpu.memory_space<vmem>>, vector<288x64xbf16>
    %c17_77 = arith.constant 17 : index
    %c0_78 = arith.constant 0 : index
    %91 = vector.load %arg11[%c17_77, %c0_78] : memref<336x64xbf16, #tpu.memory_space<vmem>>, vector<288x64xbf16>
    %c18 = arith.constant 18 : index
    %c0_79 = arith.constant 0 : index
    %92 = vector.load %arg11[%c18, %c0_79] : memref<336x64xbf16, #tpu.memory_space<vmem>>, vector<288x64xbf16>
    %c32_80 = arith.constant 32 : index
    %c0_81 = arith.constant 0 : index
    %93 = vector.load %arg11[%c32_80, %c0_81] : memref<336x64xbf16, #tpu.memory_space<vmem>>, vector<288x64xbf16>
    %c33_82 = arith.constant 33 : index
    %c0_83 = arith.constant 0 : index
    %94 = vector.load %arg11[%c33_82, %c0_83] : memref<336x64xbf16, #tpu.memory_space<vmem>>, vector<288x64xbf16>
    %c34_84 = arith.constant 34 : index
    %c0_85 = arith.constant 0 : index
    %95 = vector.load %arg11[%c34_84, %c0_85] : memref<336x64xbf16, #tpu.memory_space<vmem>>, vector<288x64xbf16>
    %96 = tpu.concatenate %87, %88, %89, %90, %91, %92, %93, %94, %95 in 1 : vector<288x64xbf16>, vector<288x64xbf16>, vector<288x64xbf16>, vector<288x64xbf16>, vector<288x64xbf16>, vector<288x64xbf16>, vector<288x64xbf16>, vector<288x64xbf16>, vector<288x64xbf16> -> vector<288x576xbf16>
    %c0_86 = arith.constant 0 : index
    %c0_87 = arith.constant 0 : index
    %97 = vector.load %arg4[%c0_86, %c0_87] : memref<576x64xbf16, #tpu.memory_space<vmem>>, vector<576x64xbf16>
    %cst_88 = arith.constant dense<0.000000e+00> : vector<288x64xf32>
    %98 = tpu.matmul %96, %97, %cst_88 {dimension_numbers = #tpu.dot_dimension_numbers<[1], [0], [0], [1], [0, 0, 1, 1], [], []>} : vector<288x576xbf16>, vector<576x64xbf16>, vector<288x64xf32> -> vector<288x64xf32>
    %c0_89 = arith.constant 0 : index
    %c0_90 = arith.constant 0 : index
    %99 = vector.load %arg5[%c0_89, %c0_90] : memref<1x64xf32, #tpu.memory_space<vmem>>, vector<1x64xf32>
    %100 = vector.broadcast %99 : vector<1x64xf32> to vector<288x64xf32>
    %101 = arith.addf %98, %100 : vector<288x64xf32>
    %cst_91 = arith.constant 0.000000e+00 : f32
    %102 = vector.broadcast %cst_91 : f32 to vector<288x64xf32>
    %103 = arith.maximumf %101, %102 : vector<288x64xf32>
    %104 = vector.extract_strided_slice %103 {offsets = [0, 0], sizes = [287, 64], strides = [1, 1]} : vector<288x64xf32> to vector<287x64xf32>
    %105 = vector.extract_strided_slice %103 {offsets = [1, 0], sizes = [287, 64], strides = [1, 1]} : vector<288x64xf32> to vector<287x64xf32>
    %106 = arith.maximumf %104, %105 : vector<287x64xf32>
    %107 = vector.extract_strided_slice %106 {offsets = [0, 0], sizes = [271, 64], strides = [1, 1]} : vector<287x64xf32> to vector<271x64xf32>
    %108 = vector.extract_strided_slice %106 {offsets = [16, 0], sizes = [271, 64], strides = [1, 1]} : vector<287x64xf32> to vector<271x64xf32>
    %109 = arith.maximumf %107, %108 : vector<271x64xf32>
    %c0_92 = arith.constant 0 : index
    %c0_93 = arith.constant 0 : index
    %110 = vector.load %arg14[%c0_92, %c0_93] : memref<1088x64xf32, #tpu.memory_space<vmem>>, vector<271x64xf32>
    tpu.vector_store %arg14[%c0_92, %c0_93], %109 {strides = array<i32>} : memref<1088x64xf32, #tpu.memory_space<vmem>>, vector<271x64xf32>,
    %c0_94 = arith.constant 0 : index
    %c0_95 = arith.constant 0 : index
    %111 = tpu.strided_load %arg14[%c0_94, %c0_95] {strides = array<i32: 2, 1>} : memref<1088x64xf32, #tpu.memory_space<vmem>>, vector<4x64xf32>
    %112 = arith.truncf %111 : vector<4x64xf32> to vector<4x64xbf16>
    %c17_96 = arith.constant 17 : index
    %c0_97 = arith.constant 0 : index
    %113 = vector.load %arg12[%c17_96, %c0_97] : memref<208x64xbf16, #tpu.memory_space<vmem>>, vector<4x64xbf16>
    tpu.vector_store %arg12[%c17_96, %c0_97], %112 {strides = array<i32>} : memref<208x64xbf16, #tpu.memory_space<vmem>>, vector<4x64xbf16>,
    %c32_98 = arith.constant 32 : index
    %c0_99 = arith.constant 0 : index
    %114 = tpu.strided_load %arg14[%c32_98, %c0_99] {strides = array<i32: 2, 1>} : memref<1088x64xf32, #tpu.memory_space<vmem>>, vector<4x64xf32>
    %115 = arith.truncf %114 : vector<4x64xf32> to vector<4x64xbf16>
    %c33_100 = arith.constant 33 : index
    %c0_101 = arith.constant 0 : index
    %116 = vector.load %arg12[%c33_100, %c0_101] : memref<208x64xbf16, #tpu.memory_space<vmem>>, vector<4x64xbf16>
    tpu.vector_store %arg12[%c33_100, %c0_101], %115 {strides = array<i32>} : memref<208x64xbf16, #tpu.memory_space<vmem>>, vector<4x64xbf16>,
    %c64_102 = arith.constant 64 : index
    %c0_103 = arith.constant 0 : index
    %117 = tpu.strided_load %arg14[%c64_102, %c0_103] {strides = array<i32: 2, 1>} : memref<1088x64xf32, #tpu.memory_space<vmem>>, vector<4x64xf32>
    %118 = arith.truncf %117 : vector<4x64xf32> to vector<4x64xbf16>
    %c49_104 = arith.constant 49 : index
    %c0_105 = arith.constant 0 : index
    %119 = vector.load %arg12[%c49_104, %c0_105] : memref<208x64xbf16, #tpu.memory_space<vmem>>, vector<4x64xbf16>
    tpu.vector_store %arg12[%c49_104, %c0_105], %118 {strides = array<i32>} : memref<208x64xbf16, #tpu.memory_space<vmem>>, vector<4x64xbf16>,
    %c96 = arith.constant 96 : index
    %c0_106 = arith.constant 0 : index
    %120 = tpu.strided_load %arg14[%c96, %c0_106] {strides = array<i32: 2, 1>} : memref<1088x64xf32, #tpu.memory_space<vmem>>, vector<4x64xf32>
    %121 = arith.truncf %120 : vector<4x64xf32> to vector<4x64xbf16>
    %c65_107 = arith.constant 65 : index
    %c0_108 = arith.constant 0 : index
    %122 = vector.load %arg12[%c65_107, %c0_108] : memref<208x64xbf16, #tpu.memory_space<vmem>>, vector<4x64xbf16>
    tpu.vector_store %arg12[%c65_107, %c0_108], %121 {strides = array<i32>} : memref<208x64xbf16, #tpu.memory_space<vmem>>, vector<4x64xbf16>,
    %c160 = arith.constant 160 : index
    %c0_109 = arith.constant 0 : index
    %123 = tpu.strided_load %arg14[%c160, %c0_109] {strides = array<i32: 2, 1>} : memref<1088x64xf32, #tpu.memory_space<vmem>>, vector<4x64xf32>
    %124 = arith.truncf %123 : vector<4x64xf32> to vector<4x64xbf16>
    %c113_110 = arith.constant 113 : index
    %c0_111 = arith.constant 0 : index
    %125 = vector.load %arg12[%c113_110, %c0_111] : memref<208x64xbf16, #tpu.memory_space<vmem>>, vector<4x64xbf16>
    tpu.vector_store %arg12[%c113_110, %c0_111], %124 {strides = array<i32>} : memref<208x64xbf16, #tpu.memory_space<vmem>>, vector<4x64xbf16>,
    %c192_112 = arith.constant 192 : index
    %c0_113 = arith.constant 0 : index
    %126 = tpu.strided_load %arg14[%c192_112, %c0_113] {strides = array<i32: 2, 1>} : memref<1088x64xf32, #tpu.memory_space<vmem>>, vector<4x64xf32>
    %127 = arith.truncf %126 : vector<4x64xf32> to vector<4x64xbf16>
    %c129_114 = arith.constant 129 : index
    %c0_115 = arith.constant 0 : index
    %128 = vector.load %arg12[%c129_114, %c0_115] : memref<208x64xbf16, #tpu.memory_space<vmem>>, vector<4x64xbf16>
    tpu.vector_store %arg12[%c129_114, %c0_115], %127 {strides = array<i32>} : memref<208x64xbf16, #tpu.memory_space<vmem>>, vector<4x64xbf16>,
    %c224 = arith.constant 224 : index
    %c0_116 = arith.constant 0 : index
    %129 = tpu.strided_load %arg14[%c224, %c0_116] {strides = array<i32: 2, 1>} : memref<1088x64xf32, #tpu.memory_space<vmem>>, vector<4x64xf32>
    %130 = arith.truncf %129 : vector<4x64xf32> to vector<4x64xbf16>
    %c145 = arith.constant 145 : index
    %c0_117 = arith.constant 0 : index
    %131 = vector.load %arg12[%c145, %c0_117] : memref<208x64xbf16, #tpu.memory_space<vmem>>, vector<4x64xbf16>
    tpu.vector_store %arg12[%c145, %c0_117], %130 {strides = array<i32>} : memref<208x64xbf16, #tpu.memory_space<vmem>>, vector<4x64xbf16>,
    %c256_118 = arith.constant 256 : index
    %c0_119 = arith.constant 0 : index
    %132 = tpu.strided_load %arg14[%c256_118, %c0_119] {strides = array<i32: 2, 1>} : memref<1088x64xf32, #tpu.memory_space<vmem>>, vector<4x64xf32>
    %133 = arith.truncf %132 : vector<4x64xf32> to vector<4x64xbf16>
    %c161 = arith.constant 161 : index
    %c0_120 = arith.constant 0 : index
    %134 = vector.load %arg12[%c161, %c0_120] : memref<208x64xbf16, #tpu.memory_space<vmem>>, vector<4x64xbf16>
    tpu.vector_store %arg12[%c161, %c0_120], %133 {strides = array<i32>} : memref<208x64xbf16, #tpu.memory_space<vmem>>, vector<4x64xbf16>,
    %c0_121 = arith.constant 0 : index
    %c0_122 = arith.constant 0 : index
    %135 = vector.load %arg12[%c0_121, %c0_122] : memref<208x64xbf16, #tpu.memory_space<vmem>>, vector<160x64xbf16>
    %c1_123 = arith.constant 1 : index
    %c0_124 = arith.constant 0 : index
    %136 = vector.load %arg12[%c1_123, %c0_124] : memref<208x64xbf16, #tpu.memory_space<vmem>>, vector<160x64xbf16>
    %c2_125 = arith.constant 2 : index
    %c0_126 = arith.constant 0 : index
    %137 = vector.load %arg12[%c2_125, %c0_126] : memref<208x64xbf16, #tpu.memory_space<vmem>>, vector<160x64xbf16>
    %c16_127 = arith.constant 16 : index
    %c0_128 = arith.constant 0 : index
    %138 = vector.load %arg12[%c16_127, %c0_128] : memref<208x64xbf16, #tpu.memory_space<vmem>>, vector<160x64xbf16>
    %c17_129 = arith.constant 17 : index
    %c0_130 = arith.constant 0 : index
    %139 = vector.load %arg12[%c17_129, %c0_130] : memref<208x64xbf16, #tpu.memory_space<vmem>>, vector<160x64xbf16>
    %c18_131 = arith.constant 18 : index
    %c0_132 = arith.constant 0 : index
    %140 = vector.load %arg12[%c18_131, %c0_132] : memref<208x64xbf16, #tpu.memory_space<vmem>>, vector<160x64xbf16>
    %c32_133 = arith.constant 32 : index
    %c0_134 = arith.constant 0 : index
    %141 = vector.load %arg12[%c32_133, %c0_134] : memref<208x64xbf16, #tpu.memory_space<vmem>>, vector<160x64xbf16>
    %c33_135 = arith.constant 33 : index
    %c0_136 = arith.constant 0 : index
    %142 = vector.load %arg12[%c33_135, %c0_136] : memref<208x64xbf16, #tpu.memory_space<vmem>>, vector<160x64xbf16>
    %c34_137 = arith.constant 34 : index
    %c0_138 = arith.constant 0 : index
    %143 = vector.load %arg12[%c34_137, %c0_138] : memref<208x64xbf16, #tpu.memory_space<vmem>>, vector<160x64xbf16>
    %144 = tpu.concatenate %135, %136, %137, %138, %139, %140, %141, %142, %143 in 1 : vector<160x64xbf16>, vector<160x64xbf16>, vector<160x64xbf16>, vector<160x64xbf16>, vector<160x64xbf16>, vector<160x64xbf16>, vector<160x64xbf16>, vector<160x64xbf16>, vector<160x64xbf16> -> vector<160x576xbf16>
    %c0_139 = arith.constant 0 : index
    %c0_140 = arith.constant 0 : index
    %145 = vector.load %arg6[%c0_139, %c0_140] : memref<576x64xbf16, #tpu.memory_space<vmem>>, vector<576x64xbf16>
    %cst_141 = arith.constant dense<0.000000e+00> : vector<160x64xf32>
    %146 = tpu.matmul %144, %145, %cst_141 {dimension_numbers = #tpu.dot_dimension_numbers<[1], [0], [0], [1], [0, 0, 1, 1], [], []>} : vector<160x576xbf16>, vector<576x64xbf16>, vector<160x64xf32> -> vector<160x64xf32>
    %c0_142 = arith.constant 0 : index
    %c0_143 = arith.constant 0 : index
    %147 = vector.load %arg7[%c0_142, %c0_143] : memref<1x64xf32, #tpu.memory_space<vmem>>, vector<1x64xf32>
    %148 = vector.broadcast %147 : vector<1x64xf32> to vector<160x64xf32>
    %149 = arith.addf %146, %148 : vector<160x64xf32>
    %cst_144 = arith.constant 0.000000e+00 : f32
    %150 = vector.broadcast %cst_144 : f32 to vector<160x64xf32>
    %151 = arith.maximumf %149, %150 : vector<160x64xf32>
    %152 = vector.extract_strided_slice %151 {offsets = [0, 0], sizes = [159, 64], strides = [1, 1]} : vector<160x64xf32> to vector<159x64xf32>
    %153 = vector.extract_strided_slice %151 {offsets = [1, 0], sizes = [159, 64], strides = [1, 1]} : vector<160x64xf32> to vector<159x64xf32>
    %154 = arith.maximumf %152, %153 : vector<159x64xf32>
    %155 = vector.extract_strided_slice %154 {offsets = [0, 0], sizes = [143, 64], strides = [1, 1]} : vector<159x64xf32> to vector<143x64xf32>
    %156 = vector.extract_strided_slice %154 {offsets = [16, 0], sizes = [143, 64], strides = [1, 1]} : vector<159x64xf32> to vector<143x64xf32>
    %157 = arith.maximumf %155, %156 : vector<143x64xf32>
    %c0_145 = arith.constant 0 : index
    %c0_146 = arith.constant 0 : index
    %158 = vector.load %arg14[%c0_145, %c0_146] : memref<1088x64xf32, #tpu.memory_space<vmem>>, vector<143x64xf32>
    tpu.vector_store %arg14[%c0_145, %c0_146], %157 {strides = array<i32>} : memref<1088x64xf32, #tpu.memory_space<vmem>>, vector<143x64xf32>,
    %c0_147 = arith.constant 0 : index
    %c0_148 = arith.constant 0 : index
    %159 = tpu.strided_load %arg14[%c0_147, %c0_148] {strides = array<i32: 2, 1>} : memref<1088x64xf32, #tpu.memory_space<vmem>>, vector<2x64xf32>
    %160 = arith.truncf %159 : vector<2x64xf32> to vector<2x64xbf16>
    %c17_149 = arith.constant 17 : index
    %c0_150 = arith.constant 0 : index
    %161 = vector.load %arg13[%c17_149, %c0_150] : memref<144x64xbf16, #tpu.memory_space<vmem>>, vector<2x64xbf16>
    tpu.vector_store %arg13[%c17_149, %c0_150], %160 {strides = array<i32>} : memref<144x64xbf16, #tpu.memory_space<vmem>>, vector<2x64xbf16>,
    %c32_151 = arith.constant 32 : index
    %c0_152 = arith.constant 0 : index
    %162 = tpu.strided_load %arg14[%c32_151, %c0_152] {strides = array<i32: 2, 1>} : memref<1088x64xf32, #tpu.memory_space<vmem>>, vector<2x64xf32>
    %163 = arith.truncf %162 : vector<2x64xf32> to vector<2x64xbf16>
    %c33_153 = arith.constant 33 : index
    %c0_154 = arith.constant 0 : index
    %164 = vector.load %arg13[%c33_153, %c0_154] : memref<144x64xbf16, #tpu.memory_space<vmem>>, vector<2x64xbf16>
    tpu.vector_store %arg13[%c33_153, %c0_154], %163 {strides = array<i32>} : memref<144x64xbf16, #tpu.memory_space<vmem>>, vector<2x64xbf16>,
    %c96_155 = arith.constant 96 : index
    %c0_156 = arith.constant 0 : index
    %165 = tpu.strided_load %arg14[%c96_155, %c0_156] {strides = array<i32: 2, 1>} : memref<1088x64xf32, #tpu.memory_space<vmem>>, vector<2x64xf32>
    %166 = arith.truncf %165 : vector<2x64xf32> to vector<2x64xbf16>
    %c81_157 = arith.constant 81 : index
    %c0_158 = arith.constant 0 : index
    %167 = vector.load %arg13[%c81_157, %c0_158] : memref<144x64xbf16, #tpu.memory_space<vmem>>, vector<2x64xbf16>
    tpu.vector_store %arg13[%c81_157, %c0_158], %166 {strides = array<i32>} : memref<144x64xbf16, #tpu.memory_space<vmem>>, vector<2x64xbf16>,
    %c128_159 = arith.constant 128 : index
    %c0_160 = arith.constant 0 : index
    %168 = tpu.strided_load %arg14[%c128_159, %c0_160] {strides = array<i32: 2, 1>} : memref<1088x64xf32, #tpu.memory_space<vmem>>, vector<2x64xf32>
    %169 = arith.truncf %168 : vector<2x64xf32> to vector<2x64xbf16>
    %c97_161 = arith.constant 97 : index
    %c0_162 = arith.constant 0 : index
    %170 = vector.load %arg13[%c97_161, %c0_162] : memref<144x64xbf16, #tpu.memory_space<vmem>>, vector<2x64xbf16>
    tpu.vector_store %arg13[%c97_161, %c0_162], %169 {strides = array<i32>} : memref<144x64xbf16, #tpu.memory_space<vmem>>, vector<2x64xbf16>,
    %c0_163 = arith.constant 0 : index
    %c0_164 = arith.constant 0 : index
    %171 = vector.load %arg13[%c0_163, %c0_164] : memref<144x64xbf16, #tpu.memory_space<vmem>>, vector<96x64xbf16>
    %c1_165 = arith.constant 1 : index
    %c0_166 = arith.constant 0 : index
    %172 = vector.load %arg13[%c1_165, %c0_166] : memref<144x64xbf16, #tpu.memory_space<vmem>>, vector<96x64xbf16>
    %c2_167 = arith.constant 2 : index
    %c0_168 = arith.constant 0 : index
    %173 = vector.load %arg13[%c2_167, %c0_168] : memref<144x64xbf16, #tpu.memory_space<vmem>>, vector<96x64xbf16>
    %c16_169 = arith.constant 16 : index
    %c0_170 = arith.constant 0 : index
    %174 = vector.load %arg13[%c16_169, %c0_170] : memref<144x64xbf16, #tpu.memory_space<vmem>>, vector<96x64xbf16>
    %c17_171 = arith.constant 17 : index
    %c0_172 = arith.constant 0 : index
    %175 = vector.load %arg13[%c17_171, %c0_172] : memref<144x64xbf16, #tpu.memory_space<vmem>>, vector<96x64xbf16>
    %c18_173 = arith.constant 18 : index
    %c0_174 = arith.constant 0 : index
    %176 = vector.load %arg13[%c18_173, %c0_174] : memref<144x64xbf16, #tpu.memory_space<vmem>>, vector<96x64xbf16>
    %c32_175 = arith.constant 32 : index
    %c0_176 = arith.constant 0 : index
    %177 = vector.load %arg13[%c32_175, %c0_176] : memref<144x64xbf16, #tpu.memory_space<vmem>>, vector<96x64xbf16>
    %c33_177 = arith.constant 33 : index
    %c0_178 = arith.constant 0 : index
    %178 = vector.load %arg13[%c33_177, %c0_178] : memref<144x64xbf16, #tpu.memory_space<vmem>>, vector<96x64xbf16>
    %c34_179 = arith.constant 34 : index
    %c0_180 = arith.constant 0 : index
    %179 = vector.load %arg13[%c34_179, %c0_180] : memref<144x64xbf16, #tpu.memory_space<vmem>>, vector<96x64xbf16>
    %180 = tpu.concatenate %171, %172, %173, %174, %175, %176, %177, %178, %179 in 1 : vector<96x64xbf16>, vector<96x64xbf16>, vector<96x64xbf16>, vector<96x64xbf16>, vector<96x64xbf16>, vector<96x64xbf16>, vector<96x64xbf16>, vector<96x64xbf16>, vector<96x64xbf16> -> vector<96x576xbf16>
    %c0_181 = arith.constant 0 : index
    %c0_182 = arith.constant 0 : index
    %181 = vector.load %arg8[%c0_181, %c0_182] : memref<576x64xbf16, #tpu.memory_space<vmem>>, vector<576x64xbf16>
    %cst_183 = arith.constant dense<0.000000e+00> : vector<96x64xf32>
    %182 = tpu.matmul %180, %181, %cst_183 {dimension_numbers = #tpu.dot_dimension_numbers<[1], [0], [0], [1], [0, 0, 1, 1], [], []>} : vector<96x576xbf16>, vector<576x64xbf16>, vector<96x64xf32> -> vector<96x64xf32>
    %c0_184 = arith.constant 0 : index
    %c0_185 = arith.constant 0 : index
    %183 = vector.load %arg9[%c0_184, %c0_185] : memref<1x64xf32, #tpu.memory_space<vmem>>, vector<1x64xf32>
    %184 = vector.broadcast %183 : vector<1x64xf32> to vector<96x64xf32>
    %185 = arith.addf %182, %184 : vector<96x64xf32>
    %cst_186 = arith.constant 0.000000e+00 : f32
    %186 = vector.broadcast %cst_186 : f32 to vector<96x64xf32>
    %187 = arith.maximumf %185, %186 : vector<96x64xf32>
    %188 = vector.extract_strided_slice %187 {offsets = [0, 0], sizes = [95, 64], strides = [1, 1]} : vector<96x64xf32> to vector<95x64xf32>
    %189 = vector.extract_strided_slice %187 {offsets = [1, 0], sizes = [95, 64], strides = [1, 1]} : vector<96x64xf32> to vector<95x64xf32>
    %190 = arith.maximumf %188, %189 : vector<95x64xf32>
    %191 = vector.extract_strided_slice %190 {offsets = [0, 0], sizes = [79, 64], strides = [1, 1]} : vector<95x64xf32> to vector<79x64xf32>
    %192 = vector.extract_strided_slice %190 {offsets = [16, 0], sizes = [79, 64], strides = [1, 1]} : vector<95x64xf32> to vector<79x64xf32>
    %193 = arith.maximumf %191, %192 : vector<79x64xf32>
    %c0_187 = arith.constant 0 : index
    %c0_188 = arith.constant 0 : index
    %194 = vector.load %arg14[%c0_187, %c0_188] : memref<1088x64xf32, #tpu.memory_space<vmem>>, vector<79x64xf32>
    tpu.vector_store %arg14[%c0_187, %c0_188], %193 {strides = array<i32>} : memref<1088x64xf32, #tpu.memory_space<vmem>>, vector<79x64xf32>,
    %c0_189 = arith.constant 0 : index
    %c0_190 = arith.constant 0 : index
    %195 = tpu.strided_load %arg14[%c0_189, %c0_190] {strides = array<i32: 2, 1>} : memref<1088x64xf32, #tpu.memory_space<vmem>>, vector<1x64xf32>
    %c0_191 = arith.constant 0 : index
    %c0_192 = arith.constant 0 : index
    %c0_193 = arith.constant 0 : index
    %196 = vector.load %arg10[%c0_191, %c0_192, %c0_193] : memref<2x1x64xf32, #tpu.memory_space<vmem>>, vector<1x1x64xf32>
    %197 = vector.shape_cast %196 : vector<1x1x64xf32> to vector<1x64xf32>
    %198 = vector.shape_cast %195 : vector<1x64xf32> to vector<1x1x64xf32>
    tpu.vector_store %arg10[%c0_191, %c0_192, %c0_193], %198 {strides = array<i32>} : memref<2x1x64xf32, #tpu.memory_space<vmem>>, vector<1x1x64xf32>,
    %c64_194 = arith.constant 64 : index
    %c0_195 = arith.constant 0 : index
    %199 = tpu.strided_load %arg14[%c64_194, %c0_195] {strides = array<i32: 2, 1>} : memref<1088x64xf32, #tpu.memory_space<vmem>>, vector<1x64xf32>
    %c1_196 = arith.constant 1 : index
    %c0_197 = arith.constant 0 : index
    %c0_198 = arith.constant 0 : index
    %200 = vector.load %arg10[%c1_196, %c0_197, %c0_198] : memref<2x1x64xf32, #tpu.memory_space<vmem>>, vector<1x1x64xf32>
    %201 = vector.shape_cast %200 : vector<1x1x64xf32> to vector<1x64xf32>
    %202 = vector.shape_cast %199 : vector<1x64xf32> to vector<1x1x64xf32>
    tpu.vector_store %arg10[%c1_196, %c0_197, %c0_198], %202 {strides = array<i32>} : memref<2x1x64xf32, #tpu.memory_space<vmem>>, vector<1x1x64xf32>,
    return
  }
  func.func @transform_0(%arg0: i32) -> (i32, i32, i32) {
    %c0_i32 = arith.constant 0 : i32
    %c0_i32_0 = arith.constant 0 : i32
    %c0_i32_1 = arith.constant 0 : i32
    return %arg0, %c0_i32, %c0_i32_0 : i32, i32, i32
  }
  func.func @transform_1(%arg0: i32) -> (i32, i32) {
    %c0_i32 = arith.constant 0 : i32
    %c0_i32_0 = arith.constant 0 : i32
    %c0_i32_1 = arith.constant 0 : i32
    return %c0_i32, %c0_i32_0 : i32, i32
  }
  func.func @transform_2(%arg0: i32) -> (i32, i32) {
    %c0_i32 = arith.constant 0 : i32
    %c0_i32_0 = arith.constant 0 : i32
    %c0_i32_1 = arith.constant 0 : i32
    return %c0_i32, %c0_i32_0 : i32, i32
  }
  func.func @transform_3(%arg0: i32) -> (i32, i32) {
    %c0_i32 = arith.constant 0 : i32
    %c0_i32_0 = arith.constant 0 : i32
    %c0_i32_1 = arith.constant 0 : i32
    return %c0_i32, %c0_i32_0 : i32, i32
  }
  func.func @transform_4(%arg0: i32) -> (i32, i32) {
    %c0_i32 = arith.constant 0 : i32
    %c0_i32_0 = arith.constant 0 : i32
    %c0_i32_1 = arith.constant 0 : i32
    return %c0_i32, %c0_i32_0 : i32, i32
  }
  func.func @transform_5(%arg0: i32) -> (i32, i32) {
    %c0_i32 = arith.constant 0 : i32
    %c0_i32_0 = arith.constant 0 : i32
    %c0_i32_1 = arith.constant 0 : i32
    return %c0_i32, %c0_i32_0 : i32, i32
  }
  func.func @transform_6(%arg0: i32) -> (i32, i32) {
    %c0_i32 = arith.constant 0 : i32
    %c0_i32_0 = arith.constant 0 : i32
    %c0_i32_1 = arith.constant 0 : i32
    return %c0_i32, %c0_i32_0 : i32, i32
  }
  func.func @transform_7(%arg0: i32) -> (i32, i32) {
    %c0_i32 = arith.constant 0 : i32
    %c0_i32_0 = arith.constant 0 : i32
    %c0_i32_1 = arith.constant 0 : i32
    return %c0_i32, %c0_i32_0 : i32, i32
  }
  func.func @transform_8(%arg0: i32) -> (i32, i32) {
    %c0_i32 = arith.constant 0 : i32
    %c0_i32_0 = arith.constant 0 : i32
    %c0_i32_1 = arith.constant 0 : i32
    return %c0_i32, %c0_i32_0 : i32, i32
  }
  func.func @transform_9(%arg0: i32) -> (i32, i32, i32) {
    %c0_i32 = arith.constant 0 : i32
    %c0_i32_0 = arith.constant 0 : i32
    %c0_i32_1 = arith.constant 0 : i32
    return %arg0, %c0_i32, %c0_i32_0 : i32, i32, i32
  }
}

</mosaic_0001>

<bundles_post_ra>
// kernel: _forward_impl.1
= control target key start
LH: loop header
LB: loop body
LE: loop exit
PB: predicated region body
PF: predicated region fallthrough
CT: control target
= control target key end

     0   :  { %s17583_s0 = inlined_call_operand.vmem [shape: bf16[2,1184,8], index: 0, kind: input, shape index: {}]   ;;  %s17584_s1 = inlined_call_operand.vmem [shape: bf16[72,64], index: 1, kind: input, shape index: {}]   ;;  %s17585_s2 = inlined_call_operand.vmem [shape: f32[1,64], index: 2, kind: input, shape index: {}]   ;;  %s17586_s3 = inlined_call_operand.vmem [shape: bf16[576,64], index: 3, kind: input, shape index: {}]   ;;  %s17587_s4 = inlined_call_operand.vmem [shape: f32[1,64], index: 4, kind: input, shape index: {}]   ;;  %s17588_s5 = inlined_call_operand.vmem [shape: bf16[576,64], index: 5, kind: input, shape index: {}]   ;;  %s17589_s6 = inlined_call_operand.vmem [shape: f32[1,64], index: 6, kind: input, shape index: {}]   ;;  %s17590_s7 = inlined_call_operand.vmem [shape: bf16[576,64], index: 7, kind: input, shape index: {}]   ;;  %s17591_s8 = inlined_call_operand.vmem [shape: f32[1,64], index: 8, kind: input, shape index: {}]   ;;  %s17592_s9 = inlined_call_operand.hbm [shape: f32[4,1,64], index: 9, kind: output, shape index: {}]  }
   0x1   :  { %17619 = sst [smem:[#allocation52_spill]] %s17583_s0 }
   0x2   :  { %14 = vsyncpa [#allocation7], 0 }
   0x3   :  { %16 = vsyncpa [#allocation7 + $0x1], 0  ;;  %s11481_s30 = smov 0   ;;  %s11483_s10 = smov 0  }
   0x4   :  { %s11485_s11 = smov 0   ;;  %s11487_s12 = smov 0  }
   0x5 LB: > { %s11502_s13 = sadd.s32 4294967295, %s11419_s12   ;;  %s9960_s14 = sadd.s32 4294967294, %s11419_s12   ;;  %s11419_s12 = sphi %s11487_s12, %s17770_s12   ;;  %s11415_s11 = sphi %s11485_s11, %s17769_s11   ;;  %s11411_s10 = sphi %s11483_s10, %s17768_s10   ;;  %s11407_s30 = sphi %s11481_s30, %s17767_s30  }
   0x6   : > { %s11506_s15 = sadd.s32 1, %s11419_s12   ;;  %s223_s16 = sadd.s32 1, %s11415_s11 }
   0x7   : > { %s220_s17 = ssub.s32 %s11419_s12, %s11506_s15  ;;  %p233_p0 = scmp.ne.s32.totalorder %s11415_s11, %s11411_s10 }
   0x8   : > { %p221_p1 = scmp.eq.s32.totalorder %s220_s17, 0  ;;  %p234_p2 = scmp.eq.s32.totalorder %s11502_s13, 1 }
   0x9   : > { %p239_p3 = scmp.ne.s32.totalorder %s11411_s10, %s11407_s30  ;;  %p240_p4 = scmp.eq.s32.totalorder %s9960_s14, 1 }
   0xa   : > { %s11517_s18 = scalar_select %p221_p1, %s11415_s11, %s223_s16  }
   0xb   : > { %p11519_p5 = por %p234_p2, %p233_p0  ;;  %p11523_p6 = por %p240_p4, %p239_p3 }
   0xc   : > { %p9963_p7 = scmp.ge.s32.totalorder %s11419_s12, 1  ;;  %p290_p8 = scmp.lt.s32.totalorder %s11419_s12, 3 }
   0xe   : > { %p291_p9 = pnand %p9963_p7, %p290_p8 }
  0x10   : > { %294 = sbr.rel (%p291_p9) target bundleno = 3373 (0xd2d), region = 56 }
  0x15   : > { %p326_p10 = scmp.lt.s32.totalorder %s11502_s13, 1  ;;  %s17622_s0 = sld [smem:[#allocation52_spill]]  ;;  %vm1601_vm0 = vcmask 1046528   ;;  %vm913_vm1 = vsmask.f32 7424  ;;  %vm4054_vm2 = vcmask 1043456  }
  0x16   : > { %s11421_s26 = smov 48   ;;  %s17593_s27 = smov 24   ;;  %vm2781_vm3 = vcmask 64512   ;;  %vm17595_vm4 = vcmask 130048   ;;  %vm3055_vm5 = vcmask 195584   ;;  %vm3192_vm6 = vcmask 261120  }
  0x17   : > { %s327_s21 = scalar_select %p326_p10, %s11502_s13, 1  ;;  %vm3329_vm7 = vcmask 326656   ;;  %vm3466_vm8 = vcmask 392192   ;;  %vm3603_vm9 = vcmask 457728   ;;  %vm3740_vm10 = vcmask 523264  }
  0x18   : > { %s17596_s28 = smov 16   ;;  %s17600_s29 = smov 40   ;;  %vm3917_vm11 = vcmask 588800   ;;  %vm333_vm12 = vcmask 519168   ;;  %vm5501_vm13 = vsmask.f32 7938 }
  0x19   : > { %s11235_s22 = smul.u32 592, %s327_s21  ;;  %s17604_s14 = smov 32   ;;  %vm5506_vm14 = vcmask 516096   ;;  %vm5507_vm15 = vsmask.f32 256 }
  0x1a   : > { %s17598_s16 = smov 8   ;;  %s17602_s17 = smov 64  }
  0x1b   : > { %s11534_s25 = scalar_lea.vmem %s17622_s0, %s11235_s22  ;;  %s11428_s21 = smov 56  }
  0x1c   : > { %v11537_v0 = vld [vmem:[%s11534_s25 + $0x20] sm:$0xff]   ;;  %v11540_v1 = vld [vmem:[%s11534_s25 + $0x10] sm:$0xff]   ;;  %v11548_v3 = vld [vmem:[%s11534_s25 + $0x8] sm:$0xff]  ;;  %s17623_s24 = smov 24   ;;  %s17660_s22 = smov 16  }
  0x1d   : > { %v11183_v2 = vld [vmem:[%s11534_s25] sm:$0xf0]  ;;  %2338 = vrot.lane.b32.xlu2 %v11537_v0, %s11421_s26  ;;  %1885 = vrot.lane.b32.xlu1 %v11540_v1, %s17593_s27  ;;  %v11184_v4 = vld [vmem:[%s11534_s25] sm:$0xe]  ;;  %v930_v5 = vshll.u32 %v11540_v1, 16  ;;  %v934_v6 = vshrl.u32 %v11540_v1, 16 }
  0x1e   : > { %v11185_v7 = vor.u32 %v11184_v4, %v11183_v2  ;;  %v11186_v8 = vld [vmem:[%s11534_s25 + $0x10] sm:$0xf0]  ;;  %v11555_v9 = vld [vmem:[%s11534_s25 + $0x18] sm:$0xff]  ;;  %v11187_v10 = vld [vmem:[%s11534_s25 + $0x10] sm:$0xe]  ;;  %v1603_v11 = vrot.slane %v11548_v3, 1 }
  0x1f   : > { %v11188_v12 = vor.u32 %v11187_v10, %v11186_v8  ;;  %v932_v13 = vrot.slane %v930_v5, 1  ;;  %v11560_v14 = vld [vmem:[%s11534_s25] sm:$0xff]   ;;  %v922_v15 = vshll.u32 %v11548_v3, 16  ;;  %v11565_v18 = vrot.slane %v11555_v9, 1  ;;  %v11575_v28 = vld [vmem:[%s11534_s25 + $0x28] sm:$0xff]  ;;  %v11596_v49 = vld [vmem:[%s11534_s25 + $0x30] sm:$0xff] }
  0x20   : > { %v11189_v16 = vld [vmem:[%s11534_s25 + $0x20] sm:$0xf0]  ;;  %v1602_v17 = vrot.slane %v11185_v7, 1  ;;  %v938_v19 = vshll.u32 %v11555_v9, 16  ;;  %v915_v22 = vshrl.u32 %v11560_v14, 16  ;;  %v917_v23 = vshll.u32 %v11560_v14, 16 }
  0x21   : > { %v2184_v20 = vrot.slane %v11188_v12, 1  ;;  %v936_v21 = vor.u32 %v934_v6, %v932_v13  ;;  %v11190_v24 = vld [vmem:[%s11534_s25 + $0x20] sm:$0xe]  ;;  %v924_v27 = vrot.slane %v922_v15, 1  ;;  %v926_v32 = vshrl.u32 %v11548_v3, 16  ;;  %v11628_v63 = vld [vmem:[%s11534_s25 + $0x38] sm:$0xff] }
  0x22   : > { %v1604_v25 = vsel %vm1601_vm0, %v1602_v17, %v1603_v11  ;;  %v940_v26 = vrot.slane %v938_v19, 1  ;;  %v11191_v29 = vor.u32 %v11190_v24, %v11189_v16  ;;  %v919_v31 = vrot.slane %v917_v23, 1  ;;  %s17662_s23 = smov 40  }
  0x23   : > { %1739 = vrot.lane.b32.xlu0 %v1604_v25, %s17596_s28  ;;  %v2185_v30 = vsel %vm1601_vm0, %v2184_v20, %v11565_v18  ;;  %v946_v34 = vshll.u32 %v11537_v0, 16  ;;  %v1611_v36 = vrot.slane %v11575_v28, 1  ;;  %v928_v38 = vor.u32 %v926_v32, %v924_v27 }
  0x24   : > { %v941_v33 = vsel %vm913_vm1, %v936_v21, %v940_v26  ;;  %v920_v35 = vor.u32 %v919_v31, %v915_v22  ;;  %v2637_v37 = vrot.slane %v11191_v29, 1  ;;  %v950_v41 = vshrl.u32 %v11537_v0, 16  ;;  %v11678_v21 = vld [vmem:[%s11534_s25 + $0x48] sm:$0xff]  ;;  %v3885_v22 = vld [vmem:[%s17584_s1 + $0x20] sm:$0xf] }
  0x25   : > { %2192 = vrot.lane.b32.xlu2 %v2185_v30, %s17600_s29  ;;  %2045 = vrot.lane.b32.xlu1 %v941_v33, %s17604_s14  ;;  %v948_v40 = vrot.slane %v946_v34, 1  ;;  %v954_v42 = vshll.u32 %v11575_v28, 16  ;;  %v933_v44 = vsel %vm913_vm1, %v928_v38, %v932_v13  ;;  %v942_v45 = vshrl.u32 %v11555_v9, 16  ;;  %v11659_v13 = vld [vmem:[%s11534_s25 + $0x40] sm:$0xff] }
  0x26   : > { %v925_v39 = vsel %vm913_vm1, %v920_v35, %v924_v27  ;;  %v2638_v43 = vsel %vm1601_vm0, %v2637_v37, %v1611_v36  ;;  %v958_v52 = vshrl.u32 %v11575_v28, 16  ;;  %v962_v53 = vshll.u32 %v11596_v49, 16  ;;  %v10992_v35 = vld [vmem:[%s17584_s1 + $0x10] sm:$0xff]  ;;  %v10991_v37 = vld [vmem:[%s17584_s1 + $0x8] sm:$0xff]  ;;  %v10990_v38 = vld [vmem:[%s17584_s1] sm:$0xff] }
  0x27   : > { %v952_v46 = vor.u32 %v950_v41, %v948_v40  ;;  %v956_v47 = vrot.slane %v954_v42, 1  ;;  %v944_v48 = vor.u32 %v942_v45, %v940_v26  ;;  %v1605_v54 = vrot.slane %v11540_v1, 1 }
  0x28   : > { %v964_v56 = vrot.slane %v962_v53, 1  ;;  %v1609_v59 = vrot.slane %v11537_v0, 1  ;;  %v1613_v62 = vrot.slane %v11596_v49, 1  ;;  %v966_v5 = vshrl.u32 %v11596_v49, 16 }
  0x29   : > { %v957_v50 = vsel %vm913_vm1, %v952_v46, %v956_v47  ;;  %v949_v51 = vsel %vm913_vm1, %v944_v48, %v948_v40  ;;  %v960_v55 = vor.u32 %v958_v52, %v956_v47  ;;  %v1606_v57 = vsel %vm1601_vm0, %v1603_v11, %v1605_v54  ;;  %v11724_v40 = vld [vmem:[%s11534_s25 + $0x50] sm:$0xff] }
  0x2a   : > { %v1610_v60 = vsel %vm1601_vm0, %v11565_v18, %v1609_v59  ;;  %v1608_v61 = vsel %vm1601_vm0, %v1605_v54, %v11565_v18  ;;  %v11631_v2 = vsel %vm1601_vm0, %v1611_v36, %v1613_v62  ;;  %v1612_v4 = vsel %vm1601_vm0, %v1609_v59, %v1611_v36 }
  0x2b   : > { %1462 = vrot.lane.b32.xlu0 %v925_v39, %s17598_s16  ;;  %v11611_v58 = vsel %vm913_vm1, %v960_v55, %v964_v56  ;;  %v970_v6 = vshll.u32 %v11628_v63, 16  ;;  %v968_v7 = vor.u32 %v966_v5, %v964_v56  ;;  %v1615_v10 = vrot.slane %v11628_v63, 1 }
  0x2c   : > { %v1617_v15 = vrot.slane %v11659_v13, 1  ;;  %v974_v16 = vshrl.u32 %v11628_v63, 16  ;;  %v978_v17 = vshll.u32 %v11659_v13, 16  ;;  %v3907_v24 = vunpack.c.l.b16 %v3885_v22  ;;  %v11797_v22 = vld [vmem:[%s11534_s25 + $0x60] sm:$0xff] }
  0x2d   : > { %2645 = vrot.lane.b32.xlu1 %v2638_v43, %s17602_s17  ;;  %1464 = vrot.lane.b32.xlu2 %v933_v44, %s17598_s16  ;;  %v972_v8 = vrot.slane %v970_v6, 1  ;;  %v11645_v12 = vsel %vm1601_vm0, %v1613_v62, %v1615_v10  ;;  %v982_v25 = vshrl.u32 %v11659_v13, 16  ;;  %v986_v26 = vshll.u32 %v11678_v21, 16 }
  0x2e   : > { %v11670_v18 = vsel %vm1601_vm0, %v1615_v10, %v1617_v15  ;;  %v980_v20 = vrot.slane %v978_v17, 1  ;;  %v3912_v27 = vpack.c.b16 %v3907_v24, %v3907_v24  ;;  %v1619_v39 = vrot.slane %v11678_v21, 1 }
  0x2f   : > { %v11642_v11 = vsel %vm913_vm1, %v968_v7, %v972_v8  ;;  %v976_v19 = vor.u32 %v974_v16, %v972_v8  ;;  %v988_v31 = vrot.slane %v986_v26, 1  ;;  %v990_v43 = vshrl.u32 %v11678_v21, 16 }
  0x30   : > { %v4056_v29 = vsel %vm4054_vm2, %v3912_v27, 0  ;;  %v984_v30 = vor.u32 %v982_v25, %v980_v20  ;;  %v11729_v42 = vsel %vm1601_vm0, %v1617_v15, %v1619_v39  ;;  %v994_v44 = vshll.u32 %v11724_v40, 16  ;;  %vm12561_vm2 = vmand %vm333_vm12, %vm5501_vm13 }
  0x31   : > { %v11684_v23 = vsel %vm913_vm1, %v976_v19, %v980_v20  ;;  %4061 = vmatpush.bf16.msra.mxu0 %v4056_v29  ;;  %11225 = vmatpush.bf16.msra.mxu1 %v4056_v29  ;;  %v992_v45 = vor.u32 %v990_v43, %v988_v31  ;;  %v1621_v47 = vrot.slane %v11724_v40, 1 }
  0x32   : > { %11226 = vmatpush.bf16.msra.mxu3 %v4056_v29  ;;  %v11700_v34 = vsel %vm913_vm1, %v984_v30, %v988_v31  ;;  %v996_v46 = vrot.slane %v994_v44, 1  ;;  %v1010_v31 = vshll.u32 %v11797_v22, 16 }
  0x33   : > { %2498 = vrot.lane.b32.xlu0 %v957_v50, %s11428_s21  ;;  %v11746_v52 = vsel %vm1601_vm0, %v1619_v39, %v1621_v47 }
  0x35   : > { %1887 = vrot.lane.b32.xlu1 %v11555_v9, %s17593_s27  ;;  %2047 = vrot.lane.b32.xlu2 %v949_v51, %s17604_s14 }
  0x3b   : > { %1741 = vrot.lane.b32.xlu0 %v1606_v57, %s17596_s28 }
  0x3d   : > { %2340 = vrot.lane.b32.xlu1 %v11575_v28, %s11421_s26  ;;  %2500 = vrot.lane.b32.xlu2 %v11611_v58, %s11428_s21 }
  0x43   : > { %2194 = vrot.lane.b32.xlu0 %v1610_v60, %s17600_s29 }
  0x45   : > { %1466 = vrot.lane.b32.xlu1 %v941_v33, %s17598_s16  ;;  %1743 = vrot.lane.b32.xlu2 %v1608_v61, %s17596_s28  ;;  %v10993_v33 = vld [vmem:[%s17584_s1 + $0x18] sm:$0xff] }
  0x46   : > { %4062 = vmatpush.bf16.msra.mxu0 %v10993_v33  ;;  %11227 = vmatpush.bf16.msra.mxu1 %v10993_v33 }
  0x47   : > { %11228 = vmatpush.bf16.msra.mxu3 %v10993_v33 }
  0x4a   : > { %4063 = vmatpush.bf16.msra.mxu0 %v10992_v35  ;;  %11229 = vmatpush.bf16.msra.mxu1 %v10992_v35 }
  0x4b   : > { %2647 = vrot.lane.b32.xlu0 %v11631_v2, %s17602_s17  ;;  %11230 = vmatpush.bf16.msra.mxu3 %v10992_v35  ;;  %v1012_v35 = vrot.slane %v1010_v31, 1  ;;  %v11890_v31 = vld [vmem:[%s11534_s25 + $0x70] sm:$0xff] }
  0x4d   : > { %2049 = vrot.lane.b32.xlu1 %v957_v50, %s17604_s14  ;;  %2196 = vrot.lane.b32.xlu2 %v1612_v4, %s17600_s29 }
  0x4e   : > { %4064 = vmatpush.bf16.msra.mxu0 %v10991_v37  ;;  %11231 = vmatpush.bf16.msra.mxu1 %v10991_v37 }
  0x4f   : > { %11232 = vmatpush.bf16.msra.mxu3 %v10991_v37 }
  0x52   : > { %4065 = vmatpush.bf16.msra.mxu0 %v10990_v38  ;;  %11233 = vmatpush.bf16.msra.mxu1 %v10990_v38 }
  0x53   : > { %1889 = vrot.lane.b32.xlu0 %v11537_v0, %s17593_s27  ;;  %11234 = vmatpush.bf16.msra.mxu3 %v10990_v38 }
  0x55   : > { %2502 = vrot.lane.b32.xlu1 %v11642_v11, %s11428_s21  ;;  %2649 = vrot.lane.b32.xlu2 %v11645_v12, %s17602_s17 }
  0x5b   : > { %2342 = vrot.lane.b32.xlu0 %v11596_v49, %s11421_s26 }
  0x5d   : > { %1745 = vrot.lane.b32.xlu1 %v1610_v60, %s17596_s28  ;;  %1891 = vrot.lane.b32.xlu2 %v11575_v28, %s17593_s27 }
  0x63   : > { %1468 = vrot.lane.b32.xlu0 %v949_v51, %s17598_s16  ;;  %v11743_v51 = vsel %vm913_vm1, %v992_v45, %v996_v46 }
  0x65   : > { %2198 = vrot.lane.b32.xlu1 %v11631_v2, %s17600_s29  ;;  %2344 = vrot.lane.b32.xlu2 %v11628_v63, %s11421_s26 }
  0x6b   : > { %2051 = vrot.lane.b32.xlu0 %v11611_v58, %s17604_s14 }
  0x6d   : > { %2651 = vrot.lane.b32.xlu1 %v11670_v18, %s17602_s17  ;;  %1470 = vrot.lane.b32.xlu2 %v957_v50, %s17598_s16 }
  0x73   : > { %2504 = vrot.lane.b32.xlu0 %v11684_v23, %s11428_s21 }
  0x75   : > { %1893 = vrot.lane.b32.xlu1 %v11596_v49, %s17593_s27  ;;  %2053 = vrot.lane.b32.xlu2 %v11642_v11, %s17604_s14 }
  0x77   : > { %v11694_v32 = vpop.permute.xlu2 %2338 }
  0x7b   : > { %1747 = vrot.lane.b32.xlu0 %v1612_v4, %s17596_s28  ;;  %v11771_v4 = vld [vmem:[%s11534_s25 + $0x58] sm:$0xff] }
  0x7c   : > { %v1623_v7 = vrot.slane %v11771_v4, 1  ;;  %v1002_v15 = vshll.u32 %v11771_v4, 16  ;;  %v1006_v30 = vshrl.u32 %v11771_v4, 16 }
  0x7d   : > { %2346 = vrot.lane.b32.xlu1 %v11659_v13, %s11421_s26  ;;  %2506 = vrot.lane.b32.xlu2 %v11700_v34, %s11428_s21 }
  0x7e   : > { %v11788_v16 = vsel %vm1601_vm0, %v1621_v47, %v1623_v7  ;;  %v1004_v19 = vrot.slane %v1002_v15, 1 }
  0x7f   : > { %v2193_v36 = vpop.permute.xlu2 %2192 }
  0x80   : > { %v1008_v33 = vor.u32 %v1006_v30, %v1004_v19 }
  0x83   : > { %2200 = vrot.lane.b32.xlu0 %v11645_v12, %s17600_s29 }
  0x85   : > { %1472 = vrot.lane.b32.xlu1 %v11611_v58, %s17598_s16  ;;  %1749 = vrot.lane.b32.xlu2 %v11631_v2, %s17596_s28 }
  0x87   : > { %v11726_v41 = vpop.permute.xlu2 %1464 }
  0x88   : > { %v2785_v24 = vsel %vm2781_vm3, %v11548_v3, %v11726_v41  ;;  %v11820_v41 = vsel %vm913_vm1, %v1008_v33, %v1012_v35 }
  0x8b   : > { %2653 = vrot.lane.b32.xlu0 %v11729_v42, %s17602_s17 }
  0x8d   : > { %2055 = vrot.lane.b32.xlu1 %v11684_v23, %s17604_s14  ;;  %2202 = vrot.lane.b32.xlu2 %v11670_v18, %s17600_s29 }
  0x8f   : > { %v1886_v48 = vpop.permute.xlu1 %1885  ;;  %v11740_v50 = vpop.permute.xlu2 %2047 }
  0x93   : > { %1895 = vrot.lane.b32.xlu0 %v11628_v63, %s17623_s24 }
  0x95   : > { %v1740_v53 = vpop.permute.xlu0 %1739  ;;  %2508 = vrot.lane.b32.xlu1 %v11743_v51, %s11428_s21  ;;  %2655 = vrot.lane.b32.xlu2 %v11746_v52, %s17602_s17 }
  0x97   : > { %v2046_v54 = vpop.permute.xlu1 %2045  ;;  %v11754_v55 = vpop.permute.xlu2 %2500 }
  0x9b   : > { %2348 = vrot.lane.b32.xlu0 %v11678_v21, %s11421_s26 }
  0x9d   : > { %v1463_v56 = vpop.permute.xlu0 %1462  ;;  %1751 = vrot.lane.b32.xlu1 %v11645_v12, %s17596_s28  ;;  %1897 = vrot.lane.b32.xlu2 %v11659_v13, %s17623_s24  ;;  %v998_v12 = vshrl.u32 %v11724_v40, 16 }
  0x9e   : > { %v2783_v57 = vsel %vm2781_vm3, %v11560_v14, %v1463_v56 }
  0x9f   : > { %v2920_v58 = vsel %vm17595_vm4, %v2783_v57, %v1740_v53  ;;  %v2646_v59 = vpop.permute.xlu1 %2645  ;;  %v11765_v60 = vpop.permute.xlu2 %1743  ;;  %v1000_v17 = vor.u32 %v998_v12, %v996_v46 }
  0xa0   : > { %v3057_v61 = vsel %vm3055_vm5, %v2920_v58, %v1886_v48  ;;  %v1625_v48 = vrot.slane %v11797_v22, 1 }
  0xa1   : > { %v3194_v62 = vsel %vm3192_vm6, %v3057_v61, %v2046_v54  ;;  %v11804_v29 = vsel %vm913_vm1, %v1000_v17, %v1004_v19  ;;  %v11844_v54 = vld [vmem:[%s11534_s25 + $0x68] sm:$0xff] }
  0xa2   : > { %v3331_v2 = vsel %vm3329_vm7, %v3194_v62, %v2193_v36  ;;  %v11848_v57 = vsel %vm1601_vm0, %v1623_v7, %v1625_v48 }
  0xa3   : > { %1474 = vrot.lane.b32.xlu0 %v11642_v11, %s17598_s16  ;;  %v3468_v14 = vsel %vm3466_vm8, %v3331_v2, %v11694_v32 }
  0xa5   : > { %v2499_v5 = vpop.permute.xlu0 %2498  ;;  %2204 = vrot.lane.b32.xlu1 %v11729_v42, %s17600_s29  ;;  %2350 = vrot.lane.b32.xlu2 %v11724_v40, %s11421_s26 }
  0xa6   : > { %v3605_v6 = vsel %vm3603_vm9, %v3468_v14, %v2499_v5  ;;  %v1627_v14 = vrot.slane %v11844_v54, 1 }
  0xa7   : > { %v1888_v8 = vpop.permute.xlu1 %1887  ;;  %v2197_v10 = vpop.permute.xlu2 %2196  ;;  %v3742_v11 = vsel %vm3740_vm10, %v3605_v6, %v2646_v59  ;;  %v1014_v59 = vshrl.u32 %v11797_v22, 16 }
  0xa8   : > { %10258 = vmatmul.msk.bf16.vlgmr.msra.gmra.mxu0 %vm3917_vm11, %v3742_v11  ;;  %v11869_v11 = vsel %vm1601_vm0, %v1625_v48, %v1627_v14 }
  0xa9   : > { %v1016_v62 = vor.u32 %v1014_v59, %v1012_v35 }
  0xab   : > { %2057 = vrot.lane.b32.xlu0 %v11700_v34, %s17604_s14 }
  0xad   : > { %v1742_v20 = vpop.permute.xlu0 %1741  ;;  %2657 = vrot.lane.b32.xlu1 %v11788_v16, %s17602_s17  ;;  %1476 = vrot.lane.b32.xlu2 %v11684_v23, %s17598_s16 }
  0xae   : > { %v2922_v27 = vsel %vm17595_vm4, %v2785_v24, %v1742_v20 }
  0xaf   : > { %v2341_v25 = vpop.permute.xlu1 %2340  ;;  %v2650_v26 = vpop.permute.xlu2 %2649  ;;  %v3059_v32 = vsel %vm3055_vm5, %v2922_v27, %v1888_v8 }
  0xb0   : > { %v3196_v3 = vsel %vm3192_vm6, %v3059_v32, %v11740_v50 }
  0xb3   : > { %2510 = vrot.lane.b32.xlu0 %v11804_v29, %s11428_s21 }
  0xb5   : > { %v2195_v23 = vpop.permute.xlu0 %2194  ;;  %1899 = vrot.lane.b32.xlu1 %v11678_v21, %s17623_s24  ;;  %2059 = vrot.lane.b32.xlu2 %v11743_v51, %s17604_s14 }
  0xb6   : > { %v3333_v36 = vsel %vm3329_vm7, %v3196_v3, %v2195_v23  ;;  %v1629_v3 = vrot.slane %v11890_v31, 1 }
  0xb7   : > { %v1467_v37 = vpop.permute.xlu1 %1466  ;;  %v1892_v38 = vpop.permute.xlu2 %1891  ;;  %v3470_v39 = vsel %vm3466_vm8, %v3333_v36, %v2341_v25 }
  0xb8   : > { %v3607_v44 = vsel %vm3603_vm9, %v3470_v39, %v11754_v55 }
  0xbb   : > { %1753 = vrot.lane.b32.xlu0 %v11670_v18, %s17596_s28  ;;  %v2787_v18 = vsel %vm2781_vm3, %v11540_v1, %v1467_v37  ;;  %v1026_v37 = vshll.u32 %v11890_v31, 16 }
  0xbc   : > { %v2924_v53 = vsel %vm17595_vm4, %v2787_v18, %v11765_v60 }
  0xbd   : > { %v2648_v43 = vpop.permute.xlu0 %2647  ;;  %2352 = vrot.lane.b32.xlu1 %v11771_v4, %s11421_s26  ;;  %2512 = vrot.lane.b32.xlu2 %v11820_v41, %s11428_s21 }
  0xbe   : > { %v3744_v45 = vsel %vm3740_vm10, %v3607_v44, %v2648_v43  ;;  %v1028_v43 = vrot.slane %v1026_v37, 1 }
  0xbf   : > { %10259 = vmatmul.msk.bf16.gmra.mxu0 %vm3917_vm11, %v3744_v45  ;;  %v2050_v46 = vpop.permute.xlu1 %2049  ;;  %v2345_v47 = vpop.permute.xlu2 %2344  ;;  %v11915_v45 = vld [vmem:[%s11534_s25 + $0x78] sm:$0xff] }
  0xc3   : > { %2206 = vrot.lane.b32.xlu0 %v11746_v52, %s17600_s29 }
  0xc5   : > { %v1890_v50 = vpop.permute.xlu0 %1889  ;;  %1478 = vrot.lane.b32.xlu1 %v11700_v34, %s17598_s16  ;;  %1755 = vrot.lane.b32.xlu2 %v11729_v42, %s17596_s28  ;;  %v1018_v34 = vshll.u32 %v11844_v54, 16 }
  0xc6   : > { %v3061_v55 = vsel %vm3055_vm5, %v2924_v53, %v1890_v50  ;;  %v1030_v53 = vshrl.u32 %v11890_v31, 16 }
  0xc7   : > { %v2503_v1 = vpop.permute.xlu1 %2502  ;;  %v1471_v56 = vpop.permute.xlu2 %1470  ;;  %v3198_v58 = vsel %vm3192_vm6, %v3061_v55, %v2050_v46  ;;  %v1020_v2 = vrot.slane %v1018_v34, 1  ;;  %v1034_v55 = vshll.u32 %v11915_v45, 16 }
  0xc8   : > { %v3335_v42 = vsel %vm3329_vm7, %v3198_v58, %v2197_v10  ;;  %v2791_v46 = vsel %vm2781_vm3, %v11537_v0, %v1471_v56  ;;  %v1032_v56 = vor.u32 %v1030_v53, %v1028_v43  ;;  %v12006_v53 = vld [vmem:[%s11534_s25 + $0x88] sm:$0xff] }
  0xc9   : > { %v11866_v10 = vsel %vm913_vm1, %v1016_v62, %v1020_v2  ;;  %v1036_v58 = vrot.slane %v1034_v55, 1 }
  0xcb   : > { %2659 = vrot.lane.b32.xlu0 %v11848_v57, %s17602_s17 }
  0xcd   : > { %v2343_v60 = vpop.permute.xlu0 %2342  ;;  %2061 = vrot.lane.b32.xlu1 %v11804_v29, %s17604_s14  ;;  %2208 = vrot.lane.b32.xlu2 %v11788_v16, %s17600_s29 }
  0xce   : > { %v3472_v61 = vsel %vm3466_vm8, %v3335_v42, %v2343_v60 }
  0xcf   : > { %v1746_v5 = vpop.permute.xlu1 %1745  ;;  %v2054_v6 = vpop.permute.xlu2 %2053  ;;  %v3609_v7 = vsel %vm3603_vm9, %v3472_v61, %v2503_v1  ;;  %v11936_v61 = vsel %vm913_vm1, %v1032_v56, %v1036_v58 }
  0xd0   : > { %v3746_v8 = vsel %vm3740_vm10, %v3609_v7, %v2650_v26 }
  0xd1   : > { %10260 = vmatmul.msk.bf16.gmra.mxu0 %vm3917_vm11, %v3746_v8 }
  0xd3   : > { %1901 = vrot.lane.b32.xlu0 %v11724_v40, %s17623_s24 }
  0xd5   : > { %v1469_v12 = vpop.permute.xlu0 %1468  ;;  %2514 = vrot.lane.b32.xlu1 %v11866_v10, %s11428_s21  ;;  %2661 = vrot.lane.b32.xlu2 %v11869_v11, %s17602_s17 }
  0xd6   : > { %v2789_v19 = vsel %vm2781_vm3, %v11555_v9, %v1469_v12 }
  0xd7   : > { %v2199_v15 = vpop.permute.xlu1 %2198  ;;  %v2507_v17 = vpop.permute.xlu2 %2506  ;;  %v2926_v20 = vsel %vm17595_vm4, %v2789_v19, %v1746_v5 }
  0xd8   : > { %v3063_v25 = vsel %vm3055_vm5, %v2926_v20, %v1892_v38  ;;  %v11906_v38 = vsel %vm1601_vm0, %v1627_v14, %v1629_v3 }
  0xdb   : > { %2354 = vrot.lane.b32.xlu0 %v11797_v22, %s11421_s26 }
  0xdd   : > { %v2052_v24 = vpop.permute.xlu0 %2051  ;;  %1757 = vrot.lane.b32.xlu1 %v11746_v52, %s17596_s28  ;;  %1903 = vrot.lane.b32.xlu2 %v11771_v4, %s17623_s24 }
  0xde   : > { %v3200_v26 = vsel %vm3192_vm6, %v3063_v25, %v2052_v24  ;;  %v1038_v25 = vshrl.u32 %v11915_v45, 16 }
  0xdf   : > { %v2652_v27 = vpop.permute.xlu1 %2651  ;;  %v1750_v30 = vpop.permute.xlu2 %1749  ;;  %v3337_v9 = vsel %vm3329_vm7, %v3200_v26, %v2199_v15  ;;  %v11958_v15 = vld [vmem:[%s11534_s25 + $0x80] sm:$0xff] }
  0xe0   : > { %v3474_v32 = vsel %vm3466_vm8, %v3337_v9, %v2345_v47 }
  0xe3   : > { %1480 = vrot.lane.b32.xlu0 %v11743_v51, %s17598_s16  ;;  %v1022_v51 = vshrl.u32 %v11844_v54, 16 }
  0xe5   : > { %v2505_v23 = vpop.permute.xlu0 %2504  ;;  %2210 = vrot.lane.b32.xlu1 %v11848_v57, %s17600_s29  ;;  %2356 = vrot.lane.b32.xlu2 %v11844_v54, %s11421_s26  ;;  %v1024_v39 = vor.u32 %v1022_v51, %v1020_v2 }
  0xe6   : > { %v3611_v52 = vsel %vm3603_vm9, %v3474_v32, %v2505_v23  ;;  %v1633_v32 = vrot.slane %v11958_v15, 1 }
  0xe7   : > { %v1894_v33 = vpop.permute.xlu1 %1893  ;;  %v2203_v35 = vpop.permute.xlu2 %2202  ;;  %v3748_v36 = vsel %vm3740_vm10, %v3611_v52, %v2652_v27  ;;  %v11921_v50 = vsel %vm913_vm1, %v1024_v39, %v1028_v43 }
  0xe8   : > { %10261 = vmatmul.msk.bf16.gmra.mxu0 %vm3917_vm11, %v3748_v36 }
  0xeb   : > { %2063 = vrot.lane.b32.xlu0 %v11820_v41, %s17604_s14 }
  0xed   : > { %v1748_v44 = vpop.permute.xlu0 %1747  ;;  %2663 = vrot.lane.b32.xlu1 %v11906_v38, %s17602_s17  ;;  %1482 = vrot.lane.b32.xlu2 %v11804_v29, %s17598_s16 }
  0xee   : > { %v2928_v48 = vsel %vm17595_vm4, %v2791_v46, %v1748_v44 }
  0xef   : > { %v2347_v47 = vpop.permute.xlu1 %2346  ;;  %v2656_v18 = vpop.permute.xlu2 %2655  ;;  %v3065_v1 = vsel %vm3055_vm5, %v2928_v48, %v1894_v33 }
  0xf0   : > { %v3202_v0 = vsel %vm3192_vm6, %v3065_v1, %v2054_v6  ;;  %v1635_v1 = vrot.slane %v12006_v53, 1 }
  0xf3   : > { %2516 = vrot.lane.b32.xlu0 %v11921_v50, %s11428_s21 }
  0xf5   : > { %v2201_v29 = vpop.permute.xlu0 %2200  ;;  %1905 = vrot.lane.b32.xlu1 %v11797_v22, %s17623_s24  ;;  %2065 = vrot.lane.b32.xlu2 %v11866_v10, %s17604_s14 }
  0xf6   : > { %v3339_v59 = vsel %vm3329_vm7, %v3202_v0, %v2201_v29 }
  0xf7   : > { %v1473_v34 = vpop.permute.xlu1 %1472  ;;  %v1898_v42 = vpop.permute.xlu2 %1897  ;;  %v3476_v60 = vsel %vm3466_vm8, %v3339_v59, %v2347_v47 }
  0xf8   : > { %v3613_v2 = vsel %vm3603_vm9, %v3476_v60, %v2507_v17  ;;  %v2793_v7 = vsel %vm2781_vm3, %v11575_v28, %v1473_v34  ;;  %v12026_v34 = vsel %vm1601_vm0, %v1633_v32, %v1635_v1 }
  0xf9   : > { %v2930_v12 = vsel %vm17595_vm4, %v2793_v7, %v1750_v30  ;;  %v1040_v30 = vor.u32 %v1038_v25, %v1036_v58  ;;  %v1050_v58 = vshll.u32 %v12006_v53, 16 }
  0xfb   : > { %1759 = vrot.lane.b32.xlu0 %v11788_v16, %s17596_s28  ;;  %v1631_v16 = vrot.slane %v11915_v45, 1  ;;  %v1052_v60 = vrot.slane %v1050_v58, 1 }
  0xfd   : > { %v2654_v62 = vpop.permute.xlu0 %2653  ;;  %2358 = vrot.lane.b32.xlu1 %v11890_v31, %s11421_s26  ;;  %2518 = vrot.lane.b32.xlu2 %v11936_v61, %s11428_s21  ;;  %v11962_v20 = vsel %vm1601_vm0, %v1629_v3, %v1631_v16  ;;  %v11983_v36 = vsel %vm1601_vm0, %v1631_v16, %v1633_v32 }
  0xfe   : > { %v3750_v14 = vsel %vm3740_vm10, %v3613_v2, %v2654_v62  ;;  %v12035_v2 = vld [vmem:[%s11534_s25 + $0x90] sm:$0xff] }
  0xff   : > { %10262 = vmatmul.msk.bf16.gmra.mxu0 %vm3917_vm11, %v3750_v14  ;;  %v2056_v5 = vpop.permute.xlu1 %2055  ;;  %v2351_v6 = vpop.permute.xlu2 %2350 }
 0x103   : > { %2212 = vrot.lane.b32.xlu0 %v11869_v11, %s17600_s29 }
 0x105   : > { %v1896_v8 = vpop.permute.xlu0 %1895  ;;  %1484 = vrot.lane.b32.xlu1 %v11820_v41, %s17598_s16  ;;  %1761 = vrot.lane.b32.xlu2 %v11848_v57, %s17596_s28  ;;  %v1042_v41 = vshll.u32 %v11958_v15, 16 }
 0x106   : > { %v3067_v17 = vsel %vm3055_vm5, %v2930_v12, %v1896_v8  ;;  %v1054_v8 = vshrl.u32 %v12006_v53, 16  ;;  %v1058_v12 = vshll.u32 %v12035_v2, 16 }
 0x107   : > { %v2509_v19 = vpop.permute.xlu1 %2508  ;;  %v1477_v28 = vpop.permute.xlu2 %1476  ;;  %v3204_v24 = vsel %vm3192_vm6, %v3067_v17, %v2056_v5  ;;  %v1044_v9 = vrot.slane %v1042_v41, 1 }
 0x108   : > { %v3341_v57 = vsel %vm3329_vm7, %v3204_v24, %v2203_v35  ;;  %v2797_v14 = vsel %vm2781_vm3, %v11628_v63, %v1477_v28  ;;  %v1056_v28 = vor.u32 %v1054_v8, %v1052_v60  ;;  %v1060_v24 = vrot.slane %v1058_v12, 1 }
 0x109   : > { %v11980_v35 = vsel %vm913_vm1, %v1040_v30, %v1044_v9 }
 0x10b   : > { %2665 = vrot.lane.b32.xlu0 %v11962_v20, %s17602_s17 }
 0x10d   : > { %v2349_v26 = vpop.permute.xlu0 %2348  ;;  %2067 = vrot.lane.b32.xlu1 %v11921_v50, %s17604_s14  ;;  %2214 = vrot.lane.b32.xlu2 %v11906_v38, %s17600_s29 }
 0x10e   : > { %v3478_v27 = vsel %vm3466_vm8, %v3341_v57, %v2349_v26 }
 0x10f   : > { %v1752_v23 = vpop.permute.xlu1 %1751  ;;  %v2060_v52 = vpop.permute.xlu2 %2059  ;;  %v3615_v3 = vsel %vm3603_vm9, %v3478_v27, %v2509_v19  ;;  %v12058_v27 = vsel %vm913_vm1, %v1056_v28, %v1060_v24 }
 0x110   : > { %v3752_v33 = vsel %vm3740_vm10, %v3615_v3, %v2656_v18  ;;  %v1637_v3 = vrot.slane %v12035_v2, 1 }
 0x111   : > { %10263 = vmatmul.msk.bf16.gmra.mxu0 %vm3917_vm11, %v3752_v33 }
 0x113   : > { %1907 = vrot.lane.b32.xlu0 %v11844_v54, %s17623_s24 }
 0x115   : > { %v1475_v51 = vpop.permute.xlu0 %1474  ;;  %2520 = vrot.lane.b32.xlu1 %v11980_v35, %s11428_s21  ;;  %2667 = vrot.lane.b32.xlu2 %v11983_v36, %s17602_s17 }
 0x116   : > { %v2795_v43 = vsel %vm2781_vm3, %v11596_v49, %v1475_v51 }
 0x117   : > { %v2205_v37 = vpop.permute.xlu1 %2204  ;;  %v2513_v39 = vpop.permute.xlu2 %2512  ;;  %v2932_v44 = vsel %vm17595_vm4, %v2795_v43, %v1752_v23 }
 0x118   : > { %v3069_v54 = vsel %vm3055_vm5, %v2932_v44, %v1898_v42 }
 0x11b   : > { %2360 = vrot.lane.b32.xlu0 %v11915_v45, %s11421_s26 }
 0x11d   : > { %v2058_v46 = vpop.permute.xlu0 %2057  ;;  %1763 = vrot.lane.b32.xlu1 %v11869_v11, %s17596_s28  ;;  %1909 = vrot.lane.b32.xlu2 %v11890_v31, %s17623_s24 }
 0x11e   : > { %v3206_v47 = vsel %vm3192_vm6, %v3069_v54, %v2058_v46  ;;  %v12091_v46 = vsel %vm1601_vm0, %v1635_v1, %v1637_v3 }
 0x11f   : > { %v2658_v18 = vpop.permute.xlu1 %2657  ;;  %v12002_v48 = vpop.permute.xlu2 %1755  ;;  %v3343_v49 = vsel %vm3329_vm7, %v3206_v47, %v2205_v37  ;;  %v12101_v47 = vld [vmem:[%s17585_s2] ss:$0 sm:$0xff] }
 0x120   : > { %v3480_v55 = vsel %vm3466_vm8, %v3343_v49, %v2351_v6 }
 0x123   : > { %1486 = vrot.lane.b32.xlu0 %v11866_v10, %s17598_s16  ;;  %v1046_v10 = vshrl.u32 %v11958_v15, 16 }
 0x125   : > { %v2511_v11 = vpop.permute.xlu0 %2510  ;;  %2216 = vrot.lane.b32.xlu1 %v11962_v20, %s17600_s29  ;;  %2362 = vrot.lane.b32.xlu2 %v11958_v15, %s11421_s26  ;;  %v12023_v59 = vpop.f32.mrf.mxu0  ;;  %v1048_v42 = vor.u32 %v1046_v10, %v1044_v9 }
 0x126   : > { %v3617_v31 = vsel %vm3603_vm9, %v3480_v55, %v2511_v11 }
 0x127   : > { %v1900_v29 = vpop.permute.xlu1 %1899  ;;  %v12017_v0 = vpop.permute.xlu2 %2208  ;;  %v3754_v56 = vsel %vm3740_vm10, %v3617_v31, %v2658_v18  ;;  %v12041_v16 = vsel %vm913_vm1, %v1048_v42, %v1052_v60  ;;  %v4068_v42 = vadd.f32 %v12101_v47, %v12023_v59 }
 0x128   : > { %10264 = vmatmul.msk.bf16.gmra.mxu0 %vm3917_vm11, %v3754_v56 }
 0x12b   : > { %2069 = vrot.lane.b32.xlu0 %v11936_v61, %s17604_s14 }
 0x12d   : > { %v1754_v62 = vpop.permute.xlu0 %1753  ;;  %2669 = vrot.lane.b32.xlu1 %v12026_v34, %s17602_s17  ;;  %1488 = vrot.lane.b32.xlu2 %v11921_v50, %s17598_s16  ;;  %v4069_v50 = vpop.f32.mrf.mxu0 }
 0x12e   : > { %v2934_v7 = vsel %vm17595_vm4, %v2797_v14, %v1754_v62 }
 0x12f   : > { %v2353_v5 = vpop.permute.xlu1 %2352  ;;  %v2662_v6 = vpop.permute.xlu2 %2661  ;;  %v3071_v17 = vsel %vm3055_vm5, %v2934_v7, %v1900_v29  ;;  %v12114_v29 = vadd.f32 %v12101_v47, %v4069_v50 }
 0x130   : > { %v3208_v63 = vsel %vm3192_vm6, %v3071_v17, %v2060_v52 }
 0x131   : > { %v4408_v14 = vmax.f32 %v12114_v29, 0.0 }
 0x133   : > { %2522 = vrot.lane.b32.xlu0 %v12041_v16, %s11428_s21  ;;  %v12142_v8 = vrot.slane %v4408_v14, 1 }
 0x135   : > { %v2207_v19 = vpop.permute.xlu0 %2206  ;;  %1911 = vrot.lane.b32.xlu1 %v11915_v45, %s17623_s24  ;;  %2071 = vrot.lane.b32.xlu2 %v11980_v35, %s17604_s14 }
 0x136   : > { %v3345_v25 = vsel %vm3329_vm7, %v3208_v63, %v2207_v19 }
 0x137   : > { %v1479_v41 = vpop.permute.xlu1 %1478  ;;  %v12054_v57 = vpop.permute.xlu2 %1903  ;;  %v3482_v26 = vsel %vm3466_vm8, %v3345_v25, %v2353_v5 }
 0x138   : > { %v3619_v9 = vsel %vm3603_vm9, %v3482_v26, %v2513_v39  ;;  %v12085_v39 = vld [vmem:[%s11534_s25 + $0x98] sm:$0xff] }
 0x139   : > { %v1639_v1 = vrot.slane %v12085_v39, 1 }
 0x13b   : > { %1765 = vrot.lane.b32.xlu0 %v11906_v38, %s17596_s28  ;;  %v2799_v38 = vsel %vm2781_vm3, %v11659_v13, %v1479_v41  ;;  %v12130_v62 = vsel %vm1601_vm0, %v1637_v3, %v1639_v1 }
 0x13c   : > { %v12062_v45 = vpop.f32.mrf.mxu0  ;;  %v2936_v37 = vsel %vm17595_vm4, %v2799_v38, %v12002_v48 }
 0x13d   : > { %v2660_v30 = vpop.permute.xlu0 %2659  ;;  %2364 = vrot.lane.b32.xlu1 %v12006_v53, %s11421_s26  ;;  %2524 = vrot.lane.b32.xlu2 %v12058_v27, %s11428_s21 }
 0x13e   : > { %v3756_v32 = vsel %vm3740_vm10, %v3619_v9, %v2660_v30  ;;  %v4073_v30 = vadd.f32 %v12101_v47, %v12062_v45 }
 0x13f   : > { %10265 = vmatmul.msk.bf16.gmra.mxu0 %vm3917_vm11, %v3756_v32  ;;  %v2062_v23 = vpop.permute.xlu1 %2061  ;;  %v12071_v52 = vpop.permute.xlu2 %2356 }
 0x143   : > { %2218 = vrot.lane.b32.xlu0 %v11983_v36, %s17600_s29 }
 0x144   : > { %v4074_v51 = vpop.f32.mrf.mxu0 }
 0x145   : > { %v1902_v33 = vpop.permute.xlu0 %1901  ;;  %1490 = vrot.lane.b32.xlu1 %v11936_v61, %s17598_s16  ;;  %1767 = vrot.lane.b32.xlu2 %v11962_v20, %s17596_s28  ;;  %v1062_v61 = vshrl.u32 %v12035_v2, 16  ;;  %v1066_v20 = vshll.u32 %v12085_v39, 16  ;;  %v4409_v51 = vmax.f32 %v4073_v30, 0.0 }
 0x146   : > { %v3073_v13 = vsel %vm3055_vm5, %v2936_v37, %v1902_v33  ;;  %v12195_v37 = vld [vmem:[%s11534_s25 + $0xa0] sm:$0xff] }
 0x147   : > { %v2515_v43 = vpop.permute.xlu1 %2514  ;;  %v12088_v44 = vpop.permute.xlu2 %1482  ;;  %v3210_v54 = vsel %vm3192_vm6, %v3073_v13, %v2062_v23  ;;  %v1064_v11 = vor.u32 %v1062_v61, %v1060_v24  ;;  %v12110_v31 = vrot.slane %v1066_v20, 1  ;;  %v11429_v24 = vmov 0  }
 0x148   : > { %v3347_v18 = vsel %vm3329_vm7, %v3210_v54, %v12017_v0  ;;  %344 = vst.msk [vmem:[#allocation2 + $0x28] sm:$0xf] %vm333_vm12, %v11429_v24  ;;  %v4683_v13 = vrot.slane %v4409_v51, 1  ;;  %v2803_v29 = vsel %vm2781_vm3, %v11724_v40, %v12088_v44 }
 0x149   : > { %v12125_v60 = vsel %vm913_vm1, %v1064_v11, %v12110_v31  ;;  %334 = vst.msk [vmem:[#allocation2] sm:$0xf] %vm333_vm12, %v11429_v24  ;;  %v1070_v11 = vshrl.u32 %v12085_v39, 16 }
 0x14a   : > { %335 = vst.msk [vmem:[#allocation2 + $0x4] sm:$0xf] %vm333_vm12, %v11429_v24 }
 0x14b   : > { %2671 = vrot.lane.b32.xlu0 %v12091_v46, %s17602_s17  ;;  %336 = vst.msk [vmem:[#allocation2 + $0x8] sm:$0xf] %vm333_vm12, %v11429_v24 }
 0x14c   : > { %337 = vst.msk [vmem:[#allocation2 + $0xc] sm:$0xf] %vm333_vm12, %v11429_v24 }
 0x14d   : > { %v2355_v48 = vpop.permute.xlu0 %2354  ;;  %2073 = vrot.lane.b32.xlu1 %v12041_v16, %s17604_s14  ;;  %2220 = vrot.lane.b32.xlu2 %v12026_v34, %s17600_s29  ;;  %338 = vst.msk [vmem:[#allocation2 + $0x10] sm:$0xf] %vm333_vm12, %v11429_v24 }
 0x14e   : > { %v3484_v49 = vsel %vm3466_vm8, %v3347_v18, %v2355_v48  ;;  %v4077_v55 = vpop.f32.mrf.mxu0  ;;  %339 = vst.msk [vmem:[#allocation2 + $0x14] sm:$0xf] %vm333_vm12, %v11429_v24  ;;  %v1641_v18 = vrot.slane %v12195_v37, 1 }
 0x14f   : > { %v1758_v56 = vpop.permute.xlu1 %1757  ;;  %v12116_v0 = vpop.permute.xlu2 %2065  ;;  %v3621_v10 = vsel %vm3603_vm9, %v3484_v49, %v2515_v43  ;;  %v4078_v5 = vadd.f32 %v12101_v47, %v4077_v55  ;;  %340 = vst.msk [vmem:[#allocation2 + $0x18] sm:$0xf] %vm333_vm12, %v11429_v24 }
 0x150   : > { %v3758_v58 = vsel %vm3740_vm10, %v3621_v10, %v2662_v6  ;;  %v4407_v6 = vmax.f32 %v4068_v42, 0.0  ;;  %341 = vst.msk [vmem:[#allocation2 + $0x1c] sm:$0xf] %vm333_vm12, %v11429_v24  ;;  %v4684_v10 = vsel %vm1601_vm0, %v12142_v8, %v4683_v13  ;;  %v12235_v42 = vsel %vm1601_vm0, %v1639_v1, %v1641_v18 }
 0x151   : > { %10266 = vmatmul.msk.bf16.gmra.mxu0 %vm3917_vm11, %v3758_v58  ;;  %v4411_v12 = vmax.f32 %v4078_v5, 0.0  ;;  %342 = vst.msk [vmem:[#allocation2 + $0x20] sm:$0xf] %vm333_vm12, %v11429_v24  ;;  %v5088_v1 = vmax.f32 %v4408_v14, %v4684_v10 }
 0x152   : > { %v4680_v63 = vrot.slane %v4407_v6, 1  ;;  %343 = vst.msk [vmem:[#allocation2 + $0x24] sm:$0xf] %vm333_vm12, %v11429_v24 }
 0x153   : > { %1913 = vrot.lane.b32.xlu0 %v11958_v15, %s17623_s24  ;;  %v4687_v41 = vrot.slane %v4411_v12, 1  ;;  %345 = vst.msk [vmem:[#allocation2 + $0x2c] sm:$0xf] %vm333_vm12, %v11429_v24 }
 0x154   : > { %v4682_v25 = vsel %vm1601_vm0, %v4680_v63, %v12142_v8  ;;  %346 = vst.msk [vmem:[#allocation2 + $0x30] sm:$0xf] %vm333_vm12, %v11429_v24  ;;  %v1078_v63 = vshrl.u32 %v12195_v37, 16 }
 0x155   : > { %v1481_v59 = vpop.permute.xlu0 %1480  ;;  %2526 = vrot.lane.b32.xlu1 %v12125_v60, %s11428_s21  ;;  %2673 = vrot.lane.b32.xlu2 %v12130_v62, %s17602_s17  ;;  %v5087_v23 = vmax.f32 %v4407_v6, %v4682_v25  ;;  %347 = vst.msk [vmem:[#allocation2 + $0x34] sm:$0xf] %vm333_vm12, %v11429_v24  ;;  %v1072_v6 = vor.u32 %v1070_v11, %v12110_v31  ;;  %v12258_v31 = vld [vmem:[%s11534_s25 + $0xa8] sm:$0xff] }
 0x156   : > { %v4079_v7 = vpop.f32.mrf.mxu0  ;;  %v2801_v15 = vsel %vm2781_vm3, %v11678_v21, %v1481_v59  ;;  %348 = vst.msk [vmem:[#allocation2 + $0x38] sm:$0xf] %vm333_vm12, %v11429_v24  ;;  %v1082_v40 = vshll.u32 %v12258_v31, 16 }
 0x157   : > { %v12145_v17 = vadd.f32 %v12101_v47, %v4079_v7  ;;  %v2211_v50 = vpop.permute.xlu1 %2210  ;;  %v12147_v19 = vpop.permute.xlu2 %2518  ;;  %v2938_v26 = vsel %vm17595_vm4, %v2801_v15, %v1758_v56  ;;  %v1074_v56 = vshll.u32 %v12195_v37, 16  ;;  %349 = vst.msk [vmem:[#allocation2 + $0x3c] sm:$0xf] %vm333_vm12, %v11429_v24 }
 0x158   : > { %v3075_v3 = vsel %vm3055_vm5, %v2938_v26, %v12054_v57  ;;  %350 = vst.msk [vmem:[#allocation2 + $0x40] sm:$0xf] %vm333_vm12, %v11429_v24  ;;  %v12295_v26 = vrot.slane %v1082_v40, 1 }
 0x159   : > { %v4412_v28 = vmax.f32 %v12145_v17, 0.0  ;;  %351 = vst.msk [vmem:[#allocation2 + $0x44] sm:$0xf] %vm333_vm12, %v11429_v24  ;;  %v1076_v59 = vrot.slane %v1074_v56, 1 }
 0x15a   : > { %352 = vst.msk [vmem:[#allocation2 + $0x48] sm:$0xf] %vm333_vm12, %v11429_v24 }
 0x15b   : > { %v4689_v21 = vrot.slane %v4412_v28, 1  ;;  %2366 = vrot.lane.b32.xlu0 %v12035_v2, %s11421_s26  ;;  %353 = vst.msk [vmem:[#allocation2 + $0x4c] sm:$0xf] %vm333_vm12, %v11429_v24  ;;  %v12271_v15 = vsel %vm913_vm1, %v1072_v6, %v1076_v59 }
 0x15c   : > { %354 = vst.msk [vmem:[#allocation2 + $0x50] sm:$0xf] %vm333_vm12, %v11429_v24 }
 0x15d   : > { %v4690_v9 = vsel %vm1601_vm0, %v4687_v41, %v4689_v21  ;;  %v2064_v32 = vpop.permute.xlu0 %2063  ;;  %1769 = vrot.lane.b32.xlu1 %v11983_v36, %s17596_s28  ;;  %1915 = vrot.lane.b32.xlu2 %v12006_v53, %s17623_s24  ;;  %355 = vst.msk [vmem:[#allocation2 + $0x54] sm:$0xf] %vm333_vm12, %v11429_v24  ;;  %v1080_v41 = vor.u32 %v1078_v63, %v1076_v59 }
 0x15e   : > { %v12176_v38 = vmax.f32 %v4411_v12, %v4690_v9  ;;  %v3212_v45 = vsel %vm3192_vm6, %v3075_v3, %v2064_v32  ;;  %356 = vst.msk [vmem:[#allocation2 + $0x58] sm:$0xf] %vm333_vm12, %v11429_v24 }
 0x15f   : > { %v2664_v33 = vpop.permute.xlu1 %2663  ;;  %v12183_v36 = vpop.permute.xlu2 %1761  ;;  %v3349_v57 = vsel %vm3329_vm7, %v3212_v45, %v2211_v50  ;;  %357 = vst.msk [vmem:[#allocation2 + $0x5c] sm:$0xf] %vm333_vm12, %v11429_v24 }
 0x160   : > { %v5223_v53 = vmax.f32 %v5087_v23, %v12176_v38  ;;  %v3486_v54 = vsel %vm3466_vm8, %v3349_v57, %v12071_v52  ;;  %358 = vst.msk [vmem:[#allocation2 + $0x60] sm:$0xf] %vm333_vm12, %v11429_v24 }
 0x161   : > { %359 = vst.msk [vmem:[#allocation2 + $0x64] sm:$0xf] %vm333_vm12, %v11429_v24 }
 0x162   : > { %5355 = vst.msk [vmem:[#allocation5] sm:$0xff] %vm3740_vm10, %v5223_v53 }
 0x163   : > { %1492 = vrot.lane.b32.xlu0 %v11980_v35, %s17598_s16  ;;  %360 = vst.msk [vmem:[#allocation2 + $0x68] sm:$0xf] %vm333_vm12, %v11429_v24 }
 0x164   : > { %361 = vst.msk [vmem:[#allocation2 + $0x6c] sm:$0xf] %vm333_vm12, %v11429_v24 }
 0x165   : > { %v4082_v43 = vpop.f32.mrf.mxu0  ;;  %v2517_v61 = vpop.permute.xlu0 %2516  ;;  %2222 = vrot.lane.b32.xlu1 %v12091_v46, %s17600_s29  ;;  %2368 = vrot.lane.b32.xlu2 %v12085_v39, %s11421_s26  ;;  %362 = vst.msk [vmem:[#allocation2 + $0x70] sm:$0xf] %vm333_vm12, %v11429_v24 }
 0x166   : > { %v4083_v35 = vadd.f32 %v12101_v47, %v4082_v43  ;;  %v3623_v20 = vsel %vm3603_vm9, %v3486_v54, %v2517_v61  ;;  %363 = vst.msk [vmem:[#allocation2 + $0x74] sm:$0xf] %vm333_vm12, %v11429_v24  ;;  %v1643_v43 = vrot.slane %v12258_v31, 1 }
 0x167   : > { %v1906_v52 = vpop.permute.xlu1 %1905  ;;  %v12216_v48 = vpop.permute.xlu2 %2214  ;;  %v3760_v49 = vsel %vm3740_vm10, %v3623_v20, %v2664_v33  ;;  %364 = vst.msk [vmem:[#allocation2 + $0x78] sm:$0xf] %vm333_vm12, %v11429_v24 }
 0x168   : > { %v4413_v55 = vmax.f32 %v4083_v35, 0.0  ;;  %10267 = vmatmul.msk.bf16.gmra.mxu0 %vm3917_vm11, %v3760_v49  ;;  %365 = vst.msk [vmem:[#allocation2 + $0x7c] sm:$0xf] %vm333_vm12, %v11429_v24  ;;  %v12359_v35 = vld [vmem:[%s11534_s25 + $0xb0] sm:$0xff] }
 0x169   : > { %366 = vst.msk [vmem:[#allocation2 + $0x80] sm:$0xf] %vm333_vm12, %v11429_v24  ;;  %v1090_v56 = vshll.u32 %v12359_v35, 16 }
 0x16a   : > { %v4691_v58 = vrot.slane %v4413_v55, 1  ;;  %367 = vst.msk [vmem:[#allocation2 + $0x84] sm:$0xf] %vm333_vm12, %v11429_v24 }
 0x16b   : > { %2075 = vrot.lane.b32.xlu0 %v12058_v27, %s17604_s14  ;;  %368 = vst.msk [vmem:[#allocation2 + $0x88] sm:$0xf] %vm333_vm12, %v11429_v24 }
 0x16c   : > { %v4692_v5 = vsel %vm1601_vm0, %v4689_v21, %v4691_v58  ;;  %369 = vst.msk [vmem:[#allocation2 + $0x8c] sm:$0xf] %vm333_vm12, %v11429_v24 }
 0x16d   : > { %v5092_v7 = vmax.f32 %v4412_v28, %v4692_v5  ;;  %v4084_v8 = vpop.f32.mrf.mxu0  ;;  %v1760_v12 = vpop.permute.xlu0 %1759  ;;  %2675 = vrot.lane.b32.xlu1 %v12235_v42, %s17602_s17  ;;  %1494 = vrot.lane.b32.xlu2 %v12041_v16, %s17598_s16  ;;  %370 = vst.msk [vmem:[#allocation2 + $0x90] sm:$0xf] %vm333_vm12, %v11429_v24 }
 0x16e   : > { %v2940_v16 = vsel %vm17595_vm4, %v2803_v29, %v1760_v12  ;;  %371 = vst.msk [vmem:[#allocation2 + $0x94] sm:$0xf] %vm333_vm12, %v11429_v24  ;;  %v12401_v8 = vrot.slane %v1090_v56, 1 }
 0x16f   : > { %v5224_v14 = vmax.f32 %v5088_v1, %v5092_v7  ;;  %v2359_v17 = vpop.permute.xlu1 %2358  ;;  %v12265_v50 = vpop.permute.xlu2 %2667  ;;  %v3077_v44 = vsel %vm3055_vm5, %v2940_v16, %v1906_v52  ;;  %372 = vst.msk [vmem:[#allocation2 + $0x98] sm:$0xf] %vm333_vm12, %v11429_v24 }
 0x170   : > { %v3214_v25 = vsel %vm3192_vm6, %v3077_v44, %v12116_v0  ;;  %v12309_v0 = vsel %vm913_vm1, %v1080_v41, %v12295_v26  ;;  %373 = vst.msk [vmem:[#allocation2 + $0x9c] sm:$0xf] %vm333_vm12, %v11429_v24 }
 0x171   : > { %5356 = vst.msk [vmem:[#allocation5 + $0x8] sm:$0xff] %vm3740_vm10, %v5224_v14 }
 0x172   : > { %374 = vst.msk [vmem:[#allocation2 + $0xa0] sm:$0xf] %vm333_vm12, %v11429_v24 }
 0x173   : > { %2528 = vrot.lane.b32.xlu0 %v12271_v15, %s11428_s21  ;;  %376 = vst.msk [vmem:[#allocation3] sm:$0xf] %vm333_vm12, %v11429_v24 }
 0x174   : > { %377 = vst.msk [vmem:[#allocation3 + $0x4] sm:$0xf] %vm333_vm12, %v11429_v24 }
 0x175   : > { %v2213_v28 = vpop.permute.xlu0 %2212  ;;  %1917 = vrot.lane.b32.xlu1 %v12035_v2, %s17623_s24  ;;  %2077 = vrot.lane.b32.xlu2 %v12125_v60, %s17604_s14  ;;  %378 = vst.msk [vmem:[#allocation3 + $0x8] sm:$0xf] %vm333_vm12, %v11429_v24 }
 0x176   : > { %v3351_v21 = vsel %vm3329_vm7, %v3214_v25, %v2213_v28  ;;  %379 = vst.msk [vmem:[#allocation3 + $0xc] sm:$0xf] %vm333_vm12, %v11429_v24 }
 0x177   : > { %v1485_v30 = vpop.permute.xlu1 %1484  ;;  %v12300_v9 = vpop.permute.xlu2 %1909  ;;  %v3488_v2 = vsel %vm3466_vm8, %v3351_v21, %v2359_v17  ;;  %380 = vst.msk [vmem:[#allocation3 + $0x10] sm:$0xf] %vm333_vm12, %v11429_v24 }
 0x178   : > { %v3625_v45 = vsel %vm3603_vm9, %v3488_v2, %v12147_v19  ;;  %v2805_v57 = vsel %vm2781_vm3, %v11771_v4, %v1485_v30  ;;  %381 = vst.msk [vmem:[#allocation3 + $0x14] sm:$0xf] %vm333_vm12, %v11429_v24 }
 0x179   : > { %v2942_v4 = vsel %vm17595_vm4, %v2805_v57, %v12183_v36  ;;  %v1086_v36 = vshrl.u32 %v12258_v31, 16  ;;  %382 = vst.msk [vmem:[#allocation3 + $0x18] sm:$0xf] %vm333_vm12, %v11429_v24 }
 0x17a   : > { %383 = vst.msk [vmem:[#allocation3 + $0x1c] sm:$0xf] %vm333_vm12, %v11429_v24 }
 0x17b   : > { %1771 = vrot.lane.b32.xlu0 %v12026_v34, %s17596_s28  ;;  %v1088_v6 = vor.u32 %v1086_v36, %v12295_v26  ;;  %384 = vst.msk [vmem:[#allocation3 + $0x20] sm:$0xf] %vm333_vm12, %v11429_v24 }
 0x17c   : > { %v4087_v32 = vpop.f32.mrf.mxu0  ;;  %385 = vst.msk [vmem:[#allocation3 + $0x24] sm:$0xf] %vm333_vm12, %v11429_v24 }
 0x17d   : > { %v4088_v23 = vadd.f32 %v12101_v47, %v4087_v32  ;;  %v2666_v3 = vpop.permute.xlu0 %2665  ;;  %2370 = vrot.lane.b32.xlu1 %v12195_v37, %s11421_s26  ;;  %2530 = vrot.lane.b32.xlu2 %v12309_v0, %s11428_s21  ;;  %v12420_v63 = vsel %vm913_vm1, %v1088_v6, %v12401_v8  ;;  %386 = vst.msk [vmem:[#allocation3 + $0x28] sm:$0xf] %vm333_vm12, %v11429_v24 }
 0x17e   : > { %v3762_v34 = vsel %vm3740_vm10, %v3625_v45, %v2666_v3  ;;  %387 = vst.msk [vmem:[#allocation3 + $0x2c] sm:$0xf] %vm333_vm12, %v11429_v24 }
 0x17f   : > { %v4415_v33 = vmax.f32 %v4088_v23, 0.0  ;;  %10268 = vmatmul.msk.bf16.gmra.mxu0 %vm3917_vm11, %v3762_v34  ;;  %v2068_v53 = vpop.permute.xlu1 %2067  ;;  %v12332_v51 = vpop.permute.xlu2 %2362  ;;  %388 = vst.msk [vmem:[#allocation3 + $0x30] sm:$0xf] %vm333_vm12, %v11429_v24 }
 0x180   : > { %389 = vst.msk [vmem:[#allocation3 + $0x34] sm:$0xf] %vm333_vm12, %v11429_v24 }
 0x181   : > { %v4695_v19 = vrot.slane %v4415_v33, 1  ;;  %390 = vst.msk [vmem:[#allocation3 + $0x38] sm:$0xf] %vm333_vm12, %v11429_v24 }
 0x182   : > { %391 = vst.msk [vmem:[#allocation3 + $0x3c] sm:$0xf] %vm333_vm12, %v11429_v24 }
 0x183   : > { %2224 = vrot.lane.b32.xlu0 %v12130_v62, %s17600_s29  ;;  %392 = vst.msk [vmem:[#allocation3 + $0x40] sm:$0xf] %vm333_vm12, %v11429_v24 }
 0x184   : > { %v4089_v13 = vpop.f32.mrf.mxu0  ;;  %393 = vst.msk [vmem:[#allocation3 + $0x44] sm:$0xf] %vm333_vm12, %v11429_v24 }
 0x185   : > { %v4090_v54 = vadd.f32 %v12101_v47, %v4089_v13  ;;  %v1908_v61 = vpop.permute.xlu0 %1907  ;;  %1496 = vrot.lane.b32.xlu1 %v12058_v27, %s17598_s16  ;;  %1773 = vrot.lane.b32.xlu2 %v12091_v46, %s17596_s28  ;;  %v12371_v27 = vsel %vm1601_vm0, %v1641_v18, %v1643_v43  ;;  %394 = vst.msk [vmem:[#allocation3 + $0x48] sm:$0xf] %vm333_vm12, %v11429_v24 }
 0x186   : > { %v3079_v52 = vsel %vm3055_vm5, %v2942_v4, %v1908_v61  ;;  %395 = vst.msk [vmem:[#allocation3 + $0x4c] sm:$0xf] %vm333_vm12, %v11429_v24  ;;  %v1094_v61 = vshrl.u32 %v12359_v35, 16 }
 0x187   : > { %v4416_v20 = vmax.f32 %v4090_v54, 0.0  ;;  %v2521_v49 = vpop.permute.xlu1 %2520  ;;  %v12364_v55 = vpop.permute.xlu2 %1488  ;;  %v3216_v11 = vsel %vm3192_vm6, %v3079_v52, %v2068_v53  ;;  %396 = vst.msk [vmem:[#allocation3 + $0x50] sm:$0xf] %vm333_vm12, %v11429_v24 }
 0x188   : > { %v3353_v58 = vsel %vm3329_vm7, %v3216_v11, %v12216_v48  ;;  %v1645_v48 = vrot.slane %v12359_v35, 1  ;;  %397 = vst.msk [vmem:[#allocation3 + $0x54] sm:$0xf] %vm333_vm12, %v11429_v24 }
 0x189   : > { %v4697_v46 = vrot.slane %v4416_v20, 1  ;;  %398 = vst.msk [vmem:[#allocation3 + $0x58] sm:$0xf] %vm333_vm12, %v11429_v24 }
 0x18a   : > { %v12425_v40 = vsel %vm1601_vm0, %v1643_v43, %v1645_v48  ;;  %399 = vst.msk [vmem:[#allocation3 + $0x5c] sm:$0xf] %vm333_vm12, %v11429_v24 }
 0x18b   : > { %v4698_v10 = vsel %vm1601_vm0, %v4695_v19, %v4697_v46  ;;  %2677 = vrot.lane.b32.xlu0 %v12371_v27, %s17602_s17  ;;  %400 = vst.msk [vmem:[#allocation3 + $0x60] sm:$0xf] %vm333_vm12, %v11429_v24 }
 0x18c   : > { %v12385_v18 = vmax.f32 %v4415_v33, %v4698_v10  ;;  %402 = vst.msk [vmem:[#allocation4] sm:$0xf] %vm333_vm12, %v11429_v24 }
 0x18d   : > { %v2361_v5 = vpop.permute.xlu0 %2360  ;;  %2079 = vrot.lane.b32.xlu1 %v12271_v15, %s17604_s14  ;;  %2226 = vrot.lane.b32.xlu2 %v12235_v42, %s17600_s29  ;;  %403 = vst.msk [vmem:[#allocation4 + $0x4] sm:$0xf] %vm333_vm12, %v11429_v24 }
 0x18e   : > { %v5227_v59 = vmax.f32 %v12176_v38, %v12385_v18  ;;  %v3490_v1 = vsel %vm3466_vm8, %v3353_v58, %v2361_v5  ;;  %v4092_v7 = vpop.f32.mrf.mxu0  ;;  %404 = vst.msk [vmem:[#allocation4 + $0x8] sm:$0xf] %vm333_vm12, %v11429_v24  ;;  %v12541_v5 = vld [vmem:[%s11534_s25 + $0xc0] sm:$0xff] }
 0x18f   : > { %v4093_v12 = vadd.f32 %v12101_v47, %v4092_v7  ;;  %v1764_v29 = vpop.permute.xlu1 %1763  ;;  %v12407_v14 = vpop.permute.xlu2 %2071  ;;  %v3627_v17 = vsel %vm3603_vm9, %v3490_v1, %v2521_v49  ;;  %405 = vst.msk [vmem:[#allocation4 + $0xc] sm:$0xf] %vm333_vm12, %v11429_v24 }
 0x190   : > { %5359 = vst.msk [vmem:[#allocation5 + $0x20] sm:$0xff] %vm3740_vm10, %v5227_v59  ;;  %v3764_v38 = vsel %vm3740_vm10, %v3627_v17, %v12265_v50  ;;  %v11289_v59 = vld [vmem:[%s11534_s25 + $0x68] sm:$0xff] }
 0x191   : > { %v4417_v16 = vmax.f32 %v4093_v12, 0.0  ;;  %10269 = vmatmul.msk.bf16.gmra.mxu0 %vm3917_vm11, %v3764_v38  ;;  %406 = vst.msk [vmem:[#allocation4 + $0x10] sm:$0xf] %vm333_vm12, %v11429_v24  ;;  %v2809_v1 = vsel %vm2781_vm3, %v11289_v59, %v12364_v55  ;;  %v5503_v38 = vld [vmem:[#allocation2 + $0x8] sm:$0xf] }
 0x192   : > { %407 = vst.msk [vmem:[#allocation4 + $0x14] sm:$0xf] %vm333_vm12, %v11429_v24 }
 0x193   : > { %v4699_v44 = vrot.slane %v4417_v16, 1  ;;  %1919 = vrot.lane.b32.xlu0 %v12085_v39, %s17623_s24  ;;  %408 = vst.msk [vmem:[#allocation4 + $0x18] sm:$0xf] %vm333_vm12, %v11429_v24  ;;  %v5509_v16 = vld [vmem:[#allocation2 + $0xc] sm:$0x1] }
 0x194   : > { %409 = vst.msk [vmem:[#allocation4 + $0x1c] sm:$0xf] %vm333_vm12, %v11429_v24 }
 0x195   : > { %v4700_v50 = vsel %vm1601_vm0, %v4697_v46, %v4699_v44  ;;  %v1487_v28 = vpop.permute.xlu0 %1486  ;;  %2532 = vrot.lane.b32.xlu1 %v12420_v63, %s11428_s21  ;;  %2679 = vrot.lane.b32.xlu2 %v12425_v40, %s17602_s17  ;;  %v1096_v46 = vor.u32 %v1094_v61, %v12401_v8  ;;  %410 = vst.msk [vmem:[#allocation4 + $0x20] sm:$0xf] %vm333_vm12, %v11429_v24 }
 0x196   : > { %v12442_v25 = vmax.f32 %v4416_v20, %v4700_v50  ;;  %v4094_v39 = vpop.f32.mrf.mxu0  ;;  %v2807_v21 = vsel %vm2781_vm3, %v11797_v22, %v1487_v28  ;;  %411 = vst.msk [vmem:[#allocation4 + $0x24] sm:$0xf] %vm333_vm12, %v11429_v24  ;;  %v1106_v28 = vshll.u32 %v12541_v5, 16 }
 0x197   : > { %v2217_v41 = vpop.permute.xlu1 %2216  ;;  %v12446_v26 = vpop.permute.xlu2 %2524  ;;  %v2944_v30 = vsel %vm17595_vm4, %v2807_v21, %v1764_v29  ;;  %412 = vst.msk [vmem:[#allocation4 + $0x28] sm:$0xf] %vm333_vm12, %v11429_v24 }
 0x198   : > { %v3081_v22 = vsel %vm3055_vm5, %v2944_v30, %v12300_v9  ;;  %v12484_v9 = vld [vmem:[%s11534_s25 + $0xb8] sm:$0xff]  ;;  %413 = vst.msk [vmem:[#allocation4 + $0x2c] sm:$0xf] %vm333_vm12, %v11429_v24 }
 0x199   : > { %v1647_v57 = vrot.slane %v12484_v9, 1  ;;  %v1098_v4 = vshll.u32 %v12484_v9, 16  ;;  %414 = vst.msk [vmem:[#allocation4 + $0x30] sm:$0xf] %vm333_vm12, %v11429_v24  ;;  %v1102_v50 = vshrl.u32 %v12484_v9, 16 }
 0x19a   : > { %415 = vst.msk [vmem:[#allocation4 + $0x34] sm:$0xf] %vm333_vm12, %v11429_v24 }
 0x19b   : > { %2372 = vrot.lane.b32.xlu0 %v12258_v31, %s11421_s26  ;;  %v12520_v49 = vsel %vm1601_vm0, %v1645_v48, %v1647_v57  ;;  %v1100_v36 = vrot.slane %v1098_v4, 1  ;;  %416 = vst.msk [vmem:[#allocation4 + $0x38] sm:$0xf] %vm333_vm12, %v11429_v24  ;;  %v11290_v4 = vld [vmem:[%s11534_s25 + $0x70] sm:$0xff] }
 0x19c   : > { %417 = vst.msk [vmem:[#allocation4 + $0x3c] sm:$0xf] %vm333_vm12, %v11429_v24 }
 0x19d   : > { %v2070_v2 = vpop.permute.xlu0 %2069  ;;  %1775 = vrot.lane.b32.xlu1 %v12130_v62, %s17596_s28  ;;  %1921 = vrot.lane.b32.xlu2 %v12195_v37, %s17623_s24  ;;  %v5488_v62 = vld [vmem:[#allocation5] ss:$2 sm:$0xff]  ;;  %v12555_v12 = vsel %vm913_vm1, %v1096_v46, %v1100_v36  ;;  %418 = vst.msk [vmem:[#allocation4 + $0x40] sm:$0xf] %vm333_vm12, %v11429_v24  ;;  %vm17628_vm12 = vcmask 130048  }
 0x19e   : > { %v3218_v32 = vsel %vm3192_vm6, %v3081_v22, %v2070_v2  ;;  %v5489_v45 = vpack.c.bf16 %v5488_v62, %v5488_v62  ;;  %v1104_v62 = vor.u32 %v1102_v50, %v1100_v36  ;;  %v1649_v36 = vrot.slane %v12541_v5, 1  ;;  %vm17629_vm13 = vmmov %vm17628_vm12 }
 0x19f   : > { %v2670_v23 = vpop.permute.xlu1 %2669  ;;  %v12474_v3 = vpop.permute.xlu2 %1767  ;;  %v3355_v37 = vsel %vm3329_vm7, %v3218_v32, %v2217_v41 }
 0x1a0   : > { %v3492_v33 = vsel %vm3466_vm8, %v3355_v37, %v12332_v51  ;;  %v5491_v20 = vshrl.u32 %v5489_v45, 16  ;;  %v5494_v6 = vshll.u32 %v5489_v45, 16  ;;  %v1108_v37 = vrot.slane %v1106_v28, 1 }
 0x1a2   : > { %v5493_v11 = vrot.slane %v5491_v20, 7 }
 0x1a3   : > { %1498 = vrot.lane.b32.xlu0 %v12125_v60, %s17598_s16 }
 0x1a4   : > { %v5496_v29 = vor.u32 %v5494_v6, %v5493_v11  ;;  %v5497_v17 = vrot.slane %v5493_v11, 4 }
 0x1a5   : > { %v4097_v34 = vpop.f32.mrf.mxu0  ;;  %v2523_v53 = vpop.permute.xlu0 %2522  ;;  %2228 = vrot.lane.b32.xlu1 %v12371_v27, %s17600_s29  ;;  %2374 = vrot.lane.b32.xlu2 %v12359_v35, %s11421_s26 }
 0x1a6   : > { %v4098_v60 = vadd.f32 %v12101_v47, %v4097_v34  ;;  %v3629_v19 = vsel %vm3603_vm9, %v3492_v33, %v2523_v53  ;;  %v5504_v30 = vsel %vm12561_vm2, %v5496_v29, %v5503_v38  ;;  %v12604_v53 = vsel %vm913_vm1, %v1104_v62, %v1108_v37 }
 0x1a7   : > { %v1912_v51 = vpop.permute.xlu1 %1911  ;;  %v12503_v13 = vpop.permute.xlu2 %2220  ;;  %v3766_v43 = vsel %vm3740_vm10, %v3629_v19, %v2670_v23  ;;  %5505 = vst [vmem:[#allocation2 + $0x8] sm:$0xf] %v5504_v30 }
 0x1a8   : > { %v4419_v54 = vmax.f32 %v4098_v60, 0.0  ;;  %10270 = vmatmul.msk.bf16.gmra.mxu0 %vm3917_vm11, %v3766_v43 }
 0x1aa   : > { %v4703_v52 = vrot.slane %v4419_v54, 1 }
 0x1ab   : > { %2081 = vrot.lane.b32.xlu0 %v12309_v0, %s17604_s14 }
 0x1ad   : > { %v4099_v56 = vpop.f32.mrf.mxu0  ;;  %v1766_v10 = vpop.permute.xlu0 %1765  ;;  %2681 = vrot.lane.b32.xlu1 %v12520_v49, %s17602_s17  ;;  %1500 = vrot.lane.b32.xlu2 %v12271_v15, %s17598_s16 }
 0x1ae   : > { %v12538_v58 = vadd.f32 %v12101_v47, %v4099_v56  ;;  %v2946_v48 = vsel %vm17595_vm4, %v2809_v1, %v1766_v10  ;;  %vm12570_vm4 = vmand %vm5506_vm14, %vm5507_vm15 }
 0x1af   : > { %v2365_v7 = vpop.permute.xlu1 %2364  ;;  %v12548_v8 = vpop.permute.xlu2 %2673  ;;  %v3083_v41 = vsel %vm3055_vm5, %v2946_v48, %v1912_v51  ;;  %v5510_v32 = vsel %vm12570_vm4, %v5497_v17, %v5509_v16  ;;  %vm17630_vm15 = vmmov %vm17628_vm12 }
 0x1b0   : > { %v4420_v15 = vmax.f32 %v12538_v58, 0.0  ;;  %v3220_v23 = vsel %vm3192_vm6, %v3083_v41, %v12407_v14  ;;  %5511 = vst [vmem:[#allocation2 + $0xc] sm:$0x1] %v5510_v32  ;;  %v12633_v58 = vld [vmem:[%s11534_s25 + $0xc8] sm:$0xff] }
 0x1b1   : > { %v1651_v38 = vrot.slane %v12633_v58, 1 }
 0x1b2   : > { %v4705_v44 = vrot.slane %v4420_v15, 1 }
 0x1b3   : > { %2534 = vrot.lane.b32.xlu0 %v12555_v12, %s11428_s21  ;;  %v12671_v30 = vsel %vm1601_vm0, %v1649_v36, %v1651_v38 }
 0x1b4   : > { %v4706_v21 = vsel %vm1601_vm0, %v4703_v52, %v4705_v44 }
 0x1b5   : > { %v12584_v2 = vmax.f32 %v4419_v54, %v4706_v21  ;;  %v2219_v22 = vpop.permute.xlu0 %2218  ;;  %1923 = vrot.lane.b32.xlu1 %v12258_v31, %s17623_s24  ;;  %2083 = vrot.lane.b32.xlu2 %v12420_v63, %s17604_s14 }
 0x1b6   : > { %v3357_v34 = vsel %vm3329_vm7, %v3220_v23, %v2219_v22 }
 0x1b7   : > { %v5231_v45 = vmax.f32 %v12385_v18, %v12584_v2  ;;  %v1491_v31 = vpop.permute.xlu1 %1490  ;;  %v12599_v33 = vpop.permute.xlu2 %1915  ;;  %v3494_v24 = vsel %vm3466_vm8, %v3357_v34, %v2365_v7 }
 0x1b8   : > { %v3631_v60 = vsel %vm3603_vm9, %v3494_v24, %v12446_v26  ;;  %v2811_v26 = vsel %vm2781_vm3, %v11290_v4, %v1491_v31  ;;  %v12704_v4 = vld [vmem:[%s11534_s25 + $0xd0] sm:$0xff] }
 0x1b9   : > { %5363 = vst.msk [vmem:[#allocation5 + $0x40] sm:$0xff] %vm3740_vm10, %v5231_v45  ;;  %v2948_v10 = vsel %vm17628_vm12, %v2811_v26, %v12474_v3  ;;  %v1114_v3 = vshll.u32 %v12633_v58, 16  ;;  %v11291_v45 = vld [vmem:[%s11534_s25 + $0x78] sm:$0xff] }
 0x1bb   : > { %1777 = vrot.lane.b32.xlu0 %v12235_v42, %s17596_s28  ;;  %v12656_v17 = vrot.slane %v1114_v3, 1 }
 0x1bc   : > { %v4102_v14 = vpop.f32.mrf.mxu0 }
 0x1bd   : > { %v4103_v18 = vadd.f32 %v12101_v47, %v4102_v14  ;;  %v2672_v19 = vpop.permute.xlu0 %2671  ;;  %2376 = vrot.lane.b32.xlu1 %v12484_v9, %s11421_s26  ;;  %2536 = vrot.lane.b32.xlu2 %v12604_v53, %s11428_s21 }
 0x1be   : > { %v3768_v51 = vsel %vm3740_vm10, %v3631_v60, %v2672_v19 }
 0x1bf   : > { %v4421_v43 = vmax.f32 %v4103_v18, 0.0  ;;  %10271 = vmatmul.msk.bf16.gmra.mxu0 %vm3917_vm11, %v3768_v51  ;;  %v2074_v42 = vpop.permute.xlu1 %2073  ;;  %v12617_v54 = vpop.permute.xlu2 %2368 }
 0x1c1   : > { %v4707_v61 = vrot.slane %v4421_v43, 1 }
 0x1c3   : > { %v4708_v20 = vsel %vm1601_vm0, %v4705_v44, %v4707_v61  ;;  %2230 = vrot.lane.b32.xlu0 %v12425_v40, %s17600_s29 }
 0x1c4   : > { %v5100_v52 = vmax.f32 %v4420_v15, %v4708_v20  ;;  %v4104_v46 = vpop.f32.mrf.mxu0 }
 0x1c5   : > { %v1914_v11 = vpop.permute.xlu0 %1913  ;;  %1502 = vrot.lane.b32.xlu1 %v12309_v0, %s17598_s16  ;;  %1779 = vrot.lane.b32.xlu2 %v12371_v27, %s17596_s28  ;;  %v12642_v0 = vsel %vm1601_vm0, %v1647_v57, %v1649_v36  ;;  %v1110_v27 = vshrl.u32 %v12541_v5, 16  ;;  %v1653_v46 = vrot.slane %v12704_v4, 1 }
 0x1c6   : > { %v5232_v56 = vmax.f32 %v12442_v25, %v5100_v52  ;;  %v3085_v6 = vsel %vm3055_vm5, %v2948_v10, %v1914_v11 }
 0x1c7   : > { %v2527_v59 = vpop.permute.xlu1 %2526  ;;  %v12636_v1 = vpop.permute.xlu2 %1494  ;;  %v3222_v25 = vsel %vm3192_vm6, %v3085_v6, %v2074_v42  ;;  %v1112_v57 = vor.u32 %v1110_v27, %v1108_v37  ;;  %v1122_v6 = vshll.u32 %v12704_v4, 16 }
 0x1c8   : > { %5364 = vst.msk [vmem:[#allocation5 + $0x48] sm:$0xff] %vm3740_vm10, %v5232_v56  ;;  %v3359_v7 = vsel %vm3329_vm7, %v3222_v25, %v12503_v13 }
 0x1c9   : > { %v12668_v21 = vsel %vm913_vm1, %v1112_v57, %v12656_v17  ;;  %v1124_v57 = vrot.slane %v1122_v6, 1 }
 0x1cb   : > { %2683 = vrot.lane.b32.xlu0 %v12642_v0, %s17602_s17 }
 0x1cd   : > { %v2367_v15 = vpop.permute.xlu0 %2366  ;;  %2085 = vrot.lane.b32.xlu1 %v12555_v12, %s17604_s14  ;;  %2232 = vrot.lane.b32.xlu2 %v12520_v49, %s17600_s29 }
 0x1ce   : > { %v3496_v48 = vsel %vm3466_vm8, %v3359_v7, %v2367_v15  ;;  %v4107_v29 = vpop.f32.mrf.mxu0 }
 0x1cf   : > { %v3633_v16 = vsel %vm3603_vm9, %v3496_v48, %v2527_v59  ;;  %v4108_v44 = vadd.f32 %v12101_v47, %v4107_v29  ;;  %v1770_v13 = vpop.permute.xlu1 %1769  ;;  %v12661_v50 = vpop.permute.xlu2 %2077 }
 0x1d0   : > { %v3770_v28 = vsel %vm3740_vm10, %v3633_v16, %v12548_v8 }
 0x1d1   : > { %v4423_v41 = vmax.f32 %v4108_v44, 0.0  ;;  %10272 = vmatmul.msk.bf16.gmra.mxu0 %vm3917_vm11, %v3770_v28  ;;  %v5528_v28 = vld [vmem:[#allocation2 + $0x14] sm:$0x1] }
 0x1d3   : > { %v4711_v22 = vrot.slane %v4423_v41, 1  ;;  %1925 = vrot.lane.b32.xlu0 %v12359_v35, %s17623_s24 }
 0x1d5   : > { %v1493_v32 = vpop.permute.xlu0 %1492  ;;  %2538 = vrot.lane.b32.xlu1 %v12668_v21, %s11428_s21  ;;  %2685 = vrot.lane.b32.xlu2 %v12671_v30, %s17602_s17 }
 0x1d6   : > { %v4109_v8 = vpop.f32.mrf.mxu0  ;;  %v2813_v34 = vsel %vm2781_vm3, %v11291_v45, %v1493_v32  ;;  %v11292_v32 = vld [vmem:[%s11534_s25 + $0x80] sm:$0xff] }
 0x1d7   : > { %v4110_v23 = vadd.f32 %v12101_v47, %v4109_v8  ;;  %v2223_v62 = vpop.permute.xlu1 %2222  ;;  %v12680_v37 = vpop.permute.xlu2 %2530  ;;  %v2950_v35 = vsel %vm17629_vm13, %v2813_v34, %v1770_v13  ;;  %v2815_v8 = vsel %vm2781_vm3, %v11292_v32, %v12636_v1  ;;  %v1126_v34 = vshrl.u32 %v12704_v4, 16  ;;  %vm17631_vm13 = vmmov %vm17628_vm12 }
 0x1d8   : > { %v3087_v19 = vsel %vm3055_vm5, %v2950_v35, %v12599_v33 }
 0x1d9   : > { %v4424_v31 = vmax.f32 %v4110_v23, 0.0 }
 0x1db   : > { %v4713_v24 = vrot.slane %v4424_v31, 1  ;;  %2378 = vrot.lane.b32.xlu0 %v12541_v5, %s11421_s26 }
 0x1dd   : > { %v4714_v14 = vsel %vm1601_vm0, %v4711_v22, %v4713_v24  ;;  %v2076_v18 = vpop.permute.xlu0 %2075  ;;  %1781 = vrot.lane.b32.xlu1 %v12425_v40, %s17596_s28  ;;  %1927 = vrot.lane.b32.xlu2 %v12484_v9, %s17623_s24  ;;  %v5513_v9 = vld [vmem:[#allocation5 + $0x40] ss:$2 sm:$0xff] }
 0x1de   : > { %v12692_v60 = vmax.f32 %v4423_v41, %v4714_v14  ;;  %v3224_v51 = vsel %vm3192_vm6, %v3087_v19, %v2076_v18  ;;  %v5514_v36 = vpack.c.bf16 %v5513_v9, %v5513_v9  ;;  %v12739_v41 = vld [vmem:[%s11534_s25 + $0xd8] sm:$0xff]  ;;  %v1128_v14 = vor.u32 %v1126_v34, %v1124_v57 }
 0x1df   : > { %v2676_v43 = vpop.permute.xlu1 %2675  ;;  %v12697_v42 = vpop.permute.xlu2 %1773  ;;  %v3361_v40 = vsel %vm3329_vm7, %v3224_v51, %v2223_v62 }
 0x1e0   : > { %v5235_v61 = vmax.f32 %v12584_v2, %v12692_v60  ;;  %v3498_v33 = vsel %vm3466_vm8, %v3361_v40, %v12617_v54  ;;  %v1118_v54 = vshrl.u32 %v12633_v58, 16  ;;  %v5516_v59 = vshrl.u32 %v5514_v36, 16 }
 0x1e1   : > { %v5519_v3 = vshll.u32 %v5514_v36, 16 }
 0x1e2   : > { %5367 = vst.msk [vmem:[#allocation5 + $0x60] sm:$0xff] %vm3740_vm10, %v5235_v61  ;;  %v5518_v25 = vrot.slane %v5516_v59, 7  ;;  %v1120_v7 = vor.u32 %v1118_v54, %v12656_v17  ;;  %v1655_v54 = vrot.slane %v12739_v41, 1 }
 0x1e3   : > { %1504 = vrot.lane.b32.xlu0 %v12420_v63, %s17598_s16 }
 0x1e4   : > { %v5521_v48 = vor.u32 %v5519_v3, %v5518_v25  ;;  %v5522_v29 = vrot.slane %v5518_v25, 4  ;;  %v12752_v45 = vsel %vm913_vm1, %v1120_v7, %v1124_v57  ;;  %v12811_v57 = vsel %vm1601_vm0, %v1653_v46, %v1655_v54 }
 0x1e5   : > { %v4112_v26 = vpop.f32.mrf.mxu0  ;;  %v2529_v20 = vpop.permute.xlu0 %2528  ;;  %2234 = vrot.lane.b32.xlu1 %v12642_v0, %s17600_s29  ;;  %2380 = vrot.lane.b32.xlu2 %v12633_v58, %s11421_s26 }
 0x1e6   : > { %v4113_v2 = vadd.f32 %v12101_v47, %v4112_v26  ;;  %v3635_v52 = vsel %vm3603_vm9, %v3498_v33, %v2529_v20  ;;  %v12726_v47 = vsel %vm1601_vm0, %v1651_v38, %v1653_v46  ;;  %v5525_v38 = vld [vmem:[#allocation2 + $0x10] sm:$0xf]  ;;  %v5529_v22 = vsel %vm12570_vm4, %v5522_v29, %v5528_v28 }
 0x1e7   : > { %v1918_v11 = vpop.permute.xlu1 %1917  ;;  %v12717_v63 = vpop.permute.xlu2 %2226  ;;  %v3772_v56 = vsel %vm3740_vm10, %v3635_v52, %v2676_v43  ;;  %v5526_v17 = vsel %vm12561_vm2, %v5521_v48, %v5525_v38  ;;  %5530 = vst [vmem:[#allocation2 + $0x14] sm:$0x1] %v5529_v22  ;;  %v1134_v48 = vshrl.u32 %v12739_v41, 16 }
 0x1e8   : > { %v4425_v10 = vmax.f32 %v4113_v2, 0.0  ;;  %10273 = vmatmul.msk.bf16.gmra.mxu0 %vm3917_vm11, %v3772_v56  ;;  %5527 = vst [vmem:[#allocation2 + $0x10] sm:$0xf] %v5526_v17 }
 0x1ea   : > { %v4715_v27 = vrot.slane %v4425_v10, 1 }
 0x1eb   : > { %2087 = vrot.lane.b32.xlu0 %v12604_v53, %s17604_s14 }
 0x1ec   : > { %v4716_v15 = vsel %vm1601_vm0, %v4713_v24, %v4715_v27  ;;  %v12803_v27 = vld [vmem:[%s11534_s25 + $0xe0] sm:$0xff] }
 0x1ed   : > { %v12732_v16 = vmax.f32 %v4424_v31, %v4716_v15  ;;  %v4114_v44 = vpop.f32.mrf.mxu0  ;;  %v1772_v13 = vpop.permute.xlu0 %1771  ;;  %2687 = vrot.lane.b32.xlu1 %v12726_v47, %s17602_s17  ;;  %1506 = vrot.lane.b32.xlu2 %v12555_v12, %s17598_s16  ;;  %v1130_v31 = vshll.u32 %v12739_v41, 16 }
 0x1ee   : > { %v2952_v12 = vsel %vm17630_vm15, %v2815_v8, %v1772_v13  ;;  %v1657_v8 = vrot.slane %v12803_v27, 1  ;;  %vm17632_vm15 = vmmov %vm17628_vm12 }
 0x1ef   : > { %v2371_v23 = vpop.permute.xlu1 %2370  ;;  %v12748_v62 = vpop.permute.xlu2 %2679  ;;  %v3089_v35 = vsel %vm3055_vm5, %v2952_v12, %v1918_v11  ;;  %v1132_v18 = vrot.slane %v1130_v31, 1  ;;  %v11294_v11 = vld [vmem:[%s11534_s25 + $0x88] sm:$0xff] }
 0x1f0   : > { %v3226_v24 = vsel %vm3192_vm6, %v3089_v35, %v12661_v50  ;;  %v12777_v50 = vld [vmem:[%s17585_s2] ss:$0 sm:$0xff] }
 0x1f1   : > { %v12770_v40 = vsel %vm913_vm1, %v1128_v14, %v1132_v18  ;;  %v1136_v46 = vor.u32 %v1134_v48, %v1132_v18 }
 0x1f3   : > { %2540 = vrot.lane.b32.xlu0 %v12752_v45, %s11428_s21 }
 0x1f5   : > { %v2225_v1 = vpop.permute.xlu0 %2224  ;;  %1929 = vrot.lane.b32.xlu1 %v12541_v5, %s17623_s24  ;;  %2089 = vrot.lane.b32.xlu2 %v12668_v21, %s17604_s14 }
 0x1f6   : > { %v3363_v19 = vsel %vm3329_vm7, %v3226_v24, %v2225_v1  ;;  %v12843_v1 = vsel %vm1601_vm0, %v1655_v54, %v1657_v8 }
 0x1f7   : > { %v1497_v51 = vpop.permute.xlu1 %1496  ;;  %v12766_v43 = vpop.permute.xlu2 %1921  ;;  %v3500_v61 = vsel %vm3466_vm8, %v3363_v19, %v2371_v23 }
 0x1f8   : > { %v3637_v26 = vsel %vm3603_vm9, %v3500_v61, %v12680_v37  ;;  %v2817_v37 = vsel %vm2781_vm3, %v11294_v11, %v1497_v51  ;;  %v12872_v11 = vld [vmem:[%s11534_s25 + $0xe8] sm:$0xff] }
 0x1f9   : > { %v2954_v59 = vsel %vm17628_vm12, %v2817_v37, %v12697_v42  ;;  %v1138_v42 = vshll.u32 %v12803_v27, 16  ;;  %v1659_v54 = vrot.slane %v12872_v11, 1 }
 0x1fb   : > { %1783 = vrot.lane.b32.xlu0 %v12520_v49, %s17596_s28  ;;  %v1140_v32 = vrot.slane %v1138_v42, 1 }
 0x1fc   : > { %v4117_v5 = vpop.f32.mrf.mxu0 }
 0x1fd   : > { %v4118_v9 = vadd.f32 %v12777_v50, %v4117_v5  ;;  %v2678_v33 = vpop.permute.xlu0 %2677  ;;  %2382 = vrot.lane.b32.xlu1 %v12704_v4, %s11421_s26  ;;  %2542 = vrot.lane.b32.xlu2 %v12770_v40, %s11428_s21  ;;  %v12840_v35 = vsel %vm913_vm1, %v1136_v46, %v1140_v32 }
 0x1fe   : > { %v3774_v49 = vsel %vm3740_vm10, %v3637_v26, %v2678_v33 }
 0x1ff   : > { %v4427_v20 = vmax.f32 %v4118_v9, 0.0  ;;  %10274 = vmatmul.msk.bf16.gmra.mxu0 %vm3917_vm11, %v3774_v49  ;;  %v2080_v2 = vpop.permute.xlu1 %2079  ;;  %v12788_v52 = vpop.permute.xlu2 %2374  ;;  %v11295_v9 = vld [vmem:[%s11534_s25 + $0x90] sm:$0xff] }
 0x201   : > { %v4719_v36 = vrot.slane %v4427_v20, 1 }
 0x203   : > { %2236 = vrot.lane.b32.xlu0 %v12671_v30, %s17600_s29 }
 0x204   : > { %v4119_v56 = vpop.f32.mrf.mxu0 }
 0x205   : > { %v4120_v10 = vadd.f32 %v12777_v50, %v4119_v56  ;;  %v1920_v6 = vpop.permute.xlu0 %1919  ;;  %1508 = vrot.lane.b32.xlu1 %v12604_v53, %s17598_s16  ;;  %1785 = vrot.lane.b32.xlu2 %v12642_v0, %s17596_s28 }
 0x206   : > { %v3091_v3 = vsel %vm3055_vm5, %v2954_v59, %v1920_v6  ;;  %v1142_v59 = vshrl.u32 %v12803_v27, 16 }
 0x207   : > { %v4428_v25 = vmax.f32 %v4120_v10, 0.0  ;;  %v2533_v7 = vpop.permute.xlu1 %2532  ;;  %v12806_v15 = vpop.permute.xlu2 %1500  ;;  %v3228_v0 = vsel %vm3192_vm6, %v3091_v3, %v2080_v2 }
 0x208   : > { %v3365_v13 = vsel %vm3329_vm7, %v3228_v0, %v12717_v63 }
 0x209   : > { %v4721_v53 = vrot.slane %v4428_v25, 1 }
 0x20b   : > { %v4722_v29 = vsel %vm1601_vm0, %v4719_v36, %v4721_v53  ;;  %2689 = vrot.lane.b32.xlu0 %v12811_v57, %s17602_s17 }
 0x20c   : > { %v12819_v44 = vmax.f32 %v4427_v20, %v4722_v29 }
 0x20d   : > { %v2373_v38 = vpop.permute.xlu0 %2372  ;;  %2091 = vrot.lane.b32.xlu1 %v12752_v45, %s17604_s14  ;;  %2238 = vrot.lane.b32.xlu2 %v12726_v47, %s17600_s29 }
 0x20e   : > { %v5239_v28 = vmax.f32 %v12692_v60, %v12819_v44  ;;  %v3502_v17 = vsel %vm3466_vm8, %v3365_v13, %v2373_v38  ;;  %v4122_v22 = vpop.f32.mrf.mxu0  ;;  %v12904_v13 = vld [vmem:[%s11534_s25 + $0xf0] sm:$0xff]  ;;  %v11296_v38 = vld [vmem:[%s11534_s25 + $0x98] sm:$0xff] }
 0x20f   : > { %v3639_v23 = vsel %vm3603_vm9, %v3502_v17, %v2533_v7  ;;  %v4123_v63 = vadd.f32 %v12777_v50, %v4122_v22  ;;  %v1776_v12 = vpop.permute.xlu1 %1775  ;;  %v12833_v34 = vpop.permute.xlu2 %2083  ;;  %v12894_v7 = vsel %vm1601_vm0, %v1657_v8, %v1659_v54  ;;  %v2821_v46 = vsel %vm2781_vm3, %v11296_v38, %v12806_v15 }
 0x210   : > { %5371 = vst.msk [vmem:[#allocation5 + $0x80] sm:$0xff] %vm3740_vm10, %v5239_v28  ;;  %v3776_v31 = vsel %vm3740_vm10, %v3639_v23, %v12748_v62 }
 0x211   : > { %v4429_v60 = vmax.f32 %v4123_v63, 0.0  ;;  %10275 = vmatmul.msk.bf16.gmra.mxu0 %vm3917_vm11, %v3776_v31  ;;  %v1154_v31 = vshll.u32 %v12904_v13, 16 }
 0x213   : > { %v4723_v24 = vrot.slane %v4429_v60, 1  ;;  %1931 = vrot.lane.b32.xlu0 %v12633_v58, %s17623_s24 }
 0x215   : > { %v4724_v14 = vsel %vm1601_vm0, %v4721_v53, %v4723_v24  ;;  %v1499_v18 = vpop.permute.xlu0 %1498  ;;  %2544 = vrot.lane.b32.xlu1 %v12840_v35, %s11428_s21  ;;  %2691 = vrot.lane.b32.xlu2 %v12843_v1, %s17602_s17  ;;  %v1144_v53 = vor.u32 %v1142_v59, %v1140_v32 }
 0x216   : > { %v5108_v62 = vmax.f32 %v4428_v25, %v4724_v14  ;;  %v4124_v19 = vpop.f32.mrf.mxu0  ;;  %v2819_v58 = vsel %vm2781_vm3, %v11295_v9, %v1499_v18  ;;  %v1146_v25 = vshll.u32 %v12872_v11, 16 }
 0x217   : > { %v2229_v51 = vpop.permute.xlu1 %2228  ;;  %v12852_v61 = vpop.permute.xlu2 %2536  ;;  %v2956_v26 = vsel %vm17631_vm13, %v2819_v58, %v1776_v12  ;;  %v1150_v12 = vshrl.u32 %v12872_v11, 16  ;;  %vm17633_vm13 = vmmov %vm17628_vm12 }
 0x218   : > { %v5240_v5 = vmax.f32 %v12732_v16, %v5108_v62  ;;  %v3093_v16 = vsel %vm3055_vm5, %v2956_v26, %v12766_v43  ;;  %v1148_v48 = vrot.slane %v1146_v25, 1  ;;  %v11297_v25 = vld [vmem:[%s11534_s25 + $0xa0] sm:$0xff] }
 0x21a   : > { %5372 = vst.msk [vmem:[#allocation5 + $0x88] sm:$0xff] %vm3740_vm10, %v5240_v5  ;;  %v12913_v23 = vsel %vm913_vm1, %v1144_v53, %v1148_v48  ;;  %v1152_v19 = vor.u32 %v1150_v12, %v1148_v48 }
 0x21b   : > { %2384 = vrot.lane.b32.xlu0 %v12739_v41, %s11421_s26 }
 0x21d   : > { %v2082_v33 = vpop.permute.xlu0 %2081  ;;  %1787 = vrot.lane.b32.xlu1 %v12671_v30, %s17596_s28  ;;  %1933 = vrot.lane.b32.xlu2 %v12704_v4, %s17623_s24 }
 0x21e   : > { %v3230_v49 = vsel %vm3192_vm6, %v3093_v16, %v2082_v33 }
 0x21f   : > { %v2682_v20 = vpop.permute.xlu1 %2681  ;;  %v12868_v2 = vpop.permute.xlu2 %1779  ;;  %v3367_v36 = vsel %vm3329_vm7, %v3230_v49, %v2229_v51  ;;  %v1156_v51 = vrot.slane %v1154_v31, 1 }
 0x220   : > { %v3504_v30 = vsel %vm3466_vm8, %v3367_v36, %v12788_v52 }
 0x221   : > { %v5532_v28 = vld [vmem:[#allocation5 + $0x80] ss:$2 sm:$0xff]  ;;  %v12937_v16 = vsel %vm913_vm1, %v1152_v19, %v1156_v51 }
 0x222   : > { %v5533_v63 = vpack.c.bf16 %v5532_v28, %v5532_v28 }
 0x223   : > { %1510 = vrot.lane.b32.xlu0 %v12668_v21, %s17598_s16 }
 0x224   : > { %v5535_v18 = vshrl.u32 %v5533_v63, 16 }
 0x225   : > { %v4127_v37 = vpop.f32.mrf.mxu0  ;;  %v2535_v4 = vpop.permute.xlu0 %2534  ;;  %2240 = vrot.lane.b32.xlu1 %v12811_v57, %s17600_s29  ;;  %2386 = vrot.lane.b32.xlu2 %v12803_v27, %s11421_s26 }
 0x226   : > { %v4128_v43 = vadd.f32 %v12777_v50, %v4127_v37  ;;  %v3641_v56 = vsel %vm3603_vm9, %v3504_v30, %v2535_v4 }
 0x227   : > { %v1924_v10 = vpop.permute.xlu1 %1923  ;;  %v12885_v6 = vpop.permute.xlu2 %2232  ;;  %v3778_v21 = vsel %vm3740_vm10, %v3641_v56, %v2682_v20 }
 0x228   : > { %v4431_v52 = vmax.f32 %v4128_v43, 0.0  ;;  %10276 = vmatmul.msk.bf16.gmra.mxu0 %vm3917_vm11, %v3778_v21 }
 0x22a   : > { %v4727_v3 = vrot.slane %v4431_v52, 1 }
 0x22b   : > { %2093 = vrot.lane.b32.xlu0 %v12770_v40, %s17604_s14 }
 0x22d   : > { %v4129_v0 = vpop.f32.mrf.mxu0  ;;  %v1778_v42 = vpop.permute.xlu0 %1777  ;;  %2693 = vrot.lane.b32.xlu1 %v12894_v7, %s17602_s17  ;;  %1512 = vrot.lane.b32.xlu2 %v12752_v45, %s17598_s16 }
 0x22e   : > { %v4130_v29 = vadd.f32 %v12777_v50, %v4129_v0  ;;  %v2958_v8 = vsel %vm17632_vm15, %v2821_v46, %v1778_v42  ;;  %v1661_v42 = vrot.slane %v12904_v13, 1  ;;  %v12971_v46 = vld [vmem:[%s11534_s25 + $0xf8] sm:$0xff]  ;;  %vm17634_vm15 = vmmov %vm17628_vm12 }
 0x22f   : > { %v2377_v17 = vpop.permute.xlu1 %2376  ;;  %v12909_v22 = vpop.permute.xlu2 %2685  ;;  %v3095_v60 = vsel %vm3055_vm5, %v2958_v8, %v1924_v10  ;;  %v5544_v10 = vld [vmem:[#allocation2 + $0x18] sm:$0xf] }
 0x230   : > { %v4432_v32 = vmax.f32 %v4130_v29, 0.0  ;;  %v3232_v62 = vsel %vm3192_vm6, %v3095_v60, %v12833_v34  ;;  %v5538_v34 = vshll.u32 %v5533_v63, 16  ;;  %v12979_v8 = vsel %vm1601_vm0, %v1659_v54, %v1661_v42 }
 0x232   : > { %v4729_v45 = vrot.slane %v4432_v32, 1 }
 0x233   : > { %2546 = vrot.lane.b32.xlu0 %v12913_v23, %s11428_s21 }
 0x234   : > { %v4730_v15 = vsel %vm1601_vm0, %v4727_v3, %v4729_v45 }
 0x235   : > { %v12921_v24 = vmax.f32 %v4431_v52, %v4730_v15  ;;  %v2231_v14 = vpop.permute.xlu0 %2230  ;;  %1935 = vrot.lane.b32.xlu1 %v12739_v41, %s17623_s24  ;;  %2095 = vrot.lane.b32.xlu2 %v12840_v35, %s17604_s14  ;;  %v5537_v41 = vrot.slane %v5535_v18, 7  ;;  %v1663_v15 = vrot.slane %v12971_v46, 1 }
 0x236   : > { %v3369_v9 = vsel %vm3329_vm7, %v3232_v62, %v2231_v14 }
 0x237   : > { %v5243_v5 = vmax.f32 %v12819_v44, %v12921_v24  ;;  %v1503_v58 = vpop.permute.xlu1 %1502  ;;  %v12932_v26 = vpop.permute.xlu2 %1927  ;;  %v3506_v33 = vsel %vm3466_vm8, %v3369_v9, %v2377_v17  ;;  %v5540_v30 = vor.u32 %v5538_v34, %v5537_v41  ;;  %v5541_v4 = vrot.slane %v5537_v41, 4 }
 0x238   : > { %v3643_v20 = vsel %vm3603_vm9, %v3506_v33, %v12852_v61  ;;  %v5547_v61 = vld [vmem:[#allocation2 + $0x1c] sm:$0x1]  ;;  %v2823_v3 = vsel %vm2781_vm3, %v11297_v25, %v1503_v58  ;;  %v13005_v9 = vsel %vm1601_vm0, %v1661_v42, %v1663_v15 }
 0x239   : > { %5375 = vst.msk [vmem:[#allocation5 + $0xa0] sm:$0xff] %vm3740_vm10, %v5243_v5  ;;  %v5545_v21 = vsel %vm12561_vm2, %v5540_v30, %v5544_v10  ;;  %v5548_v52 = vsel %vm12570_vm4, %v5541_v4, %v5547_v61  ;;  %v2960_v38 = vsel %vm17628_vm12, %v2823_v3, %v12868_v2 }
 0x23a   : > { %5546 = vst [vmem:[#allocation2 + $0x18] sm:$0xf] %v5545_v21 }
 0x23b   : > { %1789 = vrot.lane.b32.xlu0 %v12726_v47, %s17596_s28  ;;  %5549 = vst [vmem:[#allocation2 + $0x1c] sm:$0x1] %v5548_v52 }
 0x23c   : > { %v4132_v49 = vpop.f32.mrf.mxu0 }
 0x23d   : > { %v4133_v44 = vadd.f32 %v12777_v50, %v4132_v49  ;;  %v2684_v36 = vpop.permute.xlu0 %2683  ;;  %2388 = vrot.lane.b32.xlu1 %v12872_v11, %s11421_s26  ;;  %2548 = vrot.lane.b32.xlu2 %v12937_v16, %s11428_s21 }
 0x23e   : > { %v3780_v37 = vsel %vm3740_vm10, %v3643_v20, %v2684_v36 }
 0x23f   : > { %v4433_v47 = vmax.f32 %v4133_v44, 0.0  ;;  %10277 = vmatmul.msk.bf16.gmra.mxu0 %vm3917_vm11, %v3780_v37  ;;  %v2086_v43 = vpop.permute.xlu1 %2085  ;;  %v12950_v56 = vpop.permute.xlu2 %2380  ;;  %v11298_v44 = vld [vmem:[%s11534_s25 + $0xa8] sm:$0xff] }
 0x241   : > { %v4731_v59 = vrot.slane %v4433_v47, 1 }
 0x243   : > { %v4732_v53 = vsel %vm1601_vm0, %v4729_v45, %v4731_v59  ;;  %2242 = vrot.lane.b32.xlu0 %v12843_v1, %s17600_s29  ;;  %v13038_v59 = vld [vmem:[%s11534_s25 + $0x100] sm:$0xff] }
 0x244   : > { %v12961_v48 = vmax.f32 %v4432_v32, %v4732_v53  ;;  %v4134_v0 = vpop.f32.mrf.mxu0  ;;  %v1665_v53 = vrot.slane %v13038_v59, 1 }
 0x245   : > { %v1926_v29 = vpop.permute.xlu0 %1925  ;;  %1514 = vrot.lane.b32.xlu1 %v12770_v40, %s17598_s16  ;;  %1791 = vrot.lane.b32.xlu2 %v12811_v57, %s17596_s28  ;;  %v1158_v40 = vshrl.u32 %v12904_v13, 16  ;;  %v1162_v57 = vshll.u32 %v12971_v46, 16 }
 0x246   : > { %v3097_v28 = vsel %vm3055_vm5, %v2960_v38, %v1926_v29  ;;  %v1166_v29 = vshrl.u32 %v12971_v46, 16  ;;  %v1170_v38 = vshll.u32 %v13038_v59, 16 }
 0x247   : > { %v2539_v17 = vpop.permute.xlu1 %2538  ;;  %v12974_v32 = vpop.permute.xlu2 %1506  ;;  %v3234_v63 = vsel %vm3192_vm6, %v3097_v28, %v2086_v43  ;;  %v1160_v54 = vor.u32 %v1158_v40, %v1156_v51  ;;  %v1164_v60 = vrot.slane %v1162_v57, 1 }
 0x248   : > { %v3371_v2 = vsel %vm3329_vm7, %v3234_v63, %v12885_v6  ;;  %v1172_v57 = vrot.slane %v1170_v38, 1 }
 0x249   : > { %v13002_v51 = vsel %vm913_vm1, %v1160_v54, %v1164_v60  ;;  %v1168_v63 = vor.u32 %v1166_v29, %v1164_v60 }
 0x24b   : > { %2695 = vrot.lane.b32.xlu0 %v12979_v8, %s17602_s17 }
 0x24d   : > { %v2379_v45 = vpop.permute.xlu0 %2378  ;;  %2097 = vrot.lane.b32.xlu1 %v12913_v23, %s17604_s14  ;;  %2244 = vrot.lane.b32.xlu2 %v12894_v7, %s17600_s29 }
 0x24e   : > { %v3508_v12 = vsel %vm3466_vm8, %v3371_v2, %v2379_v45  ;;  %v4137_v31 = vpop.f32.mrf.mxu0 }
 0x24f   : > { %v3645_v14 = vsel %vm3603_vm9, %v3508_v12, %v2539_v17  ;;  %v4138_v18 = vadd.f32 %v12777_v50, %v4137_v31  ;;  %v1782_v62 = vpop.permute.xlu1 %1781  ;;  %v12996_v6 = vpop.permute.xlu2 %2089  ;;  %v13060_v17 = vsel %vm1601_vm0, %v1663_v15, %v1665_v53  ;;  %v13070_v12 = vld [vmem:[%s11534_s25 + $0x108] sm:$0xff]  ;;  %v11299_v31 = vld [vmem:[%s11534_s25 + $0xb0] sm:$0xff] }
 0x250   : > { %v3782_v19 = vsel %vm3740_vm10, %v3645_v14, %v12909_v22  ;;  %v2827_v15 = vsel %vm2781_vm3, %v11299_v31, %v12974_v32 }
 0x251   : > { %v4435_v5 = vmax.f32 %v4138_v18, 0.0  ;;  %10278 = vmatmul.msk.bf16.gmra.mxu0 %vm3917_vm11, %v3782_v19  ;;  %v13080_v19 = vsel %vm913_vm1, %v1168_v63, %v1172_v57 }
 0x253   : > { %v4735_v58 = vrot.slane %v4435_v5, 1  ;;  %1937 = vrot.lane.b32.xlu0 %v12803_v27, %s17623_s24 }
 0x255   : > { %v1505_v41 = vpop.permute.xlu0 %1504  ;;  %2550 = vrot.lane.b32.xlu1 %v13002_v51, %s11428_s21  ;;  %2697 = vrot.lane.b32.xlu2 %v13005_v9, %s17602_s17 }
 0x256   : > { %v4139_v22 = vpop.f32.mrf.mxu0  ;;  %v2825_v20 = vsel %vm2781_vm3, %v11298_v44, %v1505_v41 }
 0x257   : > { %v4140_v33 = vadd.f32 %v12777_v50, %v4139_v22  ;;  %v2235_v34 = vpop.permute.xlu1 %2234  ;;  %v13014_v49 = vpop.permute.xlu2 %2542  ;;  %v2962_v27 = vsel %vm17633_vm13, %v2825_v20, %v1782_v62  ;;  %vm17635_vm13 = vmmov %vm17628_vm12 }
 0x258   : > { %v3099_v43 = vsel %vm3055_vm5, %v2962_v27, %v12932_v26 }
 0x259   : > { %v4436_v36 = vmax.f32 %v4140_v33, 0.0 }
 0x25b   : > { %v4737_v37 = vrot.slane %v4436_v36, 1  ;;  %2390 = vrot.lane.b32.xlu0 %v12904_v13, %s11421_s26 }
 0x25d   : > { %v4738_v30 = vsel %vm1601_vm0, %v4735_v58, %v4737_v37  ;;  %v2088_v4 = vpop.permute.xlu0 %2087  ;;  %1793 = vrot.lane.b32.xlu1 %v12843_v1, %s17596_s28  ;;  %1939 = vrot.lane.b32.xlu2 %v12872_v11, %s17623_s24 }
 0x25e   : > { %v13026_v47 = vmax.f32 %v4435_v5, %v4738_v30  ;;  %v3236_v10 = vsel %vm3192_vm6, %v3099_v43, %v2088_v4  ;;  %v1178_v5 = vshll.u32 %v13070_v12, 16 }
 0x25f   : > { %v2688_v61 = vpop.permute.xlu1 %2687  ;;  %v13031_v21 = vpop.permute.xlu2 %1785  ;;  %v3373_v1 = vsel %vm3329_vm7, %v3236_v10, %v2235_v34 }
 0x260   : > { %v5247_v52 = vmax.f32 %v12921_v24, %v13026_v47  ;;  %v3510_v26 = vsel %vm3466_vm8, %v3373_v1, %v12950_v56  ;;  %v1180_v22 = vrot.slane %v1178_v5, 1 }
 0x262   : > { %5379 = vst.msk [vmem:[#allocation5 + $0xc0] sm:$0xff] %vm3740_vm10, %v5247_v52 }
 0x263   : > { %1516 = vrot.lane.b32.xlu0 %v12840_v35, %s17598_s16 }
 0x265   : > { %v4142_v11 = vpop.f32.mrf.mxu0  ;;  %v2541_v25 = vpop.permute.xlu0 %2540  ;;  %2246 = vrot.lane.b32.xlu1 %v12979_v8, %s17600_s29  ;;  %2392 = vrot.lane.b32.xlu2 %v12971_v46, %s11421_s26 }
 0x266   : > { %v4143_v24 = vadd.f32 %v12777_v50, %v4142_v11  ;;  %v3647_v3 = vsel %vm3603_vm9, %v3510_v26, %v2541_v25  ;;  %v1667_v11 = vrot.slane %v13070_v12, 1 }
 0x267   : > { %v1930_v0 = vpop.permute.xlu1 %1929  ;;  %v13051_v42 = vpop.permute.xlu2 %2238  ;;  %v3784_v35 = vsel %vm3740_vm10, %v3647_v3, %v2688_v61  ;;  %v11300_v61 = vld [vmem:[%s11534_s25 + $0xb8] sm:$0xff]  ;;  %v13127_v3 = vld [vmem:[%s11534_s25 + $0x110] sm:$0xff] }
 0x268   : > { %v4437_v56 = vmax.f32 %v4143_v24, 0.0  ;;  %10279 = vmatmul.msk.bf16.gmra.mxu0 %vm3917_vm11, %v3784_v35 }
 0x26a   : > { %v4739_v28 = vrot.slane %v4437_v56, 1 }
 0x26b   : > { %2099 = vrot.lane.b32.xlu0 %v12937_v16, %s17604_s14 }
 0x26c   : > { %v4740_v40 = vsel %vm1601_vm0, %v4737_v37, %v4739_v28  ;;  %v13135_v28 = vsel %vm1601_vm0, %v1665_v53, %v1667_v11 }
 0x26d   : > { %v5116_v2 = vmax.f32 %v4436_v36, %v4740_v40  ;;  %v4144_v45 = vpop.f32.mrf.mxu0  ;;  %v1784_v54 = vpop.permute.xlu0 %1783  ;;  %2699 = vrot.lane.b32.xlu1 %v13060_v17, %s17602_s17  ;;  %1518 = vrot.lane.b32.xlu2 %v12913_v23, %s17598_s16  ;;  %v1174_v23 = vshrl.u32 %v13038_v59, 16 }
 0x26e   : > { %v2964_v62 = vsel %vm17634_vm15, %v2827_v15, %v1784_v54  ;;  %vm17636_vm15 = vmmov %vm17628_vm12 }
 0x26f   : > { %v5248_v14 = vmax.f32 %v12961_v48, %v5116_v2  ;;  %v2383_v18 = vpop.permute.xlu1 %2382  ;;  %v13076_v60 = vpop.permute.xlu2 %2691  ;;  %v3101_v58 = vsel %vm3055_vm5, %v2964_v62, %v1930_v0  ;;  %v1176_v41 = vor.u32 %v1174_v23, %v1172_v57  ;;  %v1669_v62 = vrot.slane %v13127_v3, 1 }
 0x270   : > { %v3238_v32 = vsel %vm3192_vm6, %v3101_v58, %v12996_v6 }
 0x271   : > { %5380 = vst.msk [vmem:[#allocation5 + $0xc8] sm:$0xff] %vm3740_vm10, %v5248_v14  ;;  %v13099_v36 = vsel %vm913_vm1, %v1176_v41, %v1180_v22 }
 0x273   : > { %2552 = vrot.lane.b32.xlu0 %v13080_v19, %s11428_s21 }
 0x275   : > { %v2237_v48 = vpop.permute.xlu0 %2236  ;;  %1941 = vrot.lane.b32.xlu1 %v12904_v13, %s17623_s24  ;;  %2101 = vrot.lane.b32.xlu2 %v13002_v51, %s17604_s14 }
 0x276   : > { %v3375_v33 = vsel %vm3329_vm7, %v3238_v32, %v2237_v48 }
 0x277   : > { %v1509_v34 = vpop.permute.xlu1 %1508  ;;  %v13095_v44 = vpop.permute.xlu2 %1933  ;;  %v3512_v20 = vsel %vm3466_vm8, %v3375_v33, %v2383_v18  ;;  %v13170_v33 = vsel %vm1601_vm0, %v1667_v11, %v1669_v62 }
 0x278   : > { %v3649_v6 = vsel %vm3603_vm9, %v3512_v20, %v13014_v49  ;;  %v2829_v49 = vsel %vm2781_vm3, %v11300_v61, %v1509_v34  ;;  %v5551_v52 = vld [vmem:[#allocation5 + $0xc0] ss:$2 sm:$0xff] }
 0x279   : > { %v2966_v24 = vsel %vm17628_vm12, %v2829_v49, %v13031_v21  ;;  %v5552_v0 = vpack.c.bf16 %v5551_v52, %v5551_v52  ;;  %v1186_v21 = vshll.u32 %v13127_v3, 16  ;;  %v11301_v49 = vld [vmem:[%s11534_s25 + $0xc0] sm:$0xff] }
 0x27b   : > { %1795 = vrot.lane.b32.xlu0 %v12894_v7, %s17596_s28  ;;  %v5554_v63 = vshrl.u32 %v5552_v0, 16  ;;  %v13154_v18 = vrot.slane %v1186_v21, 1  ;;  %v5557_v32 = vshll.u32 %v5552_v0, 16 }
 0x27c   : > { %v4147_v13 = vpop.f32.mrf.mxu0 }
 0x27d   : > { %v4148_v27 = vadd.f32 %v12777_v50, %v4147_v13  ;;  %v2690_v37 = vpop.permute.xlu0 %2689  ;;  %2394 = vrot.lane.b32.xlu1 %v13038_v59, %s11421_s26  ;;  %2554 = vrot.lane.b32.xlu2 %v13099_v36, %s11428_s21  ;;  %v5556_v23 = vrot.slane %v5554_v63, 7  ;;  %v1190_v63 = vshrl.u32 %v13127_v3, 16 }
 0x27e   : > { %v3786_v30 = vsel %vm3740_vm10, %v3649_v6, %v2690_v37 }
 0x27f   : > { %v4439_v4 = vmax.f32 %v4148_v27, 0.0  ;;  %10280 = vmatmul.msk.bf16.gmra.mxu0 %vm3917_vm11, %v3786_v30  ;;  %v2092_v7 = vpop.permute.xlu1 %2091  ;;  %v13112_v43 = vpop.permute.xlu2 %2386  ;;  %v5559_v34 = vor.u32 %v5557_v32, %v5556_v23  ;;  %v5560_v20 = vrot.slane %v5556_v23, 4  ;;  %v5563_v30 = vld [vmem:[#allocation2 + $0x20] sm:$0xf] }
 0x281   : > { %v4743_v10 = vrot.slane %v4439_v4, 1 }
 0x283   : > { %2248 = vrot.lane.b32.xlu0 %v13005_v9, %s17600_s29 }
 0x284   : > { %v4149_v1 = vpop.f32.mrf.mxu0 }
 0x285   : > { %v4150_v26 = vadd.f32 %v12777_v50, %v4149_v1  ;;  %v1932_v25 = vpop.permute.xlu0 %1931  ;;  %1520 = vrot.lane.b32.xlu1 %v12937_v16, %s17598_s16  ;;  %1797 = vrot.lane.b32.xlu2 %v12979_v8, %s17596_s28  ;;  %v1182_v8 = vshrl.u32 %v13070_v12, 16 }
 0x286   : > { %v3103_v56 = vsel %vm3055_vm5, %v2966_v24, %v1932_v25 }
 0x287   : > { %v4440_v35 = vmax.f32 %v4150_v26, 0.0  ;;  %v2545_v29 = vpop.permute.xlu1 %2544  ;;  %v13130_v38 = vpop.permute.xlu2 %1512  ;;  %v3240_v40 = vsel %vm3192_vm6, %v3103_v56, %v2092_v7  ;;  %v1184_v54 = vor.u32 %v1182_v8, %v1180_v22  ;;  %v13203_v56 = vld [vmem:[%s11534_s25 + $0x118] sm:$0xff] }
 0x288   : > { %v3377_v45 = vsel %vm3329_vm7, %v3240_v40, %v13051_v42  ;;  %v1671_v8 = vrot.slane %v13203_v56, 1 }
 0x289   : > { %v4745_v16 = vrot.slane %v4440_v35, 1  ;;  %v13167_v22 = vsel %vm913_vm1, %v1184_v54, %v13154_v18  ;;  %v1192_v54 = vor.u32 %v1190_v63, %v13154_v18 }
 0x28b   : > { %v4746_v57 = vsel %vm1601_vm0, %v4743_v10, %v4745_v16  ;;  %2701 = vrot.lane.b32.xlu0 %v13135_v28, %s17602_s17 }
 0x28c   : > { %v13143_v2 = vmax.f32 %v4439_v4, %v4746_v57  ;;  %v5566_v4 = vld [vmem:[#allocation2 + $0x24] sm:$0x1]  ;;  %v1194_v57 = vshll.u32 %v13203_v56, 16 }
 0x28d   : > { %v2385_v53 = vpop.permute.xlu0 %2384  ;;  %2103 = vrot.lane.b32.xlu1 %v13080_v19, %s17604_s14  ;;  %2250 = vrot.lane.b32.xlu2 %v13060_v17, %s17600_s29  ;;  %v5567_v61 = vsel %vm12570_vm4, %v5560_v20, %v5566_v4 }
 0x28e   : > { %v5251_v31 = vmax.f32 %v13026_v47, %v13143_v2  ;;  %v3514_v15 = vsel %vm3466_vm8, %v3377_v45, %v2385_v53  ;;  %v4152_v14 = vpop.f32.mrf.mxu0  ;;  %5568 = vst [vmem:[#allocation2 + $0x24] sm:$0x1] %v5567_v61  ;;  %v13225_v53 = vsel %vm1601_vm0, %v1669_v62, %v1671_v8  ;;  %v11302_v62 = vld [vmem:[%s11534_s25 + $0xc8] sm:$0xff] }
 0x28f   : > { %v3651_v42 = vsel %vm3603_vm9, %v3514_v15, %v2545_v29  ;;  %v4153_v5 = vadd.f32 %v12777_v50, %v4152_v14  ;;  %v1788_v58 = vpop.permute.xlu1 %1787  ;;  %v13159_v48 = vpop.permute.xlu2 %2095 }
 0x290   : > { %5383 = vst.msk [vmem:[#allocation5 + $0xe0] sm:$0xff] %vm3740_vm10, %v5251_v31  ;;  %v3788_v47 = vsel %vm3740_vm10, %v3651_v42, %v13076_v60  ;;  %v1196_v31 = vrot.slane %v1194_v57, 1  ;;  %v13236_v42 = vld [vmem:[%s11534_s25 + $0x120] sm:$0xff] }
 0x291   : > { %v4441_v41 = vmax.f32 %v4153_v5, 0.0  ;;  %10281 = vmatmul.msk.bf16.gmra.mxu0 %vm3917_vm11, %v3788_v47  ;;  %v2833_v5 = vsel %vm2781_vm3, %v11302_v62, %v13130_v38  ;;  %v1202_v20 = vshll.u32 %v13236_v42, 16 }
 0x293   : > { %v4747_v13 = vrot.slane %v4441_v41, 1  ;;  %1943 = vrot.lane.b32.xlu0 %v12971_v46, %s17623_s24  ;;  %v5564_v46 = vsel %vm12561_vm2, %v5559_v34, %v5563_v30  ;;  %v13245_v41 = vsel %vm913_vm1, %v1192_v54, %v1196_v31  ;;  %v1204_v4 = vrot.slane %v1202_v20, 1 }
 0x294   : > { %5565 = vst [vmem:[#allocation2 + $0x20] sm:$0xf] %v5564_v46 }
 0x295   : > { %v4748_v60 = vsel %vm1601_vm0, %v4745_v16, %v4747_v13  ;;  %v1511_v27 = vpop.permute.xlu0 %1510  ;;  %2556 = vrot.lane.b32.xlu1 %v13167_v22, %s11428_s21  ;;  %2703 = vrot.lane.b32.xlu2 %v13170_v33, %s17602_s17 }
 0x296   : > { %v13179_v6 = vmax.f32 %v4440_v35, %v4748_v60  ;;  %v4154_v37 = vpop.f32.mrf.mxu0  ;;  %v2831_v52 = vsel %vm2781_vm3, %v11301_v49, %v1511_v27 }
 0x297   : > { %v2241_v7 = vpop.permute.xlu1 %2240  ;;  %v13181_v10 = vpop.permute.xlu2 %2548  ;;  %v2968_v1 = vsel %vm17635_vm13, %v2831_v52, %v1788_v58  ;;  %vm17637_vm13 = vmmov %vm17628_vm12 }
 0x298   : > { %v3105_v26 = vsel %vm3055_vm5, %v2968_v1, %v13095_v44 }
 0x29b   : > { %2396 = vrot.lane.b32.xlu0 %v13070_v12, %s11421_s26 }
 0x29d   : > { %v2094_v11 = vpop.permute.xlu0 %2093  ;;  %1799 = vrot.lane.b32.xlu1 %v13005_v9, %s17596_s28  ;;  %1945 = vrot.lane.b32.xlu2 %v13038_v59, %s17623_s24 }
 0x29e   : > { %v3242_v25 = vsel %vm3192_vm6, %v3105_v26, %v2094_v11 }
 0x29f   : > { %v2694_v24 = vpop.permute.xlu1 %2693  ;;  %v13199_v0 = vpop.permute.xlu2 %1791  ;;  %v3379_v35 = vsel %vm3329_vm7, %v3242_v25, %v2241_v7 }
 0x2a0   : > { %v3516_v9 = vsel %vm3466_vm8, %v3379_v35, %v13112_v43  ;;  %v11303_v35 = vld [vmem:[%s11534_s25 + $0xd0] sm:$0xff] }
 0x2a3   : > { %1522 = vrot.lane.b32.xlu0 %v13002_v51, %s17598_s16 }
 0x2a5   : > { %v4157_v29 = vpop.f32.mrf.mxu0  ;;  %v2547_v59 = vpop.permute.xlu0 %2546  ;;  %2252 = vrot.lane.b32.xlu1 %v13135_v28, %s17600_s29  ;;  %2398 = vrot.lane.b32.xlu2 %v13127_v3, %s11421_s26 }
 0x2a6   : > { %v4158_v44 = vadd.f32 %v12777_v50, %v4157_v29  ;;  %v3653_v16 = vsel %vm3603_vm9, %v3516_v9, %v2547_v59 }
 0x2a7   : > { %v1936_v40 = vpop.permute.xlu1 %1935  ;;  %v13216_v21 = vpop.permute.xlu2 %2244  ;;  %v3790_v51 = vsel %vm3740_vm10, %v3653_v16, %v2694_v24 }
 0x2a8   : > { %v4443_v43 = vmax.f32 %v4158_v44, 0.0  ;;  %10282 = vmatmul.msk.bf16.gmra.mxu0 %vm3917_vm11, %v3790_v51  ;;  %v1673_v44 = vrot.slane %v13236_v42, 1 }
 0x2aa   : > { %v4751_v45 = vrot.slane %v4443_v43, 1 }
 0x2ab   : > { %2105 = vrot.lane.b32.xlu0 %v13099_v36, %s17604_s14 }
 0x2ad   : > { %v4159_v15 = vpop.f32.mrf.mxu0  ;;  %v1790_v14 = vpop.permute.xlu0 %1789  ;;  %2705 = vrot.lane.b32.xlu1 %v13225_v53, %s17602_s17  ;;  %1524 = vrot.lane.b32.xlu2 %v13080_v19, %s17598_s16  ;;  %v1198_v19 = vshrl.u32 %v13203_v56, 16 }
 0x2ae   : > { %v4160_v23 = vadd.f32 %v12777_v50, %v4159_v15  ;;  %v2970_v32 = vsel %vm17636_vm15, %v2833_v5, %v1790_v14  ;;  %vm17638_vm15 = vmmov %vm17628_vm12 }
 0x2af   : > { %v2389_v58 = vpop.permute.xlu1 %2388  ;;  %v13241_v47 = vpop.permute.xlu2 %2697  ;;  %v3107_v13 = vsel %vm3055_vm5, %v2970_v32, %v1936_v40  ;;  %v1200_v30 = vor.u32 %v1198_v19, %v1196_v31 }
 0x2b0   : > { %v4444_v18 = vmax.f32 %v4160_v23, 0.0  ;;  %v3244_v37 = vsel %vm3192_vm6, %v3107_v13, %v13159_v48 }
 0x2b1   : > { %v13266_v52 = vsel %vm913_vm1, %v1200_v30, %v1204_v4 }
 0x2b2   : > { %v4753_v34 = vrot.slane %v4444_v18, 1 }
 0x2b3   : > { %2558 = vrot.lane.b32.xlu0 %v13245_v41, %s11428_s21 }
 0x2b4   : > { %v4754_v38 = vsel %vm1601_vm0, %v4751_v45, %v4753_v34 }
 0x2b5   : > { %v5123_v60 = vmax.f32 %v4443_v43, %v4754_v38  ;;  %v2243_v27 = vpop.permute.xlu0 %2242  ;;  %1947 = vrot.lane.b32.xlu1 %v13070_v12, %s17623_s24  ;;  %2107 = vrot.lane.b32.xlu2 %v13167_v22, %s17604_s14  ;;  %v13295_v43 = vld [vmem:[%s11534_s25 + $0x128] sm:$0xff] }
 0x2b6   : > { %v3381_v46 = vsel %vm3329_vm7, %v3244_v37, %v2243_v27  ;;  %v1675_v62 = vrot.slane %v13295_v43, 1 }
 0x2b7   : > { %v5255_v7 = vmax.f32 %v13143_v2, %v5123_v60  ;;  %v1515_v61 = vpop.permute.xlu1 %1514  ;;  %v13261_v49 = vpop.permute.xlu2 %1939  ;;  %v3518_v12 = vsel %vm3466_vm8, %v3381_v46, %v2389_v58 }
 0x2b8   : > { %v3655_v2 = vsel %vm3603_vm9, %v3518_v12, %v13181_v10  ;;  %v2835_v10 = vsel %vm2781_vm3, %v11303_v35, %v1515_v61  ;;  %v13340_v27 = vsel %vm1601_vm0, %v1673_v44, %v1675_v62 }
 0x2b9   : > { %5387 = vst.msk [vmem:[#allocation5 + $0x100] sm:$0xff] %vm3740_vm10, %v5255_v7  ;;  %v2972_v51 = vsel %vm17628_vm12, %v2835_v10, %v13199_v0  ;;  %v1210_v0 = vshll.u32 %v13295_v43, 16 }
 0x2bb   : > { %1801 = vrot.lane.b32.xlu0 %v13060_v17, %s17596_s28  ;;  %v13318_v23 = vrot.slane %v1210_v0, 1 }
 0x2bc   : > { %v4162_v48 = vpop.f32.mrf.mxu0 }
 0x2bd   : > { %v4163_v1 = vadd.f32 %v12777_v50, %v4162_v48  ;;  %v2696_v11 = vpop.permute.xlu0 %2695  ;;  %2400 = vrot.lane.b32.xlu1 %v13203_v56, %s11421_s26  ;;  %2560 = vrot.lane.b32.xlu2 %v13266_v52, %s11428_s21 }
 0x2be   : > { %v3792_v26 = vsel %vm3740_vm10, %v3655_v2, %v2696_v11  ;;  %v11305_v2 = vld [vmem:[%s11534_s25 + $0xd8] sm:$0xff] }
 0x2bf   : > { %v4445_v25 = vmax.f32 %v4163_v1, 0.0  ;;  %10283 = vmatmul.msk.bf16.gmra.mxu0 %vm3917_vm11, %v3792_v26  ;;  %v2098_v17 = vpop.permute.xlu1 %2097  ;;  %v13279_v24 = vpop.permute.xlu2 %2392 }
 0x2c1   : > { %v4755_v50 = vrot.slane %v4445_v25, 1 }
 0x2c3   : > { %v4756_v29 = vsel %vm1601_vm0, %v4753_v34, %v4755_v50  ;;  %2254 = vrot.lane.b32.xlu0 %v13170_v33, %s17600_s29 }
 0x2c4   : > { %v5124_v9 = vmax.f32 %v4444_v18, %v4756_v29  ;;  %v4164_v59 = vpop.f32.mrf.mxu0 }
 0x2c5   : > { %v1938_v16 = vpop.permute.xlu0 %1937  ;;  %1526 = vrot.lane.b32.xlu1 %v13099_v36, %s17598_s16  ;;  %1803 = vrot.lane.b32.xlu2 %v13135_v28, %s17596_s28  ;;  %v13304_v36 = vsel %vm1601_vm0, %v1671_v8, %v1673_v44  ;;  %v1206_v28 = vshrl.u32 %v13236_v42, 16 }
 0x2c6   : > { %v5256_v40 = vmax.f32 %v13179_v6, %v5124_v9  ;;  %v3109_v63 = vsel %vm3055_vm5, %v2972_v51, %v1938_v16 }
 0x2c7   : > { %v2551_v57 = vpop.permute.xlu1 %2550  ;;  %v13298_v45 = vpop.permute.xlu2 %1518  ;;  %v3246_v6 = vsel %vm3192_vm6, %v3109_v63, %v2098_v17  ;;  %v1208_v8 = vor.u32 %v1206_v28, %v1204_v4  ;;  %v5582_v4 = vld [vmem:[#allocation2 + $0x28] sm:$0xf] }
 0x2c8   : > { %5388 = vst.msk [vmem:[#allocation5 + $0x108] sm:$0xff] %vm3740_vm10, %v5256_v40  ;;  %v3383_v54 = vsel %vm3329_vm7, %v3246_v6, %v13216_v21  ;;  %v13325_v21 = vld [vmem:[%s17585_s2] ss:$0 sm:$0xff]  ;;  %v13372_v40 = vld [vmem:[%s11534_s25 + $0x130] sm:$0xff] }
 0x2c9   : > { %v13335_v60 = vsel %vm913_vm1, %v1208_v8, %v13318_v23 }
 0x2cb   : > { %2707 = vrot.lane.b32.xlu0 %v13304_v36, %s17602_s17 }
 0x2cd   : > { %v2391_v31 = vpop.permute.xlu0 %2390  ;;  %2109 = vrot.lane.b32.xlu1 %v13245_v41, %s17604_s14  ;;  %2256 = vrot.lane.b32.xlu2 %v13225_v53, %s17600_s29 }
 0x2ce   : > { %v3520_v15 = vsel %vm3466_vm8, %v3383_v54, %v2391_v31  ;;  %v4167_v14 = vpop.f32.mrf.mxu0  ;;  %v1218_v54 = vshll.u32 %v13372_v40, 16 }
 0x2cf   : > { %v5570_v5 = vld [vmem:[#allocation5 + $0x100] ss:$2 sm:$0xff]  ;;  %v3657_v58 = vsel %vm3603_vm9, %v3520_v15, %v2551_v57  ;;  %v4168_v18 = vadd.f32 %v13325_v21, %v4167_v14  ;;  %v1794_v32 = vpop.permute.xlu1 %1793  ;;  %v13328_v34 = vpop.permute.xlu2 %2101  ;;  %v1677_v57 = vrot.slane %v13372_v40, 1 }
 0x2d0   : > { %v5571_v19 = vpack.c.bf16 %v5570_v5, %v5570_v5  ;;  %v3794_v20 = vsel %vm3740_vm10, %v3657_v58, %v13241_v47  ;;  %v1220_v58 = vrot.slane %v1218_v54, 1 }
 0x2d1   : > { %v4447_v13 = vmax.f32 %v4168_v18, 0.0  ;;  %10284 = vmatmul.msk.bf16.gmra.mxu0 %vm3917_vm11, %v3794_v20  ;;  %v13396_v15 = vsel %vm1601_vm0, %v1675_v62, %v1677_v57  ;;  %v5585_v62 = vld [vmem:[#allocation2 + $0x2c] sm:$0x1]  ;;  %v13409_v20 = vld [vmem:[%s11534_s25 + $0x138] sm:$0xff] }
 0x2d2   : > { %v5573_v38 = vshrl.u32 %v5571_v19, 16  ;;  %v5576_v47 = vshll.u32 %v5571_v19, 16 }
 0x2d3   : > { %v4759_v37 = vrot.slane %v4447_v13, 1  ;;  %1949 = vrot.lane.b32.xlu0 %v13127_v3, %s17623_s24 }
 0x2d4   : > { %v5575_v30 = vrot.slane %v5573_v38, 7  ;;  %v11306_v38 = vld [vmem:[%s11534_s25 + $0xe0] sm:$0xff] }
 0x2d5   : > { %v1517_v7 = vpop.permute.xlu0 %1516  ;;  %2562 = vrot.lane.b32.xlu1 %v13335_v60, %s11428_s21  ;;  %2709 = vrot.lane.b32.xlu2 %v13340_v27, %s17602_s17 }
 0x2d6   : > { %v5578_v46 = vor.u32 %v5576_v47, %v5575_v30  ;;  %v4169_v61 = vpop.f32.mrf.mxu0  ;;  %v2837_v11 = vsel %vm2781_vm3, %v11305_v2, %v1517_v7  ;;  %v5579_v31 = vrot.slane %v5575_v30, 4  ;;  %v1226_v7 = vshll.u32 %v13409_v20, 16 }
 0x2d7   : > { %v4170_v12 = vadd.f32 %v13325_v21, %v4169_v61  ;;  %v2247_v48 = vpop.permute.xlu1 %2246  ;;  %v13349_v1 = vpop.permute.xlu2 %2554  ;;  %v2974_v25 = vsel %vm17637_vm13, %v2837_v11, %v1794_v32  ;;  %vm17639_vm13 = vmmov %vm17628_vm12 }
 0x2d8   : > { %v5583_v3 = vsel %vm12561_vm2, %v5578_v46, %v5582_v4  ;;  %v3111_v29 = vsel %vm3055_vm5, %v2974_v25, %v13261_v49 }
 0x2d9   : > { %5584 = vst [vmem:[#allocation2 + $0x28] sm:$0xf] %v5583_v3  ;;  %v4448_v26 = vmax.f32 %v4170_v12, 0.0 }
 0x2db   : > { %v4761_v17 = vrot.slane %v4448_v26, 1  ;;  %2402 = vrot.lane.b32.xlu0 %v13236_v42, %s11421_s26 }
 0x2dd   : > { %v4762_v50 = vsel %vm1601_vm0, %v4759_v37, %v4761_v17  ;;  %v2100_v35 = vpop.permute.xlu0 %2099  ;;  %1805 = vrot.lane.b32.xlu1 %v13170_v33, %s17596_s28  ;;  %1951 = vrot.lane.b32.xlu2 %v13203_v56, %s17623_s24 }
 0x2de   : > { %v13363_v10 = vmax.f32 %v4447_v13, %v4762_v50  ;;  %v3248_v9 = vsel %vm3192_vm6, %v3111_v29, %v2100_v35  ;;  %v5586_v13 = vsel %vm12570_vm4, %v5579_v31, %v5585_v62 }
 0x2df   : > { %v2700_v59 = vpop.permute.xlu1 %2699  ;;  %v13368_v44 = vpop.permute.xlu2 %1797  ;;  %v3385_v16 = vsel %vm3329_vm7, %v3248_v9, %v2247_v48  ;;  %5587 = vst [vmem:[#allocation2 + $0x2c] sm:$0x1] %v5586_v13  ;;  %v1228_v48 = vrot.slane %v1226_v7, 1 }
 0x2e0   : > { %v3522_v56 = vsel %vm3466_vm8, %v3385_v16, %v13279_v24  ;;  %v1214_v24 = vshrl.u32 %v13295_v43, 16  ;;  %v11307_v16 = vld [vmem:[%s11534_s25 + $0xe8] sm:$0xff] }
 0x2e2   : > { %v1216_v5 = vor.u32 %v1214_v24, %v13318_v23  ;;  %v2839_v23 = vsel %vm2781_vm3, %v11306_v38, %v13298_v45 }
 0x2e3   : > { %1528 = vrot.lane.b32.xlu0 %v13167_v22, %s17598_s16 }
 0x2e4   : > { %v13420_v4 = vsel %vm913_vm1, %v1216_v5, %v1220_v58 }
 0x2e5   : > { %v4172_v33 = vpop.f32.mrf.mxu0  ;;  %v2553_v51 = vpop.permute.xlu0 %2552  ;;  %2258 = vrot.lane.b32.xlu1 %v13304_v36, %s17600_s29  ;;  %2404 = vrot.lane.b32.xlu2 %v13295_v43, %s11421_s26 }
 0x2e6   : > { %v4173_v49 = vadd.f32 %v13325_v21, %v4172_v33  ;;  %v3659_v63 = vsel %vm3603_vm9, %v3522_v56, %v2553_v51  ;;  %v1679_v56 = vrot.slane %v13409_v20, 1 }
 0x2e7   : > { %v1942_v28 = vpop.permute.xlu1 %1941  ;;  %v13385_v6 = vpop.permute.xlu2 %2250  ;;  %v3796_v22 = vsel %vm3740_vm10, %v3659_v63, %v2700_v59 }
 0x2e8   : > { %v4449_v0 = vmax.f32 %v4173_v49, 0.0  ;;  %10285 = vmatmul.msk.bf16.gmra.mxu0 %vm3917_vm11, %v3796_v22  ;;  %v13474_v31 = vsel %vm1601_vm0, %v1677_v57, %v1679_v56 }
 0x2ea   : > { %v4763_v8 = vrot.slane %v4449_v0, 1 }
 0x2eb   : > { %2111 = vrot.lane.b32.xlu0 %v13266_v52, %s17604_s14 }
 0x2ec   : > { %v4764_v14 = vsel %vm1601_vm0, %v4761_v17, %v4763_v8  ;;  %v1230_v8 = vshrl.u32 %v13409_v20, 16 }
 0x2ed   : > { %v13402_v18 = vmax.f32 %v4448_v26, %v4764_v14  ;;  %v4174_v32 = vpop.f32.mrf.mxu0  ;;  %v1796_v19 = vpop.permute.xlu0 %1795  ;;  %2711 = vrot.lane.b32.xlu1 %v13396_v15, %s17602_s17  ;;  %1530 = vrot.lane.b32.xlu2 %v13245_v41, %s17598_s16  ;;  %v1222_v41 = vshrl.u32 %v13372_v40, 16 }
 0x2ee   : > { %v2976_v47 = vsel %vm17638_vm15, %v2839_v23, %v1796_v19  ;;  %v1232_v57 = vor.u32 %v1230_v8, %v1228_v48  ;;  %vm17640_vm15 = vmmov %vm17628_vm12 }
 0x2ef   : > { %v2395_v37 = vpop.permute.xlu1 %2394  ;;  %v13416_v30 = vpop.permute.xlu2 %2703  ;;  %v3113_v46 = vsel %vm3055_vm5, %v2976_v47, %v1942_v28  ;;  %v1224_v12 = vor.u32 %v1222_v41, %v1220_v58  ;;  %v13466_v28 = vld [vmem:[%s11534_s25 + $0x140] sm:$0xff] }
 0x2f0   : > { %v3250_v45 = vsel %vm3192_vm6, %v3113_v46, %v13328_v34  ;;  %v1681_v23 = vrot.slane %v13466_v28, 1 }
 0x2f1   : > { %v13438_v25 = vsel %vm913_vm1, %v1224_v12, %v1228_v48 }
 0x2f3   : > { %2564 = vrot.lane.b32.xlu0 %v13420_v4, %s11428_s21 }
 0x2f5   : > { %v2249_v61 = vpop.permute.xlu0 %2248  ;;  %1953 = vrot.lane.b32.xlu1 %v13236_v42, %s17623_s24  ;;  %2113 = vrot.lane.b32.xlu2 %v13335_v60, %s17604_s14 }
 0x2f6   : > { %v3387_v3 = vsel %vm3329_vm7, %v3250_v45, %v2249_v61  ;;  %v13503_v61 = vsel %vm1601_vm0, %v1679_v56, %v1681_v23 }
 0x2f7   : > { %v1521_v2 = vpop.permute.xlu1 %1520  ;;  %v13434_v11 = vpop.permute.xlu2 %1945  ;;  %v3524_v26 = vsel %vm3466_vm8, %v3387_v3, %v2395_v37 }
 0x2f8   : > { %v3661_v34 = vsel %vm3603_vm9, %v3524_v26, %v13349_v1  ;;  %v2841_v1 = vsel %vm2781_vm3, %v11307_v16, %v1521_v2  ;;  %v13532_v16 = vld [vmem:[%s11534_s25 + $0x148] sm:$0xff] }
 0x2f9   : > { %v2978_v63 = vsel %vm17628_vm12, %v2841_v1, %v13368_v44  ;;  %v1234_v44 = vshll.u32 %v13466_v28, 16  ;;  %v1683_v56 = vrot.slane %v13532_v16, 1 }
 0x2fb   : > { %1807 = vrot.lane.b32.xlu0 %v13225_v53, %s17596_s28  ;;  %v1236_v38 = vrot.slane %v1234_v44, 1 }
 0x2fc   : > { %v4177_v42 = vpop.f32.mrf.mxu0 }
 0x2fd   : > { %v4178_v17 = vadd.f32 %v13325_v21, %v4177_v42  ;;  %v2702_v50 = vpop.permute.xlu0 %2701  ;;  %2406 = vrot.lane.b32.xlu1 %v13372_v40, %s11421_s26  ;;  %2566 = vrot.lane.b32.xlu2 %v13438_v25, %s11428_s21  ;;  %v13500_v46 = vsel %vm913_vm1, %v1232_v57, %v1236_v38 }
 0x2fe   : > { %v3798_v35 = vsel %vm3740_vm10, %v3661_v34, %v2702_v50 }
 0x2ff   : > { %v4451_v29 = vmax.f32 %v4178_v17, 0.0  ;;  %10286 = vmatmul.msk.bf16.gmra.mxu0 %vm3917_vm11, %v3798_v35  ;;  %v2104_v53 = vpop.permute.xlu1 %2103  ;;  %v13451_v9 = vpop.permute.xlu2 %2398  ;;  %v11308_v17 = vld [vmem:[%s11534_s25 + $0xf0] sm:$0xff] }
 0x301   : > { %v4767_v59 = vrot.slane %v4451_v29, 1 }
 0x303   : > { %2260 = vrot.lane.b32.xlu0 %v13340_v27, %s17600_s29 }
 0x304   : > { %v4179_v33 = vpop.f32.mrf.mxu0 }
 0x305   : > { %v4180_v51 = vadd.f32 %v13325_v21, %v4179_v33  ;;  %v1944_v49 = vpop.permute.xlu0 %1943  ;;  %1532 = vrot.lane.b32.xlu1 %v13266_v52, %s17598_s16  ;;  %1809 = vrot.lane.b32.xlu2 %v13304_v36, %s17596_s28 }
 0x306   : > { %v3115_v0 = vsel %vm3055_vm5, %v2978_v63, %v1944_v49  ;;  %v1238_v63 = vshrl.u32 %v13466_v28, 16 }
 0x307   : > { %v4452_v22 = vmax.f32 %v4180_v51, 0.0  ;;  %v2557_v24 = vpop.permute.xlu1 %2556  ;;  %v13469_v54 = vpop.permute.xlu2 %1524  ;;  %v3252_v36 = vsel %vm3192_vm6, %v3115_v0, %v2104_v53 }
 0x308   : > { %v3389_v58 = vsel %vm3329_vm7, %v3252_v36, %v13385_v6 }
 0x309   : > { %v4769_v52 = vrot.slane %v4452_v22, 1 }
 0x30b   : > { %v4770_v14 = vsel %vm1601_vm0, %v4767_v59, %v4769_v52  ;;  %2713 = vrot.lane.b32.xlu0 %v13474_v31, %s17602_s17 }
 0x30c   : > { %v5131_v5 = vmax.f32 %v4451_v29, %v4770_v14 }
 0x30d   : > { %v2397_v32 = vpop.permute.xlu0 %2396  ;;  %2115 = vrot.lane.b32.xlu1 %v13420_v4, %s17604_s14  ;;  %2262 = vrot.lane.b32.xlu2 %v13396_v15, %s17600_s29 }
 0x30e   : > { %v5263_v19 = vmax.f32 %v13363_v10, %v5131_v5  ;;  %v3526_v62 = vsel %vm3466_vm8, %v3389_v58, %v2397_v32  ;;  %v4182_v13 = vpop.f32.mrf.mxu0  ;;  %v13564_v58 = vld [vmem:[%s11534_s25 + $0x150] sm:$0xff]  ;;  %v11309_v32 = vld [vmem:[%s11534_s25 + $0xf8] sm:$0xff] }
 0x30f   : > { %v3663_v37 = vsel %vm3603_vm9, %v3526_v62, %v2557_v24  ;;  %v4183_v6 = vadd.f32 %v13325_v21, %v4182_v13  ;;  %v1800_v47 = vpop.permute.xlu1 %1799  ;;  %v13493_v41 = vpop.permute.xlu2 %2107  ;;  %v13554_v24 = vsel %vm1601_vm0, %v1681_v23, %v1683_v56  ;;  %v2845_v57 = vsel %vm2781_vm3, %v11309_v32, %v13469_v54 }
 0x310   : > { %5395 = vst.msk [vmem:[#allocation5 + $0x140] sm:$0xff] %vm3740_vm10, %v5263_v19  ;;  %v3800_v7 = vsel %vm3740_vm10, %v3663_v37, %v13416_v30 }
 0x311   : > { %v4453_v10 = vmax.f32 %v4183_v6, 0.0  ;;  %10287 = vmatmul.msk.bf16.gmra.mxu0 %vm3917_vm11, %v3800_v7 }
 0x313   : > { %v4771_v45 = vrot.slane %v4453_v10, 1  ;;  %1955 = vrot.lane.b32.xlu0 %v13295_v43, %s17623_s24 }
 0x315   : > { %v4772_v12 = vsel %vm1601_vm0, %v4769_v52, %v4771_v45  ;;  %v1523_v48 = vpop.permute.xlu0 %1522  ;;  %2568 = vrot.lane.b32.xlu1 %v13500_v46, %s11428_s21  ;;  %2715 = vrot.lane.b32.xlu2 %v13503_v61, %s17602_s17  ;;  %v1240_v52 = vor.u32 %v1238_v63, %v1236_v38  ;;  %v11310_v63 = vld [vmem:[%s11534_s25 + $0x100] sm:$0xff] }
 0x316   : > { %v5132_v30 = vmax.f32 %v4452_v22, %v4772_v12  ;;  %v4184_v3 = vpop.f32.mrf.mxu0  ;;  %v2843_v43 = vsel %vm2781_vm3, %v11308_v17, %v1523_v48  ;;  %v1242_v22 = vshll.u32 %v13532_v16, 16 }
 0x317   : > { %v2253_v2 = vpop.permute.xlu1 %2252  ;;  %v13512_v26 = vpop.permute.xlu2 %2560  ;;  %v2980_v34 = vsel %vm17639_vm13, %v2843_v43, %v1800_v47  ;;  %v1250_v47 = vshll.u32 %v13564_v58, 16  ;;  %vm17641_vm13 = vmmov %vm17628_vm12 }
 0x318   : > { %v5264_v42 = vmax.f32 %v13402_v18, %v5132_v30  ;;  %v3117_v18 = vsel %vm3055_vm5, %v2980_v34, %v13434_v11  ;;  %v1244_v8 = vrot.slane %v1242_v22, 1 }
 0x319   : > { %v1252_v3 = vrot.slane %v1250_v47, 1 }
 0x31a   : > { %5396 = vst.msk [vmem:[#allocation5 + $0x148] sm:$0xff] %vm3740_vm10, %v5264_v42  ;;  %v13573_v37 = vsel %vm913_vm1, %v1240_v52, %v1244_v8 }
 0x31b   : > { %2408 = vrot.lane.b32.xlu0 %v13409_v20, %s11421_s26 }
 0x31d   : > { %v2106_v50 = vpop.permute.xlu0 %2105  ;;  %1811 = vrot.lane.b32.xlu1 %v13340_v27, %s17596_s28  ;;  %1957 = vrot.lane.b32.xlu2 %v13372_v40, %s17623_s24 }
 0x31e   : > { %v3254_v35 = vsel %vm3192_vm6, %v3117_v18, %v2106_v50 }
 0x31f   : > { %v2706_v29 = vpop.permute.xlu1 %2705  ;;  %v13528_v53 = vpop.permute.xlu2 %1803  ;;  %v3391_v59 = vsel %vm3329_vm7, %v3254_v35, %v2253_v2 }
 0x320   : > { %v3528_v27 = vsel %vm3466_vm8, %v3391_v59, %v13451_v9 }
 0x321   : > { %v5589_v36 = vld [vmem:[#allocation5 + $0x140] ss:$2 sm:$0xff] }
 0x322   : > { %v5590_v13 = vpack.c.bf16 %v5589_v36, %v5589_v36  ;;  %v1685_v36 = vrot.slane %v13564_v58, 1 }
 0x323   : > { %1534 = vrot.lane.b32.xlu0 %v13335_v60, %s17598_s16 }
 0x324   : > { %v5592_v54 = vshrl.u32 %v5590_v13, 16  ;;  %v5595_v34 = vshll.u32 %v5590_v13, 16  ;;  %v13636_v13 = vsel %vm1601_vm0, %v1683_v56, %v1685_v36 }
 0x325   : > { %v4187_v1 = vpop.f32.mrf.mxu0  ;;  %v2559_v40 = vpop.permute.xlu0 %2558  ;;  %2264 = vrot.lane.b32.xlu1 %v13474_v31, %s17600_s29  ;;  %2410 = vrot.lane.b32.xlu2 %v13466_v28, %s11421_s26 }
 0x326   : > { %v4188_v11 = vadd.f32 %v13325_v21, %v4187_v1  ;;  %v3665_v33 = vsel %vm3603_vm9, %v3528_v27, %v2559_v40  ;;  %v5594_v43 = vrot.slane %v5592_v54, 7 }
 0x327   : > { %v1948_v51 = vpop.permute.xlu1 %1947  ;;  %v13545_v49 = vpop.permute.xlu2 %2256  ;;  %v3802_v60 = vsel %vm3740_vm10, %v3665_v33, %v2706_v29  ;;  %v5601_v33 = vld [vmem:[#allocation2 + $0x30] sm:$0xf] }
 0x328   : > { %v4455_v9 = vmax.f32 %v4188_v11, 0.0  ;;  %10288 = vmatmul.msk.bf16.gmra.mxu0 %vm3917_vm11, %v3802_v60  ;;  %v5598_v35 = vrot.slane %v5594_v43, 4 }
 0x32a   : > { %v4775_v0 = vrot.slane %v4455_v9, 1 }
 0x32b   : > { %2117 = vrot.lane.b32.xlu0 %v13438_v25, %s17604_s14 }
 0x32d   : > { %v4189_v44 = vpop.f32.mrf.mxu0  ;;  %v1802_v14 = vpop.permute.xlu0 %1801  ;;  %2717 = vrot.lane.b32.xlu1 %v13554_v24, %s17602_s17  ;;  %1536 = vrot.lane.b32.xlu2 %v13420_v4, %s17598_s16  ;;  %v1246_v4 = vshrl.u32 %v13532_v16, 16 }
 0x32e   : > { %v4190_v5 = vadd.f32 %v13325_v21, %v4189_v44  ;;  %v2982_v23 = vsel %vm17640_vm15, %v2845_v57, %v1802_v14  ;;  %vm17642_vm15 = vmmov %vm17628_vm12 }
 0x32f   : > { %v2401_v19 = vpop.permute.xlu1 %2400  ;;  %v13569_v62 = vpop.permute.xlu2 %2709  ;;  %v3119_v7 = vsel %vm3055_vm5, %v2982_v23, %v1948_v51  ;;  %v1248_v30 = vor.u32 %v1246_v4, %v1244_v8  ;;  %v5604_v51 = vld [vmem:[#allocation2 + $0x34] sm:$0x1] }
 0x330   : > { %v4456_v38 = vmax.f32 %v4190_v5, 0.0  ;;  %v3256_v48 = vsel %vm3192_vm6, %v3119_v7, %v13493_v41  ;;  %v5605_v60 = vsel %vm12570_vm4, %v5598_v35, %v5604_v51  ;;  %v13628_v5 = vld [vmem:[%s11534_s25 + $0x158] sm:$0xff]  ;;  %v11311_v35 = vld [vmem:[%s11534_s25 + $0x108] sm:$0xff] }
 0x331   : > { %v13594_v18 = vsel %vm913_vm1, %v1248_v30, %v1252_v3  ;;  %5606 = vst [vmem:[#allocation2 + $0x34] sm:$0x1] %v5605_v60  ;;  %v1687_v7 = vrot.slane %v13628_v5, 1 }
 0x332   : > { %v4777_v6 = vrot.slane %v4456_v38, 1 }
 0x333   : > { %2570 = vrot.lane.b32.xlu0 %v13573_v37, %s11428_s21 }
 0x334   : > { %v4778_v10 = vsel %vm1601_vm0, %v4775_v0, %v4777_v6 }
 0x335   : > { %v13581_v45 = vmax.f32 %v4455_v9, %v4778_v10  ;;  %v2255_v12 = vpop.permute.xlu0 %2254  ;;  %1959 = vrot.lane.b32.xlu1 %v13409_v20, %s17623_s24  ;;  %2119 = vrot.lane.b32.xlu2 %v13500_v46, %s17604_s14  ;;  %v5597_v20 = vor.u32 %v5595_v34, %v5594_v43 }
 0x336   : > { %v3393_v2 = vsel %vm3329_vm7, %v3256_v48, %v2255_v12 }
 0x337   : > { %v1527_v42 = vpop.permute.xlu1 %1526  ;;  %v13590_v17 = vpop.permute.xlu2 %1951  ;;  %v3530_v50 = vsel %vm3466_vm8, %v3393_v2, %v2401_v19  ;;  %v13662_v2 = vsel %vm1601_vm0, %v1685_v36, %v1687_v7 }
 0x338   : > { %v3667_v59 = vsel %vm3603_vm9, %v3530_v50, %v13512_v26  ;;  %v5602_v26 = vsel %vm12561_vm2, %v5597_v20, %v5601_v33  ;;  %v2847_v22 = vsel %vm2781_vm3, %v11310_v63, %v1527_v42  ;;  %v13692_v63 = vld [vmem:[%s11534_s25 + $0x160] sm:$0xff] }
 0x339   : > { %5603 = vst [vmem:[#allocation2 + $0x30] sm:$0xf] %v5602_v26  ;;  %v2984_v14 = vsel %vm17628_vm12, %v2847_v22, %v13528_v53 }
 0x33b   : > { %1813 = vrot.lane.b32.xlu0 %v13396_v15, %s17596_s28 }
 0x33c   : > { %v4192_v41 = vpop.f32.mrf.mxu0 }
 0x33d   : > { %v4193_v29 = vadd.f32 %v13325_v21, %v4192_v41  ;;  %v2708_v1 = vpop.permute.xlu0 %2707  ;;  %2412 = vrot.lane.b32.xlu1 %v13532_v16, %s11421_s26  ;;  %2572 = vrot.lane.b32.xlu2 %v13594_v18, %s11428_s21 }
 0x33e   : > { %v3804_v27 = vsel %vm3740_vm10, %v3667_v59, %v2708_v1 }
 0x33f   : > { %v4457_v40 = vmax.f32 %v4193_v29, 0.0  ;;  %10289 = vmatmul.msk.bf16.gmra.mxu0 %vm3917_vm11, %v3804_v27  ;;  %v2110_v15 = vpop.permute.xlu1 %2109  ;;  %v13607_v11 = vpop.permute.xlu2 %2404 }
 0x341   : > { %v4779_v9 = vrot.slane %v4457_v40, 1 }
 0x343   : > { %v4780_v0 = vsel %vm1601_vm0, %v4777_v6, %v4779_v9  ;;  %2266 = vrot.lane.b32.xlu0 %v13503_v61, %s17600_s29 }
 0x344   : > { %v13618_v52 = vmax.f32 %v4456_v38, %v4780_v0  ;;  %v4194_v8 = vpop.f32.mrf.mxu0  ;;  %v1689_v0 = vrot.slane %v13692_v63, 1 }
 0x345   : > { %v1950_v44 = vpop.permute.xlu0 %1949  ;;  %1538 = vrot.lane.b32.xlu1 %v13438_v25, %s17598_s16  ;;  %1815 = vrot.lane.b32.xlu2 %v13474_v31, %s17596_s28  ;;  %v1254_v25 = vshrl.u32 %v13564_v58, 16  ;;  %v1258_v31 = vshll.u32 %v13628_v5, 16 }
 0x346   : > { %v3121_v32 = vsel %vm3055_vm5, %v2984_v14, %v1950_v44  ;;  %v1262_v44 = vshrl.u32 %v13628_v5, 16  ;;  %v1266_v14 = vshll.u32 %v13692_v63, 16 }
 0x347   : > { %v2563_v57 = vpop.permute.xlu1 %2562  ;;  %v13631_v19 = vpop.permute.xlu2 %1530  ;;  %v3258_v38 = vsel %vm3192_vm6, %v3121_v32, %v2110_v15  ;;  %v1256_v56 = vor.u32 %v1254_v25, %v1252_v3  ;;  %v1260_v47 = vrot.slane %v1258_v31, 1 }
 0x348   : > { %v3395_v53 = vsel %vm3329_vm7, %v3258_v38, %v13545_v49  ;;  %v1268_v31 = vrot.slane %v1266_v14, 1 }
 0x349   : > { %v13659_v3 = vsel %vm913_vm1, %v1256_v56, %v1260_v47  ;;  %v1264_v38 = vor.u32 %v1262_v44, %v1260_v47 }
 0x34b   : > { %2719 = vrot.lane.b32.xlu0 %v13636_v13, %s17602_s17 }
 0x34d   : > { %v2403_v23 = vpop.permute.xlu0 %2402  ;;  %2121 = vrot.lane.b32.xlu1 %v13573_v37, %s17604_s14  ;;  %2268 = vrot.lane.b32.xlu2 %v13554_v24, %s17600_s29 }
 0x34e   : > { %v3532_v6 = vsel %vm3466_vm8, %v3395_v53, %v2403_v23  ;;  %v4197_v4 = vpop.f32.mrf.mxu0 }
 0x34f   : > { %v3669_v54 = vsel %vm3603_vm9, %v3532_v6, %v2563_v57  ;;  %v4198_v10 = vadd.f32 %v13325_v21, %v4197_v4  ;;  %v1806_v12 = vpop.permute.xlu1 %1805  ;;  %v13653_v49 = vpop.permute.xlu2 %2113  ;;  %v13714_v57 = vsel %vm1601_vm0, %v1687_v7, %v1689_v0  ;;  %v13724_v6 = vld [vmem:[%s11534_s25 + $0x168] sm:$0xff]  ;;  %v11312_v4 = vld [vmem:[%s11534_s25 + $0x110] sm:$0xff] }
 0x350   : > { %v3806_v48 = vsel %vm3740_vm10, %v3669_v54, %v13569_v62  ;;  %v2851_v7 = vsel %vm2781_vm3, %v11312_v4, %v13631_v19 }
 0x351   : > { %v4459_v30 = vmax.f32 %v4198_v10, 0.0  ;;  %10290 = vmatmul.msk.bf16.gmra.mxu0 %vm3917_vm11, %v3806_v48  ;;  %v13734_v48 = vsel %vm913_vm1, %v1264_v38, %v1268_v31 }
 0x353   : > { %v4783_v42 = vrot.slane %v4459_v30, 1  ;;  %1961 = vrot.lane.b32.xlu0 %v13466_v28, %s17623_s24 }
 0x355   : > { %v1529_v43 = vpop.permute.xlu0 %1528  ;;  %2574 = vrot.lane.b32.xlu1 %v13659_v3, %s11428_s21  ;;  %2721 = vrot.lane.b32.xlu2 %v13662_v2, %s17602_s17 }
 0x356   : > { %v4199_v62 = vpop.f32.mrf.mxu0  ;;  %v2849_v41 = vsel %vm2781_vm3, %v11311_v35, %v1529_v43 }
 0x357   : > { %v4200_v34 = vadd.f32 %v13325_v21, %v4199_v62  ;;  %v2259_v50 = vpop.permute.xlu1 %2258  ;;  %v13671_v20 = vpop.permute.xlu2 %2566  ;;  %v2986_v28 = vsel %vm17641_vm13, %v2849_v41, %v1806_v12  ;;  %vm17643_vm13 = vmmov %vm17628_vm12 }
 0x358   : > { %v3123_v15 = vsel %vm3055_vm5, %v2986_v28, %v13590_v17 }
 0x359   : > { %v4460_v29 = vmax.f32 %v4200_v34, 0.0 }
 0x35b   : > { %v4785_v59 = vrot.slane %v4460_v29, 1  ;;  %2414 = vrot.lane.b32.xlu0 %v13564_v58, %s11421_s26 }
 0x35d   : > { %v4786_v1 = vsel %vm1601_vm0, %v4783_v42, %v4785_v59  ;;  %v2112_v27 = vpop.permute.xlu0 %2111  ;;  %1817 = vrot.lane.b32.xlu1 %v13503_v61, %s17596_s28  ;;  %1963 = vrot.lane.b32.xlu2 %v13532_v16, %s17623_s24 }
 0x35e   : > { %v5139_v40 = vmax.f32 %v4459_v30, %v4786_v1  ;;  %v3260_v33 = vsel %vm3192_vm6, %v3123_v15, %v2112_v27  ;;  %v1274_v30 = vshll.u32 %v13724_v6, 16 }
 0x35f   : > { %v2712_v51 = vpop.permute.xlu1 %2711  ;;  %v13686_v26 = vpop.permute.xlu2 %1809  ;;  %v3397_v9 = vsel %vm3329_vm7, %v3260_v33, %v2259_v50  ;;  %v11313_v33 = vld [vmem:[%s11534_s25 + $0x118] sm:$0xff] }
 0x360   : > { %v5271_v60 = vmax.f32 %v13581_v45, %v5139_v40  ;;  %v3534_v16 = vsel %vm3466_vm8, %v3397_v9, %v13607_v11  ;;  %v1276_v62 = vrot.slane %v1274_v30, 1  ;;  %v1691_v9 = vrot.slane %v13724_v6, 1 }
 0x362   : > { %5403 = vst.msk [vmem:[#allocation5 + $0x180] sm:$0xff] %vm3740_vm10, %v5271_v60  ;;  %v13789_v14 = vsel %vm1601_vm0, %v1689_v0, %v1691_v9 }
 0x363   : > { %1540 = vrot.lane.b32.xlu0 %v13500_v46, %s17598_s16 }
 0x365   : > { %v4202_v61 = vpop.f32.mrf.mxu0  ;;  %v2565_v17 = vpop.permute.xlu0 %2564  ;;  %2270 = vrot.lane.b32.xlu1 %v13636_v13, %s17600_s29  ;;  %2416 = vrot.lane.b32.xlu2 %v13628_v5, %s11421_s26 }
 0x366   : > { %v4203_v45 = vadd.f32 %v13325_v21, %v4202_v61  ;;  %v3671_v22 = vsel %vm3603_vm9, %v3534_v16, %v2565_v17 }
 0x367   : > { %v1954_v8 = vpop.permute.xlu1 %1953  ;;  %v13705_v36 = vpop.permute.xlu2 %2262  ;;  %v3808_v46 = vsel %vm3740_vm10, %v3671_v22, %v2712_v51 }
 0x368   : > { %v4461_v11 = vmax.f32 %v4203_v45, 0.0  ;;  %10291 = vmatmul.msk.bf16.gmra.mxu0 %vm3917_vm11, %v3808_v46  ;;  %v13781_v45 = vld [vmem:[%s11534_s25 + $0x170] sm:$0xff] }
 0x36a   : > { %v4787_v32 = vrot.slane %v4461_v11, 1 }
 0x36b   : > { %2123 = vrot.lane.b32.xlu0 %v13594_v18, %s17604_s14 }
 0x36c   : > { %v4788_v25 = vsel %vm1601_vm0, %v4785_v59, %v4787_v32 }
 0x36d   : > { %v5140_v53 = vmax.f32 %v4460_v29, %v4788_v25  ;;  %v4204_v23 = vpop.f32.mrf.mxu0  ;;  %v1808_v56 = vpop.permute.xlu0 %1807  ;;  %2723 = vrot.lane.b32.xlu1 %v13714_v57, %s17602_s17  ;;  %1542 = vrot.lane.b32.xlu2 %v13573_v37, %s17598_s16  ;;  %v1270_v37 = vshrl.u32 %v13692_v63, 16 }
 0x36e   : > { %v2988_v12 = vsel %vm17642_vm15, %v2851_v7, %v1808_v56  ;;  %vm17644_vm15 = vmmov %vm17628_vm12 }
 0x36f   : > { %v5272_v54 = vmax.f32 %v13618_v52, %v5140_v53  ;;  %v2407_v10 = vpop.permute.xlu1 %2406  ;;  %v13730_v47 = vpop.permute.xlu2 %2715  ;;  %v3125_v42 = vsel %vm3055_vm5, %v2988_v12, %v1954_v8  ;;  %v1272_v43 = vor.u32 %v1270_v37, %v1268_v31 }
 0x370   : > { %v3262_v19 = vsel %vm3192_vm6, %v3125_v42, %v13653_v49 }
 0x371   : > { %5404 = vst.msk [vmem:[#allocation5 + $0x188] sm:$0xff] %vm3740_vm10, %v5272_v54  ;;  %v13753_v29 = vsel %vm913_vm1, %v1272_v43, %v1276_v62  ;;  %v1693_v54 = vrot.slane %v13781_v45, 1 }
 0x373   : > { %2576 = vrot.lane.b32.xlu0 %v13734_v48, %s11428_s21 }
 0x375   : > { %v2261_v52 = vpop.permute.xlu0 %2260  ;;  %1965 = vrot.lane.b32.xlu1 %v13564_v58, %s17623_s24  ;;  %2125 = vrot.lane.b32.xlu2 %v13659_v3, %s17604_s14 }
 0x376   : > { %v3399_v34 = vsel %vm3329_vm7, %v3262_v19, %v2261_v52 }
 0x377   : > { %v1533_v50 = vpop.permute.xlu1 %1532  ;;  %v13749_v35 = vpop.permute.xlu2 %1957  ;;  %v3536_v41 = vsel %vm3466_vm8, %v3399_v34, %v2407_v10 }
 0x378   : > { %v3673_v49 = vsel %vm3603_vm9, %v3536_v41, %v13671_v20  ;;  %v2853_v20 = vsel %vm2781_vm3, %v11313_v33, %v1533_v50  ;;  %v5608_v51 = vld [vmem:[#allocation5 + $0x180] ss:$2 sm:$0xff] }
 0x379   : > { %v2990_v17 = vsel %vm17628_vm12, %v2853_v20, %v13686_v26  ;;  %v5609_v22 = vpack.c.bf16 %v5608_v51, %v5608_v51  ;;  %v1282_v26 = vshll.u32 %v13781_v45, 16 }
 0x37b   : > { %1819 = vrot.lane.b32.xlu0 %v13554_v24, %s17596_s28  ;;  %v5611_v25 = vshrl.u32 %v5609_v22, 16  ;;  %v13806_v7 = vrot.slane %v1282_v26, 1  ;;  %v5614_v52 = vshll.u32 %v5609_v22, 16  ;;  %v13854_v22 = vld [vmem:[%s11534_s25 + $0x178] sm:$0xff]  ;;  %v1286_v26 = vshrl.u32 %v13781_v45, 16 }
 0x37c   : > { %v4207_v58 = vpop.f32.mrf.mxu0 }
 0x37d   : > { %v4208_v28 = vadd.f32 %v13325_v21, %v4207_v58  ;;  %v2714_v59 = vpop.permute.xlu0 %2713  ;;  %2418 = vrot.lane.b32.xlu1 %v13692_v63, %s11421_s26  ;;  %2578 = vrot.lane.b32.xlu2 %v13753_v29, %s11428_s21  ;;  %v5613_v10 = vrot.slane %v5611_v25, 7  ;;  %v1290_v25 = vshll.u32 %v13854_v22, 16 }
 0x37e   : > { %v3810_v1 = vsel %vm3740_vm10, %v3673_v49, %v2714_v59  ;;  %v5620_v49 = vld [vmem:[#allocation2 + $0x38] sm:$0xf]  ;;  %v5623_v59 = vld [vmem:[#allocation2 + $0x3c] sm:$0x1] }
 0x37f   : > { %v4463_v27 = vmax.f32 %v4208_v28, 0.0  ;;  %10292 = vmatmul.msk.bf16.gmra.mxu0 %vm3917_vm11, %v3810_v1  ;;  %v2116_v24 = vpop.permute.xlu1 %2115  ;;  %v13766_v40 = vpop.permute.xlu2 %2410  ;;  %v5616_v34 = vor.u32 %v5614_v52, %v5613_v10 }
 0x381   : > { %v4791_v15 = vrot.slane %v4463_v27, 1 }
 0x383   : > { %2272 = vrot.lane.b32.xlu0 %v13662_v2, %s17600_s29 }
 0x384   : > { %v4209_v60 = vpop.f32.mrf.mxu0 }
 0x385   : > { %v4210_v61 = vadd.f32 %v13325_v21, %v4209_v60  ;;  %v1956_v16 = vpop.permute.xlu0 %1955  ;;  %1544 = vrot.lane.b32.xlu1 %v13594_v18, %s17598_s16  ;;  %1821 = vrot.lane.b32.xlu2 %v13636_v13, %s17596_s28  ;;  %v1278_v13 = vshrl.u32 %v13724_v6, 16 }
 0x386   : > { %v3127_v46 = vsel %vm3055_vm5, %v2990_v17, %v1956_v16 }
 0x387   : > { %v4464_v8 = vmax.f32 %v4210_v61, 0.0  ;;  %v2569_v11 = vpop.permute.xlu1 %2568  ;;  %v13784_v44 = vpop.permute.xlu2 %1536  ;;  %v3264_v32 = vsel %vm3192_vm6, %v3127_v46, %v2116_v24  ;;  %v1280_v23 = vor.u32 %v1278_v13, %v1276_v62  ;;  %v13821_v62 = vsel %vm1601_vm0, %v1691_v9, %v1693_v54 }
 0x388   : > { %v3401_v53 = vsel %vm3329_vm7, %v3264_v32, %v13705_v36 }
 0x389   : > { %v4793_v18 = vrot.slane %v4464_v8, 1  ;;  %v13818_v43 = vsel %vm913_vm1, %v1280_v23, %v13806_v7  ;;  %v1292_v23 = vrot.slane %v1290_v25, 1 }
 0x38b   : > { %v4794_v38 = vsel %vm1601_vm0, %v4791_v15, %v4793_v18  ;;  %2725 = vrot.lane.b32.xlu0 %v13789_v14, %s17602_s17  ;;  %v11314_v15 = vld [vmem:[%s11534_s25 + $0x120] sm:$0xff] }
 0x38c   : > { %v13797_v31 = vmax.f32 %v4463_v27, %v4794_v38 }
 0x38d   : > { %v2409_v0 = vpop.permute.xlu0 %2408  ;;  %2127 = vrot.lane.b32.xlu1 %v13734_v48, %s17604_s14  ;;  %2274 = vrot.lane.b32.xlu2 %v13714_v57, %s17600_s29 }
 0x38e   : > { %v3538_v56 = vsel %vm3466_vm8, %v3401_v53, %v2409_v0  ;;  %v4212_v4 = vpop.f32.mrf.mxu0  ;;  %v1288_v0 = vor.u32 %v1286_v26, %v13806_v7  ;;  %v13951_v26 = vld [vmem:[%s11534_s25 + $0x188] sm:$0xff] }
 0x38f   : > { %v3675_v12 = vsel %vm3603_vm9, %v3538_v56, %v2569_v11  ;;  %v4213_v36 = vadd.f32 %v13325_v21, %v4212_v4  ;;  %v1812_v37 = vpop.permute.xlu1 %1811  ;;  %v13811_v30 = vpop.permute.xlu2 %2119  ;;  %v5617_v21 = vrot.slane %v5613_v10, 4  ;;  %v1695_v11 = vrot.slane %v13854_v22, 1 }
 0x390   : > { %v3812_v42 = vsel %vm3740_vm10, %v3675_v12, %v13730_v47  ;;  %v13892_v12 = vld [vmem:[%s11534_s25 + $0x180] sm:$0xff] }
 0x391   : > { %v4465_v19 = vmax.f32 %v4213_v36, 0.0  ;;  %10293 = vmatmul.msk.bf16.gmra.mxu0 %vm3917_vm11, %v3812_v42  ;;  %v5624_v24 = vsel %vm12570_vm4, %v5617_v21, %v5623_v59  ;;  %v13881_v53 = vsel %vm1601_vm0, %v1693_v54, %v1695_v11  ;;  %v11316_v54 = vld [vmem:[%s11534_s25 + $0x128] sm:$0xff]  ;;  %v1298_v21 = vshll.u32 %v13892_v12, 16 }
 0x392   : > { %5625 = vst [vmem:[#allocation2 + $0x3c] sm:$0x1] %v5624_v24  ;;  %v2857_v36 = vsel %vm2781_vm3, %v11316_v54, %v13784_v44 }
 0x393   : > { %v4795_v50 = vrot.slane %v4465_v19, 1  ;;  %1967 = vrot.lane.b32.xlu0 %v13628_v5, %s17623_s24  ;;  %v5621_v5 = vsel %vm12561_vm2, %v5616_v34, %v5620_v49  ;;  %v13901_v19 = vsel %vm913_vm1, %v1288_v0, %v1292_v23  ;;  %v1300_v59 = vrot.slane %v1298_v21, 1 }
 0x394   : > { %5622 = vst [vmem:[#allocation2 + $0x38] sm:$0xf] %v5621_v5 }
 0x395   : > { %v4796_v47 = vsel %vm1601_vm0, %v4793_v18, %v4795_v50  ;;  %v1535_v41 = vpop.permute.xlu0 %1534  ;;  %2580 = vrot.lane.b32.xlu1 %v13818_v43, %s11428_s21  ;;  %2727 = vrot.lane.b32.xlu2 %v13821_v62, %s17602_s17 }
 0x396   : > { %v13830_v58 = vmax.f32 %v4464_v8, %v4796_v47  ;;  %v4214_v28 = vpop.f32.mrf.mxu0  ;;  %v2855_v33 = vsel %vm2781_vm3, %v11314_v15, %v1535_v41 }
 0x397   : > { %v2265_v1 = vpop.permute.xlu1 %2264  ;;  %v13832_v27 = vpop.permute.xlu2 %2572  ;;  %v2992_v20 = vsel %vm17643_vm13, %v2855_v33, %v1812_v37  ;;  %vm17645_vm13 = vmmov %vm17628_vm12 }
 0x398   : > { %v3129_v60 = vsel %vm3055_vm5, %v2992_v20, %v13749_v35  ;;  %v13867_v35 = vld [vmem:[%s17585_s2] ss:$0 sm:$0xff] }
 0x39b   : > { %2420 = vrot.lane.b32.xlu0 %v13724_v6, %s11421_s26 }
 0x39d   : > { %v2118_v51 = vpop.permute.xlu0 %2117  ;;  %1823 = vrot.lane.b32.xlu1 %v13662_v2, %s17596_s28  ;;  %1969 = vrot.lane.b32.xlu2 %v13692_v63, %s17623_s24 }
 0x39e   : > { %v3266_v9 = vsel %vm3192_vm6, %v3129_v60, %v2118_v51 }
 0x39f   : > { %v2718_v61 = vpop.permute.xlu1 %2717  ;;  %v13850_v16 = vpop.permute.xlu2 %1815  ;;  %v3403_v17 = vsel %vm3329_vm7, %v3266_v9, %v2265_v1 }
 0x3a0   : > { %v3540_v2 = vsel %vm3466_vm8, %v3403_v17, %v13766_v40 }
 0x3a3   : > { %1546 = vrot.lane.b32.xlu0 %v13659_v3, %s17598_s16 }
 0x3a5   : > { %v4217_v8 = vpop.f32.mrf.mxu0  ;;  %v2571_v63 = vpop.permute.xlu0 %2570  ;;  %2276 = vrot.lane.b32.xlu1 %v13789_v14, %s17600_s29  ;;  %2422 = vrot.lane.b32.xlu2 %v13781_v45, %s11421_s26 }
 0x3a6   : > { %v4218_v46 = vadd.f32 %v13867_v35, %v4217_v8  ;;  %v3677_v3 = vsel %vm3603_vm9, %v3540_v2, %v2571_v63  ;;  %v11317_v8 = vld [vmem:[%s11534_s25 + $0x130] sm:$0xff] }
 0x3a7   : > { %v1960_v18 = vpop.permute.xlu1 %1959  ;;  %v13872_v40 = vpop.permute.xlu2 %2268  ;;  %v3814_v13 = vsel %vm3740_vm10, %v3677_v3, %v2718_v61  ;;  %v1697_v3 = vrot.slane %v13892_v12, 1 }
 0x3a8   : > { %v4467_v32 = vmax.f32 %v4218_v46, 0.0  ;;  %10294 = vmatmul.msk.bf16.gmra.mxu0 %vm3917_vm11, %v3814_v13 }
 0x3aa   : > { %v4799_v38 = vrot.slane %v4467_v32, 1 }
 0x3ab   : > { %2129 = vrot.lane.b32.xlu0 %v13753_v29, %s17604_s14 }
 0x3ad   : > { %v4219_v56 = vpop.f32.mrf.mxu0  ;;  %v1814_v4 = vpop.permute.xlu0 %1813  ;;  %2729 = vrot.lane.b32.xlu1 %v13881_v53, %s17602_s17  ;;  %1548 = vrot.lane.b32.xlu2 %v13734_v48, %s17598_s16  ;;  %v1294_v48 = vshrl.u32 %v13854_v22, 16 }
 0x3ae   : > { %v4220_v10 = vadd.f32 %v13867_v35, %v4219_v56  ;;  %v2994_v52 = vsel %vm17644_vm15, %v2857_v36, %v1814_v4  ;;  %v1699_v36 = vrot.slane %v13951_v26, 1  ;;  %vm17646_vm15 = vmmov %vm17628_vm12 }
 0x3af   : > { %v2413_v37 = vpop.permute.xlu1 %2412  ;;  %v13897_v42 = vpop.permute.xlu2 %2721  ;;  %v3131_v50 = vsel %vm3055_vm5, %v2994_v52, %v1960_v18  ;;  %v1296_v49 = vor.u32 %v1294_v48, %v1292_v23 }
 0x3b0   : > { %v4468_v7 = vmax.f32 %v4220_v10, 0.0  ;;  %v3268_v28 = vsel %vm3192_vm6, %v3131_v50, %v13811_v30 }
 0x3b1   : > { %v13922_v33 = vsel %vm913_vm1, %v1296_v49, %v1300_v59  ;;  %v5642_v49 = vld [vmem:[#allocation2 + $0x44] sm:$0x1] }
 0x3b2   : > { %v4801_v34 = vrot.slane %v4468_v7, 1 }
 0x3b3   : > { %2582 = vrot.lane.b32.xlu0 %v13901_v19, %s11428_s21 }
 0x3b4   : > { %v4802_v44 = vsel %vm1601_vm0, %v4799_v38, %v4801_v34 }
 0x3b5   : > { %v5147_v47 = vmax.f32 %v4467_v32, %v4802_v44  ;;  %v2267_v41 = vpop.permute.xlu0 %2266  ;;  %1971 = vrot.lane.b32.xlu1 %v13724_v6, %s17623_s24  ;;  %2131 = vrot.lane.b32.xlu2 %v13818_v43, %s17604_s14  ;;  %v13985_v44 = vsel %vm1601_vm0, %v1697_v3, %v1699_v36 }
 0x3b6   : > { %v3405_v5 = vsel %vm3329_vm7, %v3268_v28, %v2267_v41  ;;  %v5639_v28 = vld [vmem:[#allocation2 + $0x40] sm:$0xf] }
 0x3b7   : > { %v5279_v1 = vmax.f32 %v13797_v31, %v5147_v47  ;;  %v1539_v24 = vpop.permute.xlu1 %1538  ;;  %v13917_v15 = vpop.permute.xlu2 %1963  ;;  %v3542_v6 = vsel %vm3466_vm8, %v3405_v5, %v2413_v37 }
 0x3b8   : > { %v3679_v31 = vsel %vm3603_vm9, %v3542_v6, %v13832_v27  ;;  %v2859_v27 = vsel %vm2781_vm3, %v11317_v8, %v1539_v24 }
 0x3b9   : > { %5411 = vst.msk [vmem:[#allocation5 + $0x1c0] sm:$0xff] %vm3740_vm10, %v5279_v1  ;;  %v2996_v32 = vsel %vm17628_vm12, %v2859_v27, %v13850_v16  ;;  %v1306_v16 = vshll.u32 %v13951_v26, 16 }
 0x3bb   : > { %1825 = vrot.lane.b32.xlu0 %v13714_v57, %s17596_s28  ;;  %v1308_v54 = vrot.slane %v1306_v16, 1  ;;  %v14043_v16 = vld [vmem:[%s11534_s25 + $0x198] sm:$0xff] }
 0x3bc   : > { %v4222_v30 = vpop.f32.mrf.mxu0 }
 0x3bd   : > { %v4223_v20 = vadd.f32 %v13867_v35, %v4222_v30  ;;  %v2720_v51 = vpop.permute.xlu0 %2719  ;;  %2424 = vrot.lane.b32.xlu1 %v13854_v22, %s11421_s26  ;;  %2584 = vrot.lane.b32.xlu2 %v13922_v33, %s11428_s21 }
 0x3be   : > { %v3816_v60 = vsel %vm3740_vm10, %v3679_v31, %v2720_v51 }
 0x3bf   : > { %v4469_v9 = vmax.f32 %v4223_v20, 0.0  ;;  %10295 = vmatmul.msk.bf16.gmra.mxu0 %vm3917_vm11, %v3816_v60  ;;  %v2122_v57 = vpop.permute.xlu1 %2121  ;;  %v13935_v61 = vpop.permute.xlu2 %2416  ;;  %v11318_v20 = vld [vmem:[%s11534_s25 + $0x138] sm:$0xff] }
 0x3c1   : > { %v4803_v17 = vrot.slane %v4469_v9, 1 }
 0x3c3   : > { %v4804_v2 = vsel %vm1601_vm0, %v4801_v34, %v4803_v17  ;;  %2278 = vrot.lane.b32.xlu0 %v13821_v62, %s17600_s29 }
 0x3c4   : > { %v5148_v63 = vmax.f32 %v4468_v7, %v4804_v2  ;;  %v4224_v46 = vpop.f32.mrf.mxu0  ;;  %v14015_v2 = vld [vmem:[%s11534_s25 + $0x190] sm:$0xff] }
 0x3c5   : > { %v1962_v18 = vpop.permute.xlu0 %1961  ;;  %1550 = vrot.lane.b32.xlu1 %v13753_v29, %s17598_s16  ;;  %1827 = vrot.lane.b32.xlu2 %v13789_v14, %s17596_s28  ;;  %v13960_v29 = vsel %vm1601_vm0, %v1695_v11, %v1697_v3  ;;  %v1302_v14 = vshrl.u32 %v13892_v12, 16  ;;  %v1701_v46 = vrot.slane %v14015_v2, 1 }
 0x3c6   : > { %v5280_v13 = vmax.f32 %v13830_v58, %v5148_v63  ;;  %v3133_v25 = vsel %vm3055_vm5, %v2996_v32, %v1962_v18 }
 0x3c7   : > { %v2575_v38 = vpop.permute.xlu1 %2574  ;;  %v13954_v0 = vpop.permute.xlu2 %1542  ;;  %v3270_v58 = vsel %vm3192_vm6, %v3133_v25, %v2122_v57  ;;  %v1304_v11 = vor.u32 %v1302_v14, %v1300_v59  ;;  %v14034_v32 = vsel %vm1601_vm0, %v1699_v36, %v1701_v46  ;;  %v1318_v36 = vshrl.u32 %v14015_v2, 16 }
 0x3c8   : > { %5412 = vst.msk [vmem:[#allocation5 + $0x1c8] sm:$0xff] %vm3740_vm10, %v5280_v13  ;;  %v3407_v23 = vsel %vm3329_vm7, %v3270_v58, %v13872_v40  ;;  %v1314_v13 = vshll.u32 %v14015_v2, 16 }
 0x3c9   : > { %v13982_v50 = vsel %vm913_vm1, %v1304_v11, %v1308_v54 }
 0x3cb   : > { %2731 = vrot.lane.b32.xlu0 %v13960_v29, %s17602_s17 }
 0x3cd   : > { %v2415_v56 = vpop.permute.xlu0 %2414  ;;  %2133 = vrot.lane.b32.xlu1 %v13901_v19, %s17604_s14  ;;  %2280 = vrot.lane.b32.xlu2 %v13881_v53, %s17600_s29 }
 0x3ce   : > { %v3544_v4 = vsel %vm3466_vm8, %v3407_v23, %v2415_v56  ;;  %v4227_v10 = vpop.f32.mrf.mxu0  ;;  %v11319_v23 = vld [vmem:[%s11534_s25 + $0x140] sm:$0xff] }
 0x3cf   : > { %v5627_v37 = vld [vmem:[#allocation5 + $0x1c0] ss:$2 sm:$0xff]  ;;  %v3681_v7 = vsel %vm3603_vm9, %v3544_v4, %v2575_v38  ;;  %v1818_v52 = vpop.permute.xlu1 %1817  ;;  %v13976_v34 = vpop.permute.xlu2 %2125  ;;  %v1316_v38 = vrot.slane %v1314_v13, 1  ;;  %v2863_v56 = vsel %vm2781_vm3, %v11319_v23, %v13954_v0  ;;  %v11321_v23 = vld [vmem:[%s11534_s25 + $0x150] sm:$0xff] }
 0x3d0   : > { %v5628_v40 = vpack.c.bf16 %v5627_v37, %v5627_v37  ;;  %v3818_v48 = vsel %vm3740_vm10, %v3681_v7, %v13897_v42  ;;  %v1322_v37 = vshll.u32 %v14043_v16, 16 }
 0x3d1   : > { %10296 = vmatmul.msk.bf16.gmra.mxu0 %vm3917_vm11, %v3818_v48 }
 0x3d2   : > { %v5630_v21 = vshrl.u32 %v5628_v40, 16  ;;  %v5633_v41 = vshll.u32 %v5628_v40, 16  ;;  %v1324_v40 = vrot.slane %v1322_v37, 1 }
 0x3d3   : > { %1973 = vrot.lane.b32.xlu0 %v13781_v45, %s17623_s24 }
 0x3d4   : > { %v5632_v47 = vrot.slane %v5630_v21, 7 }
 0x3d5   : > { %v1541_v59 = vpop.permute.xlu0 %1540  ;;  %2586 = vrot.lane.b32.xlu1 %v13982_v50, %s11428_s21  ;;  %2733 = vrot.lane.b32.xlu2 %v13985_v44, %s17602_s17 }
 0x3d6   : > { %v5635_v42 = vor.u32 %v5633_v41, %v5632_v47  ;;  %v5636_v1 = vrot.slane %v5632_v47, 4  ;;  %v4229_v5 = vpop.f32.mrf.mxu0  ;;  %v2861_v31 = vsel %vm2781_vm3, %v11318_v20, %v1541_v59  ;;  %v14090_v20 = vld [vmem:[%s11534_s25 + $0x1a0] sm:$0xff] }
 0x3d7   : > { %v2271_v24 = vpop.permute.xlu1 %2270  ;;  %v13993_v6 = vpop.permute.xlu2 %2578  ;;  %v2998_v51 = vsel %vm17645_vm13, %v2861_v31, %v1818_v52  ;;  %v1320_v52 = vor.u32 %v1318_v36, %v1316_v38  ;;  %v11320_v5 = vld [vmem:[%s11534_s25 + $0x148] sm:$0xff]  ;;  %vm17647_vm13 = vmmov %vm17628_vm12 }
 0x3d8   : > { %v5640_v45 = vsel %vm12561_vm2, %v5635_v42, %v5639_v28  ;;  %v5643_v30 = vsel %vm12570_vm4, %v5636_v1, %v5642_v49  ;;  %v3135_v9 = vsel %vm3055_vm5, %v2998_v51, %v13917_v15 }
 0x3d9   : > { %5641 = vst [vmem:[#allocation2 + $0x40] sm:$0xf] %v5640_v45  ;;  %v14066_v28 = vsel %vm913_vm1, %v1320_v52, %v1324_v40 }
 0x3da   : > { %5644 = vst [vmem:[#allocation2 + $0x44] sm:$0x1] %v5643_v30 }
 0x3db   : > { %2426 = vrot.lane.b32.xlu0 %v13892_v12, %s11421_s26 }
 0x3dd   : > { %v2124_v60 = vpop.permute.xlu0 %2123  ;;  %1829 = vrot.lane.b32.xlu1 %v13821_v62, %s17596_s28  ;;  %1975 = vrot.lane.b32.xlu2 %v13854_v22, %s17623_s24 }
 0x3de   : > { %v3272_v57 = vsel %vm3192_vm6, %v3135_v9, %v2124_v60 }
 0x3df   : > { %v2724_v17 = vpop.permute.xlu1 %2723  ;;  %v14011_v8 = vpop.permute.xlu2 %1821  ;;  %v3409_v27 = vsel %vm3329_vm7, %v3272_v57, %v2271_v24  ;;  %v1326_v57 = vshrl.u32 %v14043_v16, 16 }
 0x3e0   : > { %v3546_v62 = vsel %vm3466_vm8, %v3409_v27, %v13935_v61  ;;  %v1310_v61 = vshrl.u32 %v13951_v26, 16 }
 0x3e1   : > { %v1328_v27 = vor.u32 %v1326_v57, %v1324_v40 }
 0x3e2   : > { %v1312_v25 = vor.u32 %v1310_v61, %v1308_v54 }
 0x3e3   : > { %1552 = vrot.lane.b32.xlu0 %v13818_v43, %s17598_s16 }
 0x3e4   : > { %v14050_v54 = vsel %vm913_vm1, %v1312_v25, %v1316_v38 }
 0x3e5   : > { %v4232_v63 = vpop.f32.mrf.mxu0  ;;  %v2577_v22 = vpop.permute.xlu0 %2576  ;;  %2282 = vrot.lane.b32.xlu1 %v13960_v29, %s17600_s29  ;;  %2428 = vrot.lane.b32.xlu2 %v13951_v26, %s11421_s26 }
 0x3e6   : > { %v3683_v15 = vsel %vm3603_vm9, %v3546_v62, %v2577_v22 }
 0x3e7   : > { %v1966_v3 = vpop.permute.xlu1 %1965  ;;  %v14027_v18 = vpop.permute.xlu2 %2274  ;;  %v3820_v43 = vsel %vm3740_vm10, %v3683_v15, %v2724_v17  ;;  %v1330_v17 = vshll.u32 %v14090_v20, 16  ;;  %v1705_v15 = vrot.slane %v14090_v20, 1 }
 0x3e8   : > { %10297 = vmatmul.msk.bf16.gmra.mxu0 %vm3917_vm11, %v3820_v43 }
 0x3e9   : > { %v1332_v22 = vrot.slane %v1330_v17, 1 }
 0x3eb   : > { %2135 = vrot.lane.b32.xlu0 %v13922_v33, %s17604_s14  ;;  %v14117_v61 = vsel %vm913_vm1, %v1328_v27, %v1332_v22 }
 0x3ed   : > { %v4234_v14 = vpop.f32.mrf.mxu0  ;;  %v1820_v58 = vpop.permute.xlu0 %1819  ;;  %2735 = vrot.lane.b32.xlu1 %v14034_v32, %s17602_s17  ;;  %1554 = vrot.lane.b32.xlu2 %v13901_v19, %s17598_s16 }
 0x3ee   : > { %v3000_v10 = vsel %vm17646_vm15, %v2863_v56, %v1820_v58  ;;  %vm17648_vm15 = vmmov %vm17628_vm12 }
 0x3ef   : > { %v2419_v11 = vpop.permute.xlu1 %2418  ;;  %v2728_v4 = vpop.permute.xlu2 %2727  ;;  %v3137_v7 = vsel %vm3055_vm5, %v3000_v10, %v1966_v3 }
 0x3f0   : > { %v3274_v0 = vsel %vm3192_vm6, %v3137_v7, %v13976_v34 }
 0x3f3   : > { %2588 = vrot.lane.b32.xlu0 %v14050_v54, %s11428_s21 }
 0x3f5   : > { %v2273_v19 = vpop.permute.xlu0 %2272  ;;  %1977 = vrot.lane.b32.xlu1 %v13892_v12, %s17623_s24  ;;  %2137 = vrot.lane.b32.xlu2 %v13982_v50, %s17604_s14 }
 0x3f6   : > { %v3411_v48 = vsel %vm3329_vm7, %v3274_v0, %v2273_v19  ;;  %v14145_v19 = vld [vmem:[%s11534_s25 + $0x1a8] sm:$0xff] }
 0x3f7   : > { %v1545_v21 = vpop.permute.xlu1 %1544  ;;  %v1970_v47 = vpop.permute.xlu2 %1969  ;;  %v3548_v41 = vsel %vm3466_vm8, %v3411_v48, %v2419_v11  ;;  %v1707_v48 = vrot.slane %v14145_v19, 1 }
 0x3f8   : > { %v3685_v49 = vsel %vm3603_vm9, %v3548_v41, %v13993_v6  ;;  %v1703_v6 = vrot.slane %v14043_v16, 1 }
 0x3fa   : > { %v14096_v9 = vsel %vm1601_vm0, %v1701_v46, %v1703_v6  ;;  %v14120_v13 = vsel %vm1601_vm0, %v1703_v6, %v1705_v15  ;;  %v14176_v6 = vld [vmem:[%s11534_s25 + $0x1b0] sm:$0xff] }
 0x3fb   : > { %1831 = vrot.lane.b32.xlu0 %v13881_v53, %s17596_s28  ;;  %v2865_v53 = vsel %vm2781_vm3, %v11320_v5, %v1545_v21 }
 0x3fc   : > { %v4237_v12 = vpop.f32.mrf.mxu0  ;;  %v3002_v30 = vsel %vm17628_vm12, %v2865_v53, %v14011_v8 }
 0x3fd   : > { %v2726_v34 = vpop.permute.xlu0 %2725  ;;  %2430 = vrot.lane.b32.xlu1 %v14015_v2, %s11421_s26  ;;  %2590 = vrot.lane.b32.xlu2 %v14066_v28, %s11428_s21  ;;  %v1334_v12 = vshrl.u32 %v14090_v20, 16 }
 0x3fe   : > { %v3822_v59 = vsel %vm3740_vm10, %v3685_v49, %v2726_v34  ;;  %v1338_v49 = vshll.u32 %v14145_v19, 16 }
 0x3ff   : > { %10298 = vmatmul.msk.bf16.gmra.mxu0 %vm3917_vm11, %v3822_v59  ;;  %v2128_v42 = vpop.permute.xlu1 %2127  ;;  %v2423_v1 = vpop.permute.xlu2 %2422  ;;  %v14166_v59 = vsel %vm1601_vm0, %v1705_v15, %v1707_v48 }
 0x403   : > { %2284 = vrot.lane.b32.xlu0 %v13985_v44, %s17600_s29 }
 0x404   : > { %v4239_v24 = vpop.f32.mrf.mxu0 }
 0x405   : > { %v1968_v45 = vpop.permute.xlu0 %1967  ;;  %1556 = vrot.lane.b32.xlu1 %v13922_v33, %s17598_s16  ;;  %1833 = vrot.lane.b32.xlu2 %v13960_v29, %s17596_s28 }
 0x406   : > { %v3139_v31 = vsel %vm3055_vm5, %v3002_v30, %v1968_v45  ;;  %v11322_v45 = vld [vmem:[%s11534_s25 + $0x158] sm:$0xff] }
 0x407   : > { %v2581_v51 = vpop.permute.xlu1 %2580  ;;  %v14093_v60 = vpop.permute.xlu2 %1548  ;;  %v3276_v33 = vsel %vm3192_vm6, %v3139_v31, %v2128_v42  ;;  %v1336_v42 = vor.u32 %v1334_v12, %v1332_v22 }
 0x408   : > { %v3413_v29 = vsel %vm3329_vm7, %v3276_v33, %v14027_v18  ;;  %v2869_v30 = vsel %vm2781_vm3, %v11322_v45, %v14093_v60 }
 0x40b   : > { %2737 = vrot.lane.b32.xlu0 %v14096_v9, %s17602_s17 }
 0x40d   : > { %v2421_v8 = vpop.permute.xlu0 %2420  ;;  %2139 = vrot.lane.b32.xlu1 %v14050_v54, %s17604_s14  ;;  %2286 = vrot.lane.b32.xlu2 %v14034_v32, %s17600_s29 }
 0x40e   : > { %v3550_v63 = vsel %vm3466_vm8, %v3413_v29, %v2421_v8  ;;  %v4242_v62 = vpop.f32.mrf.mxu0  ;;  %v1346_v8 = vshll.u32 %v14176_v6, 16 }
 0x40f   : > { %v3687_v46 = vsel %vm3603_vm9, %v3550_v63, %v2581_v51  ;;  %v1824_v3 = vpop.permute.xlu1 %1823  ;;  %v14112_v43 = vpop.permute.xlu2 %2131 }
 0x410   : > { %v3824_v18 = vsel %vm3740_vm10, %v3687_v46, %v2728_v4  ;;  %v1348_v46 = vrot.slane %v1346_v8, 1 }
 0x411   : > { %10299 = vmatmul.msk.bf16.gmra.mxu0 %vm3917_vm11, %v3824_v18 }
 0x413   : > { %1979 = vrot.lane.b32.xlu0 %v13951_v26, %s17623_s24 }
 0x415   : > { %v1547_v25 = vpop.permute.xlu0 %1546  ;;  %2592 = vrot.lane.b32.xlu1 %v14117_v61, %s11428_s21  ;;  %2739 = vrot.lane.b32.xlu2 %v14120_v13, %s17602_s17 }
 0x416   : > { %v4244_v38 = vpop.f32.mrf.mxu0  ;;  %v2867_v56 = vsel %vm2781_vm3, %v11321_v23, %v1547_v25 }
 0x417   : > { %v2277_v14 = vpop.permute.xlu1 %2276  ;;  %v14128_v58 = vpop.permute.xlu2 %2584  ;;  %v3004_v11 = vsel %vm17647_vm13, %v2867_v56, %v1824_v3  ;;  %vm17649_vm13 = vmmov %vm17628_vm12 }
 0x418   : > { %v3141_v4 = vsel %vm3055_vm5, %v3004_v11, %v1970_v47 }
 0x41b   : > { %2432 = vrot.lane.b32.xlu0 %v14043_v16, %s11421_s26 }
 0x41d   : > { %v2130_v26 = vpop.permute.xlu0 %2129  ;;  %1835 = vrot.lane.b32.xlu1 %v13985_v44, %s17596_s28  ;;  %1981 = vrot.lane.b32.xlu2 %v14015_v2, %s17623_s24 }
 0x41e   : > { %v3278_v10 = vsel %vm3192_vm6, %v3141_v4, %v2130_v26 }
 0x41f   : > { %v2730_v36 = vpop.permute.xlu1 %2729  ;;  %v14141_v37 = vpop.permute.xlu2 %1827  ;;  %v3415_v7 = vsel %vm3329_vm7, %v3278_v10, %v2277_v14 }
 0x420   : > { %v3552_v44 = vsel %vm3466_vm8, %v3415_v7, %v2423_v1  ;;  %v1340_v1 = vrot.slane %v1338_v49, 1 }
 0x422   : > { %v14185_v17 = vsel %vm913_vm1, %v1336_v42, %v1340_v1 }
 0x423   : > { %1558 = vrot.lane.b32.xlu0 %v13982_v50, %s17598_s16 }
 0x425   : > { %v4247_v0 = vpop.f32.mrf.mxu0  ;;  %v2583_v52 = vpop.permute.xlu0 %2582  ;;  %2288 = vrot.lane.b32.xlu1 %v14096_v9, %s17600_s29  ;;  %2434 = vrot.lane.b32.xlu2 %v14090_v20, %s11421_s26 }
 0x426   : > { %v4248_v2 = vadd.f32 %v13867_v35, %v4247_v0  ;;  %v3689_v40 = vsel %vm3603_vm9, %v3552_v44, %v2583_v52  ;;  %v1709_v52 = vrot.slane %v14176_v6, 1 }
 0x427   : > { %v1972_v21 = vpop.permute.xlu1 %1971  ;;  %v14157_v47 = vpop.permute.xlu2 %2280  ;;  %v3826_v50 = vsel %vm3740_vm10, %v3689_v40, %v2730_v36  ;;  %v11323_v36 = vld [vmem:[%s11534_s25 + $0x160] sm:$0xff] }
 0x428   : > { %v4479_v41 = vmax.f32 %v4248_v2, 0.0  ;;  %10300 = vmatmul.msk.bf16.gmra.mxu0 %vm3917_vm11, %v3826_v50  ;;  %v14244_v49 = vsel %vm1601_vm0, %v1707_v48, %v1709_v52 }
 0x42a   : > { %v4823_v34 = vrot.slane %v4479_v41, 1 }
 0x42b   : > { %2141 = vrot.lane.b32.xlu0 %v14066_v28, %s17604_s14 }
 0x42d   : > { %v4249_v5 = vpop.f32.mrf.mxu0  ;;  %v1826_v53 = vpop.permute.xlu0 %1825  ;;  %2741 = vrot.lane.b32.xlu1 %v14166_v59, %s17602_s17  ;;  %1560 = vrot.lane.b32.xlu2 %v14050_v54, %s17598_s16  ;;  %v1342_v54 = vshrl.u32 %v14145_v19, 16 }
 0x42e   : > { %v4250_v24 = vadd.f32 %v13867_v35, %v4249_v5  ;;  %v3006_v33 = vsel %vm17648_vm15, %v2869_v30, %v1826_v53  ;;  %vm17650_vm15 = vmmov %vm17628_vm12 }
 0x42f   : > { %v2425_v31 = vpop.permute.xlu1 %2424  ;;  %v14181_v51 = vpop.permute.xlu2 %2733  ;;  %v3143_v27 = vsel %vm3055_vm5, %v3006_v33, %v1972_v21  ;;  %v1344_v15 = vor.u32 %v1342_v54, %v1340_v1  ;;  %v14236_v21 = vld [vmem:[%s11534_s25 + $0x1b8] sm:$0xff] }
 0x430   : > { %v4480_v57 = vmax.f32 %v4250_v24, 0.0  ;;  %v3280_v22 = vsel %vm3192_vm6, %v3143_v27, %v14112_v43  ;;  %v1711_v24 = vrot.slane %v14236_v21, 1 }
 0x431   : > { %v14206_v14 = vsel %vm913_vm1, %v1344_v15, %v1348_v46  ;;  %v11324_v15 = vld [vmem:[%s11534_s25 + $0x168] sm:$0xff] }
 0x432   : > { %v4825_v29 = vrot.slane %v4480_v57, 1  ;;  %v14270_v54 = vsel %vm1601_vm0, %v1709_v52, %v1711_v24 }
 0x433   : > { %2594 = vrot.lane.b32.xlu0 %v14185_v17, %s11428_s21 }
 0x434   : > { %v4826_v60 = vsel %vm1601_vm0, %v4823_v34, %v4825_v29 }
 0x435   : > { %v14193_v63 = vmax.f32 %v4479_v41, %v4826_v60  ;;  %v2279_v62 = vpop.permute.xlu0 %2278  ;;  %1983 = vrot.lane.b32.xlu1 %v14043_v16, %s17623_s24  ;;  %2143 = vrot.lane.b32.xlu2 %v14117_v61, %s17604_s14 }
 0x436   : > { %v3417_v3 = vsel %vm3329_vm7, %v3280_v22, %v2279_v62 }
 0x437   : > { %v1551_v18 = vpop.permute.xlu1 %1550  ;;  %v14202_v25 = vpop.permute.xlu2 %1975  ;;  %v3554_v38 = vsel %vm3466_vm8, %v3417_v3, %v2425_v31 }
 0x438   : > { %v3691_v43 = vsel %vm3603_vm9, %v3554_v38, %v14128_v58  ;;  %v2871_v58 = vsel %vm2781_vm3, %v11323_v36, %v1551_v18  ;;  %v14300_v36 = vld [vmem:[%s11534_s25 + $0x1c0] sm:$0xff] }
 0x439   : > { %v3008_v40 = vsel %vm17628_vm12, %v2871_v58, %v14141_v37 }
 0x43b   : > { %1837 = vrot.lane.b32.xlu0 %v14034_v32, %s17596_s28 }
 0x43c   : > { %v4252_v16 = vpop.f32.mrf.mxu0 }
 0x43d   : > { %v4253_v23 = vadd.f32 %v13867_v35, %v4252_v16  ;;  %v2732_v56 = vpop.permute.xlu0 %2731  ;;  %2436 = vrot.lane.b32.xlu1 %v14145_v19, %s11421_s26  ;;  %2596 = vrot.lane.b32.xlu2 %v14206_v14, %s11428_s21 }
 0x43e   : > { %v3828_v11 = vsel %vm3740_vm10, %v3691_v43, %v2732_v56 }
 0x43f   : > { %v4481_v26 = vmax.f32 %v4253_v23, 0.0  ;;  %10301 = vmatmul.msk.bf16.gmra.mxu0 %vm3917_vm11, %v3828_v11  ;;  %v2134_v32 = vpop.permute.xlu1 %2133  ;;  %v14219_v4 = vpop.permute.xlu2 %2428 }
 0x441   : > { %v4827_v10 = vrot.slane %v4481_v26, 1 }
 0x443   : > { %v4828_v7 = vsel %vm1601_vm0, %v4825_v29, %v4827_v10  ;;  %2290 = vrot.lane.b32.xlu0 %v14120_v13, %s17600_s29 }
 0x444   : > { %v14226_v0 = vmax.f32 %v4480_v57, %v4828_v7  ;;  %v4254_v44 = vpop.f32.mrf.mxu0  ;;  %v1713_v7 = vrot.slane %v14300_v36, 1 }
 0x445   : > { %v1974_v2 = vpop.permute.xlu0 %1973  ;;  %1562 = vrot.lane.b32.xlu1 %v14066_v28, %s17598_s16  ;;  %1839 = vrot.lane.b32.xlu2 %v14096_v9, %s17596_s28  ;;  %v1350_v28 = vshrl.u32 %v14176_v6, 16  ;;  %v1354_v9 = vshll.u32 %v14236_v21, 16 }
 0x446   : > { %v3145_v50 = vsel %vm3055_vm5, %v3008_v40, %v1974_v2  ;;  %v1358_v2 = vshrl.u32 %v14236_v21, 16  ;;  %v1362_v40 = vshll.u32 %v14300_v36, 16 }
 0x447   : > { %v2587_v41 = vpop.permute.xlu1 %2586  ;;  %v14239_v12 = vpop.permute.xlu2 %1554  ;;  %v3282_v34 = vsel %vm3192_vm6, %v3145_v50, %v2134_v32  ;;  %v1352_v48 = vor.u32 %v1350_v28, %v1348_v46  ;;  %v1356_v53 = vrot.slane %v1354_v9, 1 }
 0x448   : > { %v3419_v37 = vsel %vm3329_vm7, %v3282_v34, %v14157_v47  ;;  %v1364_v34 = vrot.slane %v1362_v40, 1 }
 0x449   : > { %v14267_v29 = vsel %vm913_vm1, %v1352_v48, %v1356_v53  ;;  %v1360_v28 = vor.u32 %v1358_v2, %v1356_v53  ;;  %v14332_v48 = vld [vmem:[%s11534_s25 + $0x1c8] sm:$0xff] }
 0x44a   : > { %v1715_v40 = vrot.slane %v14332_v48, 1 }
 0x44b   : > { %2743 = vrot.lane.b32.xlu0 %v14244_v49, %s17602_s17 }
 0x44d   : > { %v2427_v42 = vpop.permute.xlu0 %2426  ;;  %2145 = vrot.lane.b32.xlu1 %v14185_v17, %s17604_s14  ;;  %2292 = vrot.lane.b32.xlu2 %v14166_v59, %s17600_s29 }
 0x44e   : > { %v3556_v1 = vsel %vm3466_vm8, %v3419_v37, %v2427_v42  ;;  %v4257_v5 = vpop.f32.mrf.mxu0 }
 0x44f   : > { %v3693_v45 = vsel %vm3603_vm9, %v3556_v1, %v2587_v41  ;;  %v4258_v30 = vadd.f32 %v13867_v35, %v4257_v5  ;;  %v1830_v31 = vpop.permute.xlu1 %1829  ;;  %v14261_v47 = vpop.permute.xlu2 %2137  ;;  %v11325_v1 = vld [vmem:[%s11534_s25 + $0x170] sm:$0xff] }
 0x450   : > { %v3830_v57 = vsel %vm3740_vm10, %v3693_v45, %v14181_v51  ;;  %v2875_v5 = vsel %vm2781_vm3, %v11325_v1, %v14239_v12 }
 0x451   : > { %v4483_v33 = vmax.f32 %v4258_v30, 0.0  ;;  %10302 = vmatmul.msk.bf16.gmra.mxu0 %vm3917_vm11, %v3830_v57  ;;  %v1370_v57 = vshll.u32 %v14332_v48, 16 }
 0x453   : > { %v4831_v8 = vrot.slane %v4483_v33, 1  ;;  %1985 = vrot.lane.b32.xlu0 %v14090_v20, %s17623_s24 }
 0x455   : > { %v1553_v27 = vpop.permute.xlu0 %1552  ;;  %2598 = vrot.lane.b32.xlu1 %v14267_v29, %s11428_s21  ;;  %2745 = vrot.lane.b32.xlu2 %v14270_v54, %s17602_s17 }
 0x456   : > { %v4259_v51 = vpop.f32.mrf.mxu0  ;;  %v2873_v46 = vsel %vm2781_vm3, %v11324_v15, %v1553_v27  ;;  %v1372_v27 = vrot.slane %v1370_v57, 1 }
 0x457   : > { %v4260_v60 = vadd.f32 %v13867_v35, %v4259_v51  ;;  %v2283_v62 = vpop.permute.xlu1 %2282  ;;  %v14279_v22 = vpop.permute.xlu2 %2590  ;;  %v3010_v20 = vsel %vm17649_vm13, %v2873_v46, %v1830_v31  ;;  %v14342_v31 = vsel %vm913_vm1, %v1360_v28, %v1364_v34  ;;  %vm17651_vm13 = vmmov %vm17628_vm12 }
 0x458   : > { %v3147_v43 = vsel %vm3055_vm5, %v3010_v20, %v14202_v25 }
 0x459   : > { %v4484_v3 = vmax.f32 %v4260_v60, 0.0 }
 0x45b   : > { %v4833_v18 = vrot.slane %v4484_v3, 1  ;;  %2438 = vrot.lane.b32.xlu0 %v14176_v6, %s11421_s26 }
 0x45d   : > { %v4834_v38 = vsel %vm1601_vm0, %v4831_v8, %v4833_v18  ;;  %v2136_v16 = vpop.permute.xlu0 %2135  ;;  %1841 = vrot.lane.b32.xlu1 %v14120_v13, %s17596_s28  ;;  %1987 = vrot.lane.b32.xlu2 %v14145_v19, %s17623_s24 }
 0x45e   : > { %v5163_v23 = vmax.f32 %v4483_v33, %v4834_v38  ;;  %v3284_v56 = vsel %vm3192_vm6, %v3147_v43, %v2136_v16  ;;  %v14368_v16 = vld [vmem:[%s17585_s2] ss:$0 sm:$0xff] }
 0x45f   : > { %v2736_v11 = vpop.permute.xlu1 %2735  ;;  %v14294_v26 = vpop.permute.xlu2 %1833  ;;  %v3421_v10 = vsel %vm3329_vm7, %v3284_v56, %v2283_v62 }
 0x460   : > { %v5295_v32 = vmax.f32 %v14193_v63, %v5163_v23  ;;  %v3558_v19 = vsel %vm3466_vm8, %v3421_v10, %v14219_v4 }
 0x462   : > { %5427 = vst.msk [vmem:[#allocation5 + $0x240] sm:$0xff] %vm3740_vm10, %v5295_v32 }
 0x463   : > { %1564 = vrot.lane.b32.xlu0 %v14117_v61, %s17598_s16 }
 0x465   : > { %v4262_v13 = vpop.f32.mrf.mxu0  ;;  %v2589_v25 = vpop.permute.xlu0 %2588  ;;  %2294 = vrot.lane.b32.xlu1 %v14244_v49, %s17600_s29  ;;  %2440 = vrot.lane.b32.xlu2 %v14236_v21, %s11421_s26 }
 0x466   : > { %v4263_v63 = vadd.f32 %v13867_v35, %v4262_v13  ;;  %v3695_v58 = vsel %vm3603_vm9, %v3558_v19, %v2589_v25  ;;  %v14322_v35 = vsel %vm1601_vm0, %v1711_v24, %v1713_v7 }
 0x467   : > { %v1978_v44 = vpop.permute.xlu1 %1977  ;;  %v14313_v52 = vpop.permute.xlu2 %2286  ;;  %v3832_v61 = vsel %vm3740_vm10, %v3695_v58, %v2736_v11  ;;  %v5661_v11 = vld [vmem:[#allocation2 + $0x5c] sm:$0x1] }
 0x468   : > { %v4485_v4 = vmax.f32 %v4263_v63, 0.0  ;;  %10303 = vmatmul.msk.bf16.gmra.mxu0 %vm3917_vm11, %v3832_v61  ;;  %v11327_v61 = vld [vmem:[%s11534_s25 + $0x178] sm:$0xff] }
 0x46a   : > { %v4835_v50 = vrot.slane %v4485_v4, 1 }
 0x46b   : > { %2147 = vrot.lane.b32.xlu0 %v14206_v14, %s17604_s14 }
 0x46c   : > { %v4836_v41 = vsel %vm1601_vm0, %v4833_v18, %v4835_v50 }
 0x46d   : > { %v5164_v9 = vmax.f32 %v4484_v3, %v4836_v41  ;;  %v4264_v37 = vpop.f32.mrf.mxu0  ;;  %v1832_v42 = vpop.permute.xlu0 %1831  ;;  %2747 = vrot.lane.b32.xlu1 %v14322_v35, %s17602_s17  ;;  %1566 = vrot.lane.b32.xlu2 %v14185_v17, %s17598_s16  ;;  %v1366_v17 = vshrl.u32 %v14300_v36, 16 }
 0x46e   : > { %v3012_v30 = vsel %vm17650_vm15, %v2875_v5, %v1832_v42  ;;  %v14406_v5 = vsel %vm1601_vm0, %v1713_v7, %v1715_v40  ;;  %vm17652_vm15 = vmmov %vm17628_vm12 }
 0x46f   : > { %v5296_v24 = vmax.f32 %v14226_v0, %v5164_v9  ;;  %v2431_v45 = vpop.permute.xlu1 %2430  ;;  %v14338_v53 = vpop.permute.xlu2 %2739  ;;  %v3149_v33 = vsel %vm3055_vm5, %v3012_v30, %v1978_v44  ;;  %v1368_v8 = vor.u32 %v1366_v17, %v1364_v34  ;;  %v14398_v34 = vld [vmem:[%s11534_s25 + $0x1d0] sm:$0xff] }
 0x470   : > { %v3286_v12 = vsel %vm3192_vm6, %v3149_v33, %v14261_v47 }
 0x471   : > { %5428 = vst.msk [vmem:[#allocation5 + $0x248] sm:$0xff] %vm3740_vm10, %v5296_v24  ;;  %v14361_v20 = vsel %vm913_vm1, %v1368_v8, %v1372_v27  ;;  %v1374_v24 = vshrl.u32 %v14332_v48, 16  ;;  %v1717_v8 = vrot.slane %v14398_v34, 1 }
 0x473   : > { %2600 = vrot.lane.b32.xlu0 %v14342_v31, %s11428_s21  ;;  %v1376_v7 = vor.u32 %v1374_v24, %v1372_v27 }
 0x475   : > { %v2285_v0 = vpop.permute.xlu0 %2284  ;;  %1989 = vrot.lane.b32.xlu1 %v14176_v6, %s17623_s24  ;;  %2149 = vrot.lane.b32.xlu2 %v14267_v29, %s17604_s14 }
 0x476   : > { %v3423_v51 = vsel %vm3329_vm7, %v3286_v12, %v2285_v0 }
 0x477   : > { %v1557_v60 = vpop.permute.xlu1 %1556  ;;  %v14357_v62 = vpop.permute.xlu2 %1981  ;;  %v3560_v3 = vsel %vm3466_vm8, %v3423_v51, %v2431_v45 }
 0x478   : > { %v5646_v15 = vld [vmem:[#allocation5 + $0x240] ss:$2 sm:$0xff]  ;;  %v3697_v43 = vsel %vm3603_vm9, %v3560_v3, %v14279_v22  ;;  %v2877_v4 = vsel %vm2781_vm3, %v11327_v61, %v1557_v60 }
 0x479   : > { %v5647_v46 = vpack.c.bf16 %v5646_v15, %v5646_v15  ;;  %v3014_v28 = vsel %vm17628_vm12, %v2877_v4, %v14294_v26  ;;  %v1378_v26 = vshll.u32 %v14398_v34, 16 }
 0x47b   : > { %v5649_v6 = vshrl.u32 %v5647_v46, 16  ;;  %1843 = vrot.lane.b32.xlu0 %v14166_v59, %s17596_s28  ;;  %v5652_v38 = vshll.u32 %v5647_v46, 16  ;;  %v5658_v59 = vld [vmem:[#allocation2 + $0x58] sm:$0xf]  ;;  %v1380_v12 = vrot.slane %v1378_v26, 1 }
 0x47c   : > { %v4267_v18 = vpop.f32.mrf.mxu0 }
 0x47d   : > { %v5651_v47 = vrot.slane %v5649_v6, 7  ;;  %v4268_v23 = vadd.f32 %v14368_v16, %v4267_v18  ;;  %v2738_v56 = vpop.permute.xlu0 %2737  ;;  %2442 = vrot.lane.b32.xlu1 %v14300_v36, %s11421_s26  ;;  %2602 = vrot.lane.b32.xlu2 %v14361_v20, %s11428_s21  ;;  %v14432_v27 = vsel %vm913_vm1, %v1376_v7, %v1380_v12  ;;  %v14435_v6 = vsel %vm1601_vm0, %v1715_v40, %v1717_v8 }
 0x47e   : > { %v3834_v32 = vsel %vm3740_vm10, %v3697_v43, %v2738_v56 }
 0x47f   : > { %v5654_v10 = vor.u32 %v5652_v38, %v5651_v47  ;;  %v5655_v13 = vrot.slane %v5651_v47, 4  ;;  %v4487_v19 = vmax.f32 %v4268_v23, 0.0  ;;  %10304 = vmatmul.msk.bf16.gmra.mxu0 %vm3917_vm11, %v3834_v32  ;;  %v2140_v25 = vpop.permute.xlu1 %2139  ;;  %v14379_v63 = vpop.permute.xlu2 %2434 }
 0x481   : > { %v5659_v22 = vsel %vm12561_vm2, %v5654_v10, %v5658_v59  ;;  %v5662_v58 = vsel %vm12570_vm4, %v5655_v13, %v5661_v11  ;;  %v4839_v44 = vrot.slane %v4487_v19, 1  ;;  %v11328_v59 = vld [vmem:[%s11534_s25 + $0x180] sm:$0xff] }
 0x482   : > { %5660 = vst [vmem:[#allocation2 + $0x58] sm:$0xf] %v5659_v22 }
 0x483   : > { %5663 = vst [vmem:[#allocation2 + $0x5c] sm:$0x1] %v5662_v58  ;;  %2296 = vrot.lane.b32.xlu0 %v14270_v54, %s17600_s29  ;;  %v14464_v58 = vld [vmem:[%s11534_s25 + $0x1d8] sm:$0xff] }
 0x484   : > { %v4269_v2 = vpop.f32.mrf.mxu0  ;;  %v1719_v4 = vrot.slane %v14464_v58, 1 }
 0x485   : > { %v4270_v50 = vadd.f32 %v14368_v16, %v4269_v2  ;;  %v1980_v41 = vpop.permute.xlu0 %1979  ;;  %1568 = vrot.lane.b32.xlu1 %v14206_v14, %s17598_s16  ;;  %1845 = vrot.lane.b32.xlu2 %v14244_v49, %s17596_s28 }
 0x486   : > { %v3151_v37 = vsel %vm3055_vm5, %v3014_v28, %v1980_v41  ;;  %v14483_v41 = vld [vmem:[%s11534_s25 + $0x1e0] sm:$0xff] }
 0x487   : > { %v4488_v9 = vmax.f32 %v4270_v50, 0.0  ;;  %v2593_v42 = vpop.permute.xlu1 %2592  ;;  %v14401_v1 = vpop.permute.xlu2 %1560  ;;  %v3288_v49 = vsel %vm3192_vm6, %v3151_v37, %v2140_v25  ;;  %v1386_v50 = vshll.u32 %v14464_v58, 16  ;;  %v14489_v37 = vsel %vm1601_vm0, %v1717_v8, %v1719_v4 }
 0x488   : > { %v3425_v17 = vsel %vm3329_vm7, %v3288_v49, %v14313_v52  ;;  %v1394_v49 = vshll.u32 %v14483_v41, 16 }
 0x489   : > { %v4841_v14 = vrot.slane %v4488_v9, 1  ;;  %v14496_v24 = vrot.slane %v1386_v50, 1 }
 0x48b   : > { %v4842_v45 = vsel %vm1601_vm0, %v4839_v44, %v4841_v14  ;;  %2749 = vrot.lane.b32.xlu0 %v14406_v5, %s17602_s17 }
 0x48c   : > { %v14414_v30 = vmax.f32 %v4487_v19, %v4842_v45 }
 0x48d   : > { %v2433_v57 = vpop.permute.xlu0 %2432  ;;  %2151 = vrot.lane.b32.xlu1 %v14342_v31, %s17604_s14  ;;  %2298 = vrot.lane.b32.xlu2 %v14322_v35, %s17600_s29 }
 0x48e   : > { %v3562_v33 = vsel %vm3466_vm8, %v3425_v17, %v2433_v57  ;;  %v4272_v0 = vpop.f32.mrf.mxu0  ;;  %v1721_v57 = vrot.slane %v14483_v41, 1 }
 0x48f   : > { %v3699_v51 = vsel %vm3603_vm9, %v3562_v33, %v2593_v42  ;;  %v4273_v60 = vadd.f32 %v14368_v16, %v4272_v0  ;;  %v1836_v15 = vpop.permute.xlu1 %1835  ;;  %v14426_v52 = vpop.permute.xlu2 %2143  ;;  %v14492_v42 = vld [vmem:[%s11534_s25 + $0x1e8] sm:$0xff] }
 0x490   : > { %v3836_v46 = vsel %vm3740_vm10, %v3699_v51, %v14338_v53  ;;  %v1723_v7 = vrot.slane %v14492_v42, 1  ;;  %v11329_v33 = vld [vmem:[%s11534_s25 + $0x188] sm:$0xff] }
 0x491   : > { %v4489_v3 = vmax.f32 %v4273_v60, 0.0  ;;  %10305 = vmatmul.msk.bf16.gmra.mxu0 %vm3917_vm11, %v3836_v46  ;;  %v2881_v0 = vsel %vm2781_vm3, %v11329_v33, %v14401_v1  ;;  %v14515_v60 = vrot.slane %v1394_v49, 1  ;;  %v1398_v46 = vshrl.u32 %v14483_v41, 16  ;;  %v11330_v33 = vld [vmem:[%s11534_s25 + $0x190] sm:$0xff] }
 0x492   : > { %v14525_v1 = vsel %vm1601_vm0, %v1721_v57, %v1723_v7 }
 0x493   : > { %v4843_v18 = vrot.slane %v4489_v3, 1  ;;  %1991 = vrot.lane.b32.xlu0 %v14236_v21, %s17623_s24  ;;  %v1402_v3 = vshll.u32 %v14492_v42, 16 }
 0x495   : > { %v4844_v47 = vsel %vm1601_vm0, %v4841_v14, %v4843_v18  ;;  %v1559_v38 = vpop.permute.xlu0 %1558  ;;  %2604 = vrot.lane.b32.xlu1 %v14432_v27, %s11428_s21  ;;  %2751 = vrot.lane.b32.xlu2 %v14435_v6, %s17602_s17 }
 0x496   : > { %v14444_v53 = vmax.f32 %v4488_v9, %v4844_v47  ;;  %v4274_v23 = vpop.f32.mrf.mxu0  ;;  %v2879_v11 = vsel %vm2781_vm3, %v11328_v59, %v1559_v38 }
 0x497   : > { %v2289_v43 = vpop.permute.xlu1 %2288  ;;  %v14446_v56 = vpop.permute.xlu2 %2596  ;;  %v3016_v21 = vsel %vm17651_vm13, %v2879_v11, %v1836_v15  ;;  %v1400_v23 = vor.u32 %v1398_v46, %v14515_v60  ;;  %vm17653_vm13 = vmmov %vm17628_vm12 }
 0x498   : > { %v3153_v10 = vsel %vm3055_vm5, %v3016_v21, %v14357_v62 }
 0x49b   : > { %2444 = vrot.lane.b32.xlu0 %v14332_v48, %s11421_s26 }
 0x49d   : > { %v2142_v32 = vpop.permute.xlu0 %2141  ;;  %1847 = vrot.lane.b32.xlu1 %v14270_v54, %s17596_s28  ;;  %1993 = vrot.lane.b32.xlu2 %v14300_v36, %s17623_s24 }
 0x49e   : > { %v3290_v13 = vsel %vm3192_vm6, %v3153_v10, %v2142_v32 }
 0x49f   : > { %v2742_v19 = vpop.permute.xlu1 %2741  ;;  %v14460_v25 = vpop.permute.xlu2 %1839  ;;  %v3427_v22 = vsel %vm3329_vm7, %v3290_v13, %v2289_v43  ;;  %v14532_v43 = vrot.slane %v1402_v3, 1 }
 0x4a0   : > { %v3564_v36 = vsel %vm3466_vm8, %v3427_v22, %v14379_v63  ;;  %v1382_v63 = vshrl.u32 %v14398_v34, 16 }
 0x4a1   : > { %v14546_v22 = vsel %vm913_vm1, %v1400_v23, %v14532_v43 }
 0x4a2   : > { %v1384_v14 = vor.u32 %v1382_v63, %v1380_v12 }
 0x4a3   : > { %1570 = vrot.lane.b32.xlu0 %v14267_v29, %s17598_s16 }
 0x4a4   : > { %v14513_v51 = vsel %vm913_vm1, %v1384_v14, %v14496_v24 }
 0x4a5   : > { %v4277_v54 = vpop.f32.mrf.mxu0  ;;  %v2595_v44 = vpop.permute.xlu0 %2594  ;;  %2300 = vrot.lane.b32.xlu1 %v14406_v5, %s17600_s29  ;;  %2446 = vrot.lane.b32.xlu2 %v14398_v34, %s11421_s26 }
 0x4a6   : > { %v4278_v62 = vadd.f32 %v14368_v16, %v4277_v54  ;;  %v3701_v61 = vsel %vm3603_vm9, %v3564_v36, %v2595_v44  ;;  %v14554_v36 = vld [vmem:[%s11534_s25 + $0x1f8] sm:$0xff] }
 0x4a7   : > { %v1984_v2 = vpop.permute.xlu1 %1983  ;;  %v14477_v29 = vpop.permute.xlu2 %2292  ;;  %v3838_v40 = vsel %vm3740_vm10, %v3701_v61, %v2742_v19  ;;  %v1727_v63 = vrot.slane %v14554_v36, 1  ;;  %v1418_v49 = vshll.u32 %v14554_v36, 16 }
 0x4a8   : > { %v4491_v28 = vmax.f32 %v4278_v62, 0.0  ;;  %10306 = vmatmul.msk.bf16.gmra.mxu0 %vm3917_vm11, %v3838_v40 }
 0x4aa   : > { %v4847_v9 = vrot.slane %v4491_v28, 1 }
 0x4ab   : > { %2153 = vrot.lane.b32.xlu0 %v14361_v20, %s17604_s14 }
 0x4ad   : > { %v4279_v26 = vpop.f32.mrf.mxu0  ;;  %v1838_v45 = vpop.permute.xlu0 %1837  ;;  %2753 = vrot.lane.b32.xlu1 %v14489_v37, %s17602_s17  ;;  %1572 = vrot.lane.b32.xlu2 %v14342_v31, %s17598_s16 }
 0x4ae   : > { %v4280_v17 = vadd.f32 %v14368_v16, %v4279_v26  ;;  %v3018_v15 = vsel %vm17652_vm15, %v2881_v0, %v1838_v45  ;;  %vm17654_vm15 = vmmov %vm17628_vm12 }
 0x4af   : > { %v2437_v12 = vpop.permute.xlu1 %2436  ;;  %v14509_v8 = vpop.permute.xlu2 %2745  ;;  %v3155_v47 = vsel %vm3055_vm5, %v3018_v15, %v1984_v2 }
 0x4b0   : > { %v4492_v31 = vmax.f32 %v4280_v17, 0.0  ;;  %v3292_v21 = vsel %vm3192_vm6, %v3155_v47, %v14426_v52  ;;  %v1390_v17 = vshrl.u32 %v14464_v58, 16  ;;  %v14590_v47 = vrot.slane %v1418_v49, 1 }
 0x4b1   : > { %v14645_v49 = vsel %vm1601_vm0, %v1719_v4, %v1721_v57 }
 0x4b2   : > { %v4849_v18 = vrot.slane %v4492_v31, 1 }
 0x4b3   : > { %2606 = vrot.lane.b32.xlu0 %v14513_v51, %s11428_s21 }
 0x4b4   : > { %v4850_v38 = vsel %vm1601_vm0, %v4847_v9, %v4849_v18 }
 0x4b5   : > { %v5171_v59 = vmax.f32 %v4491_v28, %v4850_v38  ;;  %v2291_v11 = vpop.permute.xlu0 %2290  ;;  %1849 = vrot.lane.b32.xlu1 %v14322_v35, %s17596_s28  ;;  %1859 = vrot.lane.b32.xlu2 %v14525_v1, %s17596_s28  ;;  %v14550_v35 = vld [vmem:[%s11534_s25 + $0x1f0] sm:$0xff] }
 0x4b6   : > { %v3429_v10 = vsel %vm3329_vm7, %v3292_v21, %v2291_v11  ;;  %v1410_v52 = vshll.u32 %v14550_v35, 16  ;;  %v1725_v40 = vrot.slane %v14550_v35, 1  ;;  %v1414_v14 = vshrl.u32 %v14550_v35, 16 }
 0x4b7   : > { %v5303_v32 = vmax.f32 %v14414_v30, %v5171_v59  ;;  %v1563_v13 = vpop.permute.xlu1 %1562  ;;  %v14542_v19 = vpop.permute.xlu2 %1987  ;;  %v3566_v54 = vsel %vm3466_vm8, %v3429_v10, %v2437_v12 }
 0x4b8   : > { %v3703_v62 = vsel %vm3603_vm9, %v3566_v54, %v14446_v56  ;;  %v14572_v56 = vrot.slane %v1410_v52, 1  ;;  %v14581_v45 = vsel %vm1601_vm0, %v1725_v40, %v1727_v63  ;;  %v2883_v0 = vsel %vm2781_vm3, %v11330_v33, %v1563_v13 }
 0x4b9   : > { %5435 = vst.msk [vmem:[#allocation5 + $0x280] sm:$0xff] %vm3740_vm10, %v5303_v32  ;;  %v14609_v32 = vld [vmem:[%s11534_s25 + $0x200] sm:$0xff] }
 0x4ba   : > { %v1416_v3 = vor.u32 %v1414_v14, %v14572_v56  ;;  %v1426_v10 = vshll.u32 %v14609_v32, 16 }
 0x4bb   : > { %1582 = vrot.lane.b32.xlu0 %v14546_v22, %s17598_s16 }
 0x4bc   : > { %v4282_v30 = vpop.f32.mrf.mxu0  ;;  %v14606_v21 = vsel %vm913_vm1, %v1416_v3, %v14590_v47 }
 0x4bd   : > { %v4283_v44 = vadd.f32 %v14368_v16, %v4282_v30  ;;  %v2744_v61 = vpop.permute.xlu0 %2743  ;;  %2005 = vrot.lane.b32.xlu1 %v14550_v35, %s17623_s24  ;;  %2155 = vrot.lane.b32.xlu2 %v14432_v27, %s17604_s14 }
 0x4be   : > { %v3840_v2 = vsel %vm3740_vm10, %v3703_v62, %v2744_v61 }
 0x4bf   : > { %v4493_v50 = vmax.f32 %v4283_v44, 0.0  ;;  %10307 = vmatmul.msk.bf16.gmra.mxu0 %vm3917_vm11, %v3840_v2  ;;  %v2146_v28 = vpop.permute.xlu1 %2145  ;;  %v14570_v9 = vpop.permute.xlu2 %2440  ;;  %v14635_v2 = vrot.slane %v1426_v10, 1 }
 0x4c1   : > { %v4851_v26 = vrot.slane %v4493_v50, 1  ;;  %v1430_v50 = vshrl.u32 %v14609_v32, 16 }
 0x4c3   : > { %v4852_v12 = vsel %vm1601_vm0, %v4849_v18, %v4851_v26  ;;  %1995 = vrot.lane.b32.xlu0 %v14332_v48, %s17623_s24  ;;  %v3020_v48 = vsel %vm17628_vm12, %v2883_v0, %v14460_v25 }
 0x4c4   : > { %v5172_v15 = vmax.f32 %v4492_v31, %v4852_v12  ;;  %v4284_v46 = vpop.f32.mrf.mxu0  ;;  %v1392_v31 = vor.u32 %v1390_v17, %v14496_v24  ;;  %v14619_v24 = vld [vmem:[%s11534_s25 + $0x208] sm:$0xff] }
 0x4c5   : > { %v1986_v38 = vpop.permute.xlu0 %1985  ;;  %2302 = vrot.lane.b32.xlu1 %v14435_v6, %s17600_s29  ;;  %2312 = vrot.lane.b32.xlu2 %v14581_v45, %s17600_s29 }
 0x4c6   : > { %v5304_v18 = vmax.f32 %v14444_v53, %v5172_v15  ;;  %v3157_v23 = vsel %vm3055_vm5, %v3020_v48, %v1986_v38  ;;  %v14614_v25 = vsel %vm913_vm1, %v1392_v31, %v14515_v60  ;;  %v11331_v15 = vld [vmem:[%s11534_s25 + $0x198] sm:$0xff] }
 0x4c7   : > { %v2599_v59 = vpop.permute.xlu1 %2598  ;;  %v14601_v11 = vpop.permute.xlu2 %1566  ;;  %v3294_v53 = vsel %vm3192_vm6, %v3157_v23, %v2146_v28  ;;  %v1434_v28 = vshll.u32 %v14619_v24, 16  ;;  %v1729_v23 = vrot.slane %v14609_v32, 1 }
 0x4c8   : > { %5436 = vst.msk [vmem:[#allocation5 + $0x288] sm:$0xff] %vm3740_vm10, %v5304_v18  ;;  %v3431_v13 = vsel %vm3329_vm7, %v3294_v53, %v14477_v29 }
 0x4c9   : > { %v14650_v17 = vrot.slane %v1434_v28, 1 }
 0x4cb   : > { %2165 = vrot.lane.b32.xlu0 %v14606_v21, %s17604_s14 }
 0x4cd   : > { %v2439_v54 = vpop.permute.xlu0 %2438  ;;  %2458 = vrot.lane.b32.xlu1 %v14609_v32, %s11421_s26  ;;  %2608 = vrot.lane.b32.xlu2 %v14614_v25, %s11428_s21 }
 0x4ce   : > { %v3568_v60 = vsel %vm3466_vm8, %v3431_v13, %v2439_v54  ;;  %v4287_v30 = vpop.f32.mrf.mxu0 }
 0x4cf   : > { %v3705_v52 = vsel %vm3603_vm9, %v3568_v60, %v2599_v59  ;;  %v4288_v44 = vadd.f32 %v14368_v16, %v4287_v30  ;;  %v1842_v62 = vpop.permute.xlu1 %1841  ;;  %v14631_v61 = vpop.permute.xlu2 %2149  ;;  %v5665_v18 = vld [vmem:[#allocation5 + $0x280] ss:$2 sm:$0xff]  ;;  %v1731_v59 = vrot.slane %v14619_v24, 1 }
 0x4d0   : > { %v3842_v29 = vsel %vm3740_vm10, %v3705_v52, %v14509_v8  ;;  %v1432_v8 = vor.u32 %v1430_v50, %v14635_v2  ;;  %v5666_v13 = vpack.c.bf16 %v5665_v18, %v5665_v18 }
 0x4d1   : > { %v4495_v14 = vmax.f32 %v4288_v44, 0.0  ;;  %10308 = vmatmul.msk.bf16.gmra.mxu0 %vm3917_vm11, %v3842_v29  ;;  %v14690_v29 = vld [vmem:[%s11534_s25 + $0x210] sm:$0xff] }
 0x4d2   : > { %v14663_v3 = vsel %vm913_vm1, %v1432_v8, %v14650_v17  ;;  %v5668_v50 = vshrl.u32 %v5666_v13, 16 }
 0x4d3   : > { %v4855_v26 = vrot.slane %v4495_v14, 1  ;;  %2448 = vrot.lane.b32.xlu0 %v14464_v58, %s11421_s26 }
 0x4d5   : > { %v1565_v33 = vpop.permute.xlu0 %1564  ;;  %2755 = vrot.lane.b32.xlu1 %v14645_v49, %s17602_s17  ;;  %1586 = vrot.lane.b32.xlu2 %v14606_v21, %s17598_s16 }
 0x4d6   : > { %v4289_v0 = vpop.f32.mrf.mxu0  ;;  %v2885_v46 = vsel %vm2781_vm3, %v11331_v15, %v1565_v33 }
 0x4d7   : > { %v4290_v12 = vadd.f32 %v14368_v16, %v4289_v0  ;;  %v2295_v4 = vpop.permute.xlu1 %2294  ;;  %v14657_v57 = vpop.permute.xlu2 %2602  ;;  %v3022_v48 = vsel %vm17653_vm13, %v2885_v46, %v1842_v62  ;;  %v14687_v62 = vsel %vm1601_vm0, %v1729_v23, %v1731_v59  ;;  %v1733_v0 = vrot.slane %v14690_v29, 1  ;;  %vm17655_vm13 = vmmov %vm17628_vm12 }
 0x4d8   : > { %v3159_v60 = vsel %vm3055_vm5, %v3022_v48, %v14542_v19  ;;  %v1442_v19 = vshll.u32 %v14690_v29, 16 }
 0x4d9   : > { %v4496_v38 = vmax.f32 %v4290_v12, 0.0  ;;  %v5670_v12 = vrot.slane %v5668_v50, 7 }
 0x4db   : > { %v4857_v31 = vrot.slane %v4496_v38, 1  ;;  %2618 = vrot.lane.b32.xlu0 %v14663_v3, %s11428_s21 }
 0x4dd   : > { %v4858_v53 = vsel %vm1601_vm0, %v4855_v26, %v4857_v31  ;;  %v2148_v10 = vpop.permute.xlu0 %2147  ;;  %1863 = vrot.lane.b32.xlu1 %v14581_v45, %s17596_s28  ;;  %2009 = vrot.lane.b32.xlu2 %v14609_v32, %s17623_s24 }
 0x4de   : > { %v14675_v54 = vmax.f32 %v4495_v14, %v4858_v53  ;;  %v3296_v30 = vsel %vm3192_vm6, %v3159_v60, %v2148_v10  ;;  %v14694_v14 = vld [vmem:[%s11534_s25 + $0x218] sm:$0xff]  ;;  %v14714_v53 = vrot.slane %v1442_v19, 1  ;;  %v5671_v10 = vshll.u32 %v5666_v13, 16 }
 0x4df   : > { %v2748_v52 = vpop.permute.xlu1 %2747  ;;  %v14680_v44 = vpop.permute.xlu2 %1845  ;;  %v3433_v28 = vsel %vm3329_vm7, %v3296_v30, %v2295_v4  ;;  %v14709_v46 = vrot.slane %v14694_v14, 1  ;;  %v1446_v30 = vshrl.u32 %v14690_v29, 16  ;;  %v1450_v50 = vshll.u32 %v14694_v14, 16 }
 0x4e0   : > { %v3570_v8 = vsel %vm3466_vm8, %v3433_v28, %v14570_v9  ;;  %v5673_v28 = vor.u32 %v5671_v10, %v5670_v12  ;;  %v5680_v10 = vld [vmem:[#allocation2 + $0x64] sm:$0x1] }
 0x4e1   : > { %v14729_v19 = vrot.slane %v1450_v50, 1 }
 0x4e3   : > { %2765 = vrot.lane.b32.xlu0 %v14687_v62, %s17602_s17 }
 0x4e5   : > { %v4292_v26 = vpop.f32.mrf.mxu0  ;;  %v2601_v33 = vpop.permute.xlu0 %2600  ;;  %2316 = vrot.lane.b32.xlu1 %v14687_v62, %s17600_s29  ;;  %2462 = vrot.lane.b32.xlu2 %v14690_v29, %s11421_s26 }
 0x4e6   : > { %v4293_v4 = vadd.f32 %v14368_v16, %v4292_v26  ;;  %v3707_v15 = vsel %vm3603_vm9, %v3570_v8, %v2601_v33  ;;  %v5674_v26 = vrot.slane %v5670_v12, 4  ;;  %v14723_v33 = vsel %vm1601_vm0, %v1733_v0, %v14709_v46 }
 0x4e7   : > { %v1990_v18 = vpop.permute.xlu1 %1989  ;;  %v14711_v48 = vpop.permute.xlu2 %2298  ;;  %v3844_v9 = vsel %vm3740_vm10, %v3707_v15, %v2748_v52  ;;  %v1448_v52 = vor.u32 %v1446_v30, %v14714_v53  ;;  %v11332_v30 = vld [vmem:[%s11534_s25 + $0x1a0] sm:$0xff] }
 0x4e8   : > { %v4497_v60 = vmax.f32 %v4293_v4, 0.0  ;;  %10309 = vmatmul.msk.bf16.gmra.mxu0 %vm3917_vm11, %v3844_v9  ;;  %v5677_v9 = vld [vmem:[#allocation2 + $0x60] sm:$0xf] }
 0x4ea   : > { %v4859_v8 = vrot.slane %v4497_v60, 1  ;;  %v5678_v60 = vsel %vm12561_vm2, %v5673_v28, %v5677_v9  ;;  %v14757_v28 = vsel %vm1601_vm0, %v1723_v7, %v1725_v40 }
 0x4eb   : > { %2169 = vrot.lane.b32.xlu0 %v14663_v3, %s17604_s14  ;;  %5679 = vst [vmem:[#allocation2 + $0x60] sm:$0xf] %v5678_v60 }
 0x4ec   : > { %v4860_v13 = vsel %vm1601_vm0, %v4857_v31, %v4859_v8  ;;  %v5681_v31 = vsel %vm12570_vm4, %v5674_v26, %v5680_v10 }
 0x4ed   : > { %v14731_v4 = vmax.f32 %v4496_v38, %v4860_v13  ;;  %v4294_v12 = vpop.f32.mrf.mxu0  ;;  %v1844_v15 = vpop.permute.xlu0 %1843  ;;  %2769 = vrot.lane.b32.xlu1 %v14723_v33, %s17602_s17  ;;  %1574 = vrot.lane.b32.xlu2 %v14361_v20, %s17598_s16  ;;  %v2887_v38 = vsel %vm2781_vm3, %v11332_v30, %v14601_v11  ;;  %v14749_v20 = vsel %vm913_vm1, %v1448_v52, %v14729_v19 }
 0x4ee   : > { %v3024_v13 = vsel %vm17654_vm15, %v2887_v38, %v1844_v15  ;;  %v1406_v12 = vshrl.u32 %v14492_v42, 16  ;;  %5682 = vst [vmem:[#allocation2 + $0x64] sm:$0x1] %v5681_v31  ;;  %vm17656_vm15 = vmmov %vm17628_vm12 }
 0x4ef   : > { %v2443_v50 = vpop.permute.xlu1 %2442  ;;  %v14744_v8 = vpop.permute.xlu2 %2751  ;;  %v3161_v11 = vsel %vm3055_vm5, %v3024_v13, %v1990_v18 }
 0x4f0   : > { %v1408_v26 = vor.u32 %v1406_v12, %v14532_v43  ;;  %v3298_v52 = vsel %vm3192_vm6, %v3161_v11, %v14631_v61  ;;  %v11333_v12 = vld [vmem:[%s11534_s25 + $0x1a8] sm:$0xff] }
 0x4f2   : > { %v14774_v18 = vsel %vm913_vm1, %v1408_v26, %v14572_v56 }
 0x4f3   : > { %2622 = vrot.lane.b32.xlu0 %v14749_v20, %s11428_s21 }
 0x4f5   : > { %v2297_v15 = vpop.permute.xlu0 %2296  ;;  %1851 = vrot.lane.b32.xlu1 %v14406_v5, %s17596_s28  ;;  %1861 = vrot.lane.b32.xlu2 %v14757_v28, %s17596_s28 }
 0x4f6   : > { %v3435_v7 = vsel %vm3329_vm7, %v3298_v52, %v2297_v15 }
 0x4f7   : > { %v1569_v40 = vpop.permute.xlu1 %1568  ;;  %v14770_v9 = vpop.permute.xlu2 %1993  ;;  %v3572_v43 = vsel %vm3466_vm8, %v3435_v7, %v2443_v50  ;;  %v1422_v50 = vshrl.u32 %v14554_v36, 16 }
 0x4f8   : > { %v3709_v61 = vsel %vm3603_vm9, %v3572_v43, %v14657_v57  ;;  %v14796_v57 = vsel %vm1601_vm0, %v1727_v63, %v1729_v23  ;;  %v2889_v11 = vsel %vm2781_vm3, %v11333_v12, %v1569_v40  ;;  %v1438_v12 = vshrl.u32 %v14619_v24, 16 }
 0x4f9   : > { %v1424_v15 = vor.u32 %v1422_v50, %v14590_v47 }
 0x4fb   : > { %1584 = vrot.lane.b32.xlu0 %v14774_v18, %s17598_s16  ;;  %v14815_v47 = vsel %vm913_vm1, %v1424_v15, %v14635_v2 }
 0x4fc   : > { %v4297_v5 = vpop.f32.mrf.mxu0 }
 0x4fd   : > { %v4298_v10 = vadd.f32 %v14368_v16, %v4297_v5  ;;  %v2750_v60 = vpop.permute.xlu0 %2749  ;;  %2007 = vrot.lane.b32.xlu1 %v14554_v36, %s17623_s24  ;;  %2157 = vrot.lane.b32.xlu2 %v14513_v51, %s17604_s14  ;;  %v3026_v36 = vsel %vm17628_vm12, %v2889_v11, %v14680_v44 }
 0x4fe   : > { %v3846_v56 = vsel %vm3740_vm10, %v3709_v61, %v2750_v60 }
 0x4ff   : > { %v4499_v31 = vmax.f32 %v4298_v10, 0.0  ;;  %10310 = vmatmul.msk.bf16.gmra.mxu0 %vm3917_vm11, %v3846_v56  ;;  %v2152_v30 = vpop.permute.xlu1 %2151  ;;  %v14788_v38 = vpop.permute.xlu2 %2446 }
 0x501   : > { %v4863_v13 = vrot.slane %v4499_v31, 1 }
 0x503   : > { %1997 = vrot.lane.b32.xlu0 %v14398_v34, %s17623_s24 }
 0x504   : > { %v4299_v26 = vpop.f32.mrf.mxu0 }
 0x505   : > { %v4300_v52 = vadd.f32 %v14368_v16, %v4299_v26  ;;  %v1992_v7 = vpop.permute.xlu0 %1991  ;;  %2304 = vrot.lane.b32.xlu1 %v14489_v37, %s17600_s29  ;;  %2314 = vrot.lane.b32.xlu2 %v14796_v57, %s17600_s29  ;;  %v1440_v26 = vor.u32 %v1438_v12, %v14650_v17 }
 0x506   : > { %v3163_v32 = vsel %vm3055_vm5, %v3026_v36, %v1992_v7 }
 0x507   : > { %v4500_v63 = vmax.f32 %v4300_v52, 0.0  ;;  %v2605_v23 = vpop.permute.xlu1 %2604  ;;  %v14811_v34 = vpop.permute.xlu2 %1572  ;;  %v3300_v43 = vsel %vm3192_vm6, %v3163_v32, %v2152_v30 }
 0x508   : > { %v3437_v44 = vsel %vm3329_vm7, %v3300_v43, %v14711_v48  ;;  %v11334_v43 = vld [vmem:[%s11534_s25 + $0x1b0] sm:$0xff] }
 0x509   : > { %v4865_v40 = vrot.slane %v4500_v63, 1 }
 0x50b   : > { %v4866_v5 = vsel %vm1601_vm0, %v4863_v13, %v4865_v40  ;;  %2167 = vrot.lane.b32.xlu0 %v14815_v47, %s17604_s14 }
 0x50c   : > { %v5179_v10 = vmax.f32 %v4499_v31, %v4866_v5 }
 0x50d   : > { %v2445_v61 = vpop.permute.xlu0 %2444  ;;  %2460 = vrot.lane.b32.xlu1 %v14619_v24, %s11421_s26  ;;  %2610 = vrot.lane.b32.xlu2 %v14546_v22, %s11428_s21 }
 0x50e   : > { %v5311_v2 = vmax.f32 %v14675_v54, %v5179_v10  ;;  %v3574_v60 = vsel %vm3466_vm8, %v3437_v44, %v2445_v61  ;;  %v4302_v56 = vpop.f32.mrf.mxu0  ;;  %v14873_v61 = vsel %vm1601_vm0, %v1731_v59, %v1733_v0 }
 0x50f   : > { %v3711_v30 = vsel %vm3603_vm9, %v3574_v60, %v2605_v23  ;;  %v4303_v50 = vadd.f32 %v14368_v16, %v4302_v56  ;;  %v1848_v31 = vpop.permute.xlu1 %1847  ;;  %v14831_v13 = vpop.permute.xlu2 %1859  ;;  %v14877_v60 = vld [vmem:[%s11534_s25 + $0x220] sm:$0xff] }
 0x510   : > { %5443 = vst.msk [vmem:[#allocation5 + $0x2c0] sm:$0xff] %vm3740_vm10, %v5311_v2  ;;  %v3848_v48 = vsel %vm3740_vm10, %v3711_v30, %v14744_v8  ;;  %v2186_v0 = vrot.slane %v14877_v60, 1 }
 0x511   : > { %v4501_v11 = vmax.f32 %v4303_v50, 0.0  ;;  %10311 = vmatmul.msk.bf16.gmra.mxu0 %vm3917_vm11, %v3848_v48 }
 0x513   : > { %v4867_v54 = vrot.slane %v4501_v11, 1  ;;  %2450 = vrot.lane.b32.xlu0 %v14483_v41, %s11421_s26  ;;  %v2025_v11 = vshll.u32 %v14877_v60, 16 }
 0x515   : > { %v4868_v15 = vsel %vm1601_vm0, %v4865_v40, %v4867_v54  ;;  %v1571_v52 = vpop.permute.xlu0 %1570  ;;  %2757 = vrot.lane.b32.xlu1 %v14525_v1, %s17602_s17  ;;  %1588 = vrot.lane.b32.xlu2 %v14815_v47, %s17598_s16  ;;  %v14853_v40 = vsel %vm913_vm1, %v1440_v26, %v14714_v53  ;;  %v14900_v26 = vsel %vm1601_vm0, %v14709_v46, %v2186_v0 }
 0x516   : > { %v5180_v8 = vmax.f32 %v4500_v63, %v4868_v15  ;;  %v4304_v7 = vpop.f32.mrf.mxu0  ;;  %v2891_v17 = vsel %vm2781_vm3, %v11334_v43, %v1571_v52  ;;  %v14907_v52 = vrot.slane %v2025_v11, 1 }
 0x517   : > { %v2301_v36 = vpop.permute.xlu1 %2300  ;;  %v14846_v32 = vpop.permute.xlu2 %2155  ;;  %v3028_v5 = vsel %vm17655_vm13, %v2891_v17, %v1848_v31  ;;  %vm17657_vm13 = vmmov %vm17628_vm12 }
 0x518   : > { %v5312_v23 = vmax.f32 %v14731_v4, %v5180_v8  ;;  %v3165_v4 = vsel %vm3055_vm5, %v3028_v5, %v14770_v9 }
 0x51a   : > { %5444 = vst.msk [vmem:[#allocation5 + $0x2c8] sm:$0xff] %vm3740_vm10, %v5312_v23 }
 0x51b   : > { %2620 = vrot.lane.b32.xlu0 %v14853_v40, %s11428_s21 }
 0x51d   : > { %v2154_v63 = vpop.permute.xlu0 %2153  ;;  %1865 = vrot.lane.b32.xlu1 %v14796_v57, %s17596_s28  ;;  %2011 = vrot.lane.b32.xlu2 %v14619_v24, %s17623_s24 }
 0x51e   : > { %v3302_v53 = vsel %vm3192_vm6, %v3165_v4, %v2154_v63 }
 0x51f   : > { %v2754_v10 = vpop.permute.xlu1 %2753  ;;  %v14866_v44 = vpop.permute.xlu2 %2312  ;;  %v3439_v2 = vsel %vm3329_vm7, %v3302_v53, %v2301_v36 }
 0x520   : > { %v3576_v56 = vsel %vm3466_vm8, %v3439_v2, %v14788_v38  ;;  %v1454_v38 = vshrl.u32 %v14694_v14, 16 }
 0x521   : > { %v5684_v8 = vld [vmem:[#allocation5 + $0x2c0] ss:$2 sm:$0xff] }
 0x522   : > { %v14905_v15 = vor.u32 %v1454_v38, %v14729_v19  ;;  %v5685_v19 = vpack.c.bf16 %v5684_v8, %v5684_v8 }
 0x523   : > { %2767 = vrot.lane.b32.xlu0 %v14873_v61, %s17602_s17 }
 0x524   : > { %v14921_v63 = vsel %vm913_vm1, %v14905_v15, %v14907_v52  ;;  %v5687_v53 = vshrl.u32 %v5685_v19, 16 }
 0x525   : > { %v4307_v9 = vpop.f32.mrf.mxu0  ;;  %v2607_v30 = vpop.permute.xlu0 %2606  ;;  %2318 = vrot.lane.b32.xlu1 %v14873_v61, %s17600_s29  ;;  %2464 = vrot.lane.b32.xlu2 %v14694_v14, %s11421_s26 }
 0x526   : > { %v4308_v24 = vadd.f32 %v14368_v16, %v4307_v9  ;;  %v3713_v59 = vsel %vm3603_vm9, %v3576_v56, %v2607_v30  ;;  %v5689_v30 = vrot.slane %v5687_v53, 7  ;;  %v5696_v53 = vld [vmem:[#allocation2 + $0x68] sm:$0xf] }
 0x527   : > { %v1850_v50 = vpop.permute.xlu1 %1849  ;;  %v14890_v31 = vpop.permute.xlu2 %2608  ;;  %v3850_v48 = vsel %vm3740_vm10, %v3713_v59, %v2754_v10  ;;  %v11335_v59 = vld [vmem:[%s11534_s25 + $0x1b8] sm:$0xff] }
 0x528   : > { %v4503_v12 = vmax.f32 %v4308_v24, 0.0  ;;  %10312 = vmatmul.msk.bf16.gmra.mxu0 %vm3917_vm11, %v3850_v48  ;;  %v5690_v24 = vshll.u32 %v5685_v19, 16  ;;  %v2893_v48 = vsel %vm2781_vm3, %v11335_v59, %v14811_v34  ;;  %v5693_v38 = vrot.slane %v5689_v30, 4 }
 0x52a   : > { %v4871_v54 = vrot.slane %v4503_v12, 1 }
 0x52b   : > { %2171 = vrot.lane.b32.xlu0 %v14853_v40, %s17604_s14 }
 0x52d   : > { %v4309_v7 = vpop.f32.mrf.mxu0  ;;  %v1583_v36 = vpop.permute.xlu0 %1582  ;;  %2771 = vrot.lane.b32.xlu1 %v14900_v26, %s17602_s17  ;;  %1576 = vrot.lane.b32.xlu2 %v14432_v27, %s17598_s16 }
 0x52e   : > { %v4310_v23 = vadd.f32 %v14368_v16, %v4309_v7  ;;  %v3030_v7 = vsel %vm17656_vm15, %v2893_v48, %v1850_v50  ;;  %vm17658_vm15 = vmmov %vm17628_vm12 }
 0x52f   : > { %v14914_v43 = vpop.permute.xlu1 %2005  ;;  %v14916_v17 = vpop.permute.xlu2 %1586 }
 0x530   : > { %v4504_v5 = vmax.f32 %v4310_v23, 0.0 }
 0x532   : > { %v4873_v4 = vrot.slane %v4504_v5, 1 }
 0x533   : > { %2624 = vrot.lane.b32.xlu0 %v14921_v63, %s11428_s21 }
 0x534   : > { %v4874_v27 = vsel %vm1601_vm0, %v4871_v54, %v4873_v4  ;;  %v14939_v54 = vld [vmem:[#allocation2 + $0x8] sm:$0xff]  }
 0x535   : > { %v14926_v10 = vmax.f32 %v4503_v12, %v4874_v27  ;;  %v1996_v2 = vpop.permute.xlu0 %1995  ;;  %1999 = vrot.lane.b32.xlu1 %v14464_v58, %s17623_s24  ;;  %2159 = vrot.lane.b32.xlu2 %v14614_v25, %s17604_s14  ;;  %v5692_v12 = vor.u32 %v5690_v24, %v5689_v30  ;;  %v5699_v27 = vld [vmem:[#allocation2 + $0x6c] sm:$0x1] }
 0x536   : > { %v3167_v34 = vsel %vm3055_vm5, %v3030_v7, %v1996_v2  ;;  %v5700_v30 = vsel %vm12570_vm4, %v5693_v38, %v5699_v27  ;;  %v14959_v2 = vld [vmem:[#allocation2] sm:$0xff]   ;;  %v2903_v38 = vsel %vm2781_vm3, %v14483_v41, %v1583_v36 }
 0x537   : > { %v2303_v9 = vpop.permute.xlu1 %2302  ;;  %v14932_v56 = vpop.permute.xlu2 %2009  ;;  %v3304_v24 = vsel %vm3192_vm6, %v3167_v34, %v14846_v32  ;;  %5701 = vst [vmem:[#allocation2 + $0x6c] sm:$0x1] %v5700_v30  ;;  %v5937_v34 = vshrl.u32 %v14959_v2, 16 }
 0x53b   : > { %1853 = vrot.lane.b32.xlu0 %v14435_v6, %s17596_s28 }
 0x53c   : > { %v4312_v11 = vpop.f32.mrf.mxu0 }
 0x53d   : > { %v4313_v58 = vadd.f32 %v14368_v16, %v4312_v11  ;;  %v2166_v8 = vpop.permute.xlu0 %2165  ;;  %2452 = vrot.lane.b32.xlu2 %v14492_v42, %s11421_s26  ;;  %6165 = vrot.lane.b32.xlu1 %v14939_v54, %s17602_s17  ;;  %v5697_v16 = vsel %vm12561_vm2, %v5692_v12, %v5696_v53  ;;  %v3441_v12 = vsel %vm3329_vm7, %v3304_v24, %v2303_v9  ;;  %v5944_v53 = vshll.u32 %v14939_v54, 16 }
 0x53e   : > { %5698 = vst [vmem:[#allocation2 + $0x68] sm:$0xf] %v5697_v16 }
 0x53f   : > { %v4505_v23 = vmax.f32 %v4313_v58, 0.0  ;;  %v2459_v6 = vpop.permute.xlu1 %2458  ;;  %v14948_v19 = vpop.permute.xlu2 %2462  ;;  %v14991_v30 = vrot.slane %v5944_v53, 1 }
 0x541   : > { %v4875_v42 = vrot.slane %v4505_v23, 1 }
 0x543   : > { %v4876_v50 = vsel %vm1601_vm0, %v4873_v4, %v4875_v42  ;;  %2306 = vrot.lane.b32.xlu0 %v14645_v49, %s17600_s29  ;;  %v5939_v4 = vshll.u32 %v14959_v2, 16  ;;  %v14996_v42 = vld [vmem:[%s17585_s2] ss:$0 sm:$0xff] }
 0x544   : > { %v14961_v59 = vmax.f32 %v4504_v5, %v4876_v50  ;;  %v4314_v48 = vpop.f32.mrf.mxu0 }
 0x545   : > { %v2449_v11 = vpop.permute.xlu0 %2448  ;;  %1590 = vrot.lane.b32.xlu2 %v14663_v3, %s17598_s16  ;;  %2759 = vrot.lane.b32.xlu1 %v14757_v28, %s17602_s17  ;;  %v3040_v3 = vsel %vm17628_vm12, %v2903_v38, %v14831_v13  ;;  %v5941_v23 = vrot.slane %v5939_v4, 1  ;;  %v15006_v48 = vld [vmem:[%s11534_s25 + $0x228] sm:$0xff] }
 0x546   : > { %v3578_v32 = vsel %vm3466_vm8, %v3441_v12, %v2449_v11 }
 0x547   : > { %v2756_v58 = vpop.permute.xlu1 %2755  ;;  %v3715_v5 = vsel %vm3603_vm9, %v3578_v32, %v14890_v31  ;;  %v14974_v7 = vpop.permute.xlu2 %1574  ;;  %v3177_v31 = vsel %vm3055_vm5, %v3040_v3, %v14914_v43  ;;  %v5942_v16 = vor.u32 %v5941_v23, %v5937_v34  ;;  %v2907_v3 = vsel %vm2781_vm3, %v14550_v35, %v14916_v17 }
 0x548   : > { %v3852_v9 = vsel %vm3740_vm10, %v3715_v5, %v2756_v58  ;;  %v3314_v13 = vsel %vm3192_vm6, %v3177_v31, %v2166_v8  ;;  %v15017_v58 = vrot.slane %v15006_v48, 1  ;;  %v2029_v34 = vshrl.u32 %v14877_v60, 16 }
 0x549   : > { %10313 = vmatmul.msk.bf16.gmra.mxu0 %vm3917_vm11, %v3852_v9  ;;  %v5947_v8 = vsel %vm913_vm1, %v5942_v16, %v14991_v30  ;;  %v2033_v23 = vshll.u32 %v15006_v48, 16 }
 0x54a   : > { %v15032_v31 = vsel %vm1601_vm0, %v2186_v0, %v15017_v58 }
 0x54b   : > { %2612 = vrot.lane.b32.xlu0 %v14774_v18, %s11428_s21  ;;  %v15038_v17 = vrot.slane %v2033_v23, 1 }
 0x54d   : > { %v2619_v36 = vpop.permute.xlu0 %2618  ;;  %2013 = vrot.lane.b32.xlu2 %v14690_v29, %s17623_s24  ;;  %1867 = vrot.lane.b32.xlu1 %v14687_v62, %s17596_s28  ;;  %v3451_v29 = vsel %vm3329_vm7, %v3314_v13, %v14866_v44 }
 0x54e   : > { %v4317_v27 = vpop.f32.mrf.mxu0  ;;  %v3588_v11 = vsel %vm3466_vm8, %v3451_v29, %v2459_v6 }
 0x54f   : > { %v4318_v43 = vadd.f32 %v14996_v42, %v4317_v27  ;;  %v1864_v24 = vpop.permute.xlu1 %1863  ;;  %v14999_v50 = vpop.permute.xlu2 %1861  ;;  %v3725_v32 = vsel %vm3603_vm9, %v3588_v11, %v2619_v36  ;;  %v2031_v27 = vor.u32 %v2029_v34, %v14907_v52 }
 0x550   : > { %v3044_v36 = vsel %vm17657_vm13, %v2907_v3, %v1864_v24  ;;  %v15074_v3 = vld [vmem:[#allocation2 + $0x10] sm:$0xff]   ;;  %vm17659_vm13 = vmmov %vm17628_vm12 }
 0x551   : > { %v4507_v62 = vmax.f32 %v4318_v43, 0.0  ;;  %v3181_v24 = vsel %vm3055_vm5, %v3044_v36, %v14932_v56 }
 0x553   : > { %v4879_v12 = vrot.slane %v4507_v62, 1  ;;  %6084 = vrot.lane.b32.xlu0 %v5947_v8, %s17602_s17 }
 0x555   : > { %v2766_v4 = vpop.permute.xlu0 %2765  ;;  %2466 = vrot.lane.b32.xlu2 %v14877_v60, %s11421_s26  ;;  %2320 = vrot.lane.b32.xlu1 %v14723_v33, %s17600_s29 }
 0x556   : > { %v4319_v44 = vpop.f32.mrf.mxu0  ;;  %v3862_v38 = vsel %vm3740_vm10, %v3725_v32, %v2766_v4 }
 0x557   : > { %v4320_v5 = vadd.f32 %v14996_v42, %v4319_v44  ;;  %10318 = vmatmul.msk.bf16.vlgmr.msra.gmra.mxu1 %vm3917_vm11, %v3862_v38  ;;  %v2317_v6 = vpop.permute.xlu1 %2316  ;;  %v15021_v9 = vpop.permute.xlu2 %2157 }
 0x559   : > { %v4508_v53 = vmax.f32 %v4320_v5, 0.0 }
 0x55b   : > { %v4881_v13 = vrot.slane %v4508_v53, 1  ;;  %2173 = vrot.lane.b32.xlu0 %v14749_v20, %s17604_s14 }
 0x55d   : > { %v4882_v16 = vsel %vm1601_vm0, %v4879_v12, %v4881_v13  ;;  %v2170_v43 = vpop.permute.xlu0 %2169  ;;  %1578 = vrot.lane.b32.xlu2 %v14513_v51, %s17598_s16  ;;  %2773 = vrot.lane.b32.xlu1 %v15032_v31, %s17602_s17  ;;  %v15053_v12 = vsel %vm913_vm1, %v2031_v27, %v15038_v17 }
 0x55e   : > { %v5187_v0 = vmax.f32 %v4507_v62, %v4882_v16  ;;  %v3318_v29 = vsel %vm3192_vm6, %v3181_v24, %v2170_v43  ;;  %v5952_v43 = vshll.u32 %v15074_v3, 16  ;;  %v11337_v24 = vld [vmem:[%s11534_s25 + $0x1c0] sm:$0xff] }
 0x55f   : > { %v2770_v8 = vpop.permute.xlu1 %2769  ;;  %v15048_v11 = vpop.permute.xlu2 %2314  ;;  %v3455_v51 = vsel %vm3329_vm7, %v3318_v29, %v2317_v6 }
 0x560   : > { %v5319_v52 = vmax.f32 %v14926_v10, %v5187_v0  ;;  %v3592_v56 = vsel %vm3466_vm8, %v3455_v51, %v14948_v19  ;;  %v11026_v0 = vld [vmem:[%s17586_s3 + $0x78] sm:$0xff] }
 0x561   : > { %6936 = vmatpush.bf16.msra.mxu2 %v11026_v0 }
 0x562   : > { %5451 = vst.msk [vmem:[#allocation5 + $0x300] sm:$0xff] %vm3740_vm10, %v5319_v52 }
 0x563   : > { %2626 = vrot.lane.b32.xlu0 %v15053_v12, %s11428_s21 }
 0x565   : > { %v4322_v62 = vpop.f32.mrf.mxu0  ;;  %v2623_v32 = vpop.permute.xlu0 %2622  ;;  %2161 = vrot.lane.b32.xlu2 %v14546_v22, %s17604_s14  ;;  %2001 = vrot.lane.b32.xlu1 %v14483_v41, %s17623_s24 }
 0x566   : > { %v4323_v10 = vadd.f32 %v14996_v42, %v4322_v62  ;;  %v3729_v4 = vsel %vm3603_vm9, %v3592_v56, %v2623_v32  ;;  %v5715_v62 = vld [vmem:[#allocation2 + $0x70] sm:$0xf]  ;;  %v5718_v56 = vld [vmem:[#allocation2 + $0x74] sm:$0x1]  ;;  %v15112_v32 = vrot.slane %v5952_v43, 1 }
 0x567   : > { %v1852_v44 = vpop.permute.xlu1 %1851  ;;  %v15067_v38 = vpop.permute.xlu2 %2610  ;;  %v3866_v5 = vsel %vm3740_vm10, %v3729_v4, %v2770_v8 }
 0x568   : > { %v4509_v6 = vmax.f32 %v4323_v10, 0.0  ;;  %10320 = vmatmul.msk.bf16.vlgmr.msra.gmra.mxu3 %vm3917_vm11, %v3866_v5 }
 0x56a   : > { %v4883_v19 = vrot.slane %v4509_v6, 1 }
 0x56b   : > { %1855 = vrot.lane.b32.xlu0 %v14489_v37, %s17596_s28 }
 0x56c   : > { %v4884_v22 = vsel %vm1601_vm0, %v4881_v13, %v4883_v19 }
 0x56d   : > { %v5188_v41 = vmax.f32 %v4508_v53, %v4884_v22  ;;  %v4324_v34 = vpop.f32.mrf.mxu0  ;;  %v15076_v23 = vpop.permute.xlu0 %1584  ;;  %2454 = vrot.lane.b32.xlu2 %v14550_v35, %s11421_s26  ;;  %6167 = vrot.lane.b32.xlu1 %v15074_v3, %s17602_s17 }
 0x56f   : > { %v5320_v36 = vmax.f32 %v14961_v59, %v5188_v41  ;;  %v15083_v27 = vpop.permute.xlu1 %2007  ;;  %v15085_v37 = vpop.permute.xlu2 %1588 }
 0x571   : > { %5452 = vst.msk [vmem:[#allocation5 + $0x308] sm:$0xff] %vm3740_vm10, %v5320_v36 }
 0x573   : > { %2308 = vrot.lane.b32.xlu0 %v14525_v1, %s17600_s29  ;;  %v2895_v1 = vsel %vm2781_vm3, %v11337_v24, %v14974_v7 }
 0x574   : > { %v3032_v7 = vsel %vm17658_vm15, %v2895_v1, %v1852_v44  ;;  %vm17664_vm15 = vmmov %vm17628_vm12 }
 0x575   : > { %v1998_v53 = vpop.permute.xlu0 %1997  ;;  %1592 = vrot.lane.b32.xlu2 %v14853_v40, %s17598_s16  ;;  %2761 = vrot.lane.b32.xlu1 %v14581_v45, %s17602_s17 }
 0x576   : > { %v3169_v5 = vsel %vm3055_vm5, %v3032_v7, %v1998_v53  ;;  %v15131_v53 = vld [vmem:[%s11534_s25 + $0x230] sm:$0xff]  ;;  %v11023_v7 = vld [vmem:[%s17586_s3 + $0x60] sm:$0xff] }
 0x577   : > { %v2305_v35 = vpop.permute.xlu1 %2304  ;;  %v15094_v13 = vpop.permute.xlu2 %2011  ;;  %v3306_v34 = vsel %vm3192_vm6, %v3169_v5, %v15021_v9  ;;  %v11024_v9 = vld [vmem:[%s17586_s3 + $0x68] sm:$0xff]  ;;  %v2639_v1 = vrot.slane %v15131_v53, 1 }
 0x578   : > { %v5703_v59 = vld [vmem:[#allocation5 + $0x300] ss:$2 sm:$0xff] }
 0x579   : > { %v5704_v16 = vpack.c.bf16 %v5703_v59, %v5703_v59 }
 0x57b   : > { %v5706_v29 = vshrl.u32 %v5704_v16, 16  ;;  %2614 = vrot.lane.b32.xlu0 %v14606_v21, %s11428_s21  ;;  %v5709_v8 = vshll.u32 %v5704_v16, 16  ;;  %v5948_v21 = vshrl.u32 %v14939_v54, 16  ;;  %v3443_v16 = vsel %vm3329_vm7, %v3306_v34, %v2305_v35 }
 0x57c   : > { %v4327_v45 = vpop.f32.mrf.mxu0 }
 0x57d   : > { %v5708_v40 = vrot.slane %v5706_v29, 7  ;;  %v4328_v52 = vadd.f32 %v14996_v42, %v4327_v45  ;;  %v2168_v51 = vpop.permute.xlu0 %2167  ;;  %2015 = vrot.lane.b32.xlu2 %v14694_v14, %s17623_s24  ;;  %1869 = vrot.lane.b32.xlu1 %v14873_v61, %s17596_s28  ;;  %v5950_v61 = vor.u32 %v5948_v21, %v14991_v30  ;;  %v11025_v30 = vld [vmem:[%s17586_s3 + $0x70] sm:$0xff]  ;;  %v11338_v29 = vld [vmem:[%s11534_s25 + $0x1e8] sm:$0xff]  ;;  %s10918_s28 = sshll.u32 %s11502_s13, 1 }
 0x57e   : > { %6937 = vmatpush.bf16.msra.mxu2 %v11025_v30  ;;  %v2905_v45 = vsel %vm2781_vm3, %v11338_v29, %v15076_v23 }
 0x57f   : > { %v5711_v10 = vor.u32 %v5709_v8, %v5708_v40  ;;  %v5712_v4 = vrot.slane %v5708_v40, 4  ;;  %v4511_v6 = vmax.f32 %v4328_v52, 0.0  ;;  %v15115_v19 = vpop.permute.xlu1 %2460  ;;  %v15117_v14 = vpop.permute.xlu2 %2464  ;;  %v15128_v36 = vsel %vm913_vm1, %v5950_v61, %v15112_v32 }
 0x580   : > { %v3042_v23 = vsel %vm17628_vm12, %v2905_v45, %v14999_v50  ;;  %v11022_v50 = vld [vmem:[%s17586_s3 + $0x58] sm:$0xff] }
 0x581   : > { %v5716_v22 = vsel %vm12561_vm2, %v5711_v10, %v5715_v62  ;;  %v5719_v44 = vsel %vm12570_vm4, %v5712_v4, %v5718_v56  ;;  %v4887_v41 = vrot.slane %v4511_v6, 1  ;;  %v2037_v56 = vshrl.u32 %v15006_v48, 16 }
 0x582   : > { %5717 = vst [vmem:[#allocation2 + $0x70] sm:$0xf] %v5716_v22  ;;  %6938 = vmatpush.bf16.msra.mxu2 %v11024_v9  ;;  %v3179_v22 = vsel %vm3055_vm5, %v3042_v23, %v15083_v27 }
 0x583   : > { %5720 = vst [vmem:[#allocation2 + $0x74] sm:$0x1] %v5719_v44  ;;  %6086 = vrot.lane.b32.xlu0 %v15128_v36, %s17602_s17  ;;  %v15175_v5 = vor.u32 %v2037_v56, %v15038_v17 }
 0x584   : > { %v4329_v59 = vpop.f32.mrf.mxu0 }
 0x585   : > { %v4330_v43 = vadd.f32 %v14996_v42, %v4329_v59  ;;  %v2451_v0 = vpop.permute.xlu0 %2450  ;;  %2468 = vrot.lane.b32.xlu2 %v15006_v48, %s11421_s26  ;;  %2322 = vrot.lane.b32.xlu1 %v14900_v26, %s17600_s29  ;;  %v2478_v26 = vshll.u32 %v15131_v53, 16  ;;  %s17661_s29 = smov 64  }
 0x586   : > { %v3580_v24 = vsel %vm3466_vm8, %v3443_v16, %v2451_v0  ;;  %6939 = vmatpush.bf16.msra.mxu2 %v11023_v7 }
 0x587   : > { %v4512_v40 = vmax.f32 %v4330_v43, 0.0  ;;  %v2758_v8 = vpop.permute.xlu1 %2757  ;;  %v3717_v35 = vsel %vm3603_vm9, %v3580_v24, %v15067_v38  ;;  %v15154_v52 = vpop.permute.xlu2 %1576  ;;  %v2640_v38 = vsel %vm1601_vm0, %v15017_v58, %v2639_v1  ;;  %v15177_v61 = vrot.slane %v2478_v26, 1  ;;  %v11017_v43 = vld [vmem:[%s17586_s3 + $0x30] sm:$0xff]  ;;  %v11339_v26 = vld [vmem:[%s11534_s25 + $0x1f8] sm:$0xff] }
 0x588   : > { %v3854_v62 = vsel %vm3740_vm10, %v3717_v35, %v2758_v8  ;;  %v2909_v7 = vsel %vm2781_vm3, %v11339_v26, %v15085_v37  ;;  %v11015_v37 = vld [vmem:[%s17586_s3 + $0x20] sm:$0xff] }
 0x589   : > { %v4889_v21 = vrot.slane %v4512_v40, 1  ;;  %10314 = vmatmul.msk.bf16.gmra.mxu0 %vm3917_vm11, %v3854_v62  ;;  %v2481_v30 = vsel %vm913_vm1, %v15175_v5, %v15177_v61 }
 0x58a   : > { %6940 = vmatpush.bf16.msra.mxu2 %v11022_v50 }
 0x58b   : > { %v4890_v10 = vsel %vm1601_vm0, %v4887_v41, %v4889_v21  ;;  %2175 = vrot.lane.b32.xlu0 %v14921_v63, %s17604_s14  ;;  %v3316_v63 = vsel %vm3192_vm6, %v3179_v22, %v2168_v51  ;;  %v11018_v51 = vld [vmem:[%s17586_s3 + $0x38] sm:$0xff] }
 0x58c   : > { %v15172_v4 = vmax.f32 %v4511_v6, %v4890_v10  ;;  %v3453_v27 = vsel %vm3329_vm7, %v3316_v63, %v15048_v11  ;;  %6837 = vmatpush.bf16.msrb.mxu1 %v11018_v51  ;;  %v11020_v11 = vld [vmem:[%s17586_s3 + $0x48] sm:$0xff]  ;;  %v11014_v22 = vld [vmem:[%s17586_s3 + $0x18] sm:$0xff]  ;;  %v11194_v63 = vld [vmem:[#allocation2] sm:$0xf0] }
 0x58d   : > { %v2621_v44 = vpop.permute.xlu0 %2620  ;;  %1580 = vrot.lane.b32.xlu2 %v14614_v25, %s17598_s16  ;;  %2775 = vrot.lane.b32.xlu1 %v2640_v38, %s17602_s17  ;;  %v11021_v25 = vld [vmem:[%s17586_s3 + $0x50] sm:$0xff]  ;;  %v3590_v16 = vsel %vm3466_vm8, %v3453_v27, %v15115_v19  ;;  %s17665_s16 = smov 32  }
 0x58e   : > { %v4332_v17 = vpop.f32.mrf.mxu0  ;;  %6941 = vmatpush.bf16.msra.mxu2 %v11021_v25  ;;  %v3727_v0 = vsel %vm3603_vm9, %v3590_v16, %v2621_v44 }
 0x58f   : > { %v4333_v6 = vadd.f32 %v14996_v42, %v4332_v17  ;;  %v1866_v41 = vpop.permute.xlu1 %1865  ;;  %v15189_v34 = vpop.permute.xlu2 %2159  ;;  %v11195_v17 = vld [vmem:[#allocation2] sm:$0xe] }
 0x590   : > { %6838 = vmatpush.bf16.msrb.mxu1 %v11017_v43  ;;  %v6124_v43 = vrot.slane %v14939_v54, 1 }
 0x591   : > { %v4513_v59 = vmax.f32 %v4333_v6, 0.0 }
 0x592   : > { %6942 = vmatpush.bf16.msra.mxu2 %v11020_v11 }
 0x593   : > { %v4891_v9 = vrot.slane %v4513_v59, 1  ;;  %2628 = vrot.lane.b32.xlu0 %v2481_v30, %s11428_s21 }
 0x595   : > { %v4892_v24 = vsel %vm1601_vm0, %v4889_v21, %v4891_v9  ;;  %v2768_v45 = vpop.permute.xlu0 %2767  ;;  %2163 = vrot.lane.b32.xlu2 %v14774_v18, %s17604_s14  ;;  %2003 = vrot.lane.b32.xlu1 %v11338_v29, %s17623_s24  ;;  %v11019_v18 = vld [vmem:[%s17586_s3 + $0x40] sm:$0xff]  ;;  %v11016_v29 = vld [vmem:[%s17586_s3 + $0x28] sm:$0xff]  ;;  %v15234_v21 = vld [vmem:[#allocation2 + $0x18] sm:$0xff]  ;;  %s17663_s14 = smov 8   ;;  %v11196_v9 = vor.u32 %v11195_v17, %v11194_v63 }
 0x596   : > { %v15216_v19 = vmax.f32 %v4512_v40, %v4892_v24  ;;  %v4334_v8 = vpop.f32.mrf.mxu0  ;;  %v3864_v35 = vsel %vm3740_vm10, %v3727_v0, %v2768_v45  ;;  %v3046_v40 = vsel %vm17659_vm13, %v2909_v7, %v1866_v41  ;;  %6943 = vmatpush.bf16.msra.mxu2 %v11019_v18  ;;  %6839 = vmatpush.bf16.msrb.mxu1 %v11016_v29  ;;  %v11011_v0 = vld [vmem:[%s17586_s3] sm:$0xff]  ;;  %v11340_v29 = vld [vmem:[%s11534_s25 + $0x1c8] sm:$0xff]  ;;  %vm17666_vm13 = vmmov %vm17628_vm12 }
 0x597   : > { %10319 = vmatmul.msk.bf16.gmra.mxu1 %vm3917_vm11, %v3864_v35  ;;  %v2319_v62 = vpop.permute.xlu1 %2318  ;;  %v15220_v56 = vpop.permute.xlu2 %2452  ;;  %v3183_v38 = vsel %vm3055_vm5, %v3046_v40, %v15094_v13  ;;  %v11013_v13 = vld [vmem:[%s17586_s3 + $0x10] sm:$0xff]  ;;  %v6123_v11 = vrot.slane %v11196_v9, 1  ;;  %v5956_v8 = vshrl.u32 %v15074_v3, 16  ;;  %v2897_v40 = vsel %vm2781_vm3, %v11340_v29, %v15154_v52 }
 0x599   : > { %v6125_v7 = vsel %vm1601_vm0, %v6123_v11, %v6124_v43  ;;  %v5964_v11 = vshrl.u32 %v15234_v21, 16 }
 0x59a   : > { %6840 = vmatpush.bf16.msrb.mxu1 %v11015_v37 }
 0x59b   : > { %1857 = vrot.lane.b32.xlu0 %v14645_v49, %s17660_s22 }
 0x59d   : > { %v2172_v23 = vpop.permute.xlu0 %2171  ;;  %2456 = vrot.lane.b32.xlu2 %v11339_v26, %s11421_s26  ;;  %6169 = vrot.lane.b32.xlu1 %v15234_v21, %s17661_s29 }
 0x59e   : > { %v3320_v10 = vsel %vm3192_vm6, %v3183_v38, %v2172_v23  ;;  %6841 = vmatpush.bf16.msrb.mxu1 %v11014_v22  ;;  %v15305_v38 = vld [vmem:[%s11534_s25 + $0x238] sm:$0xff] }
 0x59f   : > { %v2772_v49 = vpop.permute.xlu1 %2771  ;;  %v15245_v50 = vpop.permute.xlu2 %1590  ;;  %v3457_v44 = vsel %vm3329_vm7, %v3320_v10, %v2319_v62  ;;  %v2641_v63 = vrot.slane %v15305_v38, 1 }
 0x5a0   : > { %v3594_v41 = vsel %vm3466_vm8, %v3457_v44, %v15117_v14 }
 0x5a2   : > { %6842 = vmatpush.bf16.msrb.mxu1 %v11013_v13 }
 0x5a3   : > { %2310 = vrot.lane.b32.xlu0 %v14757_v28, %s17662_s23 }
 0x5a5   : > { %v4337_v6 = vpop.f32.mrf.mxu0  ;;  %v2625_v30 = vpop.permute.xlu0 %2624  ;;  %1594 = vrot.lane.b32.xlu2 %v14749_v20, %s17663_s14  ;;  %2763 = vrot.lane.b32.xlu1 %v14796_v57, %s17661_s29  ;;  %v11012_v20 = vld [vmem:[%s17586_s3 + $0x8] sm:$0xff]  ;;  %v5960_v57 = vshll.u32 %v15234_v21, 16 }
 0x5a6   : > { %v4338_v28 = vadd.f32 %v14996_v42, %v4337_v6  ;;  %v3731_v27 = vsel %vm3603_vm9, %v3594_v41, %v2625_v30  ;;  %6843 = vmatpush.bf16.msrb.mxu1 %v11012_v20  ;;  %v15322_v30 = vld [vmem:[#allocation2 + $0x20] sm:$0xff] }
 0x5a7   : > { %v2000_v59 = vpop.permute.xlu1 %1999  ;;  %v15264_v25 = vpop.permute.xlu2 %2013  ;;  %v3868_v51 = vsel %vm3740_vm10, %v3731_v27, %v2772_v49  ;;  %v5962_v35 = vrot.slane %v5960_v57, 1  ;;  %v2486_v27 = vshll.u32 %v15305_v38, 16  ;;  %v5968_v20 = vshll.u32 %v15322_v30, 16 }
 0x5a8   : > { %v4515_v16 = vmax.f32 %v4338_v28, 0.0  ;;  %10321 = vmatmul.msk.bf16.gmra.mxu3 %vm3917_vm11, %v3868_v51  ;;  %v2482_v28 = vshrl.u32 %v15131_v53, 16 }
 0x5aa   : > { %v4895_v14 = vrot.slane %v4515_v16, 1  ;;  %6844 = vmatpush.bf16.msrb.mxu1 %v11011_v0  ;;  %v2484_v9 = vor.u32 %v2482_v28, %v15177_v61  ;;  %v15351_v0 = vrot.slane %v5968_v20, 1 }
 0x5ab   : > { %2616 = vrot.lane.b32.xlu0 %v14815_v47, %s11428_s21 }
 0x5ad   : > { %v4339_v24 = vpop.f32.mrf.mxu0  ;;  %v1854_v45 = vpop.permute.xlu0 %1853  ;;  %2017 = vrot.lane.b32.xlu2 %v14877_v60, %s17623_s24  ;;  %1871 = vrot.lane.b32.xlu1 %v14723_v33, %s17660_s22  ;;  %v5958_v33 = vor.u32 %v5956_v8, %v15112_v32  ;;  %v556_v32 = vld [vmem:[%s11534_s25 + $0x220] sm:$0x1] }
 0x5ae   : > { %v15283_v47 = vadd.f32 %v14996_v42, %v4339_v24  ;;  %v3034_v10 = vsel %vm17664_vm15, %v2897_v40, %v1854_v45  ;;  %v911_v17 = vunpack.c.l.b16 %v556_v32  ;;  %v562_v45 = vld [vmem:[%s11534_s25 + $0x230] sm:$0x1]  ;;  %v568_v8 = vld [vmem:[%s11534_s25 + $0x240] sm:$0x1]  ;;  %vm17667_vm15 = vmmov %vm17628_vm12 }
 0x5af   : > { %v15286_v62 = vpop.permute.xlu2 %2466  ;;  %v6166_v26 = vpop.permute.xlu1 %6165  ;;  %v15302_v23 = vsel %vm913_vm1, %v5958_v33, %v5962_v35  ;;  %v3171_v44 = vsel %vm3055_vm5, %v3034_v10, %v2000_v59  ;;  %v2475_v33 = vunpack.c.l.b16 %v568_v8 }
 0x5b0   : > { %v4516_v60 = vmax.f32 %v15283_v47, 0.0  ;;  %v6354_v18 = vsel %vm3740_vm10, %v6125_v7, %v6166_v26  ;;  %v912_v51 = vpack.c.b16 %v911_v17, %v911_v17  ;;  %v2022_v26 = vunpack.c.l.b16 %v562_v45 }
 0x5b1   : > { %6944 = vmatmul.bf16.vlgmr.msra.gmra.mxu2 %v6354_v18  ;;  %v5966_v18 = vor.u32 %v5964_v11, %v5962_v35  ;;  %v2476_v17 = vpack.c.b16 %v2475_v33, %v2475_v33 }
 0x5b2   : > { %v15299_v37 = vrot.slane %v4516_v60, 1  ;;  %v1458_v24 = vshll.u32 %v912_v51, 16  ;;  %v2023_v29 = vpack.c.b16 %v2022_v26, %v2022_v26  ;;  %v15410_v26 = vld [vmem:[#allocation2 + $0x30] sm:$0xff] }
 0x5b3   : > { %6088 = vrot.lane.b32.xlu0 %v15302_v23, %s17661_s29  ;;  %v15360_v40 = vsel %vm913_vm1, %v5966_v18, %v15351_v0 }
 0x5b4   : > { %v4898_v49 = vsel %vm1601_vm0, %v4895_v14, %v15299_v37  ;;  %v1460_v10 = vrot.slane %v1458_v24, 1 }
 0x5b5   : > { %v5195_v22 = vmax.f32 %v4515_v16, %v4898_v49  ;;  %v2307_v52 = vpop.permute.xlu0 %2306  ;;  %2470 = vrot.lane.b32.xlu2 %v15131_v53, %s11421_s26  ;;  %2324 = vrot.lane.b32.xlu1 %v15032_v31, %s17662_s23  ;;  %v3308_v31 = vsel %vm3192_vm6, %v3171_v44, %v15189_v34  ;;  %v2488_v16 = vrot.slane %v2486_v27, 1  ;;  %v2041_v49 = vshll.u32 %v2023_v29, 16 }
 0x5b6   : > { %v3445_v59 = vsel %vm3329_vm7, %v3308_v31, %v2307_v52  ;;  %v2190_v44 = vrot.slane %v2023_v29, 1  ;;  %v1461_v31 = vsel %vm913_vm1, %v14905_v15, %v1460_v10  ;;  %v5984_v10 = vshll.u32 %v15410_v26, 16 }
 0x5b7   : > { %v5327_v13 = vmax.f32 %v15172_v4, %v5195_v22  ;;  %v15320_v6 = vpop.permute.xlu2 %1578  ;;  %v2760_v41 = vpop.permute.xlu1 %2759  ;;  %v2642_v4 = vsel %vm1601_vm0, %v2639_v1, %v2641_v63  ;;  %v3582_v34 = vsel %vm3466_vm8, %v3445_v59, %v15220_v56  ;;  %v1737_v1 = vrot.slane %v912_v51, 1  ;;  %v11341_v22 = vld [vmem:[%s11534_s25 + $0x200] sm:$0xff] }
 0x5b8   : > { %v2489_v56 = vsel %vm913_vm1, %v2484_v9, %v2488_v16  ;;  %v2043_v27 = vrot.slane %v2041_v49, 1  ;;  %v2490_v51 = vshrl.u32 %v15305_v38, 16  ;;  %v2494_v9 = vshll.u32 %v2476_v17, 16 }
 0x5b9   : > { %5459 = vst.msk [vmem:[#allocation5 + $0x340] sm:$0xff] %vm3740_vm10, %v5327_v13  ;;  %v1738_v7 = vsel %vm1601_vm0, %v14709_v46, %v1737_v1  ;;  %v2911_v46 = vsel %vm2781_vm3, %v11341_v22, %v15245_v50  ;;  %v2191_v50 = vsel %vm1601_vm0, %v15017_v58, %v2190_v44 }
 0x5ba   : > { %v2492_v1 = vor.u32 %v2490_v51, %v2488_v16 }
 0x5bb   : > { %2177 = vrot.lane.b32.xlu0 %v15053_v12, %s17665_s16 }
 0x5bd   : > { %v2613_v14 = vpop.permute.xlu0 %2612  ;;  %2777 = vrot.lane.b32.xlu1 %v2642_v4, %s17661_s29  ;;  %6171 = vrot.lane.b32.xlu2 %v15322_v30, %s17661_s29 }
 0x5be   : > { %v3719_v53 = vsel %vm3603_vm9, %v3582_v34, %v2613_v14 }
 0x5bf   : > { %v15345_v12 = vpop.permute.xlu2 %2161  ;;  %v1868_v61 = vpop.permute.xlu1 %1867  ;;  %v3856_v57 = vsel %vm3740_vm10, %v3719_v53, %v2760_v41  ;;  %v2643_v53 = vrot.slane %v2476_v17, 1 }
 0x5c0   : > { %10315 = vmatmul.msk.bf16.gmra.mxu0 %vm3917_vm11, %v3856_v57  ;;  %v3048_v59 = vsel %vm17628_vm12, %v2911_v46, %v1868_v61  ;;  %v2496_v61 = vrot.slane %v2494_v9, 1 }
 0x5c1   : > { %v3185_v15 = vsel %vm3055_vm5, %v3048_v59, %v15264_v25  ;;  %v15394_v25 = vld [vmem:[#allocation2 + $0x28] sm:$0xff]  ;;  %v2644_v47 = vsel %vm1601_vm0, %v2641_v63, %v2643_v53 }
 0x5c2   : > { %v5976_v16 = vshll.u32 %v15394_v25, 16  ;;  %v5980_v9 = vshrl.u32 %v15394_v25, 16 }
 0x5c3   : > { %2630 = vrot.lane.b32.xlu0 %v2489_v56, %s11428_s21 }
 0x5c4   : > { %v5978_v33 = vrot.slane %v5976_v16, 1 }
 0x5c5   : > { %v6085_v32 = vpop.permute.xlu0 %6084  ;;  %1873 = vrot.lane.b32.xlu2 %v1738_v7, %s17660_s22  ;;  %6090 = vrot.lane.b32.xlu1 %v15360_v40, %s17661_s29 }
 0x5c6   : > { %v4342_v35 = vpop.f32.mrf.mxu0  ;;  %v6299_v52 = vsel %vm3740_vm10, %v14959_v2, %v6085_v32  ;;  %v2044_v2 = vsel %vm913_vm1, %v15175_v5, %v2043_v27  ;;  %v15424_v32 = vrot.slane %v15074_v3, 1  ;;  %v15442_v27 = vld [vmem:[#allocation2 + $0x40] sm:$0xff] }
 0x5c7   : > { %v4343_v13 = vadd.f32 %v14996_v42, %v4342_v35  ;;  %6845 = vmatmul.bf16.vlgmr.msrb.gmra.mxu1 %v6299_v52  ;;  %v15371_v41 = vpop.permute.xlu2 %2454  ;;  %v2321_v28 = vpop.permute.xlu1 %2320  ;;  %v5986_v35 = vrot.slane %v5984_v10, 1 }
 0x5c8   : > { %v6127_v3 = vsel %vm1601_vm0, %v6124_v43, %v15424_v32  ;;  %v6000_v43 = vshll.u32 %v15442_v27, 16 }
 0x5c9   : > { %v4517_v4 = vmax.f32 %v4343_v13, 0.0  ;;  %v5988_v13 = vshrl.u32 %v15410_v26, 16 }
 0x5ca   : > { %v6002_v53 = vrot.slane %v6000_v43, 1 }
 0x5cb   : > { %v4899_v20 = vrot.slane %v4517_v4, 1  ;;  %1596 = vrot.lane.b32.xlu0 %v1461_v31, %s17663_s14  ;;  %v11342_v31 = vld [vmem:[%s11534_s25 + $0x1d0] sm:$0xff]  ;;  %v5990_v4 = vor.u32 %v5988_v13, %v5986_v35  ;;  %s9894_s14 = scalar_lea.hbm %s17592_s9, %s10918_s28  ;;  %s11377_s28 = scalar_lea.hbm %s17592_s9, 4 }
 0x5cc   : > { %v2899_v59 = vsel %vm2781_vm3, %v11342_v31, %v15320_v6 }
 0x5cd   : > { %v4900_v34 = vsel %vm1601_vm0, %v15299_v37, %v4899_v20  ;;  %v2174_v14 = vpop.permute.xlu0 %2173  ;;  %2326 = vrot.lane.b32.xlu2 %v2191_v50, %s17662_s23  ;;  %2179 = vrot.lane.b32.xlu1 %v2044_v2, %s17665_s16  ;;  %v15460_v20 = vld [vmem:[#allocation2 + $0x48] sm:$0xff]  ;;  %s323_s23 = sand.u32 1, %s11411_s10  }
 0x5ce   : > { %v5196_v58 = vmax.f32 %v4516_v60, %v4900_v34  ;;  %v4344_v5 = vpop.f32.mrf.mxu0  ;;  %v3322_v57 = vsel %vm3192_vm6, %v3185_v15, %v2174_v14  ;;  %v2497_v60 = vsel %vm913_vm1, %v2492_v1, %v2496_v61  ;;  %v15465_v1 = vld [vmem:[#allocation2 + $0x50] sm:$0xff]  ;;  %v6008_v61 = vshll.u32 %v15460_v20, 16  ;;  %s9964_s17 = sshll.u32 %s323_s23, 1 }
 0x5cf   : > { %v15391_v11 = vpop.permute.xlu2 %1592  ;;  %v2774_v37 = vpop.permute.xlu1 %2773  ;;  %v3459_v24 = vsel %vm3329_vm7, %v3322_v57, %v2321_v28  ;;  %s17532_s27 = scalar_lea.vmem [#allocation6], %s9964_s17 }
 0x5d0   : > { %v5328_v56 = vmax.f32 %v15216_v19, %v5196_v58  ;;  %v3596_v19 = vsel %vm3466_vm8, %v3459_v24, %v15286_v62  ;;  %v15417_v62 = vld [vmem:[#allocation2 + $0x38] sm:$0xff]  ;;  %v5982_v58 = vor.u32 %v5980_v9, %v5978_v33 }
 0x5d1   : > { %v5992_v22 = vshll.u32 %v15417_v62, 16  ;;  %v5996_v5 = vshrl.u32 %v15417_v62, 16 }
 0x5d2   : > { %5460 = vst.msk [vmem:[#allocation5 + $0x348] sm:$0xff] %vm3740_vm10, %v5328_v56  ;;  %v15472_v24 = vsel %vm913_vm1, %v5982_v58, %v5986_v35  ;;  %v6004_v58 = vshrl.u32 %v15442_v27, 16 }
 0x5d3   : > { %2019 = vrot.lane.b32.xlu0 %v15006_v48, %s17623_s24  ;;  %v5972_v48 = vshrl.u32 %v15322_v30, 16  ;;  %v5994_v28 = vrot.slane %v5992_v22, 1 }
 0x5d5   : > { %v2627_v45 = vpop.permute.xlu0 %2626  ;;  %2779 = vrot.lane.b32.xlu2 %v2644_v47, %s17661_s29  ;;  %2632 = vrot.lane.b32.xlu1 %v2497_v60, %s11428_s21  ;;  %v5974_v29 = vor.u32 %v5972_v48, %v15351_v0  ;;  %v4367_v0 = vpop.f32.mrf.mxu1  ;;  %v15451_v54 = vsel %vm913_vm1, %v5990_v4, %v5994_v28  ;;  %v5998_v47 = vor.u32 %v5996_v5, %v5994_v28  ;;  %v6012_v60 = vshrl.u32 %v15460_v20, 16  ;;  %v5737_v4 = vld [vmem:[#allocation2 + $0x7c] sm:$0x1]  ;;  %s9897_s21 = sshll.u32 %s9894_s14, 4  ;;  %s9898_s21 = int_to_ptr.hbm [resolvable:$true] %s9897_s21 }
 0x5d6   : > { %v3733_v8 = vsel %vm3603_vm9, %v3596_v19, %v2627_v45  ;;  %s11371_s13 = sshra.s32 %s9898_s21, 4  ;;  %s11372_s13 = int_to_ptr.hbm [resolvable:$true] %s11371_s13 }
 0x5d7   : > { %v15412_v63 = vpop.permute.xlu2 %2015  ;;  %v2002_v7 = vpop.permute.xlu1 %2001  ;;  %v3870_v18 = vsel %vm3740_vm10, %v3733_v8, %v2774_v37  ;;  %v15427_v49 = vsel %vm913_vm1, %v5974_v29, %v5978_v33  ;;  %v15481_v8 = vsel %vm913_vm1, %v5998_v47, %v6002_v53  ;;  %v4368_v29 = vadd.f32 %v14996_v42, %v4367_v0  ;;  %v15525_v47 = vld [vmem:[#allocation2 + $0x60] sm:$0xff]  ;;  %s11373_s24 = scalar_lea.hbm %s11372_s13, 2  ;;  %p11378_p0 = scmp.lt.s32.totalorder %s11372_s13, %s17592_s9 }
 0x5d8   : > { %10322 = vmatmul.msk.bf16.gmra.mxu3 %vm3917_vm11, %v3870_v18  ;;  %p11374_p11 = scmp.ne.s32.totalorder %s11372_s13, %s11373_s24  ;;  %p11379_p1 = scmp.lt.s32.totalorder %s11377_s28, %s11373_s24 }
 0x5d9   : > { %v5722_v44 = vld [vmem:[#allocation5 + $0x340] ss:$2 sm:$0xff]  ;;  %v4527_v0 = vmax.f32 %v4368_v29, 0.0 }
 0x5da   : > { %v5723_v50 = vpack.c.bf16 %v5722_v44, %v5722_v44  ;;  %p11375_p12 = pnand %p11374_p11, %p11519_p5  ;;  %p11380_p2 = por %p11379_p1, %p11378_p0 }
 0x5db   : > { %2472 = vrot.lane.b32.xlu0 %v15305_v38, %s11421_s26 }
 0x5dc   : > { %v5725_v34 = vshrl.u32 %v5723_v50, 16  ;;  %v5728_v18 = vshll.u32 %v5723_v50, 16  ;;  %p11376_p13 = pneg %p11375_p12 }
 0x5dd   : > { %v1856_v46 = vpop.permute.xlu0 %1855  ;;  %6092 = vrot.lane.b32.xlu1 %v15427_v49, %s17661_s29  ;;  %6175 = vrot.lane.b32.xlu2 %v15410_v26, %s17661_s29  ;;  %v4369_v57 = vpop.f32.mrf.mxu1 }
 0x5de   : > { %v3036_v2 = vsel %vm17666_vm13, %v2899_v59, %v1856_v46  ;;  %v5727_v16 = vrot.slane %v5725_v34, 7  ;;  %v15478_v45 = vadd.f32 %v14996_v42, %v4369_v57  ;;  %v5734_v59 = vld [vmem:[#allocation2 + $0x78] sm:$0xf]  ;;  %vm17671_vm13 = vmmov %vm17628_vm12  ;;  %p11381_p3 = pnand %p11380_p2, %p11376_p13 }
 0x5df   : > { %v15434_v52 = vpop.permute.xlu2 %2468  ;;  %v6168_v38 = vpop.permute.xlu1 %6167  ;;  %v3173_v6 = vsel %vm3055_vm5, %v3036_v2, %v2002_v7  ;;  %v6016_v7 = vshll.u32 %v15465_v1, 16  ;;  %v6020_v2 = vshrl.u32 %v15465_v1, 16 }
 0x5e0   : > { %v6358_v17 = vsel %vm3740_vm10, %v6127_v3, %v6168_v38  ;;  %v3310_v37 = vsel %vm3192_vm6, %v3173_v6, %v15345_v12  ;;  %v6010_v12 = vrot.slane %v6008_v61, 1  ;;  %v5730_v46 = vor.u32 %v5728_v18, %v5727_v16  ;;  %v11344_v18 = vld [vmem:[%s11534_s25 + $0x208] sm:$0xff] }
 0x5e1   : > { %6949 = vmatmul.bf16.gmra.mxu2 %v6358_v17  ;;  %v5731_v35 = vrot.slane %v5727_v16, 4  ;;  %v4528_v17 = vmax.f32 %v15478_v45, 0.0  ;;  %v6018_v28 = vrot.slane %v6016_v7, 1  ;;  %v4919_v61 = vrot.slane %v4527_v0, 1 }
 0x5e2   : > { %v6014_v22 = vor.u32 %v6012_v60, %v6010_v12 }
 0x5e3   : > { %6173 = vrot.lane.b32.xlu0 %v15394_v25, %s17661_s29  ;;  %v5738_v6 = vsel %vm12570_vm4, %v5731_v35, %v5737_v4  ;;  %v15513_v9 = vrot.slane %v4528_v17, 1  ;;  %v6032_v35 = vshll.u32 %v15525_v47, 16 }
 0x5e4   : > { %v15501_v31 = vsel %vm913_vm1, %v6014_v22, %v6018_v28  ;;  %5739 = vst [vmem:[#allocation2 + $0x7c] sm:$0x1] %v5738_v6 }
 0x5e5   : > { %v2309_v51 = vpop.permute.xlu0 %2308  ;;  %6177 = vrot.lane.b32.xlu1 %v15417_v62, %s17661_s29  ;;  %6096 = vrot.lane.b32.xlu2 %v15451_v54, %s17661_s29 }
 0x5e6   : > { %v3447_v56 = vsel %vm3329_vm7, %v3310_v37, %v2309_v51  ;;  %v5735_v51 = vsel %vm12561_vm2, %v5730_v46, %v5734_v59  ;;  %v11343_v37 = vld [vmem:[#allocation2 + $0x8] sm:$0xff]  }
 0x5e7   : > { %v15462_v15 = vpop.permute.xlu2 %1580  ;;  %v2762_v14 = vpop.permute.xlu1 %2761  ;;  %v3584_v48 = vsel %vm3466_vm8, %v3447_v56, %v15371_v41  ;;  %v15495_v41 = vld [vmem:[#allocation2 + $0x58] sm:$0xff]  ;;  %5736 = vst [vmem:[#allocation2 + $0x78] sm:$0xf] %v5735_v51  ;;  %v6036_v51 = vshrl.u32 %v15525_v47, 16 }
 0x5e8   : > { %v6024_v43 = vshll.u32 %v15495_v41, 16 }
 0x5ea   : > { %v6026_v7 = vrot.slane %v6024_v43, 1 }
 0x5eb   : > { %6094 = vrot.lane.b32.xlu0 %v15472_v24, %s17661_s29  ;;  %v4377_v19 = vpop.f32.mrf.mxu3 }
 0x5ec   : > { %v4378_v13 = vadd.f32 %v14996_v42, %v4377_v19  ;;  %v6022_v19 = vor.u32 %v6020_v2, %v6018_v28 }
 0x5ed   : > { %v2615_v33 = vpop.permute.xlu0 %2614  ;;  %6181 = vrot.lane.b32.xlu2 %v15460_v20, %s17661_s29  ;;  %6098 = vrot.lane.b32.xlu1 %v15481_v8, %s17661_s29 }
 0x5ee   : > { %v3721_v10 = vsel %vm3603_vm9, %v3584_v48, %v2615_v33  ;;  %v4531_v34 = vmax.f32 %v4378_v13, 0.0  ;;  %v2913_v48 = vsel %vm2781_vm3, %v11344_v18, %v15391_v11  ;;  %v4922_v33 = vsel %vm1601_vm0, %v4919_v61, %v15513_v9  ;;  %v15584_v18 = vld [vmem:[%s17585_s2] ss:$0 sm:$0xff] }
 0x5ef   : > { %v15492_v38 = vpop.permute.xlu2 %2163  ;;  %v1870_v3 = vpop.permute.xlu1 %1869  ;;  %v3858_v44 = vsel %vm3740_vm10, %v3721_v10, %v2762_v14  ;;  %v15550_v28 = vsel %vm913_vm1, %v6022_v19, %v6026_v7  ;;  %v6028_v19 = vshrl.u32 %v15495_v41, 16 }
 0x5f0   : > { %10316 = vmatmul.msk.bf16.gmra.mxu0 %vm3917_vm11, %v3858_v44  ;;  %v4927_v29 = vrot.slane %v4531_v34, 1  ;;  %v5207_v44 = vmax.f32 %v4527_v0, %v4922_v33  ;;  %v3050_v11 = vsel %vm17667_vm15, %v2913_v48, %v1870_v3  ;;  %v6034_v3 = vrot.slane %v6032_v35, 1  ;;  %vm17674_vm15 = vmmov %vm17628_vm12 }
 0x5f3   : > { %6179 = vrot.lane.b32.xlu0 %v15442_v27, %s17661_s29  ;;  %v4379_v50 = vpop.f32.mrf.mxu3 }
 0x5f4   : > { %v15516_v14 = vadd.f32 %v14996_v42, %v4379_v50  ;;  %v6006_v42 = vor.u32 %v6004_v58, %v6002_v53  ;;  %v15538_v53 = vld [vmem:[#allocation2 + $0x68] sm:$0xff] }
 0x5f5   : > { %v6087_v5 = vpop.permute.xlu0 %6086  ;;  %6102 = vrot.lane.b32.xlu2 %v15501_v31, %s17661_s29  ;;  %6183 = vrot.lane.b32.xlu1 %v15465_v1, %s17661_s29  ;;  %v6040_v59 = vshll.u32 %v15538_v53, 16 }
 0x5f6   : > { %v17608_v57 = vmax.f32 %v15516_v14, 0.0  ;;  %v6302_v56 = vsel %vm3740_vm10, %v11343_v37, %v6087_v5  ;;  %v15543_v46 = vsel %vm913_vm1, %v6006_v42, %v6010_v12  ;;  %v3187_v12 = vsel %vm3055_vm5, %v3050_v11, %v15412_v63 }
 0x5f7   : > { %6850 = vmatmul.bf16.gmra.mxu1 %v6302_v56  ;;  %v15527_v60 = vpop.permute.xlu2 %2456  ;;  %v2323_v16 = vpop.permute.xlu1 %2322  ;;  %v6042_v6 = vrot.slane %v6040_v59, 1  ;;  %v6038_v5 = vor.u32 %v6036_v51, %v6034_v3 }
 0x5f8   : > { %v15536_v10 = vrot.slane %v17608_v57, 1 }
 0x5f9   : > { %v15570_v63 = vsel %vm913_vm1, %v6038_v5, %v6042_v6 }
 0x5fa   : > { %v4930_v22 = vsel %vm1601_vm0, %v4927_v29, %v15536_v10  ;;  %17668 = vst [vmem:[#allocation9_spill] sm:$0xff] %v15570_v63  ;;  %v6030_v29 = vor.u32 %v6028_v19, %v6026_v7 }
 0x5fb   : > { %v5211_v13 = vmax.f32 %v4531_v34, %v4930_v22  ;;  %6100 = vrot.lane.b32.xlu0 %v15543_v46, %s17661_s29  ;;  %v15564_v34 = vld [vmem:[#allocation2 + $0x70] sm:$0xff]  ;;  %v6044_v22 = vshrl.u32 %v15538_v53, 16 }
 0x5fc   : > { %v6048_v61 = vshll.u32 %v15564_v34, 16 }
 0x5fd   : > { %v5343_v4 = vmax.f32 %v5207_v44, %v5211_v13  ;;  %v2176_v50 = vpop.permute.xlu0 %2175  ;;  %6104 = vrot.lane.b32.xlu1 %v15550_v28, %s17661_s29  ;;  %6187 = vrot.lane.b32.xlu2 %v15525_v47, %s17661_s29  ;;  %v15593_v13 = vsel %vm913_vm1, %v6030_v29, %v6034_v3  ;;  %v6046_v59 = vor.u32 %v6044_v22, %v6042_v6 }
 0x5fe   : > { %v3324_v0 = vsel %vm3192_vm6, %v3187_v12, %v2176_v50  ;;  %v6050_v35 = vrot.slane %v6048_v61, 1  ;;  %v15597_v50 = vld [vmem:[#allocation2 + $0x78] sm:$0xff]  ;;  %v15600_v12 = vrot.slane %v15234_v21, 1 }
 0x5ff   : > { %5475 = vst.msk [vmem:[#allocation5 + $0x3c0] sm:$0xff] %vm3740_vm10, %v5343_v4  ;;  %v15561_v2 = vpop.permute.xlu2 %1594  ;;  %v2776_v43 = vpop.permute.xlu1 %2775  ;;  %v3461_v58 = vsel %vm3329_vm7, %v3324_v0, %v2323_v16  ;;  %v11346_v61 = vld [vmem:[%s11534_s25 + $0x1d8] sm:$0xff] }
 0x600   : > { %v3598_v37 = vsel %vm3466_vm8, %v3461_v58, %v15434_v52  ;;  %v15603_v7 = vsel %vm913_vm1, %v6046_v59, %v6050_v35  ;;  %v15615_v6 = vsel %vm1601_vm0, %v15424_v32, %v15600_v12 }
 0x601   : > { %17669 = vst [vmem:[#allocation10_spill] sm:$0xff] %v15603_v7 }
 0x603   : > { %6185 = vrot.lane.b32.xlu0 %v15495_v41, %s17661_s29 }
 0x605   : > { %v2629_v56 = vpop.permute.xlu0 %2628  ;;  %6189 = vrot.lane.b32.xlu1 %v15538_v53, %s17661_s29  ;;  %6108 = vrot.lane.b32.xlu2 %v15570_v63, %s17661_s29 }
 0x606   : > { %v3735_v42 = vsel %vm3603_vm9, %v3598_v37, %v2629_v56  ;;  %v4347_v16 = vpop.f32.mrf.mxu0  ;;  %v2901_v37 = vsel %vm2781_vm3, %v11346_v61, %v15462_v15  ;;  %v6056_v56 = vshll.u32 %v15597_v50, 16  ;;  %v6052_v15 = vshrl.u32 %v15564_v34, 16 }
 0x607   : > { %v4348_v48 = vadd.f32 %v15584_v18, %v4347_v16  ;;  %v2004_v52 = vpop.permute.xlu1 %2003  ;;  %v3872_v33 = vsel %vm3740_vm10, %v3735_v42, %v2776_v43  ;;  %v15590_v11 = vpop.permute.xlu2 %2017 }
 0x608   : > { %10323 = vmatmul.msk.bf16.gmra.mxu3 %vm3917_vm11, %v3872_v33  ;;  %v15637_v59 = vrot.slane %v6056_v56, 1 }
 0x609   : > { %v4519_v44 = vmax.f32 %v4348_v48, 0.0 }
 0x60b   : > { %v4903_v4 = vrot.slane %v4519_v44, 1  ;;  %6106 = vrot.lane.b32.xlu0 %v15593_v13, %s17661_s29 }
 0x60d   : > { %v1858_v0 = vpop.permute.xlu0 %1857  ;;  %6110 = vrot.lane.b32.xlu1 %v15603_v7, %s17661_s29  ;;  %6193 = vrot.lane.b32.xlu2 %v15597_v50, %s17661_s29 }
 0x60e   : > { %v4349_v3 = vpop.f32.mrf.mxu0  ;;  %v3038_v42 = vsel %vm17628_vm12, %v2901_v37, %v1858_v0 }
 0x60f   : > { %v15610_v43 = vadd.f32 %v15584_v18, %v4349_v3  ;;  %v6170_v51 = vpop.permute.xlu1 %6169  ;;  %v2471_v19 = vpop.permute.xlu2 %2470  ;;  %v3175_v29 = vsel %vm3055_vm5, %v3038_v42, %v2004_v52  ;;  %v6054_v3 = vor.u32 %v6052_v15, %v6050_v35  ;;  %v17606_v52 = vrot.slane %v15322_v30, 1  ;;  %v11347_v15 = vld [vmem:[#allocation2 + $0x10] sm:$0xff]  }
 0x610   : > { %v6362_v58 = vsel %vm3740_vm10, %v15615_v6, %v6170_v51  ;;  %v3312_v51 = vsel %vm3192_vm6, %v3175_v29, %v15492_v38 }
 0x611   : > { %v17607_v5 = vmax.f32 %v15610_v43, 0.0  ;;  %6954 = vmatmul.bf16.gmra.mxu2 %v6362_v58  ;;  %v15644_v61 = vsel %vm913_vm1, %v6054_v3, %v15637_v59 }
 0x612   : > { %17670 = vst [vmem:[#allocation11_spill] sm:$0xff] %v15644_v61 }
 0x613   : > { %v15627_v16 = vrot.slane %v17607_v5, 1  ;;  %6191 = vrot.lane.b32.xlu0 %v15564_v34, %s17661_s29 }
 0x614   : > { %v4372_v38 = vpop.f32.mrf.mxu1 }
 0x615   : > { %v4906_v48 = vsel %vm1601_vm0, %v4903_v4, %v15627_v16  ;;  %v2311_v33 = vpop.permute.xlu0 %2310 }
 0x616   : > { %v15634_v22 = vmax.f32 %v4519_v44, %v4906_v48  ;;  %v3449_v58 = vsel %vm3329_vm7, %v3312_v51, %v2311_v33  ;;  %v15657_v48 = vsel %vm1601_vm0, %v15600_v12, %v17606_v52  ;;  %v11348_v51 = vld [vmem:[%s11534_s25 + $0x210] sm:$0xff] }
 0x617   : > { %v2764_v0 = vpop.permute.xlu1 %2763  ;;  %v6172_v44 = vpop.permute.xlu2 %6171  ;;  %v3586_v4 = vsel %vm3466_vm8, %v3449_v58, %v15527_v60  ;;  %v4373_v60 = vadd.f32 %v15584_v18, %v4372_v38  ;;  %v2915_v58 = vsel %vm2781_vm3, %v11348_v51, %v15561_v2 }
 0x618   : > { %v6366_v33 = vsel %vm3740_vm10, %v15657_v48, %v6172_v44 }
 0x61b   : > { %6112 = vrot.lane.b32.xlu0 %v15644_v61, %s17661_s29 }
 0x61d   : > { %v2617_v35 = vpop.permute.xlu0 %2616 }
 0x61e   : > { %v3723_v37 = vsel %vm3603_vm9, %v3586_v4, %v2617_v35  ;;  %v4529_v4 = vmax.f32 %v4373_v60, 0.0  ;;  %v4374_v35 = vpop.f32.mrf.mxu1 }
 0x61f   : > { %v1872_v56 = vpop.permute.xlu1 %1871  ;;  %v3860_v42 = vsel %vm3740_vm10, %v3723_v37, %v2764_v0 }
 0x620   : > { %10317 = vmatmul.msk.bf16.gmra.mxu0 %vm3917_vm11, %v3860_v42  ;;  %v3052_v37 = vsel %vm17671_vm13, %v2915_v58, %v1872_v56  ;;  %v4923_v42 = vrot.slane %v4529_v4, 1  ;;  %v17672_v58 = vmax.f32 %v15516_v14, 0.0 }
 0x621   : > { %6959 = vmatmul.bf16.gmra.mxu2 %v6366_v33 }
 0x622   : > { %v4924_v57 = vsel %vm1601_vm0, %v15513_v9, %v4923_v42 }
 0x623   : > { %v5208_v51 = vmax.f32 %v4528_v17, %v4924_v57  ;;  %v1874_v17 = vpop.permute.xlu2 %1873 }
 0x625   : > { %v6089_v29 = vpop.permute.xlu0 %6088 }
 0x626   : > { %v15664_v3 = vsel %vm3740_vm10, %v11347_v15, %v6089_v29  ;;  %v3189_v29 = vsel %vm3055_vm5, %v3052_v37, %v15590_v11 }
 0x627   : > { %6855 = vmatmul.bf16.gmra.mxu1 %v15664_v3  ;;  %v2325_v0 = vpop.permute.xlu1 %2324 }
 0x62b   : > { %v4382_v44 = vpop.f32.mrf.mxu3 }
 0x62c   : > { %v4383_v38 = vadd.f32 %v15584_v18, %v4382_v44 }
 0x62d   : > { %v2178_v33 = vpop.permute.xlu0 %2177 }
 0x62e   : > { %v4533_v52 = vmax.f32 %v4383_v38, 0.0  ;;  %v3326_v15 = vsel %vm3192_vm6, %v3189_v29, %v2178_v33 }
 0x62f   : > { %v2778_v5 = vpop.permute.xlu1 %2777  ;;  %v3463_v56 = vsel %vm3329_vm7, %v3326_v15, %v2325_v0 }
 0x630   : > { %v4931_v2 = vrot.slane %v4533_v52, 1  ;;  %v3600_v37 = vsel %vm3466_vm8, %v3463_v56, %v2471_v19 }
 0x632   : > { %v4932_v60 = vsel %vm1601_vm0, %v15536_v10, %v4931_v2 }
 0x633   : > { %v5212_v4 = vmax.f32 %v17672_v58, %v4932_v60  ;;  %v4384_v35 = vpop.f32.mrf.mxu3  ;;  %v11349_v60 = vld [vmem:[%s11534_s25 + $0x218] sm:$0xff]  ;;  %v5772_v58 = vld [vmem:[#allocation2 + $0x88] sm:$0xf]  ;;  %s9895_s25 = sshll.u32 %s17532_s27, 4  ;;  %s9896_s25 = int_to_ptr.vmem [resolvable:$true] %s9895_s25 }
 0x635   : > { %v5344_v11 = vmax.f32 %v5208_v51, %v5212_v4  ;;  %v2631_v44 = vpop.permute.xlu0 %2630  ;;  %v5775_v4 = vld [vmem:[#allocation2 + $0x8c] sm:$0x1] }
 0x636   : > { %v3737_v38 = vsel %vm3603_vm9, %v3600_v37, %v2631_v44  ;;  %v17673_v37 = vmax.f32 %v15610_v43, 0.0 }
 0x637   : > { %5476 = vst.msk [vmem:[#allocation5 + $0x3c8] sm:$0xff] %vm3740_vm10, %v5344_v11  ;;  %v6091_v9 = vpop.permute.xlu1 %6090  ;;  %v3874_v10 = vsel %vm3740_vm10, %v3737_v38, %v2778_v5 }
 0x638   : > { %10324 = vmatmul.msk.bf16.gmra.mxu3 %vm3917_vm11, %v3874_v10  ;;  %v15691_v45 = vsel %vm3740_vm10, %v15234_v21, %v6091_v9  ;;  %v2327_v21 = vpop.permute.xlu2 %2326 }
 0x639   : > { %6860 = vmatmul.bf16.gmra.mxu1 %v15691_v45 }
 0x63d   : > { %v4352_v14 = vpop.f32.mrf.mxu0  ;;  %v1597_v57 = vpop.permute.xlu0 %1596 }
 0x63e   : > { %v5760_v19 = vld [vmem:[#allocation5 + $0x3c0] ss:$2 sm:$0xff]  ;;  %v4353_v52 = vadd.f32 %v15584_v18, %v4352_v14  ;;  %v2917_v56 = vsel %vm2781_vm3, %v11349_v60, %v1597_v57  ;;  %vm5486_vm3 = vcmask 522240  }
 0x63f   : > { %v5761_v0 = vpack.c.bf16 %v5760_v19, %v5760_v19  ;;  %v2180_v42 = vpop.permute.xlu1 %2179  ;;  %v3054_v10 = vsel %vm17674_vm15, %v2917_v56, %v1874_v17 }
 0x640   : > { %v4521_v33 = vmax.f32 %v4353_v52, 0.0  ;;  %v11046_v52 = vld [vmem:[%s17586_s3 + $0x118] sm:$0xff] }
 0x641   : > { %v5763_v29 = vshrl.u32 %v5761_v0, 16  ;;  %v5766_v2 = vshll.u32 %v5761_v0, 16  ;;  %7237 = vmatpush.bf16.msrb.mxu2 %v11046_v52 }
 0x642   : > { %v4907_v5 = vrot.slane %v4521_v33, 1 }
 0x643   : > { %v5765_v15 = vrot.slane %v5763_v29, 7  ;;  %v2780_v29 = vpop.permute.xlu2 %2779 }
 0x644   : > { %v4908_v51 = vsel %vm1601_vm0, %v15627_v16, %v4907_v5 }
 0x645   : > { %v5768_v35 = vor.u32 %v5766_v2, %v5765_v15  ;;  %v5769_v11 = vrot.slane %v5765_v15, 4  ;;  %v15701_v44 = vmax.f32 %v17673_v37, %v4908_v51  ;;  %v4354_v38 = vpop.f32.mrf.mxu0  ;;  %v2020_v9 = vpop.permute.xlu0 %2019  ;;  %v11042_v2 = vld [vmem:[%s17586_s3 + $0xf8] sm:$0xff]  ;;  %v15734_v51 = vld [vmem:[%s17587_s4] ss:$0 sm:$0xff] }
 0x646   : > { %v3191_v14 = vsel %vm3055_vm5, %v3054_v10, %v2020_v9  ;;  %7134 = vmatpush.bf16.msra.mxu1 %v11042_v2  ;;  %v6945_v10 = vpop.f32.mrf.mxu2  ;;  %vm7626_vm5 = vsmask.f32 2306 }
 0x647   : > { %v2633_v19 = vpop.permute.xlu1 %2632  ;;  %v5773_v57 = vsel %vm12561_vm2, %v5768_v35, %v5772_v58  ;;  %v5776_v16 = vsel %vm12570_vm4, %v5769_v11, %v5775_v4  ;;  %v3328_v43 = vsel %vm3192_vm6, %v3191_v14, %v2180_v42  ;;  %v17675_v4 = vrot.slane %v15322_v30, 1  ;;  %v6846_v11 = vpop.f32.mrf.mxu1 }
 0x648   : > { %5774 = vst [vmem:[#allocation2 + $0x88] sm:$0xf] %v5773_v57  ;;  %v3465_v17 = vsel %vm3329_vm7, %v3328_v43, %v2327_v21  ;;  %v6132_v21 = vrot.slane %v15394_v25, 1  ;;  %v6847_v38 = vadd.f32 %v15734_v51, %v6846_v11  ;;  %v6134_v43 = vrot.slane %v15410_v26, 1 }
 0x649   : > { %5777 = vst [vmem:[#allocation2 + $0x8c] sm:$0x1] %v5776_v16  ;;  %vm8938_vm7 = vcmask 517120  }
 0x64a   : > { %v15739_v35 = vsel %vm1601_vm0, %v17675_v4, %v6132_v21  ;;  %v15745_v57 = vadd.f32 %v6945_v10, %v6847_v38 }
 0x64c   : > { %17676 = vst [vmem:[#allocation12_spill] sm:$0xff] %v15745_v57 }
 0x64d   : > { %v2473_v0 = vpop.permute.xlu0 %2472 }
 0x64e   : > { %v3602_v33 = vsel %vm3466_vm8, %v3465_v17, %v2473_v0  ;;  %v6176_v17 = vpop.permute.xlu2 %6175  ;;  %vm8939_vm8 = vsmask.f32 1282 }
 0x64f   : > { %v6093_v5 = vpop.permute.xlu1 %6092  ;;  %v3739_v15 = vsel %vm3603_vm9, %v3602_v33, %v2633_v19  ;;  %vm17109_vm9 = vmand %vm8938_vm7, %vm8939_vm8 }
 0x650   : > { %v3876_v60 = vsel %vm3740_vm10, %v3739_v15, %v2780_v29  ;;  %v15722_v56 = vsel %vm3740_vm10, %v15322_v30, %v6093_v5  ;;  %v15725_v42 = vld [vmem:[#allocation2 + $0x88] sm:$0xff]  ;;  %v15755_v29 = vsel %vm1601_vm0, %v6132_v21, %v6134_v43 }
 0x651   : > { %10325 = vmatmul.msk.bf16.gmra.mxu3 %vm3917_vm11, %v3876_v60  ;;  %6865 = vmatmul.bf16.gmra.mxu1 %v15722_v56  ;;  %v6374_v15 = vsel %vm3740_vm10, %v15755_v29, %v6176_v17 }
 0x652   : > { %6197 = vrot.lane.b32.xlu0 %v15725_v42, %s17661_s29 }
 0x655   : > { %v6174_v58 = vpop.permute.xlu0 %6173 }
 0x656   : > { %v6370_v37 = vsel %vm3740_vm10, %v15739_v35, %v6174_v58  ;;  %v6097_v4 = vpop.permute.xlu2 %6096 }
 0x657   : > { %6964 = vmatmul.bf16.gmra.mxu2 %v6370_v37  ;;  %v15767_v21 = vsel %vm3740_vm10, %v15410_v26, %v6097_v4  ;;  %v6136_v37 = vrot.slane %v15417_v62, 1 }
 0x65b   : > { %v4387_v9 = vpop.f32.mrf.mxu3 }
 0x65c   : > { %v4388_v14 = vadd.f32 %v15584_v18, %v4387_v9  ;;  %v6178_v9 = vpop.permute.xlu1 %6177 }
 0x65d   : > { %v6095_v19 = vpop.permute.xlu0 %6094 }
 0x65e   : > { %v4535_v16 = vmax.f32 %v4388_v14, 0.0  ;;  %v15749_v30 = vsel %vm3740_vm10, %v15394_v25, %v6095_v19  ;;  %v11041_v25 = vld [vmem:[%s17586_s3 + $0xf0] sm:$0xff]  ;;  %v15773_v14 = vsel %vm1601_vm0, %v6134_v43, %v6136_v37 }
 0x65f   : > { %7135 = vmatpush.bf16.msra.mxu1 %v11041_v25 }
 0x660   : > { %v4935_v52 = vrot.slane %v4535_v16, 1 }
 0x661   : > { %6870 = vmatmul.bf16.gmra.mxu1 %v15749_v30 }
 0x663   : > { %v4389_v0 = vpop.f32.mrf.mxu3 }
 0x664   : > { %v4390_v33 = vadd.f32 %v15584_v18, %v4389_v0 }
 0x666   : > { %v4536_v5 = vmax.f32 %v4390_v33, 0.0 }
 0x667   : > { %6969 = vmatmul.bf16.gmra.mxu2 %v6374_v15  ;;  %v6099_v15 = vpop.permute.xlu1 %6098 }
 0x668   : > { %v4937_v2 = vrot.slane %v4536_v5, 1  ;;  %v15784_v43 = vsel %vm3740_vm10, %v15417_v62, %v6099_v15 }
 0x66a   : > { %v4938_v60 = vsel %vm1601_vm0, %v4935_v52, %v4937_v2  ;;  %v6378_v52 = vsel %vm3740_vm10, %v15773_v14, %v6178_v9  ;;  %v15789_v9 = vpop.f32.mrf.mxu2 }
 0x66b   : > { %v15763_v58 = vmax.f32 %v4535_v16, %v4938_v60  ;;  %v15779_v60 = vpop.f32.mrf.mxu1  ;;  %17678 = vst [vmem:[#allocation14_spill] sm:$0xff] %v15789_v9 }
 0x66c   : > { %17677 = vst [vmem:[#allocation13_spill] sm:$0xff] %v15779_v60 }
 0x66d   : > { %v4357_v11 = vpop.f32.mrf.mxu0 }
 0x66e   : > { %v4358_v38 = vadd.f32 %v15584_v18, %v4357_v11  ;;  %v6138_v11 = vrot.slane %v15442_v27, 1 }
 0x670   : > { %v4523_v19 = vmax.f32 %v4358_v38, 0.0  ;;  %v6180_v38 = vpop.permute.xlu0 %6179 }
 0x671   : > { %6875 = vmatmul.bf16.gmra.mxu1 %v15767_v21 }
 0x672   : > { %v4911_v17 = vrot.slane %v4523_v19, 1 }
 0x675   : > { %v4359_v10 = vpop.f32.mrf.mxu0 }
 0x676   : > { %v4360_v16 = vadd.f32 %v15584_v18, %v4359_v10  ;;  %v15792_v10 = vsel %vm1601_vm0, %v6136_v37, %v6138_v11 }
 0x677   : > { %6974 = vmatmul.bf16.gmra.mxu2 %v6378_v52  ;;  %v6950_v52 = vpop.f32.mrf.mxu2 }
 0x678   : > { %v4524_v26 = vmax.f32 %v4360_v16, 0.0 }
 0x67a   : > { %v4913_v0 = vrot.slane %v4524_v26, 1 }
 0x67c   : > { %v4914_v33 = vsel %vm1601_vm0, %v4911_v17, %v4913_v0 }
 0x67d   : > { %v5203_v25 = vmax.f32 %v4523_v19, %v4914_v33  ;;  %v6851_v19 = vpop.f32.mrf.mxu1  ;;  %v6101_v33 = vpop.permute.xlu0 %6100 }
 0x67e   : > { %v6852_v62 = vadd.f32 %v15734_v51, %v6851_v19  ;;  %v15802_v37 = vsel %vm3740_vm10, %v15442_v27, %v6101_v33  ;;  %v6182_v19 = vpop.permute.xlu2 %6181  ;;  %v11045_v27 = vld [vmem:[%s17586_s3 + $0x110] sm:$0xff] }
 0x67f   : > { %v5335_v4 = vmax.f32 %v15634_v22, %v5203_v25  ;;  %v6382_v22 = vsel %vm3740_vm10, %v15792_v10, %v6180_v38  ;;  %v6140_v38 = vrot.slane %v15460_v20, 1  ;;  %7238 = vmatpush.bf16.msrb.mxu2 %v11045_v27 }
 0x680   : > { %v15798_v15 = vadd.f32 %v6950_v52, %v6852_v62  ;;  %v11040_v52 = vld [vmem:[%s17586_s3 + $0xe8] sm:$0xff] }
 0x681   : > { %5467 = vst.msk [vmem:[#allocation5 + $0x380] sm:$0xff] %vm3740_vm10, %v5335_v4  ;;  %6880 = vmatmul.bf16.gmra.mxu1 %v15784_v43 }
 0x682   : > { %17679 = vst [vmem:[#allocation15_spill] sm:$0xff] %v15798_v15  ;;  %7136 = vmatpush.bf16.msra.mxu1 %v11040_v52 }
 0x687   : > { %6979 = vmatmul.bf16.gmra.mxu2 %v6382_v22 }
 0x68b   : > { %v4392_v16 = vpop.f32.mrf.mxu3 }
 0x68c   : > { %v4393_v17 = vadd.f32 %v15584_v18, %v4392_v16  ;;  %v15810_v16 = vsel %vm1601_vm0, %v6138_v11, %v6140_v38 }
 0x68d   : > { %v6386_v62 = vsel %vm3740_vm10, %v15810_v16, %v6182_v19  ;;  %v6184_v19 = vpop.permute.xlu1 %6183 }
 0x68e   : > { %v4537_v25 = vmax.f32 %v4393_v17, 0.0  ;;  %v6142_v17 = vrot.slane %v15465_v1, 1 }
 0x690   : > { %v4939_v4 = vrot.slane %v4537_v25, 1  ;;  %v15828_v25 = vsel %vm1601_vm0, %v6140_v38, %v6142_v17 }
 0x691   : > { %6885 = vmatmul.bf16.gmra.mxu1 %v15802_v37  ;;  %v6390_v27 = vsel %vm3740_vm10, %v15828_v25, %v6184_v19 }
 0x692   : > { %v4940_v22 = vsel %vm1601_vm0, %v4937_v2, %v4939_v4  ;;  %v15830_v4 = vpop.f32.mrf.mxu1 }
 0x693   : > { %v15807_v61 = vmax.f32 %v4536_v5, %v4940_v22  ;;  %v4394_v7 = vpop.f32.mrf.mxu3  ;;  %v6103_v5 = vpop.permute.xlu2 %6102  ;;  %17680 = vst [vmem:[#allocation16_spill] sm:$0xff] %v15830_v4 }
 0x694   : > { %v15823_v11 = vsel %vm3740_vm10, %v15460_v20, %v6103_v5 }
 0x695   : > { %v6105_v38 = vpop.permute.xlu1 %6104 }
 0x697   : > { %6984 = vmatmul.bf16.gmra.mxu2 %v6386_v62 }
 0x69d   : > { %v4362_v2 = vpop.f32.mrf.mxu0 }
 0x69e   : > { %v4363_v7 = vadd.f32 %v15584_v18, %v4362_v2 }
 0x6a0   : > { %v4525_v33 = vmax.f32 %v4363_v7, 0.0  ;;  %v15837_v7 = vpop.f32.mrf.mxu2 }
 0x6a1   : > { %6890 = vmatmul.bf16.gmra.mxu1 %v15823_v11  ;;  %17681 = vst [vmem:[#allocation17_spill] sm:$0xff] %v15837_v7 }
 0x6a2   : > { %v4915_v22 = vrot.slane %v4525_v33, 1  ;;  %v15841_v33 = vsel %vm3740_vm10, %v15465_v1, %v6105_v38  ;;  %v5756_v38 = vld [vmem:[#allocation2 + $0x84] sm:$0x1] }
 0x6a3   : > { %17682 = vst [vmem:[#allocation18_spill] sm:$0xff] %v15841_v33 }
 0x6a4   : > { %v4916_v62 = vsel %vm1601_vm0, %v4913_v0, %v4915_v22  ;;  %v6856_v2 = vpop.f32.mrf.mxu1  ;;  %v6186_v22 = vpop.permute.xlu0 %6185 }
 0x6a5   : > { %v5204_v52 = vmax.f32 %v4524_v26, %v4916_v62  ;;  %v4364_v20 = vpop.f32.mrf.mxu0  ;;  %v6144_v26 = vrot.slane %v15495_v41, 1  ;;  %v6857_v57 = vadd.f32 %v15734_v51, %v6856_v2 }
 0x6a7   : > { %v5336_v5 = vmax.f32 %v15701_v44, %v5204_v52  ;;  %6989 = vmatmul.bf16.gmra.mxu2 %v6390_v27  ;;  %v11039_v44 = vld [vmem:[%s17586_s3 + $0xe0] sm:$0xff]  ;;  %v15851_v1 = vsel %vm1601_vm0, %v6142_v17, %v6144_v26 }
 0x6a8   : > { %7137 = vmatpush.bf16.msra.mxu1 %v11039_v44  ;;  %v6955_v62 = vpop.f32.mrf.mxu2 }
 0x6a9   : > { %5468 = vst.msk [vmem:[#allocation5 + $0x388] sm:$0xff] %vm3740_vm10, %v5336_v5  ;;  %v5753_v5 = vld [vmem:[#allocation2 + $0x80] sm:$0xf]  ;;  %v15860_v9 = vadd.f32 %v6955_v62, %v6857_v57  ;;  %v6060_v57 = vshrl.u32 %v15597_v50, 16 }
 0x6ab   : > { %17684 = vst [vmem:[#allocation20_spill] sm:$0xff] %v15860_v9 }
 0x6ac   : > { %v15848_v27 = vpop.f32.mrf.mxu1 }
 0x6ad   : > { %17683 = vst [vmem:[#allocation19_spill] sm:$0xff] %v15848_v27  ;;  %v6107_v27 = vpop.permute.xlu0 %6106 }
 0x6ae   : > { %v15867_v2 = vsel %vm3740_vm10, %v15495_v41, %v6107_v27  ;;  %v6072_v41 = vshll.u32 %v15725_v42, 16 }
 0x6af   : > { %17686 = vst [vmem:[#allocation22_spill] sm:$0xff] %v15867_v2 }
 0x6b0   : > { %v5741_v15 = vld [vmem:[#allocation5 + $0x380] ss:$2 sm:$0xff] }
 0x6b1   : > { %v5742_v0 = vpack.c.bf16 %v5741_v15, %v5741_v15  ;;  %6895 = vmatmul.bf16.gmra.mxu1 %v15841_v33  ;;  %v6394_v15 = vsel %vm3740_vm10, %v15851_v1, %v6186_v22  ;;  %v15862_v22 = vpop.f32.mrf.mxu2  ;;  %v15891_v33 = vrot.slane %v6072_v41, 1 }
 0x6b2   : > { %17685 = vst [vmem:[#allocation21_spill] sm:$0xff] %v15862_v22 }
 0x6b3   : > { %v5744_v19 = vshrl.u32 %v5742_v0, 16  ;;  %v5747_v20 = vshll.u32 %v5742_v0, 16 }
 0x6b5   : > { %v5746_v52 = vrot.slane %v5744_v19, 7 }
 0x6b6   : > { %v6861_v17 = vpop.f32.mrf.mxu1 }
 0x6b7   : > { %v5749_v7 = vor.u32 %v5747_v20, %v5746_v52  ;;  %v5750_v4 = vrot.slane %v5746_v52, 4  ;;  %6994 = vmatmul.bf16.gmra.mxu2 %v6394_v15  ;;  %v6188_v20 = vpop.permute.xlu2 %6187 }
 0x6b9   : > { %v5754_v44 = vsel %vm12561_vm2, %v5749_v7, %v5753_v5  ;;  %v5757_v19 = vsel %vm12570_vm4, %v5750_v4, %v5756_v38  ;;  %v6146_v7 = vrot.slane %v15525_v47, 1 }
 0x6ba   : > { %5755 = vst [vmem:[#allocation2 + $0x80] sm:$0xf] %v5754_v44  ;;  %v6062_v44 = vor.u32 %v6060_v57, %v15637_v59  ;;  %v11197_v57 = vld [vmem:[#allocation2 + $0x8] sm:$0xf0] }
 0x6bb   : > { %v4397_v0 = vpop.f32.mrf.mxu3  ;;  %5758 = vst [vmem:[#allocation2 + $0x84] sm:$0x1] %v5757_v19  ;;  %v15880_v27 = vsel %vm1601_vm0, %v6144_v26, %v6146_v7 }
 0x6bc   : > { %v4398_v52 = vadd.f32 %v15584_v18, %v4397_v0 }
 0x6be   : > { %v4539_v15 = vmax.f32 %v4398_v52, 0.0  ;;  %v15883_v19 = vpop.f32.mrf.mxu1  ;;  %v6398_v52 = vsel %vm3740_vm10, %v15880_v27, %v6188_v20 }
 0x6c0   : > { %v4943_v9 = vrot.slane %v4539_v15, 1 }
 0x6c1   : > { %6900 = vmatmul.bf16.gmra.mxu1 %v15867_v2  ;;  %v6960_v2 = vpop.f32.mrf.mxu2 }
 0x6c2   : > { %v15871_v4 = vld [vmem:[#allocation2 + $0x80] sm:$0xff] }
 0x6c3   : > { %v4399_v5 = vpop.f32.mrf.mxu3  ;;  %6195 = vrot.lane.b32.xlu1 %v15871_v4, %s17661_s29  ;;  %v6064_v38 = vshll.u32 %v15871_v4, 16 }
 0x6c4   : > { %v4400_v62 = vadd.f32 %v15584_v18, %v4399_v5  ;;  %v6068_v5 = vshrl.u32 %v15871_v4, 16 }
 0x6c5   : > { %v6066_v22 = vrot.slane %v6064_v38, 1 }
 0x6c6   : > { %v4540_v0 = vmax.f32 %v4400_v62, 0.0  ;;  %v11198_v62 = vld [vmem:[#allocation2 + $0x8] sm:$0xe] }
 0x6c7   : > { %6999 = vmatmul.bf16.gmra.mxu2 %v6398_v52  ;;  %v15889_v60 = vsel %vm913_vm1, %v6062_v44, %v6066_v22  ;;  %v6070_v26 = vor.u32 %v6068_v5, %v6066_v22  ;;  %v6862_v52 = vadd.f32 %v15734_v51, %v6861_v17  ;;  %v6109_v22 = vpop.permute.xlu2 %6108  ;;  %v11199_v44 = vor.u32 %v11198_v62, %v11197_v57  ;;  %v11044_v57 = vld [vmem:[%s17586_s3 + $0x108] sm:$0xff] }
 0x6c8   : > { %v4945_v63 = vrot.slane %v4540_v0, 1  ;;  %17687 = vst [vmem:[#allocation23_spill] sm:$0xff] %v15889_v60  ;;  %6114 = vrot.lane.b32.xlu2 %v15889_v60, %s17661_s29  ;;  %v6148_v17 = vrot.slane %v15538_v53, 1  ;;  %7239 = vmatpush.bf16.msrb.mxu2 %v11044_v57 }
 0x6c9   : > { %v15898_v20 = vsel %vm913_vm1, %v6070_v26, %v15891_v33  ;;  %v15909_v26 = vadd.f32 %v6960_v2, %v6862_v52  ;;  %v11038_v2 = vld [vmem:[%s17586_s3 + $0xd8] sm:$0xff] }
 0x6ca   : > { %v4946_v59 = vsel %vm1601_vm0, %v4943_v9, %v4945_v63  ;;  %17688 = vst [vmem:[#allocation24_spill] sm:$0xff] %v15898_v20  ;;  %v15907_v9 = vsel %vm3740_vm10, %v15525_v47, %v6109_v22  ;;  %7138 = vmatpush.bf16.msra.mxu1 %v11038_v2 }
 0x6cb   : > { %v5219_v38 = vmax.f32 %v4539_v15, %v4946_v59  ;;  %6116 = vrot.lane.b32.xlu1 %v15898_v20, %s17661_s29  ;;  %v6220_v15 = vrot.slane %v11199_v44, 1  ;;  %v15913_v59 = vpop.f32.mrf.mxu2  ;;  %v6190_v20 = vpop.permute.xlu1 %6189 }
 0x6cd   : > { %v5351_v41 = vmax.f32 %v15763_v58, %v5219_v38  ;;  %v6221_v58 = vsel %vm1601_vm0, %v6220_v15, %v15424_v32  ;;  %v15926_v38 = vsel %vm1601_vm0, %v6146_v7, %v6148_v17 }
 0x6ce   : > { %v6866_v5 = vpop.f32.mrf.mxu1  ;;  %v6402_v32 = vsel %vm3740_vm10, %v15926_v38, %v6190_v20 }
 0x6cf   : > { %5483 = vst.msk [vmem:[#allocation5 + $0x400] sm:$0xff] %vm3740_vm10, %v5351_v41  ;;  %v6867_v41 = vadd.f32 %v15734_v51, %v6866_v5 }
 0x6d1   : > { %6905 = vmatmul.bf16.gmra.mxu1 %v15907_v9 }
 0x6d3   : > { %6226 = vrot.lane.b32.xlu1 %v6221_v58, %s17661_s29  ;;  %v6111_v57 = vpop.permute.xlu1 %6110 }
 0x6d4   : > { %v4402_v47 = vpop.f32.mrf.mxu3  ;;  %v15942_v5 = vsel %vm3740_vm10, %v15538_v53, %v6111_v57  ;;  %v5791_v57 = vld [vmem:[#allocation2 + $0x90] sm:$0xf] }
 0x6d5   : > { %v4403_v62 = vadd.f32 %v15584_v18, %v4402_v47 }
 0x6d6   : > { %v15928_v52 = vpop.f32.mrf.mxu1 }
 0x6d7   : > { %v4541_v22 = vmax.f32 %v4403_v62, 0.0  ;;  %7004 = vmatmul.bf16.gmra.mxu2 %v6402_v32 }
 0x6d9   : > { %v4947_v44 = vrot.slane %v4541_v22, 1 }
 0x6da   : > { %v6965_v15 = vpop.f32.mrf.mxu2 }
 0x6db   : > { %v4948_v58 = vsel %vm1601_vm0, %v4945_v63, %v4947_v44  ;;  %v15934_v60 = vadd.f32 %v6965_v15, %v6867_v41  ;;  %6232 = vrot.lane.b32.xlu1 %v15739_v35, %s17661_s29  ;;  %v6150_v63 = vrot.slane %v15564_v34, 1 }
 0x6dc   : > { %v5220_v18 = vmax.f32 %v4540_v0, %v4948_v58  ;;  %v4404_v7 = vpop.f32.mrf.mxu3  ;;  %v6192_v0 = vpop.permute.xlu0 %6191 }
 0x6de   : > { %v5352_v47 = vmax.f32 %v15807_v61, %v5220_v18  ;;  %v6871_v20 = vpop.f32.mrf.mxu1  ;;  %v15951_v61 = vsel %vm1601_vm0, %v6148_v17, %v6150_v63 }
 0x6df   : > { %v6406_v53 = vsel %vm3740_vm10, %v15951_v61, %v6192_v0  ;;  %v6872_v41 = vadd.f32 %v15734_v51, %v6871_v20 }
 0x6e0   : > { %5484 = vst.msk [vmem:[#allocation5 + $0x408] sm:$0xff] %vm3740_vm10, %v5352_v47  ;;  %v5794_v47 = vld [vmem:[#allocation2 + $0x94] sm:$0x1] }
 0x6e1   : > { %6910 = vmatmul.bf16.gmra.mxu1 %v15942_v5 }
 0x6e2   : > { %v15946_v2 = vpop.f32.mrf.mxu2 }
 0x6e3   : > { %17689 = vst [vmem:[#allocation25_spill] sm:$0xff] %v15946_v2  ;;  %6238 = vrot.lane.b32.xlu1 %v15792_v10, %s17661_s29 }
 0x6e4   : > { %v6113_v17 = vpop.permute.xlu0 %6112 }
 0x6e6   : > { %v15953_v62 = vpop.f32.mrf.mxu1 }
 0x6e7   : > { %17690 = vst [vmem:[#allocation26_spill] sm:$0xff] %v15953_v62  ;;  %v5779_v32 = vld [vmem:[#allocation5 + $0x400] ss:$2 sm:$0xff]  ;;  %7009 = vmatmul.bf16.gmra.mxu2 %v6406_v53  ;;  %v15964_v53 = vsel %vm3740_vm10, %v15564_v34, %v6113_v17 }
 0x6e8   : > { %v5780_v22 = vpack.c.bf16 %v5779_v32, %v5779_v32  ;;  %17692 = vst [vmem:[#allocation28_spill] sm:$0xff] %v15964_v53 }
 0x6ea   : > { %v5782_v44 = vshrl.u32 %v5780_v22, 16  ;;  %v6970_v15 = vpop.f32.mrf.mxu2  ;;  %v5785_v7 = vshll.u32 %v5780_v22, 16  ;;  %v17616_v22 = vrot.slane %v15597_v50, 1 }
 0x6eb   : > { %v15958_v58 = vadd.f32 %v6970_v15, %v6872_v41  ;;  %6244 = vrot.lane.b32.xlu1 %v15851_v1, %s17661_s29  ;;  %v15990_v15 = vrot.slane %v15725_v42, 1 }
 0x6ec   : > { %v5784_v18 = vrot.slane %v5782_v44, 7  ;;  %v6194_v44 = vpop.permute.xlu2 %6193  ;;  %v15979_v55 = vsel %vm1601_vm0, %v6150_v63, %v17616_v22 }
 0x6ed   : > { %17691 = vst [vmem:[#allocation27_spill] sm:$0xff] %v15958_v58  ;;  %v6410_v39 = vsel %vm3740_vm10, %v15979_v55, %v6194_v44 }
 0x6ee   : > { %v5787_v62 = vor.u32 %v5785_v7, %v5784_v18  ;;  %v5788_v2 = vrot.slane %v5784_v18, 4  ;;  %v6876_v0 = vpop.f32.mrf.mxu1 }
 0x6ef   : > { %v6877_v7 = vadd.f32 %v15734_v51, %v6876_v0 }
 0x6f0   : > { %v5792_v20 = vsel %vm12561_vm2, %v5787_v62, %v5791_v57  ;;  %v5795_v32 = vsel %vm12570_vm4, %v5788_v2, %v5794_v47  ;;  %v17617_v2 = vrot.slane %v15871_v4, 1  ;;  %v11037_v62 = vld [vmem:[%s17586_s3 + $0xd0] sm:$0xff]  ;;  %v15995_v57 = vld [vmem:[#allocation2 + $0x98] sm:$0xff]  ;;  %vm7625_vm4 = vcmask 518144  }
 0x6f1   : > { %6915 = vmatmul.bf16.gmra.mxu1 %v15964_v53  ;;  %5793 = vst [vmem:[#allocation2 + $0x90] sm:$0xf] %v5792_v20  ;;  %vm16342_vm6 = vmand %vm7625_vm4, %vm7626_vm5 }
 0x6f2   : > { %v15972_v41 = vpop.f32.mrf.mxu2  ;;  %5796 = vst [vmem:[#allocation2 + $0x94] sm:$0x1] %v5795_v32  ;;  %7139 = vmatpush.bf16.msra.mxu1 %v11037_v62  ;;  %v16001_v20 = vsel %vm1601_vm0, %v17617_v2, %v15990_v15  ;;  %v11034_v62 = vld [vmem:[%s17586_s3 + $0xb8] sm:$0xff] }
 0x6f3   : > { %17693 = vst [vmem:[#allocation29_spill] sm:$0xff] %v15972_v41  ;;  %6250 = vrot.lane.b32.xlu1 %v15951_v61, %s17661_s29  ;;  %7035 = vmatpush.bf16.msrb.mxu3 %v11034_v62 }
 0x6f6   : > { %v15981_v34 = vpop.f32.mrf.mxu1 }
 0x6f7   : > { %17694 = vst [vmem:[#allocation30_spill] sm:$0xff] %v15981_v34  ;;  %7014 = vmatmul.bf16.gmra.mxu2 %v6410_v39  ;;  %v6271_v39 = vshll.u32 %v15995_v57, 16 }
 0x6f8   : > { %v5833_v18 = vld [vmem:[#allocation2 + $0x90] sm:$0x1] }
 0x6f9   : > { %v15993_v63 = vld [vmem:[#allocation2 + $0x90] sm:$0xff]  ;;  %v5934_v17 = vunpack.c.l.b16 %v5833_v18  ;;  %v6076_v18 = vshrl.u32 %v15725_v42, 16  ;;  %v16022_v41 = vrot.slane %v6271_v39, 1 }
 0x6fa   : > { %v6975_v47 = vpop.f32.mrf.mxu2  ;;  %6199 = vrot.lane.b32.xlu2 %v15993_v63, %s17661_s29  ;;  %v6205_v0 = vshll.u32 %v15993_v63, 16 }
 0x6fb   : > { %v16003_v32 = vadd.f32 %v6975_v47, %v6877_v7  ;;  %v5935_v44 = vpack.c.b16 %v5934_v17, %v5934_v17  ;;  %6256 = vrot.lane.b32.xlu1 %v16001_v20, %s17661_s29  ;;  %v6209_v47 = vshrl.u32 %v15993_v63, 16  ;;  %v16019_v2 = vor.u32 %v6076_v18, %v15891_v33 }
 0x6fc   : > { %v16015_v7 = vrot.slane %v6205_v0, 1 }
 0x6fd   : > { %17695 = vst [vmem:[#allocation31_spill] sm:$0xff] %v16003_v32  ;;  %v6080_v22 = vshll.u32 %v5935_v44, 16 }
 0x6fe   : > { %v6881_v17 = vpop.f32.mrf.mxu1  ;;  %v6211_v32 = vor.u32 %v6209_v47, %v16015_v7  ;;  %v11032_v47 = vld [vmem:[%s17586_s3 + $0xa8] sm:$0xff] }
 0x6ff   : > { %v6082_v34 = vrot.slane %v6080_v22, 1  ;;  %v11033_v22 = vld [vmem:[%s17586_s3 + $0xb0] sm:$0xff] }
 0x700   : > { %v6274_v0 = vsel %vm913_vm1, %v6211_v32, %v16022_v41  ;;  %7036 = vmatpush.bf16.msrb.mxu3 %v11033_v22 }
 0x701   : > { %v6083_v58 = vsel %vm913_vm1, %v16019_v2, %v6082_v34  ;;  %v6882_v34 = vadd.f32 %v15734_v51, %v6881_v17 }
 0x702   : > { %6118 = vrot.lane.b32.xlu0 %v6083_v58, %s17661_s29  ;;  %v16027_v53 = vpop.f32.mrf.mxu2  ;;  %6228 = vrot.lane.b32.xlu2 %v15615_v6, %s17661_s29  ;;  %v5837_v6 = vld [vmem:[#allocation2 + $0x98] sm:$0x1] }
 0x703   : > { %17696 = vst [vmem:[#allocation32_spill] sm:$0xff] %v16027_v53  ;;  %6285 = vrot.lane.b32.xlu1 %v6274_v0, %s17661_s29  ;;  %v6202_v62 = vunpack.c.l.b16 %v5837_v6 }
 0x704   : > { %7037 = vmatpush.bf16.msrb.mxu3 %v11032_v47 }
 0x705   : > { %v6203_v0 = vpack.c.b16 %v6202_v62, %v6202_v62 }
 0x706   : > { %v16034_v33 = vpop.f32.mrf.mxu1 }
 0x707   : > { %17697 = vst [vmem:[#allocation33_spill] sm:$0xff] %v16034_v33  ;;  %v6213_v22 = vshll.u32 %v6203_v0, 16 }
 0x709   : > { %v6215_v6 = vrot.slane %v6213_v22, 1 }
 0x70a   : > { %6230 = vrot.lane.b32.xlu0 %v15657_v48, %s17661_s29  ;;  %v6980_v58 = vpop.f32.mrf.mxu2  ;;  %6234 = vrot.lane.b32.xlu2 %v15755_v29, %s17661_s29 }
 0x70b   : > { %v16042_v39 = vadd.f32 %v6980_v58, %v6882_v34  ;;  %v11031_v34 = vld [vmem:[%s17586_s3 + $0xa0] sm:$0xff]  ;;  %v6158_v58 = vrot.slane %v5935_v44, 1  ;;  %v16065_v33 = vsel %vm913_vm1, %v6211_v32, %v6215_v6 }
 0x70c   : > { %7038 = vmatpush.bf16.msrb.mxu3 %v11031_v34  ;;  %17701 = vst [vmem:[#allocation37_spill] sm:$0xff] %v16065_v33  ;;  %v11043_v32 = vld [vmem:[%s17586_s3 + $0x100] sm:$0xff]  ;;  %v11029_v34 = vld [vmem:[%s17586_s3 + $0x90] sm:$0xff] }
 0x70d   : > { %17698 = vst [vmem:[#allocation34_spill] sm:$0xff] %v16042_v39  ;;  %v16060_v62 = vsel %vm1601_vm0, %v15990_v15, %v6158_v58  ;;  %7240 = vmatpush.bf16.msrb.mxu2 %v11043_v32  ;;  %v11350_v32 = vld [vmem:[#allocation2 + $0x78] sm:$0xff] }
 0x70e   : > { %v6886_v18 = vpop.f32.mrf.mxu1 }
 0x70f   : > { %v6887_v39 = vadd.f32 %v15734_v51, %v6886_v18  ;;  %v11036_v18 = vld [vmem:[%s17586_s3 + $0xc8] sm:$0xff] }
 0x710   : > { %7140 = vmatpush.bf16.msra.mxu1 %v11036_v18 }
 0x712   : > { %6236 = vrot.lane.b32.xlu0 %v15773_v14, %s17661_s29  ;;  %v16051_v17 = vpop.f32.mrf.mxu2  ;;  %6240 = vrot.lane.b32.xlu2 %v15810_v16, %s17661_s29 }
 0x713   : > { %17699 = vst [vmem:[#allocation35_spill] sm:$0xff] %v16051_v17  ;;  %v11030_v17 = vld [vmem:[%s17586_s3 + $0x98] sm:$0xff] }
 0x714   : > { %7039 = vmatpush.bf16.msrb.mxu3 %v11030_v17 }
 0x716   : > { %v16062_v47 = vpop.f32.mrf.mxu1 }
 0x717   : > { %17700 = vst [vmem:[#allocation36_spill] sm:$0xff] %v16062_v47  ;;  %v17706_v47 = vrot.slane %v15597_v50, 1 }
 0x718   : > { %7040 = vmatpush.bf16.msrb.mxu3 %v11029_v34 }
 0x71a   : > { %6242 = vrot.lane.b32.xlu0 %v15828_v25, %s17661_s29  ;;  %v6985_v44 = vpop.f32.mrf.mxu2  ;;  %6246 = vrot.lane.b32.xlu2 %v15880_v27, %s17661_s29 }
 0x71b   : > { %v16073_v22 = vadd.f32 %v6985_v44, %v6887_v39  ;;  %v11028_v39 = vld [vmem:[%s17586_s3 + $0x88] sm:$0xff]  ;;  %v11027_v44 = vld [vmem:[%s17586_s3 + $0x80] sm:$0xff] }
 0x71c   : > { %7041 = vmatpush.bf16.msrb.mxu3 %v11028_v39  ;;  %v17705_v39 = vrot.slane %v15871_v4, 1 }
 0x71d   : > { %17702 = vst [vmem:[#allocation38_spill] sm:$0xff] %v16073_v22 }
 0x71e   : > { %v6891_v17 = vpop.f32.mrf.mxu1  ;;  %v16110_v22 = vsel %vm1601_vm0, %v17706_v47, %v17705_v39  ;;  %v6224_v47 = vrot.slane %v6203_v0, 1 }
 0x720   : > { %7042 = vmatpush.bf16.msrb.mxu3 %v11027_v44 }
 0x722   : > { %6248 = vrot.lane.b32.xlu0 %v15926_v38, %s17661_s29  ;;  %v16091_v58 = vpop.f32.mrf.mxu2  ;;  %v6115_v6 = vpop.permute.xlu2 %6114  ;;  %6252 = vrot.lane.b32.xlu2 %v15979_v55, %s17661_s29 }
 0x723   : > { %17703 = vst [vmem:[#allocation39_spill] sm:$0xff] %v16091_v58  ;;  %v16099_v34 = vsel %vm3740_vm10, %v11350_v32, %v6115_v6  ;;  %v6892_v58 = vadd.f32 %v15734_v51, %v6891_v17  ;;  %v16117_v6 = vsel %vm913_vm1, %v16019_v2, %v16015_v7  ;;  %v16124_v17 = vrot.slane %v15993_v63, 1 }
 0x724   : > { %6920 = vmatmul.bf16.gmra.mxu1 %v16099_v34 }
 0x725   : > { %v16129_v44 = vsel %vm1601_vm0, %v15990_v15, %v16124_v17  ;;  %v6225_v7 = vsel %vm1601_vm0, %v16124_v17, %v6224_v47 }
 0x726   : > { %v16102_v18 = vpop.f32.mrf.mxu1 }
 0x727   : > { %17704 = vst [vmem:[#allocation40_spill] sm:$0xff] %v16102_v18 }
 0x72a   : > { %6254 = vrot.lane.b32.xlu0 %v16110_v22, %s17661_s29  ;;  %v6990_v33 = vpop.f32.mrf.mxu2  ;;  %6283 = vrot.lane.b32.xlu2 %v16117_v6, %s17661_s29 }
 0x72b   : > { %v16119_v32 = vadd.f32 %v6990_v33, %v6892_v58 }
 0x72d   : > { %17707 = vst [vmem:[#allocation41_spill] sm:$0xff] %v16119_v32 }
 0x72e   : > { %v6896_v50 = vpop.f32.mrf.mxu1 }
 0x72f   : > { %v6897_v15 = vadd.f32 %v15734_v51, %v6896_v50 }
 0x732   : > { %6258 = vrot.lane.b32.xlu0 %v16129_v44, %s17661_s29  ;;  %v16133_v2 = vpop.f32.mrf.mxu2  ;;  %6260 = vrot.lane.b32.xlu2 %v6225_v7, %s17661_s29  ;;  %v11035_v7 = vld [vmem:[%s17586_s3 + $0xc0] sm:$0xff] }
 0x733   : > { %17708 = vst [vmem:[#allocation42_spill] sm:$0xff] %v16133_v2  ;;  %7141 = vmatpush.bf16.msra.mxu1 %v11035_v7 }
 0x735   : > { %v6196_v33 = vpop.permute.xlu1 %6195 }
 0x736   : > { %v16138_v63 = vpop.f32.mrf.mxu1  ;;  %v6414_v0 = vsel %vm3740_vm10, %v16110_v22, %v6196_v33  ;;  %v6198_v33 = vpop.permute.xlu0 %6197 }
 0x737   : > { %17709 = vst [vmem:[#allocation43_spill] sm:$0xff] %v16138_v63  ;;  %7019 = vmatmul.bf16.gmra.mxu2 %v6414_v0 }
 0x73a   : > { %v6995_v58 = vpop.f32.mrf.mxu2 }
 0x73b   : > { %v16143_v39 = vadd.f32 %v6995_v58, %v6897_v15  ;;  %v6418_v15 = vsel %vm3740_vm10, %v16001_v20, %v6198_v33 }
 0x73d   : > { %17710 = vst [vmem:[#allocation44_spill] sm:$0xff] %v16143_v39  ;;  %v6117_v18 = vpop.permute.xlu1 %6116 }
 0x73e   : > { %v6901_v32 = vpop.f32.mrf.mxu1  ;;  %v16147_v2 = vsel %vm3740_vm10, %v15871_v4, %v6117_v18 }
 0x73f   : > { %6925 = vmatmul.bf16.gmra.mxu1 %v16147_v2  ;;  %v6902_v18 = vadd.f32 %v15734_v51, %v6901_v32 }
 0x742   : > { %v16150_v47 = vpop.f32.mrf.mxu2 }
 0x743   : > { %17711 = vst [vmem:[#allocation45_spill] sm:$0xff] %v16150_v47 }
 0x745   : > { %v6227_v50 = vpop.permute.xlu1 %6226 }
 0x746   : > { %v16155_v0 = vpop.f32.mrf.mxu1  ;;  %v6426_v4 = vsel %vm3740_vm10, %v15128_v36, %v6227_v50 }
 0x747   : > { %17712 = vst [vmem:[#allocation46_spill] sm:$0xff] %v16155_v0  ;;  %7024 = vmatmul.bf16.gmra.mxu2 %v6418_v15  ;;  %7043 = vmatmul.bf16.vlgmr.msrb.gmra.mxu3 %v6426_v4  ;;  %v11200_v4 = vld [vmem:[#allocation2 + $0x10] sm:$0xf0] }
 0x74a   : > { %v7000_v58 = vpop.f32.mrf.mxu2 }
 0x74b   : > { %v16162_v47 = vadd.f32 %v7000_v58, %v6902_v18  ;;  %v11201_v18 = vld [vmem:[#allocation2 + $0x10] sm:$0xe] }
 0x74c   : > { %v11202_v58 = vor.u32 %v11201_v18, %v11200_v4 }
 0x74d   : > { %17713 = vst [vmem:[#allocation47_spill] sm:$0xff] %v16162_v47 }
 0x74e   : > { %v6906_v63 = vpop.f32.mrf.mxu1 }
 0x74f   : > { %v6907_v33 = vadd.f32 %v15734_v51, %v6906_v63 }
 0x752   : > { %v16164_v39 = vpop.f32.mrf.mxu2 }
 0x753   : > { %17714 = vst [vmem:[#allocation48_spill] sm:$0xff] %v16164_v39 }
 0x754   : > { %v6200_v7 = vpop.permute.xlu2 %6199 }
 0x755   : > { %v6422_v0 = vsel %vm3740_vm10, %v16060_v62, %v6200_v7  ;;  %v6292_v62 = vrot.slane %v11202_v58, 1 }
 0x756   : > { %v16168_v53 = vpop.f32.mrf.mxu1 }
 0x757   : > { %7029 = vmatmul.bf16.gmra.mxu2 %v6422_v0  ;;  %v6293_v0 = vsel %vm1601_vm0, %v6292_v62, %v15600_v12 }
 0x75a   : > { %v7005_v36 = vpop.f32.mrf.mxu2 }
 0x75b   : > { %v16171_v50 = vadd.f32 %v7005_v36, %v6907_v33 }
 0x75c   : > { %v6229_v15 = vpop.permute.xlu2 %6228 }
 0x75d   : > { %v6430_v32 = vsel %vm3740_vm10, %v15302_v23, %v6229_v15 }
 0x75e   : > { %7048 = vmatmul.bf16.gmra.mxu3 %v6430_v32  ;;  %v6911_v39 = vpop.f32.mrf.mxu1 }
 0x75f   : > { %v6912_v63 = vadd.f32 %v15734_v51, %v6911_v39 }
 0x762   : > { %v16175_v47 = vpop.f32.mrf.mxu2 }
 0x766   : > { %v16183_v36 = vpop.f32.mrf.mxu1 }
 0x767   : > { %10538 = vmatmul.msk.bf16.vlgmr.msrb.gmra.mxu2 %vm3740_vm10, %v6293_v0 }
 0x76a   : > { %v7010_v7 = vpop.f32.mrf.mxu2 }
 0x76b   : > { %v16181_v33 = vadd.f32 %v7010_v7, %v6912_v63 }
 0x76e   : > { %v6916_v4 = vpop.f32.mrf.mxu1 }
 0x76f   : > { %v6917_v12 = vadd.f32 %v15734_v51, %v6916_v4 }
 0x772   : > { %v16185_v23 = vpop.f32.mrf.mxu2 }
 0x774   : > { %v6119_v15 = vpop.permute.xlu0 %6118 }
 0x775   : > { %v6350_v32 = vsel %vm3740_vm10, %v15725_v42, %v6119_v15  ;;  %v6233_v42 = vpop.permute.xlu1 %6232 }
 0x776   : > { %6930 = vmatmul.bf16.gmra.mxu1 %v6350_v32  ;;  %v6438_v0 = vsel %vm3740_vm10, %v15427_v49, %v6233_v42 }
 0x777   : > { %10539 = vmatmul.msk.bf16.gmra.mxu2 %vm3740_vm10, %v15657_v48  ;;  %v6235_v48 = vpop.permute.xlu2 %6234 }
 0x77a   : > { %v7015_v18 = vpop.f32.mrf.mxu2 }
 0x77b   : > { %v16192_v39 = vadd.f32 %v7015_v18, %v6917_v12 }
 0x77c   : > { %v6231_v58 = vpop.permute.xlu0 %6230 }
 0x77d   : > { %v6434_v62 = vsel %vm3740_vm10, %v15360_v40, %v6231_v58  ;;  %v6442_v40 = vsel %vm3740_vm10, %v15472_v24, %v6235_v48  ;;  %v6239_v24 = vpop.permute.xlu1 %6238 }
 0x77e   : > { %7053 = vmatmul.bf16.gmra.mxu3 %v6434_v62  ;;  %v6450_v7 = vsel %vm3740_vm10, %v15481_v8, %v6239_v24 }
 0x786   : > { %7142 = vmatmul.bf16.vlgmr.msra.gmra.mxu1 %v15664_v3  ;;  %v6237_v3 = vpop.permute.xlu0 %6236 }
 0x787   : > { %10540 = vmatmul.msk.bf16.gmra.mxu2 %vm3740_vm10, %v15739_v35  ;;  %v16209_v35 = vpop.f32.mrf.mxu1  ;;  %v6446_v49 = vsel %vm3740_vm10, %v15451_v54, %v6237_v3  ;;  %v11063_v3 = vld [vmem:[%s17588_s5 + $0x38] sm:$0xff] }
 0x788   : > { %8478 = vmatpush.bf16.msra.mxu3 %v11063_v3 }
 0x78e   : > { %7058 = vmatmul.bf16.gmra.mxu3 %v6438_v0 }
 0x796   : > { %7147 = vmatmul.bf16.gmra.mxu1 %v15691_v45  ;;  %v16213_v45 = vpop.f32.mrf.mxu2 }
 0x797   : > { %10541 = vmatmul.msk.bf16.gmra.mxu2 %vm3740_vm10, %v15755_v29 }
 0x79e   : > { %7063 = vmatmul.bf16.gmra.mxu3 %v6442_v40 }
 0x7a1   : > { %v6921_v29 = vpop.f32.mrf.mxu1 }
 0x7a6   : > { %7152 = vmatmul.bf16.gmra.mxu1 %v15722_v56  ;;  %v6922_v56 = vadd.f32 %v15734_v51, %v6921_v29 }
 0x7a7   : > { %10542 = vmatmul.msk.bf16.gmra.mxu2 %vm3740_vm10, %v15773_v14 }
 0x7a9   : > { %v16223_v54 = vpop.f32.mrf.mxu1 }
 0x7ae   : > { %7068 = vmatmul.bf16.gmra.mxu3 %v6446_v49 }
 0x7b6   : > { %7157 = vmatmul.bf16.gmra.mxu1 %v15749_v30 }
 0x7b7   : > { %10543 = vmatmul.msk.bf16.gmra.mxu2 %vm3740_vm10, %v15792_v10  ;;  %v6241_v10 = vpop.permute.xlu2 %6240 }
 0x7b8   : > { %v6454_v8 = vsel %vm3740_vm10, %v15543_v46, %v6241_v10  ;;  %v6245_v46 = vpop.permute.xlu1 %6244  ;;  %v17719_v10 = vld [vmem:[#allocation13_spill] sm:$0xff] }
 0x7ba   : > { %v7020_v63 = vpop.f32.mrf.mxu2 }
 0x7bb   : > { %v16219_v14 = vadd.f32 %v7020_v63, %v6922_v56 }
 0x7bc   : > { %v6926_v30 = vpop.f32.mrf.mxu1 }
 0x7bd   : > { %v6927_v32 = vadd.f32 %v15734_v51, %v6926_v30 }
 0x7be   : > { %7073 = vmatmul.bf16.gmra.mxu3 %v6450_v7  ;;  %v17718_v7 = vld [vmem:[#allocation18_spill] sm:$0xff] }
 0x7c2   : > { %v16225_v15 = vpop.f32.mrf.mxu2 }
 0x7c4   : > { %v16245_v0 = vpop.f32.mrf.mxu1 }
 0x7c5   : > { %17717 = vst [vmem:[#allocation51_spill] sm:$0xff] %v16245_v0 }
 0x7c6   : > { %7162 = vmatmul.bf16.gmra.mxu1 %v15767_v21  ;;  %v6243_v21 = vpop.permute.xlu0 %6242 }
 0x7c7   : > { %10544 = vmatmul.msk.bf16.gmra.mxu2 %vm3740_vm10, %v15810_v16  ;;  %v6458_v16 = vsel %vm3740_vm10, %v15501_v31, %v6243_v21 }
 0x7ca   : > { %v7025_v4 = vpop.f32.mrf.mxu2  ;;  %v7044_v51 = vpop.f32.mrf.mxu3 }
 0x7cb   : > { %v16231_v12 = vadd.f32 %v7025_v4, %v6927_v32 }
 0x7cd   : > { %17715 = vst [vmem:[#allocation49_spill] sm:$0xff] %v16231_v12  ;;  %v6275_v12 = vshrl.u32 %v15995_v57, 16 }
 0x7ce   : > { %7078 = vmatmul.bf16.gmra.mxu3 %v6454_v8  ;;  %v6249_v32 = vpop.permute.xlu0 %6248 }
 0x7d2   : > { %v16235_v18 = vpop.f32.mrf.mxu2  ;;  %v7046_v42 = vpop.f32.mrf.mxu3 }
 0x7d3   : > { %17716 = vst [vmem:[#allocation50_spill] sm:$0xff] %v16235_v18 }
 0x7d6   : > { %7167 = vmatmul.bf16.gmra.mxu1 %v15784_v43 }
 0x7d7   : > { %10545 = vmatmul.msk.bf16.gmra.mxu2 %vm3740_vm10, %v15828_v25  ;;  %v6462_v25 = vsel %vm3740_vm10, %v15550_v28, %v6245_v46 }
 0x7da   : > { %v7030_v58 = vpop.f32.mrf.mxu2 }
 0x7de   : > { %7083 = vmatmul.bf16.gmra.mxu3 %v6458_v16  ;;  %v17721_v16 = vld [vmem:[#allocation9_spill] sm:$0xff] }
 0x7df   : > { %v6470_v46 = vsel %vm3740_vm10, %v17721_v16, %v6249_v32 }
 0x7e1   : > { %v7049_v48 = vpop.f32.mrf.mxu3 }
 0x7e2   : > { %v7032_v62 = vpop.f32.mrf.mxu2 }
 0x7e6   : > { %7172 = vmatmul.bf16.gmra.mxu1 %v15802_v37 }
 0x7e7   : > { %10546 = vmatmul.msk.bf16.gmra.mxu2 %vm3740_vm10, %v15851_v1  ;;  %v6247_v1 = vpop.permute.xlu2 %6246 }
 0x7e8   : > { %v6466_v28 = vsel %vm3740_vm10, %v15593_v13, %v6247_v1 }
 0x7e9   : > { %v7051_v37 = vpop.f32.mrf.mxu3 }
 0x7ea   : > { %v7242_v43 = vpop.f32.mrf.mxu2 }
 0x7ee   : > { %7088 = vmatmul.bf16.gmra.mxu3 %v6462_v25  ;;  %v17722_v25 = vld [vmem:[#allocation14_spill] sm:$0xff] }
 0x7f2   : > { %v7244_v31 = vpop.f32.mrf.mxu2 }
 0x7f3   : > { %v6931_v40 = vpop.f32.mrf.mxu1 }
 0x7f6   : > { %7177 = vmatmul.bf16.gmra.mxu1 %v15823_v11  ;;  %v16261_v11 = vld [vmem:[%s17587_s4] ss:$0 sm:$0xff] }
 0x7f7   : > { %10547 = vmatmul.msk.bf16.gmra.mxu2 %vm3740_vm10, %v15880_v27  ;;  %v6932_v27 = vadd.f32 %v16261_v11, %v6931_v40  ;;  %v6849_v13 = vadd.f32 %v16261_v11, %v17719_v10 }
 0x7f9   : > { %v16270_v21 = vadd.f32 %v7030_v58, %v6932_v27  ;;  %v6948_v3 = vadd.f32 %v17722_v25, %v6849_v13  ;;  %v17724_v58 = vld [vmem:[#allocation16_spill] sm:$0xff]  ;;  %v17725_v13 = vld [vmem:[#allocation15_spill] sm:$0xff] }
 0x7fa   : > { %v7247_v29 = vpop.f32.mrf.mxu2  ;;  %v6854_v27 = vadd.f32 %v16261_v11, %v17724_v58  ;;  %v7050_v16 = vadd.f32 %v7049_v48, %v17725_v13 }
 0x7fb   : > { %v6933_v49 = vpop.f32.mrf.mxu1  ;;  %17720 = vst [vmem:[#allocation18_spill] sm:$0xff] %v16270_v21  ;;  %v7047_v40 = vadd.f32 %v7046_v42, %v6948_v3 }
 0x7fc   : > { %v6934_v1 = vadd.f32 %v16261_v11, %v6933_v49 }
 0x7fe   : > { %7093 = vmatmul.bf16.gmra.mxu3 %v6466_v28  ;;  %v5841_v28 = vld [vmem:[#allocation2 + $0xa0] sm:$0x1]  ;;  %v16287_v49 = vadd.f32 %v7032_v62, %v6934_v1 }
 0x7ff   : > { %v6268_v0 = vunpack.c.l.b16 %v5841_v28  ;;  %v17727_v28 = vld [vmem:[#allocation17_spill] sm:$0xff] }
 0x801   : > { %v7054_v24 = vpop.f32.mrf.mxu3 }
 0x802   : > { %v7249_v63 = vpop.f32.mrf.mxu2 }
 0x803   : > { %v7143_v56 = vpop.f32.mrf.mxu1 }
 0x806   : > { %7182 = vmatmul.bf16.gmra.mxu1 %v17718_v7  ;;  %v17723_v7 = vld [vmem:[#allocation12_spill] sm:$0xff] }
 0x807   : > { %10548 = vmatmul.msk.bf16.gmra.mxu2 %vm3740_vm10, %v15926_v38  ;;  %v7045_v18 = vadd.f32 %v7044_v51, %v17723_v7  ;;  %v17726_v51 = vld [vmem:[#allocation22_spill] sm:$0xff]  ;;  %v6953_v7 = vadd.f32 %v17727_v28, %v6854_v27 }
 0x808   : > { %v17728_v27 = vld [vmem:[#allocation10_spill] sm:$0xff] }
 0x809   : > { %v16266_v30 = vpop.f32.mrf.mxu3  ;;  %v7144_v42 = vadd.f32 %v7143_v56, %v7045_v18  ;;  %v7052_v62 = vadd.f32 %v7051_v37, %v6953_v7 }
 0x80a   : > { %v7252_v8 = vpop.f32.mrf.mxu2 }
 0x80b   : > { %v7145_v4 = vpop.f32.mrf.mxu1  ;;  %v7243_v58 = vadd.f32 %v7242_v43, %v7144_v42 }
 0x80c   : > { %v7146_v10 = vadd.f32 %v7145_v4, %v7047_v40  ;;  %v6277_v4 = vor.u32 %v6275_v12, %v16022_v41 }
 0x80d   : > { %v7332_v41 = vmax.f32 %v7243_v58, 0.0 }
 0x80e   : > { %7098 = vmatmul.bf16.gmra.mxu3 %v6470_v46  ;;  %v16285_v46 = vpack.c.b16 %v6268_v0, %v6268_v0  ;;  %v7245_v25 = vadd.f32 %v7244_v31, %v7146_v10  ;;  %v6251_v0 = vpop.permute.xlu1 %6250 }
 0x80f   : > { %v6474_v43 = vsel %vm3740_vm10, %v17728_v27, %v6251_v0  ;;  %v7404_v42 = vrot.slane %v7332_v41, 1 }
 0x810   : > { %v6279_v40 = vshll.u32 %v16285_v46, 16  ;;  %v7333_v56 = vmax.f32 %v7245_v25, 0.0  ;;  %v17729_v25 = vld [vmem:[#allocation20_spill] sm:$0xff] }
 0x811   : > { %v16276_v38 = vpop.f32.mrf.mxu3 }
 0x812   : > { %v16282_v32 = vpop.f32.mrf.mxu2  ;;  %v6281_v48 = vrot.slane %v6279_v40, 1  ;;  %v7405_v13 = vrot.slane %v7333_v56, 1 }
 0x813   : > { %v7148_v21 = vpop.f32.mrf.mxu1 }
 0x814   : > { %v7149_v3 = vadd.f32 %v7148_v21, %v7050_v16  ;;  %v6282_v21 = vsel %vm913_vm1, %v6277_v4, %v6281_v48  ;;  %v7406_v4 = vsel %vm1601_vm0, %v7404_v42, %v7405_v13  ;;  %v6253_v42 = vpop.permute.xlu2 %6252 }
 0x815   : > { %6287 = vrot.lane.b32.xlu0 %v6282_v21, %s17661_s29 }
 0x816   : > { %7187 = vmatmul.bf16.gmra.mxu1 %v17726_v51  ;;  %v7248_v31 = vadd.f32 %v7247_v29, %v7149_v3  ;;  %v11062_v29 = vld [vmem:[%s17588_s5 + $0x30] sm:$0xff]  ;;  %v7055_v3 = vadd.f32 %v7054_v24, %v17729_v25 }
 0x817   : > { %10549 = vmatmul.msk.bf16.gmra.mxu2 %vm3740_vm10, %v15951_v61  ;;  %8479 = vmatpush.bf16.msra.mxu3 %v11062_v29 }
 0x818   : > { %v7334_v61 = vmax.f32 %v7248_v31, 0.0  ;;  %v7511_v31 = vmax.f32 %v7332_v41, %v7406_v4 }
 0x819   : > { %v16295_v18 = vpop.f32.mrf.mxu3 }
 0x81a   : > { %v7257_v10 = vpop.f32.mrf.mxu2  ;;  %v7407_v40 = vrot.slane %v7334_v61, 1 }
 0x81b   : > { %v7150_v1 = vpop.f32.mrf.mxu1 }
 0x81c   : > { %v7151_v12 = vadd.f32 %v7150_v1, %v7052_v62  ;;  %v7408_v41 = vsel %vm1601_vm0, %v7405_v13, %v7407_v40 }
 0x81d   : > { %v7512_v4 = vmax.f32 %v7333_v56, %v7408_v41  ;;  %v7628_v41 = vld [vmem:[#allocation3 + $0x8] sm:$0x7] }
 0x81e   : > { %v7250_v16 = vadd.f32 %v7249_v63, %v7151_v12  ;;  %7103 = vmatmul.bf16.gmra.mxu3 %v6474_v43  ;;  %v17730_v63 = vld [vmem:[#allocation19_spill] sm:$0xff]  ;;  %v17731_v12 = vld [vmem:[#allocation21_spill] sm:$0xff] }
 0x81f   : > { %v6859_v48 = vadd.f32 %v16261_v11, %v17730_v63  ;;  %v17732_v63 = vld [vmem:[#allocation11_spill] sm:$0xff] }
 0x820   : > { %v7335_v51 = vmax.f32 %v7250_v16, 0.0 }
 0x821   : > { %v16301_v37 = vpop.f32.mrf.mxu3  ;;  %v6958_v27 = vadd.f32 %v17731_v12, %v6859_v48 }
 0x822   : > { %v7409_v28 = vrot.slane %v7335_v51, 1  ;;  %v16308_v58 = vpop.f32.mrf.mxu2 }
 0x823   : > { %v7153_v7 = vpop.f32.mrf.mxu1  ;;  %v7057_v29 = vadd.f32 %v16266_v30, %v6958_v27 }
 0x824   : > { %v7410_v0 = vsel %vm1601_vm0, %v7407_v40, %v7409_v28  ;;  %v7154_v62 = vadd.f32 %v7153_v7, %v7055_v3  ;;  %v7060_v40 = vadd.f32 %v16276_v38, %v15909_v26 }
 0x825   : > { %v7513_v21 = vmax.f32 %v7334_v61, %v7410_v0 }
 0x826   : > { %v7253_v1 = vadd.f32 %v7252_v8, %v7154_v62  ;;  %7192 = vmatmul.bf16.gmra.mxu1 %v15907_v9 }
 0x827   : > { %v7547_v24 = vmax.f32 %v7511_v31, %v7513_v21  ;;  %10550 = vmatmul.msk.bf16.gmra.mxu2 %vm3740_vm10, %v15979_v55  ;;  %v6478_v55 = vsel %vm3740_vm10, %v17732_v63, %v6253_v42  ;;  %v6864_v21 = vadd.f32 %v16261_v11, %v15883_v19  ;;  %v17735_v63 = vld [vmem:[#allocation23_spill] sm:$0xff] }
 0x828   : > { %v7336_v43 = vmax.f32 %v7253_v1, 0.0 }
 0x829   : > { %7581 = vst.msk [vmem:[#allocation5] sm:$0xff] %vm3740_vm10, %v7547_v24  ;;  %v16318_v16 = vpop.f32.mrf.mxu3  ;;  %v6963_v26 = vadd.f32 %v15913_v59, %v6864_v21 }
 0x82a   : > { %v7411_v61 = vrot.slane %v7336_v43, 1  ;;  %v16322_v25 = vpop.f32.mrf.mxu2 }
 0x82b   : > { %v7155_v8 = vpop.f32.mrf.mxu1 }
 0x82c   : > { %v7412_v9 = vsel %vm1601_vm0, %v7409_v28, %v7411_v61  ;;  %v7156_v3 = vadd.f32 %v7155_v8, %v7057_v29  ;;  %v7062_v8 = vadd.f32 %v16295_v18, %v6963_v26 }
 0x82d   : > { %v7514_v7 = vmax.f32 %v7335_v51, %v7412_v9 }
 0x82e   : > { %v7255_v48 = vadd.f32 %v16282_v32, %v7156_v3  ;;  %7108 = vmatmul.bf16.gmra.mxu3 %v6478_v55 }
 0x82f   : > { %v7548_v0 = vmax.f32 %v7512_v4, %v7514_v7 }
 0x830   : > { %v7615_v62 = vld [vmem:[#allocation5] ss:$2 sm:$0xf]  ;;  %v7337_v30 = vmax.f32 %v7255_v48, 0.0 }
 0x831   : > { %v7616_v31 = vpack.c.bf16 %v7615_v62, %v7615_v62  ;;  %7582 = vst.msk [vmem:[#allocation5 + $0x8] sm:$0xff] %vm3740_vm10, %v7548_v0  ;;  %v16329_v13 = vpop.f32.mrf.mxu3 }
 0x832   : > { %v7413_v28 = vrot.slane %v7337_v30, 1  ;;  %v16333_v51 = vpop.f32.mrf.mxu2 }
 0x833   : > { %v7158_v56 = vpop.f32.mrf.mxu1  ;;  %v7618_v12 = vshrl.u32 %v7616_v31, 16  ;;  %v7621_v29 = vshll.u32 %v7616_v31, 16  ;;  %v11061_v31 = vld [vmem:[%s17588_s5 + $0x28] sm:$0xff] }
 0x834   : > { %v7414_v32 = vsel %vm1601_vm0, %v7411_v61, %v7413_v28  ;;  %v7159_v1 = vadd.f32 %v7158_v56, %v7060_v40  ;;  %v7065_v40 = vadd.f32 %v16301_v37, %v15934_v60  ;;  %8480 = vmatpush.bf16.msra.mxu3 %v11061_v31  ;;  %v17736_v60 = vld [vmem:[#allocation28_spill] sm:$0xff] }
 0x835   : > { %v7515_v24 = vmax.f32 %v7336_v43, %v7414_v32  ;;  %v7620_v42 = vrot.slane %v7618_v12, 7 }
 0x836   : > { %v7258_v27 = vadd.f32 %v7257_v10, %v7159_v1  ;;  %7197 = vmatmul.bf16.gmra.mxu1 %v15942_v5  ;;  %v16348_v10 = vld [vmem:[#allocation3] sm:$0xff]   ;;  %v6255_v5 = vpop.permute.xlu0 %6254 }
 0x837   : > { %10551 = vmatmul.msk.bf16.gmra.mxu2 %vm3740_vm10, %v16110_v22  ;;  %v7623_v61 = vor.u32 %v7621_v29, %v7620_v42  ;;  %v7812_v7 = vshll.u32 %v16348_v10, 16  ;;  %v6482_v55 = vsel %vm3740_vm10, %v17735_v63, %v6255_v5  ;;  %v7810_v62 = vshrl.u32 %v16348_v10, 16 }
 0x838   : > { %v7338_v38 = vmax.f32 %v7258_v27, 0.0  ;;  %v6869_v29 = vadd.f32 %v16261_v11, %v15928_v52 }
 0x839   : > { %v16346_v43 = vpop.f32.mrf.mxu3  ;;  %v7629_v4 = vsel %vm16342_vm6, %v7623_v61, %v7628_v41  ;;  %v7814_v18 = vrot.slane %v7812_v7, 1  ;;  %v17737_v61 = vld [vmem:[#allocation25_spill] sm:$0xff]  ;;  %v17738_v7 = vld [vmem:[#allocation24_spill] sm:$0xff] }
 0x83a   : > { %v7415_v9 = vrot.slane %v7338_v38, 1  ;;  %v7267_v59 = vpop.f32.mrf.mxu2  ;;  %7630 = vst [vmem:[#allocation3 + $0x8] sm:$0x7] %v7629_v4  ;;  %v6968_v5 = vadd.f32 %v17737_v61, %v6869_v29 }
 0x83b   : > { %v7160_v3 = vpop.f32.mrf.mxu1  ;;  %v7815_v12 = vor.u32 %v7814_v18, %v7810_v62  ;;  %v17739_v18 = vld [vmem:[#allocation27_spill] sm:$0xff] }
 0x83c   : > { %v7161_v22 = vadd.f32 %v7160_v3, %v7062_v8  ;;  %v7070_v31 = vadd.f32 %v16329_v13, %v17739_v18  ;;  %v17741_v13 = vld [vmem:[#allocation29_spill] sm:$0xff]  ;;  %v17742_v18 = vld [vmem:[#allocation31_spill] sm:$0xff] }
 0x83e   : > { %v7260_v48 = vadd.f32 %v16308_v58, %v7161_v22  ;;  %7113 = vmatmul.bf16.gmra.mxu3 %v6482_v55 }
 0x840   : > { %v7339_v0 = vmax.f32 %v7260_v48, 0.0 }
 0x841   : > { %v16358_v30 = vpop.f32.mrf.mxu3  ;;  %v16367_v32 = vld [vmem:[#allocation3 + $0x8] sm:$0xff]  }
 0x842   : > { %v7417_v28 = vrot.slane %v7339_v0, 1  ;;  %v16365_v21 = vpop.f32.mrf.mxu2  ;;  %v7817_v27 = vshll.u32 %v16367_v32, 16 }
 0x843   : > { %v7163_v56 = vpop.f32.mrf.mxu1 }
 0x844   : > { %v7418_v58 = vsel %vm1601_vm0, %v7415_v9, %v7417_v28  ;;  %v7164_v1 = vadd.f32 %v7163_v56, %v7065_v40  ;;  %v16375_v37 = vrot.slane %v7817_v27, 1 }
 0x845   : > { %v7517_v42 = vmax.f32 %v7338_v38, %v7418_v58  ;;  %v7067_v38 = vadd.f32 %v16318_v16, %v6968_v5 }
 0x846   : > { %v7263_v26 = vadd.f32 %v16322_v25, %v7164_v1  ;;  %7202 = vmatmul.bf16.gmra.mxu1 %v17736_v60  ;;  %v7820_v9 = vsel %vm913_vm1, %v7815_v12, %v16375_v37  ;;  %v6257_v25 = vpop.permute.xlu1 %6256 }
 0x847   : > { %v7551_v41 = vmax.f32 %v7515_v24, %v7517_v42  ;;  %10552 = vmatmul.msk.bf16.gmra.mxu2 %vm3740_vm10, %v16001_v20  ;;  %7893 = vrot.lane.b32.xlu1 %v7820_v9, %s17661_s29  ;;  %v6486_v63 = vsel %vm3740_vm10, %v17738_v7, %v6257_v25  ;;  %v17740_v42 = vld [vmem:[#allocation26_spill] sm:$0xff] }
 0x848   : > { %v7340_v8 = vmax.f32 %v7263_v26, 0.0  ;;  %v6874_v29 = vadd.f32 %v16261_v11, %v17740_v42 }
 0x849   : > { %7585 = vst.msk [vmem:[#allocation5 + $0x20] sm:$0xff] %vm3740_vm10, %v7551_v41  ;;  %v16384_v52 = vpop.f32.mrf.mxu3  ;;  %v7642_v41 = vld [vmem:[#allocation3 + $0x10] sm:$0x7] }
 0x84a   : > { %v7419_v3 = vrot.slane %v7340_v8, 1  ;;  %v7272_v4 = vpop.f32.mrf.mxu2  ;;  %v6973_v61 = vadd.f32 %v17741_v13, %v6874_v29  ;;  %v17743_v29 = vld [vmem:[#allocation30_spill] sm:$0xff] }
 0x84b   : > { %v7165_v24 = vpop.f32.mrf.mxu1 }
 0x84c   : > { %v7166_v22 = vadd.f32 %v7165_v24, %v7067_v38  ;;  %v7072_v38 = vadd.f32 %v16346_v43, %v6973_v61 }
 0x84e   : > { %v7265_v55 = vadd.f32 %v16333_v51, %v7166_v22  ;;  %7118 = vmatmul.bf16.gmra.mxu3 %v6486_v63 }
 0x850   : > { %v7632_v20 = vld [vmem:[#allocation5 + $0x20] ss:$2 sm:$0xf]  ;;  %v7341_v48 = vmax.f32 %v7265_v55, 0.0  ;;  %v6284_v55 = vpop.permute.xlu2 %6283 }
 0x851   : > { %v7633_v0 = vpack.c.bf16 %v7632_v20, %v7632_v20  ;;  %v16390_v62 = vpop.f32.mrf.mxu3 }
 0x852   : > { %v7421_v40 = vrot.slane %v7341_v48, 1  ;;  %v16394_v56 = vpop.f32.mrf.mxu2 }
 0x853   : > { %v7635_v16 = vshrl.u32 %v7633_v0, 16  ;;  %v7168_v28 = vpop.f32.mrf.mxu1  ;;  %v7638_v27 = vshll.u32 %v7633_v0, 16 }
 0x854   : > { %v7422_v58 = vsel %vm1601_vm0, %v7419_v3, %v7421_v40  ;;  %v7169_v1 = vadd.f32 %v7168_v28, %v7070_v31  ;;  %v7075_v31 = vadd.f32 %v16358_v30, %v17742_v18  ;;  %v6879_v30 = vadd.f32 %v16261_v11, %v17743_v29  ;;  %v11352_v29 = vld [vmem:[#allocation2 + $0x88] sm:$0xff] }
 0x855   : > { %v7637_v12 = vrot.slane %v7635_v16, 7  ;;  %v7519_v51 = vmax.f32 %v7340_v8, %v7422_v58  ;;  %v6259_v8 = vpop.permute.xlu0 %6258 }
 0x856   : > { %v7268_v26 = vadd.f32 %v7267_v59, %v7169_v1  ;;  %7207 = vmatmul.bf16.gmra.mxu1 %v16099_v34 }
 0x857   : > { %v7640_v60 = vor.u32 %v7638_v27, %v7637_v12  ;;  %10553 = vmatmul.msk.bf16.gmra.mxu2 %vm3740_vm10, %v16129_v44  ;;  %v6490_v44 = vsel %vm3740_vm10, %v16117_v6, %v6259_v8  ;;  %v6294_v6 = vrot.slane %v15995_v57, 1 }
 0x858   : > { %v7342_v5 = vmax.f32 %v7268_v26, 0.0 }
 0x859   : > { %v16403_v9 = vpop.f32.mrf.mxu3  ;;  %v7643_v25 = vsel %vm16342_vm6, %v7640_v60, %v7642_v41  ;;  %v6295_v57 = vsel %vm1601_vm0, %v16124_v17, %v6294_v6 }
 0x85a   : > { %v7423_v3 = vrot.slane %v7342_v5, 1  ;;  %7644 = vst [vmem:[#allocation3 + $0x10] sm:$0x7] %v7643_v25  ;;  %v16408_v34 = vpop.f32.mrf.mxu2 }
 0x85b   : > { %v7170_v59 = vpop.f32.mrf.mxu1 }
 0x85c   : > { %v7424_v24 = vsel %vm1601_vm0, %v7421_v40, %v7423_v3  ;;  %v7171_v22 = vadd.f32 %v7170_v59, %v7072_v38  ;;  %v7821_v40 = vshrl.u32 %v16367_v32, 16  ;;  %v17745_v59 = vld [vmem:[#allocation37_spill] sm:$0xff] }
 0x85d   : > { %v7520_v7 = vmax.f32 %v7341_v48, %v7424_v24 }
 0x85e   : > { %v7270_v63 = vadd.f32 %v16365_v21, %v7171_v22  ;;  %7123 = vmatmul.bf16.gmra.mxu3 %v6490_v44  ;;  %v7823_v12 = vor.u32 %v7821_v40, %v16375_v37  ;;  %v17744_v37 = vld [vmem:[#allocation32_spill] sm:$0xff]  ;;  %v17746_v40 = vld [vmem:[#allocation34_spill] sm:$0xff] }
 0x85f   : > { %v6978_v13 = vadd.f32 %v17744_v37, %v6879_v30  ;;  %v6497_v30 = vsel %vm3740_vm10, %v11352_v29, %v6284_v55  ;;  %v11060_v37 = vld [vmem:[%s17588_s5 + $0x20] sm:$0xff] }
 0x860   : > { %v7343_v20 = vmax.f32 %v7270_v63, 0.0  ;;  %8481 = vmatpush.bf16.msra.mxu3 %v11060_v37 }
 0x861   : > { %v16414_v0 = vpop.f32.mrf.mxu3  ;;  %v16416_v43 = vld [vmem:[#allocation3 + $0x10] sm:$0xff]  }
 0x862   : > { %v7425_v16 = vrot.slane %v7343_v20, 1  ;;  %v7825_v48 = vshll.u32 %v16416_v43, 16  ;;  %v16422_v58 = vpop.f32.mrf.mxu2 }
 0x863   : > { %v7173_v28 = vpop.f32.mrf.mxu1 }
 0x864   : > { %v7426_v21 = vsel %vm1601_vm0, %v7423_v3, %v7425_v16  ;;  %v7174_v1 = vadd.f32 %v7173_v28, %v7075_v31  ;;  %v16427_v27 = vrot.slane %v7825_v48, 1  ;;  %v7080_v48 = vadd.f32 %v16390_v62, %v17746_v40 }
 0x865   : > { %v7521_v42 = vmax.f32 %v7342_v5, %v7426_v21  ;;  %v7077_v5 = vadd.f32 %v16384_v52, %v6978_v13  ;;  %v7655_v13 = vld [vmem:[#allocation3 + $0x18] sm:$0x7] }
 0x866   : > { %v7273_v26 = vadd.f32 %v7272_v4, %v7174_v1  ;;  %7212 = vmatmul.bf16.gmra.mxu1 %v16147_v2  ;;  %v16434_v60 = vsel %vm913_vm1, %v7823_v12, %v16427_v27  ;;  %v6261_v2 = vpop.permute.xlu2 %6260 }
 0x867   : > { %v7555_v41 = vmax.f32 %v7519_v51, %v7521_v42  ;;  %7895 = vrot.lane.b32.xlu2 %v16434_v60, %s17661_s29  ;;  %10554 = vmatmul.msk.bf16.gmra.mxu2 %vm3740_vm10, %v6295_v57  ;;  %v6494_v24 = vsel %vm3740_vm10, %v17745_v59, %v6261_v2  ;;  %v6296_v2 = vrot.slane %v16285_v46, 1 }
 0x868   : > { %v7344_v61 = vmax.f32 %v7273_v26, 0.0  ;;  %v17747_v26 = vld [vmem:[#allocation33_spill] sm:$0xff] }
 0x869   : > { %7589 = vst.msk [vmem:[#allocation5 + $0x40] sm:$0xff] %vm3740_vm10, %v7555_v41  ;;  %v16443_v4 = vpop.f32.mrf.mxu3  ;;  %v6884_v41 = vadd.f32 %v16261_v11, %v17747_v26 }
 0x86a   : > { %v7427_v25 = vrot.slane %v7344_v61, 1  ;;  %v16446_v8 = vpop.f32.mrf.mxu2 }
 0x86b   : > { %v7175_v51 = vpop.f32.mrf.mxu1 }
 0x86c   : > { %v7428_v38 = vsel %vm1601_vm0, %v7425_v16, %v7427_v25  ;;  %v7176_v3 = vadd.f32 %v7175_v51, %v7077_v5  ;;  %v17748_v5 = vld [vmem:[#allocation35_spill] sm:$0xff] }
 0x86d   : > { %v7522_v17 = vmax.f32 %v7343_v20, %v7428_v38 }
 0x86e   : > { %v7275_v22 = vadd.f32 %v16394_v56, %v7176_v3  ;;  %7128 = vmatmul.bf16.gmra.mxu3 %v6494_v24 }
 0x86f   : > { %v7556_v44 = vmax.f32 %v7520_v7, %v7522_v17 }
 0x870   : > { %v7645_v63 = vld [vmem:[#allocation5 + $0x40] ss:$2 sm:$0xf]  ;;  %v7345_v18 = vmax.f32 %v7275_v22, 0.0 }
 0x871   : > { %v7646_v31 = vpack.c.bf16 %v7645_v63, %v7645_v63  ;;  %7590 = vst.msk [vmem:[#allocation5 + $0x48] sm:$0xff] %vm3740_vm10, %v7556_v44  ;;  %v16453_v52 = vpop.f32.mrf.mxu3 }
 0x872   : > { %v7429_v16 = vrot.slane %v7345_v18, 1  ;;  %v16457_v21 = vpop.f32.mrf.mxu2  ;;  %v6286_v18 = vpop.permute.xlu1 %6285 }
 0x873   : > { %v7648_v28 = vshrl.u32 %v7646_v31, 16  ;;  %v7178_v20 = vpop.f32.mrf.mxu1  ;;  %v7651_v7 = vshll.u32 %v7646_v31, 16  ;;  %v17749_v31 = vld [vmem:[#allocation38_spill] sm:$0xff] }
 0x874   : > { %v7430_v1 = vsel %vm1601_vm0, %v7427_v25, %v7429_v16  ;;  %v7179_v56 = vadd.f32 %v7178_v20, %v7080_v48  ;;  %v6983_v25 = vadd.f32 %v17748_v5, %v6884_v41  ;;  %v7829_v16 = vshrl.u32 %v16416_v43, 16 }
 0x875   : > { %v7650_v12 = vrot.slane %v7648_v28, 7  ;;  %v7523_v42 = vmax.f32 %v7344_v61, %v7430_v1 }
 0x876   : > { %v7278_v57 = vadd.f32 %v16408_v34, %v7179_v56  ;;  %7217 = vmatmul.bf16.gmra.mxu1 %v6497_v30  ;;  %v6297_v34 = vsel %vm1601_vm0, %v6294_v6, %v6296_v2  ;;  %v7082_v38 = vadd.f32 %v16403_v9, %v6983_v25  ;;  %v7085_v6 = vadd.f32 %v16414_v0, %v17749_v31  ;;  %v11353_v56 = vld [vmem:[#allocation2 + $0x90] sm:$0xff] }
 0x877   : > { %v7653_v62 = vor.u32 %v7651_v7, %v7650_v12  ;;  %10555 = vmatmul.msk.bf16.gmra.mxu2 %vm3740_vm10, %v6297_v34  ;;  %v6500_v12 = vsel %vm3740_vm10, %v11353_v56, %v6286_v18  ;;  %v7831_v7 = vor.u32 %v7829_v16, %v16427_v27  ;;  %v17750_v0 = vld [vmem:[#allocation36_spill] sm:$0xff] }
 0x878   : > { %v7346_v61 = vmax.f32 %v7278_v57, 0.0  ;;  %v6889_v30 = vadd.f32 %v16261_v11, %v17750_v0  ;;  %v11059_v27 = vld [vmem:[%s17588_s5 + $0x18] sm:$0xff]  ;;  %v17754_v0 = vld [vmem:[#allocation42_spill] sm:$0xff] }
 0x879   : > { %v16469_v51 = vpop.f32.mrf.mxu3  ;;  %v7656_v55 = vsel %vm16342_vm6, %v7653_v62, %v7655_v13  ;;  %v17751_v62 = vld [vmem:[#allocation39_spill] sm:$0xff]  ;;  %8482 = vmatpush.bf16.msra.mxu3 %v11059_v27 }
 0x87a   : > { %v7431_v3 = vrot.slane %v7346_v61, 1  ;;  %7657 = vst [vmem:[#allocation3 + $0x18] sm:$0x7] %v7656_v55  ;;  %v7287_v59 = vpop.f32.mrf.mxu2  ;;  %v6988_v37 = vadd.f32 %v17751_v62, %v6889_v30  ;;  %v11058_v62 = vld [vmem:[%s17588_s5 + $0x10] sm:$0xff] }
 0x87b   : > { %v7180_v17 = vpop.f32.mrf.mxu1 }
 0x87c   : > { %v7181_v46 = vadd.f32 %v7180_v17, %v7082_v38 }
 0x87d   : > { %8483 = vmatpush.bf16.msra.mxu3 %v11058_v62  ;;  %v17757_v62 = vld [vmem:[#allocation45_spill] sm:$0xff] }
 0x87e   : > { %v7280_v24 = vadd.f32 %v16422_v58, %v7181_v46  ;;  %v17752_v46 = vld [vmem:[#allocation41_spill] sm:$0xff] }
 0x880   : > { %v7347_v22 = vmax.f32 %v7280_v24, 0.0  ;;  %v7090_v24 = vadd.f32 %v16453_v52, %v17752_v46 }
 0x881   : > { %v16477_v44 = vpop.f32.mrf.mxu3  ;;  %v16479_v63 = vld [vmem:[#allocation3 + $0x18] sm:$0xff] }
 0x882   : > { %v7433_v40 = vrot.slane %v7347_v22, 1  ;;  %v16483_v48 = vpop.f32.mrf.mxu2  ;;  %v7833_v28 = vshll.u32 %v16479_v63, 16 }
 0x883   : > { %v7183_v9 = vpop.f32.mrf.mxu1 }
 0x884   : > { %v7434_v20 = vsel %vm1601_vm0, %v7431_v3, %v7433_v40  ;;  %v7184_v58 = vadd.f32 %v7183_v9, %v7085_v6  ;;  %v16490_v29 = vrot.slane %v7833_v28, 1  ;;  %v11354_v6 = vld [vmem:[#allocation2 + $0x98] sm:$0xff] }
 0x885   : > { %v7525_v1 = vmax.f32 %v7346_v61, %v7434_v20  ;;  %v17753_v9 = vld [vmem:[#allocation40_spill] sm:$0xff] }
 0x886   : > { %v7283_v26 = vadd.f32 %v16446_v8, %v7184_v58  ;;  %7222 = vmatmul.bf16.gmra.mxu1 %v6500_v12  ;;  %v16497_v57 = vsel %vm913_vm1, %v7831_v7, %v16490_v29  ;;  %v7087_v8 = vadd.f32 %v16443_v4, %v6988_v37  ;;  %v6894_v16 = vadd.f32 %v16261_v11, %v17753_v9  ;;  %v7669_v12 = vld [vmem:[#allocation3 + $0x20] sm:$0x7] }
 0x887   : > { %v7559_v41 = vmax.f32 %v7523_v42, %v7525_v1  ;;  %7897 = vrot.lane.b32.xlu0 %v16497_v57, %s17661_s29  ;;  %v6288_v3 = vpop.permute.xlu0 %6287 }
 0x888   : > { %v7348_v13 = vmax.f32 %v7283_v26, 0.0  ;;  %v6503_v40 = vsel %vm3740_vm10, %v11354_v6, %v6288_v3  ;;  %v6993_v30 = vadd.f32 %v17754_v0, %v6894_v16  ;;  %v11056_v6 = vld [vmem:[%s17588_s5] sm:$0xff] }
 0x889   : > { %7593 = vst.msk [vmem:[#allocation5 + $0x60] sm:$0xff] %vm3740_vm10, %v7559_v41  ;;  %v16507_v42 = vpop.f32.mrf.mxu3 }
 0x88a   : > { %v7435_v2 = vrot.slane %v7348_v13, 1  ;;  %v7292_v25 = vpop.f32.mrf.mxu2  ;;  %v7092_v37 = vadd.f32 %v16469_v51, %v6993_v30  ;;  %v11057_v51 = vld [vmem:[%s17588_s5 + $0x8] sm:$0xff] }
 0x88b   : > { %v7185_v5 = vpop.f32.mrf.mxu1  ;;  %8484 = vmatpush.bf16.msra.mxu3 %v11057_v51 }
 0x88c   : > { %v7186_v61 = vadd.f32 %v7185_v5, %v7087_v8 }
 0x88e   : > { %v7285_v55 = vadd.f32 %v16457_v21, %v7186_v61 }
 0x88f   : > { %8485 = vmatpush.bf16.msra.mxu3 %v11056_v6 }
 0x890   : > { %v7659_v34 = vld [vmem:[#allocation5 + $0x60] ss:$2 sm:$0xf]  ;;  %v7349_v38 = vmax.f32 %v7285_v55, 0.0 }
 0x891   : > { %v7660_v17 = vpack.c.bf16 %v7659_v34, %v7659_v34  ;;  %v16518_v56 = vpop.f32.mrf.mxu3  ;;  %v16529_v34 = vld [vmem:[#allocation3 + $0x28] sm:$0xff] }
 0x892   : > { %v7437_v22 = vrot.slane %v7349_v38, 1  ;;  %v16512_v4 = vpop.f32.mrf.mxu2  ;;  %v7849_v46 = vshll.u32 %v16529_v34, 16 }
 0x893   : > { %v7662_v18 = vshrl.u32 %v7660_v17, 16  ;;  %v7188_v31 = vpop.f32.mrf.mxu1  ;;  %v7665_v58 = vshll.u32 %v7660_v17, 16 }
 0x894   : > { %v7438_v21 = vsel %vm1601_vm0, %v7435_v2, %v7437_v22  ;;  %v7189_v28 = vadd.f32 %v7188_v31, %v7090_v24  ;;  %v17755_v24 = vld [vmem:[#allocation44_spill] sm:$0xff] }
 0x895   : > { %v7664_v20 = vrot.slane %v7662_v18, 7  ;;  %v7527_v1 = vmax.f32 %v7348_v13, %v7438_v21 }
 0x896   : > { %v7288_v52 = vadd.f32 %v7287_v59, %v7189_v28  ;;  %7227 = vmatmul.bf16.gmra.mxu1 %v6503_v40 }
 0x897   : > { %v7667_v7 = vor.u32 %v7665_v58, %v7664_v20  ;;  %v7851_v20 = vrot.slane %v7849_v46, 1  ;;  %v17756_v58 = vld [vmem:[#allocation43_spill] sm:$0xff] }
 0x898   : > { %v7350_v26 = vmax.f32 %v7288_v52, 0.0  ;;  %v6899_v52 = vadd.f32 %v16261_v11, %v17756_v58 }
 0x899   : > { %v7670_v41 = vsel %vm16342_vm6, %v7667_v7, %v7669_v12  ;;  %v7101_v55 = vpop.f32.mrf.mxu3 }
 0x89a   : > { %v7439_v27 = vrot.slane %v7350_v26, 1  ;;  %7671 = vst [vmem:[#allocation3 + $0x20] sm:$0x7] %v7670_v41  ;;  %v7297_v2 = vpop.f32.mrf.mxu2 }
 0x89b   : > { %v7190_v13 = vpop.f32.mrf.mxu1 }
 0x89c   : > { %v7440_v59 = vsel %vm1601_vm0, %v7437_v22, %v7439_v27  ;;  %v7191_v8 = vadd.f32 %v7190_v13, %v7092_v37  ;;  %v7095_v22 = vadd.f32 %v16477_v44, %v17755_v24  ;;  %v6998_v37 = vadd.f32 %v17757_v62, %v6899_v52 }
 0x89d   : > { %v7528_v5 = vmax.f32 %v7349_v38, %v7440_v59  ;;  %v7837_v38 = vshrl.u32 %v16479_v63, 16 }
 0x89e   : > { %v7290_v61 = vadd.f32 %v16483_v48, %v7191_v8 }
 0x89f   : > { %v7839_v16 = vor.u32 %v7837_v38, %v16490_v29  ;;  %v17758_v38 = vld [vmem:[#allocation47_spill] sm:$0xff] }
 0x8a0   : > { %v7351_v3 = vmax.f32 %v7290_v61, 0.0 }
 0x8a1   : > { %v16531_v17 = vld [vmem:[#allocation3 + $0x20] sm:$0xff]  ;;  %v7104_v29 = vpop.f32.mrf.mxu3 }
 0x8a2   : > { %v7441_v18 = vrot.slane %v7351_v3, 1  ;;  %v7841_v48 = vshll.u32 %v16531_v17, 16  ;;  %v7845_v44 = vshrl.u32 %v16531_v17, 16  ;;  %v7299_v7 = vpop.f32.mrf.mxu2 }
 0x8a3   : > { %v7193_v31 = vpop.f32.mrf.mxu1 }
 0x8a4   : > { %v7442_v40 = vsel %vm1601_vm0, %v7439_v27, %v7441_v18  ;;  %v7194_v9 = vadd.f32 %v7193_v31, %v7095_v22  ;;  %v7843_v28 = vrot.slane %v7841_v48, 1  ;;  %v7100_v31 = vadd.f32 %v16518_v56, %v17758_v38 }
 0x8a5   : > { %v7529_v21 = vmax.f32 %v7350_v26, %v7442_v40 }
 0x8a6   : > { %v7293_v12 = vadd.f32 %v7292_v25, %v7194_v9  ;;  %v16550_v30 = vsel %vm913_vm1, %v7839_v16, %v7843_v28  ;;  %v7847_v41 = vor.u32 %v7845_v44, %v7843_v28  ;;  %v7097_v25 = vadd.f32 %v16507_v42, %v6998_v37 }
 0x8a7   : > { %v7563_v0 = vmax.f32 %v7527_v1, %v7529_v21  ;;  %7899 = vrot.lane.b32.xlu1 %v16550_v30, %s17661_s29 }
 0x8a8   : > { %v7352_v27 = vmax.f32 %v7293_v12, 0.0  ;;  %v16557_v26 = vsel %vm913_vm1, %v7847_v41, %v7851_v20 }
 0x8a9   : > { %7597 = vst.msk [vmem:[#allocation5 + $0x80] sm:$0xff] %vm3740_vm10, %v7563_v0  ;;  %7901 = vrot.lane.b32.xlu2 %v16557_v26, %s17661_s29  ;;  %v7106_v48 = vpop.f32.mrf.mxu3 }
 0x8aa   : > { %v7443_v1 = vrot.slane %v7352_v27, 1  ;;  %v7302_v22 = vpop.f32.mrf.mxu2 }
 0x8ab   : > { %v7195_v13 = vpop.f32.mrf.mxu1 }
 0x8ac   : > { %v7444_v59 = vsel %vm1601_vm0, %v7441_v18, %v7443_v1  ;;  %v7196_v8 = vadd.f32 %v7195_v13, %v7097_v25  ;;  %v17759_v18 = vld [vmem:[#allocation46_spill] sm:$0xff]  ;;  %v16573_v25 = vld [vmem:[#allocation3 + $0x30] sm:$0xff] }
 0x8ad   : > { %v7530_v61 = vmax.f32 %v7351_v3, %v7444_v59  ;;  %v6904_v3 = vadd.f32 %v16261_v11, %v17759_v18 }
 0x8ae   : > { %v7295_v46 = vadd.f32 %v16512_v4, %v7196_v8  ;;  %v17760_v4 = vld [vmem:[#allocation48_spill] sm:$0xff]  ;;  %v7857_v8 = vshll.u32 %v16573_v25, 16 }
 0x8af   : > { %v7564_v51 = vmax.f32 %v7528_v5, %v7530_v61  ;;  %v7003_v5 = vadd.f32 %v17760_v4, %v6904_v3 }
 0x8b0   : > { %v7353_v24 = vmax.f32 %v7295_v46, 0.0 }
 0x8b1   : > { %7598 = vst.msk [vmem:[#allocation5 + $0x88] sm:$0xff] %vm3740_vm10, %v7564_v51  ;;  %v7102_v44 = vadd.f32 %v7101_v55, %v7003_v5  ;;  %v7109_v62 = vpop.f32.mrf.mxu3 }
 0x8b2   : > { %v7445_v42 = vrot.slane %v7353_v24, 1  ;;  %v7304_v52 = vpop.f32.mrf.mxu2  ;;  %v16579_v24 = vrot.slane %v7857_v8, 1 }
 0x8b3   : > { %v7198_v6 = vpop.f32.mrf.mxu1 }
 0x8b4   : > { %v7446_v40 = vsel %vm1601_vm0, %v7443_v1, %v7445_v42  ;;  %v7199_v9 = vadd.f32 %v7198_v6, %v7100_v31  ;;  %v7105_v1 = vadd.f32 %v7104_v29, %v16171_v50 }
 0x8b5   : > { %v7531_v16 = vmax.f32 %v7352_v27, %v7446_v40 }
 0x8b6   : > { %v7298_v21 = vadd.f32 %v7297_v2, %v7199_v9  ;;  %v7853_v2 = vshrl.u32 %v16529_v34, 16 }
 0x8b8   : > { %v7354_v28 = vmax.f32 %v7298_v21, 0.0  ;;  %v7855_v59 = vor.u32 %v7853_v2, %v7851_v20 }
 0x8b9   : > { %v7894_v12 = vpop.permute.xlu1 %7893  ;;  %v7111_v31 = vpop.f32.mrf.mxu3 }
 0x8ba   : > { %v7447_v58 = vrot.slane %v7354_v28, 1  ;;  %v8044_v56 = vsel %vm3740_vm10, %v16348_v10, %v7894_v12  ;;  %v7307_v51 = vpop.f32.mrf.mxu2  ;;  %v16585_v50 = vsel %vm913_vm1, %v7855_v59, %v16579_v24  ;;  %v11086_v59 = vld [vmem:[%s17588_s5 + $0xf0] sm:$0xff] }
 0x8bb   : > { %v7200_v0 = vpop.f32.mrf.mxu1  ;;  %8486 = vmatmul.bf16.vlgmr.msra.gmra.mxu3 %v8044_v56  ;;  %7903 = vrot.lane.b32.xlu0 %v16585_v50, %s17661_s29 }
 0x8bc   : > { %v7201_v41 = vadd.f32 %v7200_v0, %v7102_v44 }
 0x8be   : > { %v7300_v37 = vadd.f32 %v7299_v7, %v7201_v41  ;;  %v6909_v7 = vadd.f32 %v16261_v11, %v16168_v53 }
 0x8c0   : > { %v7355_v27 = vmax.f32 %v7300_v37, 0.0  ;;  %v7008_v20 = vadd.f32 %v16175_v47, %v6909_v7  ;;  %v11085_v7 = vld [vmem:[%s17588_s5 + $0xe8] sm:$0xff] }
 0x8c1   : > { %v7896_v6 = vpop.permute.xlu2 %7895  ;;  %v7114_v5 = vpop.f32.mrf.mxu3 }
 0x8c2   : > { %v7449_v13 = vrot.slane %v7355_v27, 1  ;;  %v7107_v40 = vadd.f32 %v7106_v48, %v7008_v20  ;;  %v7309_v3 = vpop.f32.mrf.mxu2  ;;  %v6914_v27 = vadd.f32 %v16261_v11, %v16183_v36 }
 0x8c3   : > { %v7203_v55 = vpop.f32.mrf.mxu1 }
 0x8c4   : > { %v7450_v61 = vsel %vm1601_vm0, %v7447_v58, %v7449_v13  ;;  %v7204_v46 = vadd.f32 %v7203_v55, %v7105_v1  ;;  %v11087_v1 = vld [vmem:[%s17588_s5 + $0xf8] sm:$0xff]  ;;  %v7683_v13 = vld [vmem:[#allocation3 + $0x38] sm:$0x7] }
 0x8c5   : > { %v7533_v10 = vmax.f32 %v7354_v28, %v7450_v61  ;;  %v7110_v28 = vadd.f32 %v7109_v62, %v16181_v33  ;;  %v7013_v33 = vadd.f32 %v16185_v23, %v6914_v27  ;;  %8655 = vmatpush.bf16.msra.mxu2 %v11087_v1 }
 0x8c6   : > { %v7303_v38 = vadd.f32 %v7302_v22, %v7204_v46  ;;  %v8047_v22 = vsel %vm3740_vm10, %v16367_v32, %v7896_v6  ;;  %v7115_v6 = vadd.f32 %v7114_v5, %v16192_v39  ;;  %v16628_v39 = vld [vmem:[%s17587_s4] ss:$0 sm:$0xff] }
 0x8c7   : > { %v7567_v42 = vmax.f32 %v7531_v16, %v7533_v10  ;;  %v7112_v36 = vadd.f32 %v7111_v31, %v7013_v33  ;;  %v11084_v31 = vld [vmem:[%s17588_s5 + $0xe0] sm:$0xff] }
 0x8c8   : > { %v7356_v29 = vmax.f32 %v7303_v38, 0.0 }
 0x8c9   : > { %7601 = vst.msk [vmem:[#allocation5 + $0xa0] sm:$0xff] %vm3740_vm10, %v7567_v42  ;;  %v7116_v61 = vpop.f32.mrf.mxu3  ;;  %8656 = vmatpush.bf16.msra.mxu2 %v11086_v59  ;;  %v7861_v42 = vshrl.u32 %v16573_v25, 16 }
 0x8ca   : > { %v7451_v9 = vrot.slane %v7356_v29, 1  ;;  %v7312_v55 = vpop.f32.mrf.mxu2 }
 0x8cb   : > { %v7205_v18 = vpop.f32.mrf.mxu1  ;;  %8491 = vmatmul.bf16.gmra.mxu3 %v8047_v22 }
 0x8cc   : > { %v7206_v53 = vadd.f32 %v7205_v18, %v7107_v40 }
 0x8cd   : > { %8657 = vmatpush.bf16.msra.mxu2 %v11085_v7 }
 0x8ce   : > { %v7305_v16 = vadd.f32 %v7304_v52, %v7206_v53  ;;  %v7863_v53 = vor.u32 %v7861_v42, %v16579_v24  ;;  %v6919_v24 = vadd.f32 %v16628_v39, %v16209_v35  ;;  %v6924_v42 = vadd.f32 %v16628_v39, %v16223_v54 }
 0x8d0   : > { %v7673_v21 = vld [vmem:[#allocation5 + $0xa0] ss:$2 sm:$0xf]  ;;  %v7357_v4 = vmax.f32 %v7305_v16, 0.0 }
 0x8d1   : > { %v7674_v47 = vpack.c.bf16 %v7673_v21, %v7673_v21  ;;  %v7119_v21 = vpop.f32.mrf.mxu3  ;;  %8658 = vmatpush.bf16.msra.mxu2 %v11084_v31 }
 0x8d2   : > { %v7453_v44 = vrot.slane %v7357_v4, 1 }
 0x8d3   : > { %v7676_v58 = vshrl.u32 %v7674_v47, 16  ;;  %v7208_v12 = vpop.f32.mrf.mxu1  ;;  %v7679_v41 = vshll.u32 %v7674_v47, 16 }
 0x8d4   : > { %v7454_v48 = vsel %vm1601_vm0, %v7451_v9, %v7453_v44  ;;  %v7209_v0 = vadd.f32 %v7208_v12, %v7110_v28  ;;  %v7314_v9 = vpop.f32.mrf.mxu2  ;;  %v11083_v28 = vld [vmem:[%s17588_s5 + $0xd8] sm:$0xff]  ;;  %v7018_v12 = vadd.f32 %v16213_v45, %v6919_v24  ;;  %v11081_v45 = vld [vmem:[%s17588_s5 + $0xc8] sm:$0xff] }
 0x8d5   : > { %v7678_v56 = vrot.slane %v7676_v58, 7  ;;  %v7535_v37 = vmax.f32 %v7356_v29, %v7454_v48  ;;  %8659 = vmatpush.bf16.msra.mxu2 %v11083_v28 }
 0x8d6   : > { %v7308_v52 = vadd.f32 %v7307_v51, %v7209_v0  ;;  %v11082_v0 = vld [vmem:[%s17588_s5 + $0xd0] sm:$0xff]  ;;  %v7117_v35 = vadd.f32 %v7116_v61, %v7018_v12 }
 0x8d7   : > { %v7681_v2 = vor.u32 %v7679_v41, %v7678_v56 }
 0x8d8   : > { %v7358_v62 = vmax.f32 %v7308_v52, 0.0 }
 0x8d9   : > { %v7684_v8 = vsel %vm16342_vm6, %v7681_v2, %v7683_v13  ;;  %8660 = vmatpush.bf16.msra.mxu2 %v11082_v0  ;;  %v7121_v33 = vpop.f32.mrf.mxu3 }
 0x8da   : > { %v7455_v11 = vrot.slane %v7358_v62, 1  ;;  %7685 = vst [vmem:[#allocation3 + $0x38] sm:$0x7] %v7684_v8  ;;  %v11080_v8 = vld [vmem:[%s17588_s5 + $0xc0] sm:$0xff] }
 0x8db   : > { %v7210_v46 = vpop.f32.mrf.mxu1 }
 0x8dc   : > { %v7456_v10 = vsel %vm1601_vm0, %v7453_v44, %v7455_v11  ;;  %v7211_v51 = vadd.f32 %v7210_v46, %v7112_v36  ;;  %v7317_v52 = vpop.f32.mrf.mxu2  ;;  %v7120_v36 = vadd.f32 %v7119_v21, %v16219_v14 }
 0x8dd   : > { %v7536_v23 = vmax.f32 %v7357_v4, %v7456_v10  ;;  %8661 = vmatpush.bf16.msra.mxu2 %v11081_v45 }
 0x8de   : > { %v7310_v38 = vadd.f32 %v7309_v3, %v7211_v51 }
 0x8e0   : > { %v7359_v20 = vmax.f32 %v7310_v38, 0.0 }
 0x8e1   : > { %v16611_v29 = vld [vmem:[#allocation3 + $0x38] sm:$0xff]  ;;  %8662 = vmatpush.bf16.msra.mxu2 %v11080_v8  ;;  %v7124_v14 = vpop.f32.mrf.mxu3 }
 0x8e2   : > { %v7457_v40 = vrot.slane %v7359_v20, 1  ;;  %v7865_v22 = vshll.u32 %v16611_v29, 16 }
 0x8e3   : > { %v7213_v18 = vpop.f32.mrf.mxu1 }
 0x8e4   : > { %v7458_v16 = vsel %vm1601_vm0, %v7455_v11, %v7457_v40  ;;  %v7214_v3 = vadd.f32 %v7213_v18, %v7115_v6  ;;  %v16620_v47 = vrot.slane %v7865_v22, 1  ;;  %v7319_v6 = vpop.f32.mrf.mxu2 }
 0x8e5   : > { %v7537_v4 = vmax.f32 %v7358_v62, %v7458_v16  ;;  %v7696_v16 = vld [vmem:[#allocation3 + $0x40] sm:$0x7] }
 0x8e6   : > { %v7313_v5 = vadd.f32 %v7312_v55, %v7214_v3  ;;  %v16634_v58 = vsel %vm913_vm1, %v7863_v53, %v16620_v47 }
 0x8e7   : > { %v7571_v44 = vmax.f32 %v7535_v37, %v7537_v4  ;;  %7905 = vrot.lane.b32.xlu1 %v16634_v58, %s17661_s29 }
 0x8e8   : > { %v7360_v48 = vmax.f32 %v7313_v5, 0.0  ;;  %v17761_v5 = vld [vmem:[#allocation49_spill] sm:$0xff] }
 0x8e9   : > { %7605 = vst.msk [vmem:[#allocation5 + $0xc0] sm:$0xff] %vm3740_vm10, %v7571_v44  ;;  %v7125_v44 = vadd.f32 %v7124_v14, %v17761_v5 }
 0x8ea   : > { %v7459_v56 = vrot.slane %v7360_v48, 1 }
 0x8eb   : > { %v7215_v41 = vpop.f32.mrf.mxu1 }
 0x8ec   : > { %v7460_v37 = vsel %vm1601_vm0, %v7457_v40, %v7459_v56  ;;  %v7216_v27 = vadd.f32 %v7215_v41, %v7117_v35  ;;  %v7023_v40 = vadd.f32 %v16225_v15, %v6924_v42  ;;  %v7322_v15 = vpop.f32.mrf.mxu2  ;;  %v11071_v42 = vld [vmem:[%s17588_s5 + $0x78] sm:$0xff] }
 0x8ed   : > { %v7538_v2 = vmax.f32 %v7359_v20, %v7460_v37  ;;  %8537 = vmatpush.bf16.msrb.mxu3 %v11071_v42 }
 0x8ee   : > { %v7315_v1 = vadd.f32 %v7314_v9, %v7216_v27  ;;  %v7122_v18 = vadd.f32 %v7121_v33, %v7023_v40  ;;  %v7869_v27 = vshrl.u32 %v16611_v29, 16 }
 0x8ef   : > { %v7572_v62 = vmax.f32 %v7536_v23, %v7538_v2  ;;  %v17762_v2 = vld [vmem:[#allocation51_spill] sm:$0xff] }
 0x8f0   : > { %v7686_v13 = vld [vmem:[#allocation5 + $0xc0] ss:$2 sm:$0xf]  ;;  %v7361_v55 = vmax.f32 %v7315_v1, 0.0  ;;  %v6929_v45 = vadd.f32 %v16628_v39, %v17762_v2  ;;  %v11070_v2 = vld [vmem:[%s17588_s5 + $0x70] sm:$0xff] }
 0x8f1   : > { %v7687_v59 = vpack.c.bf16 %v7686_v13, %v7686_v13  ;;  %7606 = vst.msk [vmem:[#allocation5 + $0xc8] sm:$0xff] %vm3740_vm10, %v7572_v62  ;;  %v7871_v62 = vor.u32 %v7869_v27, %v16620_v47  ;;  %8538 = vmatpush.bf16.msrb.mxu3 %v11070_v2 }
 0x8f2   : > { %v7461_v11 = vrot.slane %v7361_v55, 1  ;;  %v17763_v55 = vld [vmem:[#allocation50_spill] sm:$0xff] }
 0x8f3   : > { %v7689_v61 = vshrl.u32 %v7687_v59, 16  ;;  %v7218_v46 = vpop.f32.mrf.mxu1  ;;  %v7692_v23 = vshll.u32 %v7687_v59, 16  ;;  %v7028_v59 = vadd.f32 %v17763_v55, %v6929_v45 }
 0x8f4   : > { %v7462_v10 = vsel %vm1601_vm0, %v7459_v56, %v7461_v11  ;;  %v7219_v51 = vadd.f32 %v7218_v46, %v7120_v36  ;;  %v7324_v46 = vpop.f32.mrf.mxu2 }
 0x8f5   : > { %v7691_v7 = vrot.slane %v7689_v61, 7  ;;  %v7539_v38 = vmax.f32 %v7360_v48, %v7462_v10  ;;  %v7126_v48 = vpop.f32.mrf.mxu3 }
 0x8f6   : > { %v7318_v20 = vadd.f32 %v7317_v52, %v7219_v51  ;;  %v7127_v11 = vadd.f32 %v7126_v48, %v7028_v59 }
 0x8f7   : > { %v7694_v31 = vor.u32 %v7692_v23, %v7691_v7 }
 0x8f8   : > { %v7362_v9 = vmax.f32 %v7318_v20, 0.0  ;;  %v17764_v20 = vld [vmem:[#allocation18_spill] sm:$0xff] }
 0x8f9   : > { %v7898_v22 = vpop.permute.xlu0 %7897  ;;  %v7697_v4 = vsel %vm16342_vm6, %v7694_v31, %v7696_v16 }
 0x8fa   : > { %v7463_v53 = vrot.slane %v7362_v9, 1  ;;  %v8050_v21 = vsel %vm3740_vm10, %v16416_v43, %v7898_v22  ;;  %7698 = vst [vmem:[#allocation3 + $0x40] sm:$0x7] %v7697_v4 }
 0x8fb   : > { %v7220_v3 = vpop.f32.mrf.mxu1  ;;  %8496 = vmatmul.bf16.gmra.mxu3 %v8050_v21  ;;  %8663 = vmatmul.bf16.vlgmr.msra.gmra.mxu2 %v8050_v21  ;;  %v7710_v21 = vld [vmem:[#allocation3 + $0x48] sm:$0x7] }
 0x8fc   : > { %v7221_v28 = vadd.f32 %v7220_v3, %v7122_v18 }
 0x8fd   : > { %v7129_v51 = vpop.f32.mrf.mxu3 }
 0x8fe   : > { %v7320_v54 = vadd.f32 %v7319_v6, %v7221_v28  ;;  %v7130_v31 = vadd.f32 %v7129_v51, %v17764_v20  ;;  %v7723_v20 = vld [vmem:[#allocation3 + $0x50] sm:$0x7] }
 0x900   : > { %v7363_v24 = vmax.f32 %v7320_v54, 0.0 }
 0x901   : > { %v16661_v35 = vld [vmem:[#allocation3 + $0x40] sm:$0xff] }
 0x902   : > { %v7465_v12 = vrot.slane %v7363_v24, 1  ;;  %v7873_v52 = vshll.u32 %v16661_v35, 16 }
 0x903   : > { %v7223_v0 = vpop.f32.mrf.mxu1 }
 0x904   : > { %v7466_v56 = vsel %vm1601_vm0, %v7463_v53, %v7465_v12  ;;  %v7224_v41 = vadd.f32 %v7223_v0, %v7125_v44  ;;  %v7875_v13 = vrot.slane %v7873_v52, 1 }
 0x905   : > { %v7541_v37 = vmax.f32 %v7362_v9, %v7466_v56  ;;  %v7327_v9 = vpop.f32.mrf.mxu2  ;;  %v7131_v28 = vpop.f32.mrf.mxu3 }
 0x906   : > { %v7323_v1 = vadd.f32 %v7322_v15, %v7224_v41  ;;  %v16672_v36 = vsel %vm913_vm1, %v7871_v62, %v7875_v13 }
 0x907   : > { %v7575_v33 = vmax.f32 %v7539_v38, %v7541_v37  ;;  %7907 = vrot.lane.b32.xlu2 %v16672_v36, %s17661_s29 }
 0x908   : > { %v7364_v8 = vmax.f32 %v7323_v1, 0.0  ;;  %v7877_v1 = vshrl.u32 %v16661_v35, 16 }
 0x909   : > { %7609 = vst.msk [vmem:[#allocation5 + $0xe0] sm:$0xff] %vm3740_vm10, %v7575_v33 }
 0x90a   : > { %v7467_v61 = vrot.slane %v7364_v8, 1 }
 0x90b   : > { %v7225_v39 = vpop.f32.mrf.mxu1 }
 0x90c   : > { %v7226_v10 = vadd.f32 %v7225_v39, %v7127_v11 }
 0x90d   : > { %v7329_v41 = vpop.f32.mrf.mxu2 }
 0x90e   : > { %v7325_v7 = vadd.f32 %v7324_v46, %v7226_v10  ;;  %v7902_v10 = vpop.permute.xlu2 %7901 }
 0x90f   : > { %7942 = vrot.lane.b32.xlu2 %v16367_v32, %s17661_s29  ;;  %v7132_v32 = vadd.f32 %v7131_v28, %v16287_v49  ;;  %v8056_v51 = vsel %vm3740_vm10, %v16531_v17, %v7902_v10 }
 0x910   : > { %v7700_v47 = vld [vmem:[#allocation5 + $0xe0] ss:$2 sm:$0xf]  ;;  %v7365_v23 = vmax.f32 %v7325_v7, 0.0 }
 0x911   : > { %v7701_v38 = vpack.c.bf16 %v7700_v47, %v7700_v47  ;;  %v11079_v47 = vld [vmem:[%s17588_s5 + $0xb8] sm:$0xff] }
 0x912   : > { %v7469_v6 = vrot.slane %v7365_v23, 1  ;;  %8596 = vmatpush.bf16.msrb.mxu1 %v11079_v47  ;;  %v11067_v47 = vld [vmem:[%s17588_s5 + $0x58] sm:$0xff] }
 0x913   : > { %v7703_v40 = vshrl.u32 %v7701_v38, 16  ;;  %v7228_v14 = vpop.f32.mrf.mxu1  ;;  %v7706_v16 = vshll.u32 %v7701_v38, 16 }
 0x914   : > { %v7470_v18 = vsel %vm1601_vm0, %v7467_v61, %v7469_v6  ;;  %v7229_v53 = vadd.f32 %v7228_v14, %v7130_v31 }
 0x915   : > { %v7705_v22 = vrot.slane %v7703_v40, 7  ;;  %v7543_v3 = vmax.f32 %v7364_v8, %v7470_v18  ;;  %v7879_v8 = vor.u32 %v7877_v1, %v7875_v13  ;;  %v11069_v40 = vld [vmem:[%s17588_s5 + $0x68] sm:$0xff]  ;;  %v11208_v18 = vld [vmem:[#allocation3 + $0x8] sm:$0xf0]  ;;  %v16775_v1 = vld [vmem:[#allocation3 + $0x58] sm:$0xff] }
 0x916   : > { %v7328_v4 = vadd.f32 %v7327_v9, %v7229_v53  ;;  %8539 = vmatpush.bf16.msrb.mxu3 %v11069_v40  ;;  %v11209_v53 = vld [vmem:[#allocation3 + $0x8] sm:$0xe] }
 0x917   : > { %v7708_v54 = vor.u32 %v7706_v16, %v7705_v22  ;;  %7948 = vrot.lane.b32.xlu2 %v16531_v17, %s17661_s29  ;;  %v11210_v19 = vor.u32 %v11209_v53, %v11208_v18  ;;  %v11077_v18 = vld [vmem:[%s17588_s5 + $0xa8] sm:$0xff] }
 0x918   : > { %v7366_v24 = vmax.f32 %v7328_v4, 0.0 }
 0x919   : > { %v7711_v15 = vsel %vm16342_vm6, %v7708_v54, %v7710_v21  ;;  %v7900_v44 = vpop.permute.xlu1 %7899  ;;  %v16731_v21 = vrot.slane %v16416_v43, 1  ;;  %v7981_v28 = vrot.slane %v11210_v19, 1 }
 0x91a   : > { %7712 = vst [vmem:[#allocation3 + $0x48] sm:$0x7] %v7711_v15  ;;  %v7471_v5 = vrot.slane %v7366_v24, 1  ;;  %v8053_v48 = vsel %vm3740_vm10, %v16479_v63, %v7900_v44  ;;  %v7923_v15 = vrot.slane %v16531_v17, 1 }
 0x91b   : > { %v7230_v12 = vpop.f32.mrf.mxu1  ;;  %8501 = vmatmul.bf16.gmra.mxu3 %v8053_v48  ;;  %8668 = vmatmul.bf16.gmra.mxu2 %v8053_v48 }
 0x91c   : > { %v7472_v0 = vsel %vm1601_vm0, %v7469_v6, %v7471_v5  ;;  %v7231_v56 = vadd.f32 %v7230_v12, %v7132_v32  ;;  %v7982_v32 = vsel %vm1601_vm0, %v7981_v28, %v16731_v21  ;;  %v16741_v12 = vrot.slane %v16479_v63, 1  ;;  %v11076_v28 = vld [vmem:[%s17588_s5 + $0xa0] sm:$0xff] }
 0x91d   : > { %v7544_v37 = vmax.f32 %v7365_v23, %v7472_v0  ;;  %v7925_v0 = vrot.slane %v16529_v34, 1 }
 0x91e   : > { %v7330_v27 = vadd.f32 %v7329_v41, %v7231_v56  ;;  %v16750_v17 = vsel %vm1601_vm0, %v16741_v12, %v7923_v15  ;;  %v7927_v56 = vrot.slane %v16573_v25, 1  ;;  %v7929_v41 = vrot.slane %v16611_v29, 1 }
 0x91f   : > { %7954 = vrot.lane.b32.xlu2 %v16611_v29, %s17661_s29  ;;  %v16823_v53 = vsel %vm1601_vm0, %v16731_v21, %v16741_v12 }
 0x920   : > { %v7367_v52 = vmax.f32 %v7330_v27, 0.0  ;;  %v16764_v27 = vsel %vm1601_vm0, %v7927_v56, %v7929_v41 }
 0x921   : > { %v16691_v49 = vld [vmem:[#allocation3 + $0x48] sm:$0xff] }
 0x922   : > { %v7473_v45 = vrot.slane %v7367_v52, 1  ;;  %v7881_v33 = vshll.u32 %v16691_v49, 16  ;;  %v7885_v54 = vshrl.u32 %v16691_v49, 16 }
 0x924   : > { %v7474_v62 = vsel %vm1601_vm0, %v7471_v5, %v7473_v45  ;;  %v7546_v55 = vmax.f32 %v7367_v52, %v7473_v45  ;;  %v7883_v11 = vrot.slane %v7881_v33, 1  ;;  %v7750_v52 = vld [vmem:[#allocation3 + $0x58] sm:$0x1]  ;;  %v11078_v45 = vld [vmem:[%s17588_s5 + $0xb0] sm:$0xff] }
 0x925   : > { %v7545_v59 = vmax.f32 %v7366_v24, %v7474_v62  ;;  %v7963_v33 = vunpack.c.l.b16 %v7750_v52  ;;  %v7933_v62 = vrot.slane %v16691_v49, 1  ;;  %8597 = vmatpush.bf16.msrb.mxu1 %v11078_v45 }
 0x926   : > { %v7580_v61 = vmax.f32 %v7544_v37, %v7546_v55  ;;  %v16702_v39 = vsel %vm913_vm1, %v7879_v8, %v7883_v11  ;;  %v16738_v5 = vor.u32 %v7885_v54, %v7883_v11  ;;  %v16759_v37 = vsel %vm1601_vm0, %v7923_v15, %v7925_v0  ;;  %v11075_v54 = vld [vmem:[%s17588_s5 + $0x98] sm:$0xff]  ;;  %v11073_v15 = vld [vmem:[%s17588_s5 + $0x88] sm:$0xff] }
 0x927   : > { %v7579_v46 = vmax.f32 %v7543_v3, %v7545_v59  ;;  %7909 = vrot.lane.b32.xlu0 %v16702_v39, %s17661_s29  ;;  %v8016_v59 = vshll.u32 %v16775_v1, 16  ;;  %v7964_v11 = vpack.c.b16 %v7963_v33, %v7963_v33  ;;  %v11091_v33 = vld [vmem:[%s17588_s5 + $0x118] sm:$0xff] }
 0x928   : > { %7614 = vst.msk [vmem:[#allocation5 + $0x108] sm:$0x7f] %vm5486_vm3, %v7580_v61 }
 0x929   : > { %7613 = vst.msk [vmem:[#allocation5 + $0x100] sm:$0xff] %vm3740_vm10, %v7579_v46  ;;  %8598 = vmatpush.bf16.msrb.mxu1 %v11077_v18 }
 0x92b   : > { %8506 = vmatmul.bf16.gmra.mxu3 %v8056_v51  ;;  %8673 = vmatmul.bf16.gmra.mxu2 %v8056_v51 }
 0x92d   : > { %v7904_v9 = vpop.permute.xlu0 %7903  ;;  %8599 = vmatpush.bf16.msrb.mxu1 %v11076_v28 }
 0x92e   : > { %v8059_v14 = vsel %vm3740_vm10, %v16529_v34, %v7904_v9 }
 0x92f   : > { %7944 = vrot.lane.b32.xlu0 %v16416_v43, %s17661_s29  ;;  %v11068_v43 = vld [vmem:[%s17588_s5 + $0x60] sm:$0xff] }
 0x930   : > { %v7713_v13 = vld [vmem:[#allocation5 + $0x100] ss:$2 sm:$0xf]  ;;  %8540 = vmatpush.bf16.msrb.mxu3 %v11068_v43  ;;  %v11064_v43 = vld [vmem:[%s17588_s5 + $0x40] sm:$0xff] }
 0x931   : > { %v7714_v7 = vpack.c.bf16 %v7713_v13, %v7713_v13  ;;  %v16794_v13 = vrot.slane %v8016_v59, 1  ;;  %8600 = vmatpush.bf16.msrb.mxu1 %v11075_v54 }
 0x933   : > { %v7716_v23 = vshrl.u32 %v7714_v7, 16  ;;  %v7719_v42 = vshll.u32 %v7714_v7, 16  ;;  %v7974_v7 = vshll.u32 %v7964_v11, 16 }
 0x934   : > { %8541 = vmatpush.bf16.msrb.mxu3 %v11067_v47  ;;  %v11206_v47 = vld [vmem:[#allocation3] sm:$0xe] }
 0x935   : > { %v7718_v38 = vrot.slane %v7716_v23, 7 }
 0x937   : > { %v7721_v31 = vor.u32 %v7719_v42, %v7718_v38  ;;  %7950 = vrot.lane.b32.xlu0 %v16529_v34, %s17661_s29  ;;  %v7931_v34 = vrot.slane %v16661_v35, 1  ;;  %v7976_v38 = vrot.slane %v7974_v7, 1  ;;  %v11205_v7 = vld [vmem:[#allocation3] sm:$0xf0] }
 0x939   : > { %v7724_v6 = vsel %vm16342_vm6, %v7721_v31, %v7723_v20  ;;  %v16779_v55 = vsel %vm1601_vm0, %v7929_v41, %v7931_v34  ;;  %v16786_v46 = vsel %vm1601_vm0, %v7931_v34, %v7933_v62 }
 0x93a   : > { %7725 = vst [vmem:[#allocation3 + $0x50] sm:$0x7] %v7724_v6  ;;  %v7985_v6 = vrot.slane %v7964_v11, 1 }
 0x93b   : > { %8511 = vmatmul.bf16.gmra.mxu3 %v8059_v14  ;;  %8678 = vmatmul.bf16.gmra.mxu2 %v8059_v14  ;;  %v11066_v14 = vld [vmem:[%s17588_s5 + $0x50] sm:$0xff] }
 0x93c   : > { %8542 = vmatpush.bf16.msrb.mxu3 %v11066_v14 }
 0x93f   : > { %7956 = vrot.lane.b32.xlu0 %v16661_v35, %s17661_s29 }
 0x941   : > { %v16726_v22 = vld [vmem:[#allocation3 + $0x50] sm:$0xff] }
 0x942   : > { %v7746_v16 = vld [vmem:[#allocation3 + $0x50] sm:$0x1]  ;;  %7960 = vrot.lane.b32.xlu2 %v16726_v22, %s17661_s29  ;;  %v7966_v2 = vshll.u32 %v16726_v22, 16  ;;  %v7970_v8 = vshrl.u32 %v16726_v22, 16  ;;  %v16809_v31 = vrot.slane %v16726_v22, 1 }
 0x943   : > { %v7807_v3 = vunpack.c.l.b16 %v7746_v16  ;;  %v16830_v16 = vsel %vm1601_vm0, %v7925_v0, %v7927_v56 }
 0x944   : > { %v7986_v40 = vsel %vm1601_vm0, %v16809_v31, %v7985_v6  ;;  %v11356_v6 = vld [vmem:[#allocation3 + $0x8] sm:$0xff]  }
 0x945   : > { %v7808_v4 = vpack.c.b16 %v7807_v3, %v7807_v3 }
 0x947   : > { %v7889_v24 = vshll.u32 %v7808_v4, 16  ;;  %7987 = vrot.lane.b32.xlu0 %v7982_v32, %s17661_s29  ;;  %v7935_v23 = vrot.slane %v7808_v4, 1  ;;  %v16842_v4 = vsel %vm1601_vm0, %v7933_v62, %v16809_v31 }
 0x949   : > { %v7891_v44 = vrot.slane %v7889_v24, 1  ;;  %v7936_v42 = vsel %vm1601_vm0, %v7933_v62, %v7935_v23  ;;  %v11074_v24 = vld [vmem:[%s17588_s5 + $0x90] sm:$0xff]  ;;  %v11207_v23 = vor.u32 %v11206_v47, %v11205_v7 }
 0x94a   : > { %7991 = vrot.lane.b32.xlu2 %v16750_v17, %s17661_s29  ;;  %8601 = vmatpush.bf16.msrb.mxu1 %v11074_v24 }
 0x94b   : > { %v7892_v48 = vsel %vm913_vm1, %v16738_v5, %v7891_v44  ;;  %v11072_v44 = vld [vmem:[%s17588_s5 + $0x80] sm:$0xff] }
 0x94c   : > { %7911 = vrot.lane.b32.xlu1 %v7892_v48, %s17661_s29 }
 0x94e   : > { %8602 = vmatpush.bf16.msrb.mxu1 %v11073_v15 }
 0x94f   : > { %7993 = vrot.lane.b32.xlu0 %v16759_v37, %s17661_s29 }
 0x952   : > { %7997 = vrot.lane.b32.xlu2 %v16764_v27, %s17661_s29  ;;  %8603 = vmatpush.bf16.msrb.mxu1 %v11072_v44  ;;  %v7754_v44 = vld [vmem:[#allocation3 + $0x60] sm:$0x1] }
 0x954   : > { %7946 = vrot.lane.b32.xlu1 %v16479_v63, %s17661_s29  ;;  %v7968_v63 = vrot.slane %v7966_v2, 1 }
 0x956   : > { %v7972_v51 = vor.u32 %v7970_v8, %v7968_v63  ;;  %v16836_v3 = vsel %vm913_vm1, %v16738_v5, %v7968_v63  ;;  %v16861_v5 = vpop.f32.mrf.mxu3 }
 0x957   : > { %7999 = vrot.lane.b32.xlu0 %v16779_v55, %s17661_s29 }
 0x958   : > { %v8019_v20 = vsel %vm913_vm1, %v7972_v51, %v16794_v13 }
 0x959   : > { %v7906_v61 = vpop.permute.xlu1 %7905 }
 0x95a   : > { %8001 = vrot.lane.b32.xlu2 %v16786_v46, %s17661_s29  ;;  %v8062_v10 = vsel %vm3740_vm10, %v16573_v25, %v7906_v61 }
 0x95b   : > { %8516 = vmatmul.bf16.gmra.mxu3 %v8062_v10  ;;  %8683 = vmatmul.bf16.gmra.mxu2 %v8062_v10 }
 0x95c   : > { %7952 = vrot.lane.b32.xlu1 %v16573_v25, %s17661_s29  ;;  %v16803_v25 = vsel %vm913_vm1, %v7972_v51, %v7976_v38 }
 0x95e   : > { %v16873_v41 = vpop.f32.mrf.mxu3 }
 0x95f   : > { %8030 = vrot.lane.b32.xlu0 %v8019_v20, %s17661_s29  ;;  %v7916_v20 = vrot.slane %v11207_v23, 1 }
 0x961   : > { %v7908_v9 = vpop.permute.xlu2 %7907 }
 0x962   : > { %v8065_v19 = vsel %vm3740_vm10, %v16611_v29, %v7908_v9  ;;  %v11065_v29 = vld [vmem:[%s17588_s5 + $0x48] sm:$0xff] }
 0x963   : > { %8543 = vmatpush.bf16.msrb.mxu3 %v11065_v29  ;;  %v11090_v29 = vld [vmem:[%s17588_s5 + $0x110] sm:$0xff] }
 0x964   : > { %7958 = vrot.lane.b32.xlu1 %v16691_v49, %s17661_s29 }
 0x966   : > { %v16879_v45 = vpop.f32.mrf.mxu3 }
 0x967   : > { %8005 = vrot.lane.b32.xlu0 %v7986_v40, %s17661_s29  ;;  %8544 = vmatpush.bf16.msrb.mxu3 %v11064_v43  ;;  %v7917_v40 = vrot.slane %v11356_v6, 1  ;;  %v8013_v43 = vunpack.c.l.b16 %v7754_v44 }
 0x969   : > { %v7943_v32 = vpop.permute.xlu2 %7942  ;;  %v7918_v9 = vsel %vm1601_vm0, %v7916_v20, %v7917_v40  ;;  %v7920_v24 = vsel %vm1601_vm0, %v7917_v40, %v16731_v21 }
 0x96a   : > { %v8075_v14 = vsel %vm3740_vm10, %v7918_v9, %v7943_v32 }
 0x96b   : > { %8521 = vmatmul.bf16.gmra.mxu3 %v8065_v19  ;;  %8688 = vmatmul.bf16.gmra.mxu2 %v8065_v19 }
 0x96c   : > { %7989 = vrot.lane.b32.xlu1 %v16823_v53, %s17661_s29  ;;  %8718 = vmatpush.bf16.msra.mxu3 %v11091_v33 }
 0x96e   : > { %v16889_v59 = vpop.f32.mrf.mxu3 }
 0x970   : > { %8719 = vmatpush.bf16.msra.mxu3 %v11090_v29 }
 0x971   : > { %v16871_v56 = vpop.permute.xlu2 %7948 }
 0x972   : > { %v8087_v9 = vsel %vm3740_vm10, %v16750_v17, %v16871_v56 }
 0x974   : > { %7995 = vrot.lane.b32.xlu1 %v16830_v16, %s17661_s29 }
 0x979   : > { %v16875_v34 = vpop.permute.xlu2 %7954 }
 0x97c   : > { %8028 = vrot.lane.b32.xlu1 %v16836_v3, %s17661_s29 }
 0x97e   : > { %v16893_v10 = vpop.f32.mrf.mxu3 }
 0x984   : > { %8003 = vrot.lane.b32.xlu1 %v16842_v4, %s17661_s29 }
 0x999   : > { %v7910_v48 = vpop.permute.xlu0 %7909 }
 0x99a   : > { %v8068_v0 = vsel %vm3740_vm10, %v16661_v35, %v7910_v48  ;;  %v8020_v48 = vshrl.u32 %v16775_v1, 16 }
 0x99b   : > { %8526 = vmatmul.bf16.gmra.mxu3 %v8068_v0  ;;  %8693 = vmatmul.bf16.gmra.mxu2 %v8068_v0  ;;  %v16916_v0 = vpack.c.b16 %v8013_v43, %v8013_v43 }
 0x99c   : > { %v7961_v62 = vpop.permute.xlu2 %7960 }
 0x99d   : > { %v16887_v63 = vsel %vm3740_vm10, %v7936_v42, %v7961_v62  ;;  %v16897_v42 = vpop.f32.mrf.mxu3  ;;  %v8024_v21 = vshll.u32 %v16916_v0, 16 }
 0x9a1   : > { %v7945_v52 = vpop.permute.xlu0 %7944 }
 0x9a2   : > { %v8079_v15 = vsel %vm3740_vm10, %v7920_v24, %v7945_v52 }
 0x9a5   : > { %v16901_v18 = vpop.f32.mrf.mxu3 }
 0x9a9   : > { %v16877_v2 = vpop.permute.xlu0 %7950 }
 0x9ad   : > { %v16908_v28 = vpop.f32.mrf.mxu3 }
 0x9b1   : > { %v16884_v35 = vpop.permute.xlu0 %7956 }
 0x9b5   : > { %v16918_v33 = vpop.f32.mrf.mxu3 }
 0x9b9   : > { %v7988_v8 = vpop.permute.xlu0 %7987 }
 0x9ba   : > { %v8115_v11 = vsel %vm3740_vm10, %v16434_v60, %v7988_v8  ;;  %v8022_v8 = vor.u32 %v8020_v48, %v16794_v13  ;;  %v8103_v48 = vsel %vm3740_vm10, %v16779_v55, %v16884_v35 }
 0x9bb   : > { %8604 = vmatmul.bf16.vlgmr.msrb.gmra.mxu1 %v8115_v11  ;;  %v8026_v11 = vrot.slane %v8024_v21, 1 }
 0x9bd   : > { %v16924_v7 = vpop.f32.mrf.mxu3 }
 0x9be   : > { %v7912_v61 = vpop.permute.xlu1 %7911 }
 0x9bf   : > { %v8071_v51 = vsel %vm3740_vm10, %v16691_v49, %v7912_v61  ;;  %v8027_v61 = vsel %vm913_vm1, %v8022_v8, %v8026_v11 }
 0x9c0   : > { %8531 = vmatmul.bf16.gmra.mxu3 %v8071_v51  ;;  %8032 = vrot.lane.b32.xlu2 %v8027_v61, %s17661_s29 }
 0x9c1   : > { %v7994_v52 = vpop.permute.xlu0 %7993 }
 0x9c5   : > { %v16932_v6 = vpop.f32.mrf.mxu3 }
 0x9c6   : > { %v7947_v38 = vpop.permute.xlu1 %7946 }
 0x9c7   : > { %v8083_v47 = vsel %vm3740_vm10, %v16823_v53, %v7947_v38  ;;  %v8127_v53 = vsel %vm3740_vm10, %v16557_v26, %v7994_v52  ;;  %v8091_v26 = vsel %vm3740_vm10, %v16759_v37, %v16877_v2  ;;  %v16989_v52 = vld [vmem:[%s17589_s6] ss:$0 sm:$0xff] }
 0x9c8   : > { %v8488_v61 = vadd.f32 %v16989_v52, %v16861_v5  ;;  %v11212_v5 = vld [vmem:[#allocation3 + $0x10] sm:$0xe] }
 0x9c9   : > { %v8000_v20 = vpop.permute.xlu0 %7999 }
 0x9cd   : > { %v16944_v38 = vpop.f32.mrf.mxu3 }
 0x9ce   : > { %v7953_v60 = vpop.permute.xlu1 %7952 }
 0x9d0   : > { %8545 = vmatmul.bf16.vlgmr.msrb.gmra.mxu3 %v8075_v14 }
 0x9d1   : > { %v8031_v40 = vpop.permute.xlu0 %8030 }
 0x9d6   : > { %v16903_v19 = vpop.permute.xlu1 %7958 }
 0x9de   : > { %v7990_v54 = vpop.permute.xlu1 %7989  ;;  %v16946_v14 = vpop.f32.mrf.mxu3 }
 0x9df   : > { %v8119_v32 = vsel %vm3740_vm10, %v16497_v57, %v7990_v54  ;;  %v7992_v57 = vpop.permute.xlu2 %7991  ;;  %v8095_v54 = vsel %vm3740_vm10, %v16830_v16, %v7953_v60  ;;  %v8139_v60 = vsel %vm3740_vm10, %v16672_v36, %v8000_v20 }
 0x9e0   : > { %8550 = vmatmul.bf16.gmra.mxu3 %v8079_v15  ;;  %8609 = vmatmul.bf16.gmra.mxu1 %v8119_v32  ;;  %v8123_v23 = vsel %vm3740_vm10, %v16550_v30, %v7992_v57  ;;  %v8157_v30 = vsel %vm3740_vm10, %v16726_v22, %v8031_v40  ;;  %v8099_v32 = vsel %vm3740_vm10, %v16764_v27, %v16875_v34  ;;  %v11211_v40 = vld [vmem:[#allocation3 + $0x10] sm:$0xf0] }
 0x9e6   : > { %v7996_v62 = vpop.permute.xlu1 %7995  ;;  %v16953_v22 = vpop.f32.mrf.mxu3 }
 0x9e7   : > { %v8131_v56 = vsel %vm3740_vm10, %v16585_v50, %v7996_v62  ;;  %v7998_v29 = vpop.permute.xlu2 %7997  ;;  %v11088_v50 = vld [vmem:[%s17588_s5 + $0x100] sm:$0xff] }
 0x9e8   : > { %v8135_v15 = vsel %vm3740_vm10, %v16634_v58, %v7998_v29 }
 0x9ee   : > { %v8029_v51 = vpop.permute.xlu1 %8028  ;;  %v16957_v24 = vpop.f32.mrf.mxu3 }
 0x9ef   : > { %v8154_v13 = vsel %vm3740_vm10, %v16691_v49, %v8029_v51  ;;  %v11089_v49 = vld [vmem:[%s17588_s5 + $0x108] sm:$0xff]  ;;  %v8002_v43 = vpop.permute.xlu2 %8001 }
 0x9f0   : > { %8555 = vmatmul.bf16.gmra.mxu3 %v8083_v47  ;;  %8614 = vmatmul.bf16.gmra.mxu1 %v8123_v23  ;;  %v8143_v62 = vsel %vm3740_vm10, %v16702_v39, %v8002_v43  ;;  %v8107_v39 = vsel %vm3740_vm10, %v16786_v46, %v16903_v19  ;;  %v8006_v23 = vpop.permute.xlu0 %8005 }
 0x9f1   : > { %8698 = vmatmul.bf16.gmra.mxu2 %v8154_v13  ;;  %8720 = vmatpush.bf16.msra.mxu3 %v11089_v49  ;;  %v8151_v13 = vsel %vm3740_vm10, %v16803_v25, %v8006_v23  ;;  %v8498_v25 = vadd.f32 %v16989_v52, %v16893_v10  ;;  %v8508_v10 = vadd.f32 %v16989_v52, %v16918_v33 }
 0x9f5   : > { %8721 = vmatpush.bf16.msra.mxu3 %v11088_v50 }
 0x9f6   : > { %v16964_v2 = vpop.f32.mrf.mxu3  ;;  %v8004_v11 = vpop.permute.xlu1 %8003 }
 0x9f7   : > { %v8147_v35 = vsel %vm3740_vm10, %v16836_v3, %v8004_v11  ;;  %v8493_v3 = vadd.f32 %v16989_v52, %v16879_v45 }
 0xa00   : > { %8560 = vmatmul.bf16.gmra.mxu3 %v8087_v9  ;;  %8619 = vmatmul.bf16.gmra.mxu1 %v8127_v53  ;;  %v11213_v9 = vor.u32 %v11212_v5, %v11211_v40  ;;  %v8039_v40 = vrot.slane %v16775_v1, 1 }
 0xa01   : > { %8703 = vmatmul.bf16.gmra.mxu2 %v8157_v30 }
 0xa02   : > { %v8037_v30 = vrot.slane %v11213_v9, 1 }
 0xa04   : > { %v8038_v49 = vsel %vm1601_vm0, %v8037_v30, %v16741_v12  ;;  %v8040_v30 = vsel %vm1601_vm0, %v16809_v31, %v8039_v40 }
 0xa10   : > { %8565 = vmatmul.bf16.gmra.mxu3 %v8091_v26  ;;  %8624 = vmatmul.bf16.gmra.mxu1 %v8131_v56  ;;  %v8503_v26 = vadd.f32 %v16989_v52, %v16901_v18 }
 0xa1a   : > { %v8033_v8 = vpop.permute.xlu2 %8032 }
 0xa1b   : > { %v8160_v36 = vsel %vm3740_vm10, %v16775_v1, %v8033_v8 }
 0xa1c   : > { %8708 = vmatmul.bf16.gmra.mxu2 %v8160_v36 }
 0xa1e   : > { %v16971_v44 = vpop.f32.mrf.mxu3 }
 0xa20   : > { %8570 = vmatmul.bf16.gmra.mxu3 %v8095_v54  ;;  %8629 = vmatmul.bf16.gmra.mxu1 %v8135_v15 }
 0xa26   : > { %v16973_v58 = vpop.f32.mrf.mxu3 }
 0xa30   : > { %8575 = vmatmul.bf16.gmra.mxu3 %v8099_v32  ;;  %8634 = vmatmul.bf16.gmra.mxu1 %v8139_v60 }
 0xa38   : > { %v8605_v36 = vpop.f32.mrf.mxu1 }
 0xa40   : > { %8580 = vmatmul.bf16.gmra.mxu3 %v8103_v48  ;;  %8639 = vmatmul.bf16.gmra.mxu1 %v8143_v62 }
 0xa43   : > { %v16980_v34 = vpop.f32.mrf.mxu3 }
 0xa44   : > { %v8533_v23 = vadd.f32 %v16989_v52, %v16980_v34 }
 0xa4b   : > { %v16984_v21 = vpop.f32.mrf.mxu3 }
 0xa50   : > { %8585 = vmatmul.bf16.gmra.mxu3 %v8107_v39  ;;  %8644 = vmatmul.bf16.gmra.mxu1 %v8147_v35  ;;  %v8607_v39 = vpop.f32.mrf.mxu1 }
 0xa53   : > { %v8546_v57 = vpop.f32.mrf.mxu3 }
 0xa54   : > { %v16998_v51 = vadd.f32 %v8546_v57, %v8488_v61 }
 0xa56   : > { %v8606_v34 = vadd.f32 %v8605_v36, %v16998_v51  ;;  %v8495_v51 = vadd.f32 %v16989_v52, %v16889_v59 }
 0xa5b   : > { %v17000_v47 = vpop.f32.mrf.mxu3 }
 0xa60   : > { %8590 = vmatmul.bf16.gmra.mxu3 %v16887_v63  ;;  %8649 = vmatmul.bf16.gmra.mxu1 %v8151_v13 }
 0xa63   : > { %v8551_v19 = vpop.f32.mrf.mxu3 }
 0xa64   : > { %v17007_v20 = vadd.f32 %v8551_v19, %v8493_v3 }
 0xa6b   : > { %v17009_v53 = vpop.f32.mrf.mxu3 }
 0xa70   : > { %10736 = vmatmul.msk.bf16.vlgmr.msra.gmra.mxu3 %vm3740_vm10, %v8038_v49 }
 0xa73   : > { %v8556_v63 = vpop.f32.mrf.mxu3 }
 0xa74   : > { %v17016_v56 = vadd.f32 %v8556_v63, %v8498_v25 }
 0xa7b   : > { %v17018_v45 = vpop.f32.mrf.mxu3 }
 0xa80   : > { %10737 = vmatmul.msk.bf16.gmra.mxu3 %vm3740_vm10, %v16750_v17  ;;  %v8513_v17 = vadd.f32 %v16989_v52, %v16932_v6 }
 0xa83   : > { %v8561_v29 = vpop.f32.mrf.mxu3 }
 0xa84   : > { %v17024_v54 = vadd.f32 %v8561_v29, %v8503_v26 }
 0xa8b   : > { %v17026_v12 = vpop.f32.mrf.mxu3 }
 0xa90   : > { %10738 = vmatmul.msk.bf16.gmra.mxu3 %vm3740_vm10, %v16759_v37  ;;  %v8518_v37 = vadd.f32 %v16989_v52, %v16946_v14  ;;  %v8528_v14 = vadd.f32 %v16989_v52, %v16971_v44 }
 0xa93   : > { %v8566_v15 = vpop.f32.mrf.mxu3 }
 0xa94   : > { %v17032_v50 = vadd.f32 %v8566_v15, %v8508_v10  ;;  %v8041_v15 = vrot.slane %v16916_v0, 1 }
 0xa9b   : > { %v17034_v32 = vpop.f32.mrf.mxu3 }
 0xaa0   : > { %10739 = vmatmul.msk.bf16.gmra.mxu3 %vm3740_vm10, %v16830_v16  ;;  %v8523_v16 = vadd.f32 %v16989_v52, %v16957_v24 }
 0xaa3   : > { %v8571_v18 = vpop.f32.mrf.mxu3 }
 0xaa4   : > { %v17040_v60 = vadd.f32 %v8571_v18, %v8513_v17 }
 0xaab   : > { %v17042_v43 = vpop.f32.mrf.mxu3 }
 0xab0   : > { %10740 = vmatmul.msk.bf16.gmra.mxu3 %vm3740_vm10, %v16764_v27  ;;  %v8664_v27 = vpop.f32.mrf.mxu2 }
 0xab1   : > { %v8665_v26 = vadd.f32 %v8664_v27, %v8606_v34  ;;  %v8554_v27 = vadd.f32 %v17009_v53, %v8495_v51 }
 0xab3   : > { %v8576_v33 = vpop.f32.mrf.mxu3 }
 0xab4   : > { %v17048_v48 = vadd.f32 %v8576_v33, %v8518_v37 }
 0xab8   : > { %v8666_v24 = vpop.f32.mrf.mxu2 }
 0xabb   : > { %v17050_v62 = vpop.f32.mrf.mxu3 }
 0xac0   : > { %10741 = vmatmul.msk.bf16.gmra.mxu3 %vm3740_vm10, %v16779_v55  ;;  %v8610_v55 = vpop.f32.mrf.mxu1 }
 0xac1   : > { %v8611_v33 = vadd.f32 %v8610_v55, %v17007_v20 }
 0xac3   : > { %v8581_v6 = vpop.f32.mrf.mxu3 }
 0xac4   : > { %v17056_v8 = vadd.f32 %v8581_v6, %v8523_v16 }
 0xac8   : > { %v8612_v19 = vpop.f32.mrf.mxu1 }
 0xacb   : > { %v17058_v11 = vpop.f32.mrf.mxu3 }
 0xad0   : > { %10742 = vmatmul.msk.bf16.gmra.mxu3 %vm3740_vm10, %v16786_v46  ;;  %v8669_v46 = vpop.f32.mrf.mxu2  ;;  %v8615_v9 = vpop.f32.mrf.mxu1 }
 0xad1   : > { %v8616_v53 = vadd.f32 %v8615_v9, %v17016_v56 }
 0xad3   : > { %v8586_v35 = vpop.f32.mrf.mxu3 }
 0xad4   : > { %v17064_v61 = vadd.f32 %v8586_v35, %v8528_v14  ;;  %v8670_v14 = vadd.f32 %v8669_v46, %v8611_v33  ;;  %v8500_v46 = vadd.f32 %v16989_v52, %v16897_v42 }
 0xad8   : > { %v8671_v5 = vpop.f32.mrf.mxu2  ;;  %v8617_v1 = vpop.f32.mrf.mxu1 }
 0xadb   : > { %v17066_v57 = vpop.f32.mrf.mxu3 }
 0xae0   : > { %10743 = vmatmul.msk.bf16.gmra.mxu3 %vm3740_vm10, %v16842_v4  ;;  %v8490_v4 = vadd.f32 %v16989_v52, %v16873_v41  ;;  %v8674_v29 = vpop.f32.mrf.mxu2  ;;  %v8042_v41 = vsel %vm1601_vm0, %v8039_v40, %v8041_v15 }
 0xae1   : > { %v8675_v15 = vadd.f32 %v8674_v29, %v8616_v53 }
 0xae2   : > { %v8549_v49 = vadd.f32 %v17000_v47, %v8490_v4 }
 0xae3   : > { %v8591_v13 = vpop.f32.mrf.mxu3 }
 0xae4   : > { %v17072_v3 = vadd.f32 %v8591_v13, %v8533_v23  ;;  %v8608_v63 = vadd.f32 %v8607_v39, %v8549_v49  ;;  %v8620_v39 = vpop.f32.mrf.mxu1  ;;  %v8613_v13 = vadd.f32 %v8612_v19, %v8554_v27 }
 0xae5   : > { %v8621_v29 = vadd.f32 %v8620_v39, %v17024_v54 }
 0xae6   : > { %v8667_v17 = vadd.f32 %v8666_v24, %v8608_v63  ;;  %v8672_v59 = vadd.f32 %v8671_v5, %v8613_v13 }
 0xae8   : > { %v8676_v36 = vpop.f32.mrf.mxu2 }
 0xaeb   : > { %v17074_v44 = vpop.f32.mrf.mxu3 }
 0xaf0   : > { %10744 = vmatmul.msk.bf16.gmra.mxu3 %vm3740_vm10, %v8040_v30  ;;  %v8679_v30 = vpop.f32.mrf.mxu2 }
 0xaf3   : > { %v8723_v25 = vpop.f32.mrf.mxu3 }
 0xaf4   : > { %v8724_v10 = vadd.f32 %v8723_v25, %v8665_v26  ;;  %v8622_v25 = vpop.f32.mrf.mxu1 }
 0xaf6   : > { %v8773_v31 = vmax.f32 %v8724_v10, 0.0  ;;  %v8559_v10 = vadd.f32 %v17018_v45, %v8500_v46 }
 0xaf8   : > { %v8813_v47 = vrot.slane %v8773_v31, 1 }
 0xafb   : > { %v8725_v18 = vpop.f32.mrf.mxu3 }
 0xafc   : > { %v8726_v37 = vadd.f32 %v8725_v18, %v8667_v17 }
 0xafe   : > { %v8774_v16 = vmax.f32 %v8726_v37, 0.0 }
 0xb00   : > { %v8814_v6 = vrot.slane %v8774_v16, 1  ;;  %10745 = vmatmul.msk.bf16.gmra.mxu3 %vm3740_vm10, %v8042_v41  ;;  %v8618_v41 = vadd.f32 %v8617_v1, %v8559_v10 }
 0xb02   : > { %v8815_v0 = vsel %vm1601_vm0, %v8813_v47, %v8814_v6  ;;  %v8677_v42 = vadd.f32 %v8676_v36, %v8618_v41 }
 0xb03   : > { %v8872_v35 = vmax.f32 %v8773_v31, %v8815_v0  ;;  %v8728_v24 = vpop.f32.mrf.mxu3  ;;  %v8681_v31 = vpop.f32.mrf.mxu2 }
 0xb04   : > { %v8729_v23 = vadd.f32 %v8728_v24, %v8670_v14  ;;  %v8505_v24 = vadd.f32 %v16989_v52, %v16908_v28  ;;  %v8941_v28 = vld [vmem:[#allocation4 + $0x8] sm:$0x3] }
 0xb06   : > { %v8775_v20 = vmax.f32 %v8729_v23, 0.0  ;;  %v8564_v54 = vadd.f32 %v17026_v12, %v8505_v24 }
 0xb08   : > { %v8816_v55 = vrot.slane %v8775_v20, 1  ;;  %v8623_v46 = vadd.f32 %v8622_v25, %v8564_v54 }
 0xb0a   : > { %v8817_v40 = vsel %vm1601_vm0, %v8814_v6, %v8816_v55 }
 0xb0b   : > { %v8873_v4 = vmax.f32 %v8774_v16, %v8817_v40  ;;  %v8730_v34 = vpop.f32.mrf.mxu3  ;;  %v8625_v16 = vpop.f32.mrf.mxu1 }
 0xb0c   : > { %v8731_v49 = vadd.f32 %v8730_v34, %v8672_v59  ;;  %v8684_v14 = vpop.f32.mrf.mxu2 }
 0xb0e   : > { %v8776_v63 = vmax.f32 %v8731_v49, 0.0 }
 0xb10   : > { %v8818_v26 = vrot.slane %v8776_v63, 1 }
 0xb12   : > { %v8819_v19 = vsel %vm1601_vm0, %v8816_v55, %v8818_v26 }
 0xb13   : > { %v8874_v17 = vmax.f32 %v8775_v20, %v8819_v19  ;;  %v8733_v18 = vpop.f32.mrf.mxu3  ;;  %v8627_v23 = vpop.f32.mrf.mxu1  ;;  %v8680_v20 = vadd.f32 %v8679_v30, %v8621_v29  ;;  %v11104_v30 = vld [vmem:[%s17590_s7 + $0x38] sm:$0xff] }
 0xb14   : > { %v8734_v5 = vadd.f32 %v8733_v18, %v8675_v15  ;;  %v8686_v15 = vpop.f32.mrf.mxu2  ;;  %9591 = vmatpush.bf16.msra.mxu1 %v11104_v30 }
 0xb15   : > { %v8892_v37 = vmax.f32 %v8872_v35, %v8874_v17  ;;  %v11112_v35 = vld [vmem:[%s17590_s7 + $0x78] sm:$0xff]  ;;  %v8682_v17 = vadd.f32 %v8681_v31, %v8623_v46  ;;  %v8515_v46 = vadd.f32 %v16989_v52, %v16944_v38 }
 0xb16   : > { %v8777_v33 = vmax.f32 %v8734_v5, 0.0  ;;  %9630 = vmatpush.bf16.msrb.mxu2 %v11112_v35 }
 0xb17   : > { %8910 = vst.msk [vmem:[#allocation5] sm:$0xff] %vm3740_vm10, %v8892_v37  ;;  %v8574_v30 = vadd.f32 %v17042_v43, %v8515_v46  ;;  %v11110_v43 = vld [vmem:[%s17590_s7 + $0x68] sm:$0xff] }
 0xb18   : > { %v8820_v56 = vrot.slane %v8777_v33, 1 }
 0xb1a   : > { %v8821_v9 = vsel %vm1601_vm0, %v8818_v26, %v8820_v56 }
 0xb1b   : > { %v8875_v51 = vmax.f32 %v8776_v63, %v8821_v9  ;;  %v8735_v47 = vpop.f32.mrf.mxu3  ;;  %v17113_v63 = vld [vmem:[#allocation4] sm:$0xff]   ;;  %v8630_v18 = vpop.f32.mrf.mxu1 }
 0xb1c   : > { %v8736_v45 = vadd.f32 %v8735_v47, %v8677_v42  ;;  %v9041_v19 = vshll.u32 %v17113_v63, 16  ;;  %v9039_v25 = vshrl.u32 %v17113_v63, 16  ;;  %v8510_v42 = vadd.f32 %v16989_v52, %v16924_v7 }
 0xb1d   : > { %v8893_v6 = vmax.f32 %v8873_v4, %v8875_v51 }
 0xb1e   : > { %v8778_v27 = vmax.f32 %v8736_v45, 0.0  ;;  %v8928_v0 = vld [vmem:[#allocation5] ss:$2 sm:$0x3]  ;;  %v9043_v41 = vrot.slane %v9041_v19, 1  ;;  %v8569_v45 = vadd.f32 %v17034_v32, %v8510_v42  ;;  %v11111_v32 = vld [vmem:[%s17590_s7 + $0x70] sm:$0xff] }
 0xb1f   : > { %8911 = vst.msk [vmem:[#allocation5 + $0x8] sm:$0xff] %vm3740_vm10, %v8893_v6  ;;  %v8929_v1 = vpack.c.bf16 %v8928_v0, %v8928_v0  ;;  %9631 = vmatpush.bf16.msrb.mxu2 %v11111_v32 }
 0xb20   : > { %v8822_v36 = vrot.slane %v8778_v27, 1  ;;  %v9044_v47 = vor.u32 %v9043_v41, %v9039_v25 }
 0xb21   : > { %v8931_v13 = vshrl.u32 %v8929_v1, 16  ;;  %v8934_v4 = vshll.u32 %v8929_v1, 16 }
 0xb22   : > { %v8823_v39 = vsel %vm1601_vm0, %v8820_v56, %v8822_v36  ;;  %v8628_v36 = vadd.f32 %v8627_v23, %v8569_v45 }
 0xb23   : > { %v8876_v55 = vmax.f32 %v8777_v33, %v8823_v39  ;;  %v8738_v40 = vpop.f32.mrf.mxu3  ;;  %v8933_v59 = vrot.slane %v8931_v13, 7  ;;  %v8626_v33 = vadd.f32 %v8625_v16, %v17032_v50  ;;  %v8689_v50 = vpop.f32.mrf.mxu2  ;;  %v17144_v39 = vld [vmem:[#allocation4 + $0x18] sm:$0xff]  ;;  %9632 = vmatpush.bf16.msrb.mxu2 %v11110_v43 }
 0xb24   : > { %v8739_v34 = vadd.f32 %v8738_v40, %v8680_v20  ;;  %v8632_v35 = vpop.f32.mrf.mxu1  ;;  %v8687_v20 = vadd.f32 %v8686_v15, %v8628_v36  ;;  %v11102_v36 = vld [vmem:[%s17590_s7 + $0x28] sm:$0xff] }
 0xb25   : > { %v8936_v53 = vor.u32 %v8934_v4, %v8933_v59  ;;  %v8685_v29 = vadd.f32 %v8684_v14, %v8626_v33  ;;  %v11103_v14 = vld [vmem:[%s17590_s7 + $0x30] sm:$0xff]  ;;  %v8631_v59 = vadd.f32 %v8630_v18, %v17040_v60  ;;  %v8954_v60 = vld [vmem:[#allocation4 + $0x10] sm:$0x3]  ;;  %v8633_v33 = vadd.f32 %v8632_v35, %v8574_v30 }
 0xb26   : > { %v8779_v26 = vmax.f32 %v8739_v34, 0.0  ;;  %9592 = vmatpush.bf16.msra.mxu1 %v11103_v14 }
 0xb27   : > { %v8942_v12 = vsel %vm17109_vm9, %v8936_v53, %v8941_v28  ;;  %v8690_v19 = vadd.f32 %v8689_v50, %v8631_v59 }
 0xb28   : > { %v8824_v10 = vrot.slane %v8779_v26, 1  ;;  %8943 = vst [vmem:[#allocation4 + $0x8] sm:$0x3] %v8942_v12 }
 0xb2a   : > { %9593 = vmatpush.bf16.msra.mxu1 %v11102_v36  ;;  %v11099_v36 = vld [vmem:[%s17590_s7 + $0x10] sm:$0xff] }
 0xb2b   : > { %v8740_v5 = vpop.f32.mrf.mxu3  ;;  %v8691_v23 = vpop.f32.mrf.mxu2 }
 0xb2c   : > { %v8741_v37 = vadd.f32 %v8740_v5, %v8682_v17  ;;  %v8635_v28 = vpop.f32.mrf.mxu1 }
 0xb2d   : > { %v8636_v50 = vadd.f32 %v8635_v28, %v17048_v48 }
 0xb2e   : > { %v8780_v56 = vmax.f32 %v8741_v37, 0.0 }
 0xb2f   : > { %v17123_v9 = vld [vmem:[#allocation4 + $0x8] sm:$0xff]  }
 0xb30   : > { %v8826_v51 = vrot.slane %v8780_v56, 1  ;;  %9123 = vrot.lane.b32.xlu1 %v17123_v9, %s17661_s29  ;;  %v9046_v31 = vshll.u32 %v17123_v9, 16 }
 0xb32   : > { %v8827_v6 = vsel %vm1601_vm0, %v8824_v10, %v8826_v51  ;;  %v17132_v27 = vrot.slane %v9046_v31, 1  ;;  %v8692_v31 = vadd.f32 %v8691_v23, %v8633_v33 }
 0xb33   : > { %v8878_v16 = vmax.f32 %v8779_v26, %v8827_v6  ;;  %v8743_v0 = vpop.f32.mrf.mxu3  ;;  %v8694_v18 = vpop.f32.mrf.mxu2 }
 0xb34   : > { %v8744_v1 = vadd.f32 %v8743_v0, %v8685_v29  ;;  %v9049_v7 = vsel %vm913_vm1, %v9044_v47, %v17132_v27  ;;  %v8637_v51 = vpop.f32.mrf.mxu1  ;;  %v9062_v0 = vshll.u32 %v17144_v39, 16  ;;  %v8695_v14 = vadd.f32 %v8694_v18, %v8636_v50  ;;  %v17206_v50 = vld [vmem:[#allocation4 + $0x20] sm:$0xff] }
 0xb35   : > { %v8896_v24 = vmax.f32 %v8876_v55, %v8878_v16  ;;  %9090 = vrot.lane.b32.xlu2 %v9049_v7, %s17661_s29 }
 0xb36   : > { %v8781_v13 = vmax.f32 %v8744_v1, 0.0  ;;  %v8520_v1 = vadd.f32 %v16989_v52, %v16953_v22 }
 0xb37   : > { %8914 = vst.msk [vmem:[#allocation5 + $0x20] sm:$0xff] %vm3740_vm10, %v8896_v24  ;;  %v9050_v24 = vshrl.u32 %v17123_v9, 16 }
 0xb38   : > { %v8828_v54 = vrot.slane %v8781_v13, 1  ;;  %v8579_v32 = vadd.f32 %v17050_v62, %v8520_v1  ;;  %v11108_v1 = vld [vmem:[%s17590_s7 + $0x58] sm:$0xff] }
 0xb39   : > { %v9052_v22 = vor.u32 %v9050_v24, %v17132_v27 }
 0xb3a   : > { %v8638_v27 = vadd.f32 %v8637_v51, %v8579_v32 }
 0xb3b   : > { %v8745_v55 = vpop.f32.mrf.mxu3  ;;  %v8696_v7 = vpop.f32.mrf.mxu2 }
 0xb3c   : > { %v8746_v40 = vadd.f32 %v8745_v55, %v8687_v20  ;;  %v8640_v23 = vpop.f32.mrf.mxu1 }
 0xb3d   : > { %9127 = vrot.lane.b32.xlu2 %v17144_v39, %s17661_s29 }
 0xb3e   : > { %v8782_v4 = vmax.f32 %v8746_v40, 0.0  ;;  %v8944_v34 = vld [vmem:[#allocation5 + $0x20] ss:$2 sm:$0x3]  ;;  %v17176_v40 = vrot.slane %v9062_v0, 1 }
 0xb3f   : > { %v8945_v53 = vpack.c.bf16 %v8944_v34, %v8944_v34 }
 0xb40   : > { %v8830_v26 = vrot.slane %v8782_v4, 1 }
 0xb41   : > { %v8947_v12 = vshrl.u32 %v8945_v53, 16  ;;  %v8950_v37 = vshll.u32 %v8945_v53, 16 }
 0xb42   : > { %v8831_v10 = vsel %vm1601_vm0, %v8828_v54, %v8830_v26 }
 0xb43   : > { %v8880_v15 = vmax.f32 %v8781_v13, %v8831_v10  ;;  %v8748_v17 = vpop.f32.mrf.mxu3  ;;  %v8949_v5 = vrot.slane %v8947_v12, 7  ;;  %v8699_v12 = vpop.f32.mrf.mxu2 }
 0xb44   : > { %v8749_v25 = vadd.f32 %v8748_v17, %v8690_v19  ;;  %v8697_v19 = vadd.f32 %v8696_v7, %v8638_v27 }
 0xb45   : > { %v8952_v41 = vor.u32 %v8950_v37, %v8949_v5  ;;  %v8642_v37 = vpop.f32.mrf.mxu1 }
 0xb46   : > { %v8783_v56 = vmax.f32 %v8749_v25, 0.0 }
 0xb47   : > { %v8955_v38 = vsel %vm17109_vm9, %v8952_v41, %v8954_v60  ;;  %v8641_v60 = vadd.f32 %v8640_v23, %v17056_v8  ;;  %v8525_v41 = vadd.f32 %v16989_v52, %v16964_v2  ;;  %v11109_v8 = vld [vmem:[%s17590_s7 + $0x60] sm:$0xff] }
 0xb48   : > { %v8832_v42 = vrot.slane %v8783_v56, 1  ;;  %8956 = vst [vmem:[#allocation4 + $0x10] sm:$0x3] %v8955_v38  ;;  %9633 = vmatpush.bf16.msrb.mxu2 %v11109_v8  ;;  %v9066_v8 = vshrl.u32 %v17144_v39, 16 }
 0xb49   : > { %v8584_v38 = vadd.f32 %v17058_v11, %v8525_v41  ;;  %v11100_v11 = vld [vmem:[%s17590_s7 + $0x18] sm:$0xff] }
 0xb4a   : > { %v8833_v47 = vsel %vm1601_vm0, %v8830_v26, %v8832_v42 }
 0xb4b   : > { %v8881_v45 = vmax.f32 %v8782_v4, %v8833_v47  ;;  %v8750_v6 = vpop.f32.mrf.mxu3 }
 0xb4c   : > { %v8751_v29 = vadd.f32 %v8750_v6, %v8692_v31  ;;  %v8643_v6 = vadd.f32 %v8642_v37, %v8584_v38  ;;  %9634 = vmatpush.bf16.msrb.mxu2 %v11108_v1  ;;  %v11119_v1 = vld [vmem:[%s17590_s7 + $0xb0] sm:$0xff] }
 0xb4e   : > { %v8784_v16 = vmax.f32 %v8751_v29, 0.0  ;;  %v8645_v29 = vpop.f32.mrf.mxu1 }
 0xb4f   : > { %v17163_v35 = vld [vmem:[#allocation4 + $0x10] sm:$0xff]  }
 0xb50   : > { %v8834_v13 = vrot.slane %v8784_v16, 1  ;;  %9125 = vrot.lane.b32.xlu0 %v17163_v35, %s17661_s29  ;;  %v9054_v48 = vshll.u32 %v17163_v35, 16  ;;  %v9058_v55 = vshrl.u32 %v17163_v35, 16 }
 0xb52   : > { %v8835_v54 = vsel %vm1601_vm0, %v8832_v42, %v8834_v13  ;;  %v9056_v20 = vrot.slane %v9054_v48, 1  ;;  %v8700_v42 = vadd.f32 %v8699_v12, %v8641_v60  ;;  %v8646_v48 = vadd.f32 %v8645_v29, %v17064_v61 }
 0xb53   : > { %v8882_v59 = vmax.f32 %v8783_v56, %v8835_v54  ;;  %v8753_v4 = vpop.f32.mrf.mxu3  ;;  %v8701_v56 = vpop.f32.mrf.mxu2 }
 0xb54   : > { %v8754_v34 = vadd.f32 %v8753_v4, %v8695_v14  ;;  %v17179_v28 = vsel %vm913_vm1, %v9052_v22, %v9056_v20  ;;  %v9060_v53 = vor.u32 %v9058_v55, %v9056_v20  ;;  %v8702_v0 = vadd.f32 %v8701_v56, %v8643_v6  ;;  %v11098_v14 = vld [vmem:[%s17590_s7 + $0x8] sm:$0xff] }
 0xb55   : > { %v8900_v62 = vmax.f32 %v8880_v15, %v8882_v59  ;;  %9092 = vrot.lane.b32.xlu1 %v17179_v28, %s17661_s29  ;;  %v8530_v22 = vadd.f32 %v16989_v52, %v16973_v58 }
 0xb56   : > { %v8785_v46 = vmax.f32 %v8754_v34, 0.0  ;;  %v17185_v26 = vsel %vm913_vm1, %v9060_v53, %v17176_v40  ;;  %v8647_v20 = vpop.f32.mrf.mxu1 }
 0xb57   : > { %8918 = vst.msk [vmem:[#allocation5 + $0x40] sm:$0xff] %vm3740_vm10, %v8900_v62  ;;  %v8589_v55 = vadd.f32 %v17066_v57, %v8530_v22 }
 0xb58   : > { %v8836_v30 = vrot.slane %v8785_v46, 1  ;;  %9094 = vrot.lane.b32.xlu0 %v17185_v26, %s17661_s29 }
 0xb59   : > { %v8648_v27 = vadd.f32 %v8647_v20, %v8589_v55  ;;  %v9074_v20 = vshrl.u32 %v17206_v50, 16 }
 0xb5a   : > { %v8837_v10 = vsel %vm1601_vm0, %v8834_v13, %v8836_v30 }
 0xb5b   : > { %v8883_v15 = vmax.f32 %v8784_v16, %v8837_v10  ;;  %v8755_v17 = vpop.f32.mrf.mxu3  ;;  %v8704_v7 = vpop.f32.mrf.mxu2 }
 0xb5c   : > { %v8756_v5 = vadd.f32 %v8755_v17, %v8697_v19  ;;  %v8705_v59 = vadd.f32 %v8704_v7, %v8646_v48 }
 0xb5d   : > { %v8901_v25 = vmax.f32 %v8881_v45, %v8883_v15  ;;  %v11101_v45 = vld [vmem:[%s17590_s7 + $0x20] sm:$0xff]  ;;  %9129 = vrot.lane.b32.xlu1 %v17206_v50, %s17661_s29 }
 0xb5e   : > { %v8786_v18 = vmax.f32 %v8756_v5, 0.0  ;;  %9594 = vmatpush.bf16.msra.mxu1 %v11101_v45  ;;  %v8650_v58 = vpop.f32.mrf.mxu1 }
 0xb5f   : > { %8919 = vst.msk [vmem:[#allocation5 + $0x48] sm:$0xff] %vm3740_vm10, %v8901_v25  ;;  %v8651_v57 = vadd.f32 %v8650_v58, %v17072_v3  ;;  %v8535_v25 = vadd.f32 %v16989_v52, %v16984_v21  ;;  %v11097_v3 = vld [vmem:[%s17590_s7] sm:$0xff]  ;;  %v9070_v21 = vshll.u32 %v17206_v50, 16  ;;  %v11219_v58 = vld [vmem:[#allocation4 + $0x8] sm:$0xf0] }
 0xb60   : > { %v8838_v33 = vrot.slane %v8786_v18, 1 }
 0xb62   : > { %v8839_v43 = vsel %vm1601_vm0, %v8836_v30, %v8838_v33  ;;  %9595 = vmatpush.bf16.msra.mxu1 %v11100_v11  ;;  %v8594_v33 = vadd.f32 %v17074_v44, %v8535_v25  ;;  %v11107_v44 = vld [vmem:[%s17590_s7 + $0x50] sm:$0xff]  ;;  %v9072_v11 = vrot.slane %v9070_v21, 1 }
 0xb63   : > { %v8884_v51 = vmax.f32 %v8785_v46, %v8839_v43  ;;  %v8758_v47 = vpop.f32.mrf.mxu3  ;;  %v8706_v53 = vpop.f32.mrf.mxu2  ;;  %9635 = vmatpush.bf16.msrb.mxu2 %v11107_v44  ;;  %v8980_v44 = vld [vmem:[#allocation4 + $0x30] sm:$0x3] }
 0xb64   : > { %v8759_v31 = vadd.f32 %v8758_v47, %v8700_v42  ;;  %v8707_v30 = vadd.f32 %v8706_v53, %v8648_v27  ;;  %v11120_v47 = vld [vmem:[%s17590_s7 + $0xb8] sm:$0xff] }
 0xb65   : > { %9669 = vmatpush.bf16.msrb.mxu3 %v11120_v47 }
 0xb66   : > { %v8787_v2 = vmax.f32 %v8759_v31, 0.0  ;;  %9596 = vmatpush.bf16.msra.mxu1 %v11099_v36  ;;  %v8967_v31 = vld [vmem:[#allocation4 + $0x28] sm:$0x3]  ;;  %v8652_v45 = vpop.f32.mrf.mxu1 }
 0xb68   : > { %v8840_v16 = vrot.slane %v8787_v2, 1 }
 0xb69   : > { %9670 = vmatpush.bf16.msrb.mxu3 %v11119_v1 }
 0xb6a   : > { %9597 = vmatpush.bf16.msra.mxu1 %v11098_v14 }
 0xb6b   : > { %v8760_v24 = vpop.f32.mrf.mxu3  ;;  %v8709_v15 = vpop.f32.mrf.mxu2 }
 0xb6c   : > { %v8761_v13 = vadd.f32 %v8760_v24, %v8702_v0  ;;  %v8710_v41 = vadd.f32 %v8709_v15, %v8651_v57  ;;  %v9068_v0 = vor.u32 %v9066_v8, %v17176_v40  ;;  %v11216_v57 = vld [vmem:[#allocation4] sm:$0xf0] }
 0xb6e   : > { %v8788_v32 = vmax.f32 %v8761_v13, 0.0  ;;  %9598 = vmatpush.bf16.msra.mxu1 %v11097_v3  ;;  %v17251_v13 = vsel %vm913_vm1, %v9068_v0, %v9072_v11 }
 0xb6f   : > { %9096 = vrot.lane.b32.xlu2 %v17251_v13, %s17661_s29 }
 0xb70   : > { %v8842_v54 = vrot.slane %v8788_v32, 1  ;;  %v11105_v32 = vld [vmem:[%s17590_s7 + $0x40] sm:$0xff] }
 0xb72   : > { %v8843_v23 = vsel %vm1601_vm0, %v8840_v16, %v8842_v54  ;;  %v11106_v16 = vld [vmem:[%s17590_s7 + $0x48] sm:$0xff] }
 0xb73   : > { %v8886_v4 = vmax.f32 %v8787_v2, %v8843_v23  ;;  %v8763_v34 = vpop.f32.mrf.mxu3  ;;  %v8653_v2 = vadd.f32 %v8652_v45, %v8594_v33  ;;  %v8711_v7 = vpop.f32.mrf.mxu2  ;;  %9636 = vmatpush.bf16.msrb.mxu2 %v11106_v16 }
 0xb74   : > { %v8764_v61 = vadd.f32 %v8763_v34, %v8705_v59 }
 0xb75   : > { %v8904_v62 = vmax.f32 %v8884_v51, %v8886_v4  ;;  %v8712_v48 = vadd.f32 %v8711_v7, %v8653_v2  ;;  %v11117_v2 = vld [vmem:[%s17590_s7 + $0xa0] sm:$0xff] }
 0xb76   : > { %v8789_v46 = vmax.f32 %v8764_v61, 0.0  ;;  %v9076_v61 = vor.u32 %v9074_v20, %v9072_v11 }
 0xb77   : > { %8922 = vst.msk [vmem:[#allocation5 + $0x60] sm:$0xff] %vm3740_vm10, %v8904_v62  ;;  %9637 = vmatpush.bf16.msrb.mxu2 %v11105_v32 }
 0xb78   : > { %v8844_v12 = vrot.slane %v8789_v46, 1 }
 0xb7b   : > { %v8765_v10 = vpop.f32.mrf.mxu3 }
 0xb7c   : > { %v8766_v19 = vadd.f32 %v8765_v10, %v8707_v30  ;;  %v11220_v10 = vld [vmem:[#allocation4 + $0x8] sm:$0xe] }
 0xb7e   : > { %v8957_v17 = vld [vmem:[#allocation5 + $0x60] ss:$2 sm:$0x3]  ;;  %v8790_v5 = vmax.f32 %v8766_v19, 0.0 }
 0xb7f   : > { %v8958_v37 = vpack.c.bf16 %v8957_v17, %v8957_v17  ;;  %v11217_v17 = vld [vmem:[#allocation4] sm:$0xe] }
 0xb80   : > { %v8846_v60 = vrot.slane %v8790_v5, 1  ;;  %v11218_v25 = vor.u32 %v11217_v17, %v11216_v57 }
 0xb81   : > { %v8960_v18 = vshrl.u32 %v8958_v37, 16  ;;  %v8963_v43 = vshll.u32 %v8958_v37, 16  ;;  %v11118_v37 = vld [vmem:[%s17590_s7 + $0xa8] sm:$0xff] }
 0xb82   : > { %v8847_v56 = vsel %vm1601_vm0, %v8844_v12, %v8846_v60  ;;  %9671 = vmatpush.bf16.msrb.mxu3 %v11118_v37  ;;  %v9105_v33 = vrot.slane %v11218_v25, 1  ;;  %v11115_v25 = vld [vmem:[%s17590_s7 + $0x90] sm:$0xff] }
 0xb83   : > { %v8962_v38 = vrot.slane %v8960_v18, 7  ;;  %v8888_v42 = vmax.f32 %v8789_v46, %v8847_v56  ;;  %v8768_v51 = vpop.f32.mrf.mxu3  ;;  %v9106_v56 = vrot.slane %v17123_v9, 1 }
 0xb84   : > { %v8769_v52 = vadd.f32 %v8768_v51, %v8710_v41 }
 0xb85   : > { %v8965_v6 = vor.u32 %v8963_v43, %v8962_v38  ;;  %v9107_v47 = vsel %vm1601_vm0, %v9105_v33, %v9106_v56 }
 0xb86   : > { %v8791_v29 = vmax.f32 %v8769_v52, 0.0  ;;  %9672 = vmatpush.bf16.msrb.mxu3 %v11117_v2 }
 0xb87   : > { %v8968_v24 = vsel %vm17109_vm9, %v8965_v6, %v8967_v31 }
 0xb88   : > { %v8848_v36 = vrot.slane %v8791_v29, 1  ;;  %8969 = vst [vmem:[#allocation4 + $0x28] sm:$0x3] %v8968_v24 }
 0xb8a   : > { %v8849_v40 = vsel %vm1601_vm0, %v8846_v60, %v8848_v36 }
 0xb8b   : > { %v8770_v14 = vpop.f32.mrf.mxu3  ;;  %v8889_v22 = vmax.f32 %v8790_v5, %v8849_v40  ;;  %v17276_v5 = vrot.slane %v17163_v35, 1 }
 0xb8c   : > { %v8771_v54 = vadd.f32 %v8770_v14, %v8712_v48  ;;  %v17315_v14 = vrot.slane %v17144_v39, 1 }
 0xb8d   : > { %v9109_v57 = vsel %vm1601_vm0, %v9106_v56, %v17276_v5  ;;  %v11125_v56 = vld [vmem:[%s17590_s7 + $0xe0] sm:$0xff] }
 0xb8e   : > { %v8792_v55 = vmax.f32 %v8771_v54, 0.0 }
 0xb8f   : > { %v9091_v23 = vpop.permute.xlu2 %9090  ;;  %v17260_v59 = vld [vmem:[#allocation4 + $0x28] sm:$0xff] }
 0xb90   : > { %v8850_v4 = vrot.slane %v8792_v55, 1  ;;  %v9209_v34 = vsel %vm3740_vm10, %v17113_v63, %v9091_v23  ;;  %9131 = vrot.lane.b32.xlu0 %v17260_v59, %s17661_s29  ;;  %v9078_v53 = vshll.u32 %v17260_v59, 16  ;;  %v11221_v63 = vor.u32 %v11220_v10, %v11219_v58  ;;  %v11126_v58 = vld [vmem:[%s17590_s7 + $0xe8] sm:$0xff] }
 0xb91   : > { %9599 = vmatmul.bf16.vlgmr.msra.gmra.mxu1 %v9209_v34  ;;  %v17287_v51 = vrot.slane %v17260_v59, 1  ;;  %v9082_v40 = vshrl.u32 %v17260_v59, 16  ;;  %v11132_v34 = vld [vmem:[%s17590_s7 + $0x118] sm:$0xff] }
 0xb92   : > { %v8851_v62 = vsel %vm1601_vm0, %v8848_v36, %v8850_v4  ;;  %v8891_v27 = vmax.f32 %v8792_v55, %v8850_v4  ;;  %v9080_v12 = vrot.slane %v9078_v53, 1  ;;  %v9154_v60 = vrot.slane %v11221_v63, 1  ;;  %v8999_v53 = vld [vmem:[#allocation4 + $0x38] sm:$0x1]  ;;  %9751 = vmatpush.bf16.msra.mxu2 %v11132_v34 }
 0xb93   : > { %v8890_v46 = vmax.f32 %v8791_v29, %v8851_v62  ;;  %v17302_v29 = vld [vmem:[#allocation4 + $0x38] sm:$0xff]  ;;  %v9111_v4 = vsel %vm1601_vm0, %v17276_v5, %v17315_v14  ;;  %v11116_v62 = vld [vmem:[%s17590_s7 + $0x98] sm:$0xff] }
 0xb94   : > { %v8909_v30 = vmax.f32 %v8889_v22, %v8891_v27  ;;  %v17269_v15 = vsel %vm913_vm1, %v9076_v61, %v9080_v12  ;;  %v9155_v18 = vsel %vm1601_vm0, %v9154_v60, %v17276_v5  ;;  %v9181_v16 = vshll.u32 %v17302_v29, 16  ;;  %v11128_v61 = vld [vmem:[%s17590_s7 + $0xf8] sm:$0xff]  ;;  %v11127_v27 = vld [vmem:[%s17590_s7 + $0xf0] sm:$0xff]  ;;  %9673 = vmatpush.bf16.msrb.mxu3 %v11116_v62 }
 0xb95   : > { %v8908_v19 = vmax.f32 %v8888_v42, %v8890_v46  ;;  %9098 = vrot.lane.b32.xlu1 %v17269_v15, %s17661_s29  ;;  %v9112_v42 = vrot.slane %v17206_v50, 1  ;;  %v9084_v54 = vor.u32 %v9082_v40, %v9080_v12  ;;  %9708 = vmatpush.bf16.msrb.mxu1 %v11128_v61  ;;  %v11131_v46 = vld [vmem:[%s17590_s7 + $0x110] sm:$0xff]  ;;  %v9136_v12 = vunpack.c.l.b16 %v8999_v53  ;;  %v11121_v61 = vld [vmem:[%s17590_s7 + $0xc0] sm:$0xff] }
 0xb96   : > { %8927 = vst.msk [vmem:[#allocation5 + $0x88] sm:$0x7f] %vm5486_vm3, %v8909_v30  ;;  %v17311_v48 = vrot.slane %v9181_v16, 1  ;;  %9752 = vmatpush.bf16.msra.mxu2 %v11131_v46  ;;  %v11124_v16 = vld [vmem:[%s17590_s7 + $0xd8] sm:$0xff]  ;;  %v11222_v46 = vld [vmem:[#allocation4 + $0x10] sm:$0xf0] }
 0xb97   : > { %8926 = vst.msk [vmem:[#allocation5 + $0x80] sm:$0xff] %vm3740_vm10, %v8908_v19  ;;  %v17293_v8 = vsel %vm1601_vm0, %v9112_v42, %v17287_v51  ;;  %v17343_v30 = vsel %vm1601_vm0, %v17315_v14, %v9112_v42  ;;  %v9137_v19 = vpack.c.b16 %v9136_v12, %v9136_v12  ;;  %v11223_v12 = vld [vmem:[#allocation4 + $0x10] sm:$0xe] }
 0xb98   : > { %9674 = vmatpush.bf16.msrb.mxu3 %v11115_v25 }
 0xb99   : > { %9709 = vmatpush.bf16.msrb.mxu1 %v11127_v27  ;;  %v9158_v60 = vrot.slane %v9137_v19, 1 }
 0xb9d   : > { %9160 = vrot.lane.b32.xlu1 %v9155_v18, %s17661_s29  ;;  %9710 = vmatpush.bf16.msrb.mxu1 %v11126_v58  ;;  %v11224_v58 = vor.u32 %v11223_v12, %v11222_v46 }
 0xb9e   : > { %v8970_v41 = vld [vmem:[#allocation5 + $0x80] ss:$2 sm:$0x3] }
 0xb9f   : > { %v8971_v38 = vpack.c.bf16 %v8970_v41, %v8970_v41 }
 0xba1   : > { %v8973_v43 = vshrl.u32 %v8971_v38, 16  ;;  %v8976_v52 = vshll.u32 %v8971_v38, 16  ;;  %v9147_v38 = vshll.u32 %v9137_v19, 16  ;;  %9711 = vmatpush.bf16.msrb.mxu1 %v11125_v56 }
 0xba2   : > { %v9124_v3 = vpop.permute.xlu1 %9123 }
 0xba3   : > { %v8975_v21 = vrot.slane %v8973_v43, 7  ;;  %v9228_v31 = vsel %vm3740_vm10, %v9107_v47, %v9124_v3  ;;  %v9149_v43 = vrot.slane %v9147_v38, 1  ;;  %v9128_v47 = vpop.permute.xlu2 %9127 }
 0xba4   : > { %9638 = vmatmul.bf16.vlgmr.msrb.gmra.mxu2 %v9228_v31 }
 0xba5   : > { %v8978_v45 = vor.u32 %v8976_v52, %v8975_v21  ;;  %9166 = vrot.lane.b32.xlu1 %v17293_v8, %s17661_s29  ;;  %v9236_v21 = vsel %vm3740_vm10, %v9111_v4, %v9128_v47  ;;  %9712 = vmatpush.bf16.msrb.mxu1 %v11124_v16 }
 0xba7   : > { %v8981_v6 = vsel %vm17109_vm9, %v8978_v45, %v8980_v44 }
 0xba8   : > { %8982 = vst [vmem:[#allocation4 + $0x30] sm:$0x3] %v8981_v6 }
 0xbaf   : > { %v17304_v11 = vld [vmem:[#allocation4 + $0x30] sm:$0xff] }
 0xbb0   : > { %v8995_v0 = vld [vmem:[#allocation4 + $0x30] sm:$0x1]  ;;  %9133 = vrot.lane.b32.xlu2 %v17304_v11, %s17661_s29  ;;  %v9139_v49 = vshll.u32 %v17304_v11, 16  ;;  %v9143_v36 = vshrl.u32 %v17304_v11, 16  ;;  %v17359_v37 = vrot.slane %v17304_v11, 1 }
 0xbb1   : > { %v9036_v1 = vunpack.c.l.b16 %v8995_v0  ;;  %v11113_v0 = vld [vmem:[%s17590_s7 + $0x80] sm:$0xff] }
 0xbb2   : > { %v9141_v24 = vrot.slane %v9139_v49, 1  ;;  %v17369_v5 = vsel %vm1601_vm0, %v17287_v51, %v17359_v37  ;;  %v9159_v33 = vsel %vm1601_vm0, %v17359_v37, %v9158_v60 }
 0xbb3   : > { %v9037_v7 = vpack.c.b16 %v9036_v1, %v9036_v1  ;;  %v9003_v1 = vld [vmem:[#allocation4 + $0x40] sm:$0x1] }
 0xbb4   : > { %v9145_v22 = vor.u32 %v9143_v36, %v9141_v24  ;;  %v17349_v10 = vsel %vm913_vm1, %v9084_v54, %v9141_v24  ;;  %v9178_v49 = vunpack.c.l.b16 %v9003_v1  ;;  %v11129_v36 = vld [vmem:[%s17590_s7 + $0x100] sm:$0xff] }
 0xbb5   : > { %v9086_v32 = vshll.u32 %v9037_v7, 16 }
 0xbb6   : > { %v9184_v55 = vsel %vm913_vm1, %v9145_v22, %v17311_v48  ;;  %v17382_v3 = vsel %vm913_vm1, %v9145_v22, %v9149_v43  ;;  %v17413_v24 = vpack.c.b16 %v9178_v49, %v9178_v49 }
 0xbb7   : > { %v9088_v20 = vrot.slane %v9086_v32, 1  ;;  %9195 = vrot.lane.b32.xlu1 %v9184_v55, %s17661_s29 }
 0xbb8   : > { %9162 = vrot.lane.b32.xlu2 %v9111_v4, %s17661_s29  ;;  %v9189_v32 = vshll.u32 %v17413_v24, 16 }
 0xbb9   : > { %v9089_v23 = vsel %vm913_vm1, %v9084_v54, %v9088_v20 }
 0xbba   : > { %9100 = vrot.lane.b32.xlu0 %v9089_v23, %s17661_s29  ;;  %v9191_v22 = vrot.slane %v9189_v32, 1  ;;  %v11122_v23 = vld [vmem:[%s17590_s7 + $0xc8] sm:$0xff] }
 0xbc0   : > { %9193 = vrot.lane.b32.xlu2 %v17349_v10, %s17661_s29 }
 0xbc2   : > { %9164 = vrot.lane.b32.xlu0 %v17343_v30, %s17661_s29  ;;  %v9126_v63 = vpop.permute.xlu0 %9125 }
 0xbc3   : > { %v9232_v17 = vsel %vm3740_vm10, %v9109_v57, %v9126_v63 }
 0xbc4   : > { %9643 = vmatmul.bf16.gmra.mxu2 %v9232_v17  ;;  %v17440_v17 = vld [vmem:[%s17591_s8] ss:$0 sm:$0xff] }
 0xbc7   : > { %v9093_v18 = vpop.permute.xlu1 %9092 }
 0xbc8   : > { %v9212_v41 = vsel %vm3740_vm10, %v17123_v9, %v9093_v18  ;;  %9170 = vrot.lane.b32.xlu2 %v9159_v33, %s17661_s29  ;;  %v9116_v9 = vrot.slane %v9037_v7, 1  ;;  %v9185_v7 = vshrl.u32 %v17302_v29, 16 }
 0xbc9   : > { %9604 = vmatmul.bf16.gmra.mxu1 %v9212_v41  ;;  %v9097_v6 = vpop.permute.xlu2 %9096 }
 0xbca   : > { %9168 = vrot.lane.b32.xlu0 %v17369_v5, %s17661_s29  ;;  %v9117_v42 = vsel %vm1601_vm0, %v17287_v51, %v9116_v9  ;;  %v9095_v52 = vpop.permute.xlu0 %9094  ;;  %v11130_v51 = vld [vmem:[%s17590_s7 + $0x108] sm:$0xff]  ;;  %v17397_v2 = vsel %vm3740_vm10, %v17144_v39, %v9097_v6  ;;  %v11123_v39 = vld [vmem:[%s17590_s7 + $0xd0] sm:$0xff]  ;;  %v9187_v40 = vor.u32 %v9185_v7, %v17311_v48  ;;  %v9204_v7 = vrot.slane %v17302_v29, 1 }
 0xbcb   : > { %v17387_v31 = vsel %vm3740_vm10, %v17163_v35, %v9095_v52  ;;  %9753 = vmatpush.bf16.msra.mxu2 %v11130_v51  ;;  %v11114_v35 = vld [vmem:[%s17590_s7 + $0x88] sm:$0xff]  ;;  %9713 = vmatpush.bf16.msrb.mxu1 %v11123_v39 }
 0xbcc   : > { %9675 = vmatpush.bf16.msrb.mxu3 %v11114_v35  ;;  %v9192_v54 = vsel %vm913_vm1, %v9187_v40, %v9191_v22  ;;  %v9205_v40 = vsel %vm1601_vm0, %v17359_v37, %v9204_v7 }
 0xbcf   : > { %v9130_v44 = vpop.permute.xlu1 %9129  ;;  %9754 = vmatpush.bf16.msra.mxu2 %v11129_v36  ;;  %9714 = vmatpush.bf16.msrb.mxu1 %v11122_v23 }
 0xbd0   : > { %v9240_v45 = vsel %vm3740_vm10, %v17343_v30, %v9130_v44  ;;  %9676 = vmatpush.bf16.msrb.mxu3 %v11113_v0 }
 0xbd2   : > { %9197 = vrot.lane.b32.xlu0 %v9192_v54, %s17661_s29  ;;  %s9884_s29 = scalar_lea.sflag [#allocation7], %s323_s23 }
 0xbd3   : > { %9715 = vmatpush.bf16.msrb.mxu1 %v11121_v61 }
 0xbd4   : > { %9648 = vmatmul.bf16.gmra.mxu2 %v9236_v21 }
 0xbd9   : > { %9609 = vmatmul.bf16.gmra.mxu1 %v17387_v31 }
 0xbe4   : > { %9653 = vmatmul.bf16.gmra.mxu2 %v9240_v45 }
 0xbe9   : > { %9614 = vmatmul.bf16.gmra.mxu1 %v17397_v2 }
 0xc02   : > { %v9132_v20 = vpop.permute.xlu0 %9131 }
 0xc03   : > { %v9244_v55 = vsel %vm3740_vm10, %v17293_v8, %v9132_v20 }
 0xc04   : > { %9658 = vmatmul.bf16.gmra.mxu2 %v9244_v55 }
 0xc07   : > { %v9099_v4 = vpop.permute.xlu1 %9098 }
 0xc08   : > { %v9221_v48 = vsel %vm3740_vm10, %v17206_v50, %v9099_v4  ;;  %v9202_v50 = vrot.slane %v11224_v58, 1  ;;  %v9206_v4 = vrot.slane %v17413_v24, 1 }
 0xc09   : > { %9619 = vmatmul.bf16.gmra.mxu1 %v9221_v48 }
 0xc0a   : > { %v9134_v53 = vpop.permute.xlu2 %9133 }
 0xc0b   : > { %v9248_v27 = vsel %vm3740_vm10, %v9117_v42, %v9134_v53 }
 0xc0e   : > { %v9600_v63 = vpop.f32.mrf.mxu1 }
 0xc0f   : > { %v9161_v34 = vpop.permute.xlu1 %9160  ;;  %v9601_v25 = vadd.f32 %v17440_v17, %v9600_v63 }
 0xc10   : > { %v9252_v62 = vsel %vm3740_vm10, %v17179_v28, %v9161_v34  ;;  %v9203_v28 = vsel %vm1601_vm0, %v9202_v50, %v17315_v14  ;;  %v9207_v34 = vsel %vm1601_vm0, %v9204_v7, %v9206_v4 }
 0xc11   : > { %9677 = vmatmul.bf16.vlgmr.msrb.gmra.mxu3 %v9252_v62 }
 0xc12   : > { %v9163_v19 = vpop.permute.xlu2 %9162 }
 0xc13   : > { %v9256_v57 = vsel %vm3740_vm10, %v17185_v26, %v9163_v19 }
 0xc14   : > { %9663 = vmatmul.bf16.gmra.mxu2 %v9248_v27 }
 0xc16   : > { %v9602_v41 = vpop.f32.mrf.mxu1 }
 0xc17   : > { %v9603_v56 = vadd.f32 %v17440_v17, %v9602_v41  ;;  %v9167_v42 = vpop.permute.xlu1 %9166 }
 0xc18   : > { %v9264_v47 = vsel %vm3740_vm10, %v17269_v15, %v9167_v42 }
 0xc1a   : > { %v9194_v35 = vpop.permute.xlu2 %9193 }
 0xc1b   : > { %v9275_v55 = vsel %vm3740_vm10, %v17260_v59, %v9194_v35 }
 0xc21   : > { %9682 = vmatmul.bf16.gmra.mxu3 %v9256_v57 }
 0xc22   : > { %v9171_v36 = vpop.permute.xlu2 %9170 }
 0xc24   : > { %10910 = vmatmul.msk.bf16.vlgmr.msra.gmra.mxu2 %vm3740_vm10, %v9203_v28 }
 0xc27   : > { %v9639_v60 = vpop.f32.mrf.mxu2 }
 0xc28   : > { %v17446_v18 = vadd.f32 %v9639_v60, %v9601_v25 }
 0xc29   : > { %v9196_v61 = vpop.permute.xlu1 %9195 }
 0xc2a   : > { %v9278_v53 = vsel %vm3740_vm10, %v17304_v11, %v9196_v61 }
 0xc2c   : > { %v9101_v33 = vpop.permute.xlu0 %9100 }
 0xc2d   : > { %v9224_v26 = vsel %vm3740_vm10, %v17260_v59, %v9101_v33 }
 0xc2e   : > { %9624 = vmatmul.bf16.gmra.mxu1 %v9224_v26 }
 0xc2f   : > { %v9641_v38 = vpop.f32.mrf.mxu2 }
 0xc30   : > { %v17451_v9 = vadd.f32 %v9641_v38, %v9603_v56 }
 0xc34   : > { %v9165_v43 = vpop.permute.xlu0 %9164  ;;  %10911 = vmatmul.msk.bf16.gmra.mxu2 %vm3740_vm10, %v17343_v30 }
 0xc35   : > { %v9260_v14 = vsel %vm3740_vm10, %v17251_v13, %v9165_v43 }
 0xc36   : > { %9687 = vmatmul.bf16.gmra.mxu3 %v9260_v14 }
 0xc3c   : > { %v9169_v6 = vpop.permute.xlu0 %9168 }
 0xc3d   : > { %v9268_v15 = vsel %vm3740_vm10, %v17349_v10, %v9169_v6 }
 0xc3e   : > { %9716 = vmatmul.bf16.vlgmr.msrb.gmra.mxu1 %v17387_v31 }
 0xc44   : > { %10912 = vmatmul.msk.bf16.gmra.mxu2 %vm3740_vm10, %v17293_v8  ;;  %v9198_v59 = vpop.permute.xlu0 %9197 }
 0xc45   : > { %v9281_v12 = vsel %vm3740_vm10, %v17302_v29, %v9198_v59 }
 0xc46   : > { %9692 = vmatmul.bf16.gmra.mxu3 %v9264_v47  ;;  %v9605_v21 = vpop.f32.mrf.mxu1 }
 0xc47   : > { %v9606_v52 = vadd.f32 %v17440_v17, %v9605_v21  ;;  %v9644_v44 = vpop.f32.mrf.mxu2 }
 0xc49   : > { %v17463_v45 = vadd.f32 %v9644_v44, %v9606_v52 }
 0xc4e   : > { %9721 = vmatmul.bf16.gmra.mxu1 %v17397_v2  ;;  %v9607_v13 = vpop.f32.mrf.mxu1 }
 0xc4f   : > { %v9608_v30 = vadd.f32 %v17440_v17, %v9607_v13  ;;  %v9646_v31 = vpop.f32.mrf.mxu2 }
 0xc51   : > { %v17467_v51 = vadd.f32 %v9646_v31, %v9608_v30 }
 0xc54   : > { %10913 = vmatmul.msk.bf16.gmra.mxu2 %vm3740_vm10, %v17369_v5  ;;  %v9272_v5 = vsel %vm3740_vm10, %v17382_v3, %v9171_v36 }
 0xc56   : > { %9697 = vmatmul.bf16.gmra.mxu3 %v9268_v15  ;;  %v9610_v8 = vpop.f32.mrf.mxu1 }
 0xc57   : > { %v9611_v16 = vadd.f32 %v17440_v17, %v9610_v8  ;;  %v9649_v0 = vpop.f32.mrf.mxu2 }
 0xc59   : > { %v17474_v2 = vadd.f32 %v9649_v0, %v9611_v16 }
 0xc5e   : > { %9726 = vmatmul.bf16.gmra.mxu1 %v9221_v48  ;;  %v9612_v39 = vpop.f32.mrf.mxu1 }
 0xc5f   : > { %v9613_v1 = vadd.f32 %v17440_v17, %v9612_v39  ;;  %v9651_v49 = vpop.f32.mrf.mxu2 }
 0xc61   : > { %v17478_v10 = vadd.f32 %v9651_v49, %v9613_v1 }
 0xc64   : > { %10914 = vmatmul.msk.bf16.gmra.mxu2 %vm3740_vm10, %v9205_v40 }
 0xc66   : > { %9702 = vmatmul.bf16.gmra.mxu3 %v9272_v5  ;;  %v9615_v32 = vpop.f32.mrf.mxu1 }
 0xc67   : > { %v9616_v22 = vadd.f32 %v17440_v17, %v9615_v32  ;;  %v9654_v54 = vpop.f32.mrf.mxu2 }
 0xc69   : > { %v17486_v20 = vadd.f32 %v9654_v54, %v9616_v22 }
 0xc6e   : > { %9731 = vmatmul.bf16.gmra.mxu1 %v9275_v55  ;;  %v9617_v23 = vpop.f32.mrf.mxu1 }
 0xc6f   : > { %v9618_v3 = vadd.f32 %v17440_v17, %v9617_v23  ;;  %v9656_v48 = vpop.f32.mrf.mxu2 }
 0xc71   : > { %v17492_v37 = vadd.f32 %v9656_v48, %v9618_v3 }
 0xc74   : > { %10915 = vmatmul.msk.bf16.gmra.mxu2 %vm3740_vm10, %v9207_v34 }
 0xc7e   : > { %9736 = vmatmul.bf16.gmra.mxu1 %v9278_v53 }
 0xc86   : > { %v9620_v62 = vpop.f32.mrf.mxu1 }
 0xc87   : > { %v9621_v27 = vadd.f32 %v17440_v17, %v9620_v62  ;;  %v9659_v46 = vpop.f32.mrf.mxu2 }
 0xc89   : > { %v17499_v24 = vadd.f32 %v9659_v46, %v9621_v27 }
 0xc8e   : > { %9741 = vmatmul.bf16.gmra.mxu1 %v9281_v12  ;;  %v9622_v58 = vpop.f32.mrf.mxu1 }
 0xc8f   : > { %v9623_v19 = vadd.f32 %v17440_v17, %v9622_v58  ;;  %v9661_v50 = vpop.f32.mrf.mxu2 }
 0xc91   : > { %v17504_v63 = vadd.f32 %v9661_v50, %v9623_v19 }
 0xc94   : > { %v9678_v28 = vpop.f32.mrf.mxu3 }
 0xc95   : > { %v9679_v29 = vadd.f32 %v9678_v28, %v17446_v18 }
 0xc97   : > { %v9664_v57 = vpop.f32.mrf.mxu2 }
 0xc9c   : > { %v9680_v41 = vpop.f32.mrf.mxu3 }
 0xc9d   : > { %v9681_v52 = vadd.f32 %v9680_v41, %v17451_v9 }
 0xc9f   : > { %v9666_v11 = vpop.f32.mrf.mxu2 }
 0xca4   : > { %v9683_v38 = vpop.f32.mrf.mxu3 }
 0xca5   : > { %v9684_v0 = vadd.f32 %v9683_v38, %v17463_v45 }
 0xca7   : > { %v9756_v25 = vpop.f32.mrf.mxu2 }
 0xcab   : > { %v9625_v60 = vpop.f32.mrf.mxu1 }
 0xcac   : > { %v9626_v47 = vadd.f32 %v17440_v17, %v9625_v60  ;;  %v9685_v21 = vpop.f32.mrf.mxu3 }
 0xcad   : > { %v9686_v32 = vadd.f32 %v9685_v21, %v17467_v51 }
 0xcae   : > { %v17510_v31 = vadd.f32 %v9664_v57, %v9626_v47 }
 0xcaf   : > { %v9758_v33 = vpop.f32.mrf.mxu2 }
 0xcb3   : > { %v9627_v26 = vpop.f32.mrf.mxu1 }
 0xcb4   : > { %v9628_v56 = vadd.f32 %v17440_v17, %v9627_v26 }
 0xcb6   : > { %v17514_v7 = vadd.f32 %v9666_v11, %v9628_v56 }
 0xcb7   : > { %v9761_v14 = vpop.f32.mrf.mxu2 }
 0xcb9   : > { %v9688_v16 = vpop.f32.mrf.mxu3 }
 0xcba   : > { %v9689_v34 = vadd.f32 %v9688_v16, %v17474_v2 }
 0xcbb   : > { %v9717_v43 = vpop.f32.mrf.mxu1 }
 0xcbc   : > { %v9718_v42 = vadd.f32 %v9717_v43, %v9679_v29 }
 0xcbe   : > { %v9757_v44 = vadd.f32 %v9756_v25, %v9718_v42 }
 0xcbf   : > { %v9763_v8 = vpop.f32.mrf.mxu2 }
 0xcc0   : > { %v9786_v6 = vmax.f32 %v9757_v44, 0.0 }
 0xcc1   : > { %v9690_v54 = vpop.f32.mrf.mxu3 }
 0xcc2   : > { %v9810_v18 = vrot.slane %v9786_v6, 1  ;;  %v9691_v50 = vadd.f32 %v9690_v54, %v17478_v10 }
 0xcc3   : > { %v9719_v13 = vpop.f32.mrf.mxu1 }
 0xcc4   : > { %v9720_v30 = vadd.f32 %v9719_v13, %v9681_v52 }
 0xcc6   : > { %v9759_v15 = vadd.f32 %v9758_v33, %v9720_v30 }
 0xcc7   : > { %v9766_v40 = vpop.f32.mrf.mxu2 }
 0xcc8   : > { %v9787_v35 = vmax.f32 %v9759_v15, 0.0 }
 0xcc9   : > { %v9693_v46 = vpop.f32.mrf.mxu3 }
 0xcca   : > { %v9811_v39 = vrot.slane %v9787_v35, 1  ;;  %v9694_v38 = vadd.f32 %v9693_v46, %v17486_v20 }
 0xccb   : > { %v9722_v1 = vpop.f32.mrf.mxu1 }
 0xccc   : > { %v9812_v17 = vsel %vm1601_vm0, %v9810_v18, %v9811_v39  ;;  %v9723_v49 = vadd.f32 %v9722_v1, %v9684_v0 }
 0xccd   : > { %v9845_v9 = vmax.f32 %v9786_v6, %v9812_v17 }
 0xcce   : > { %v9762_v36 = vadd.f32 %v9761_v14, %v9723_v49 }
 0xccf   : > { %v9768_v53 = vpop.f32.mrf.mxu2 }
 0xcd0   : > { %v9788_v5 = vmax.f32 %v9762_v36, 0.0 }
 0xcd1   : > { %v9695_v33 = vpop.f32.mrf.mxu3 }
 0xcd2   : > { %v9813_v22 = vrot.slane %v9788_v5, 1  ;;  %v9696_v13 = vadd.f32 %v9695_v33, %v17492_v37 }
 0xcd3   : > { %v9724_v55 = vpop.f32.mrf.mxu1 }
 0xcd4   : > { %v9814_v23 = vsel %vm1601_vm0, %v9811_v39, %v9813_v22  ;;  %v9725_v45 = vadd.f32 %v9724_v55, %v9686_v32 }
 0xcd5   : > { %v9846_v4 = vmax.f32 %v9787_v35, %v9814_v23 }
 0xcd6   : > { %v9764_v3 = vadd.f32 %v9763_v8, %v9725_v45 }
 0xcd7   : > { %v9771_v25 = vpop.f32.mrf.mxu2 }
 0xcd8   : > { %v9789_v48 = vmax.f32 %v9764_v3, 0.0 }
 0xcd9   : > { %v9698_v44 = vpop.f32.mrf.mxu3 }
 0xcda   : > { %v9815_v61 = vrot.slane %v9789_v48, 1  ;;  %v9699_v16 = vadd.f32 %v9698_v44, %v17499_v24 }
 0xcdb   : > { %v9727_v62 = vpop.f32.mrf.mxu1 }
 0xcdc   : > { %v9816_v59 = vsel %vm1601_vm0, %v9813_v22, %v9815_v61  ;;  %v9728_v27 = vadd.f32 %v9727_v62, %v9689_v34 }
 0xcdd   : > { %v9847_v12 = vmax.f32 %v9788_v5, %v9816_v59 }
 0xcde   : > { %v9767_v51 = vadd.f32 %v9766_v40, %v9728_v27 }
 0xcdf   : > { %v9857_v58 = vmax.f32 %v9845_v9, %v9847_v12  ;;  %v9773_v21 = vpop.f32.mrf.mxu2 }
 0xce0   : > { %v9790_v19 = vmax.f32 %v9767_v51, 0.0 }
 0xce1   : > { %9867 = vst.msk [vmem:[#allocation5] sm:$0xff] %vm3740_vm10, %v9857_v58  ;;  %v9700_v18 = vpop.f32.mrf.mxu3 }
 0xce2   : > { %v9817_v57 = vrot.slane %v9790_v19, 1  ;;  %v9701_v24 = vadd.f32 %v9700_v18, %v17504_v63 }
 0xce3   : > { %v9729_v11 = vpop.f32.mrf.mxu1 }
 0xce4   : > { %v9818_v28 = vsel %vm1601_vm0, %v9815_v61, %v9817_v57  ;;  %v9730_v2 = vadd.f32 %v9729_v11, %v9691_v50 }
 0xce5   : > { %v9848_v60 = vmax.f32 %v9789_v48, %v9818_v28 }
 0xce6   : > { %v9769_v41 = vadd.f32 %v9768_v53, %v9730_v2 }
 0xce7   : > { %v9858_v26 = vmax.f32 %v9846_v4, %v9848_v60  ;;  %v9776_v20 = vpop.f32.mrf.mxu2 }
 0xce8   : > { %v9791_v56 = vmax.f32 %v9769_v41, 0.0  ;;  %v9877_v37 = vld [vmem:[#allocation5] ss:$2 sm:$0x1] }
 0xce9   : > { %9868 = vst.msk [vmem:[#allocation5 + $0x8] sm:$0xff] %vm3740_vm10, %v9858_v26  ;;  %v9703_v55 = vpop.f32.mrf.mxu3 }
 0xcea   : > { %v9819_v43 = vrot.slane %v9791_v56, 1  ;;  %9879 = vst.msk [vmem:[%s17532_s27] sm:$0x1] %vm5506_vm14, %v9877_v37  ;;  %v9704_v4 = vadd.f32 %v9703_v55, %v17510_v31 }
 0xceb   : > { %v9732_v29 = vpop.f32.mrf.mxu1 }
 0xcec   : > { %v9820_v10 = vsel %vm1601_vm0, %v9817_v57, %v9819_v43  ;;  %v9733_v14 = vadd.f32 %v9732_v29, %v9694_v38 }
 0xced   : > { %v9849_v42 = vmax.f32 %v9790_v19, %v9820_v10 }
 0xcee   : > { %v9772_v47 = vadd.f32 %v9771_v25, %v9733_v14 }
 0xcef   : > { %v9778_v32 = vpop.f32.mrf.mxu2 }
 0xcf0   : > { %v9792_v52 = vmax.f32 %v9772_v47, 0.0 }
 0xcf1   : > { %v9705_v27 = vpop.f32.mrf.mxu3 }
 0xcf2   : > { %v9821_v30 = vrot.slane %v9792_v52, 1  ;;  %v9706_v46 = vadd.f32 %v9705_v27, %v17514_v7 }
 0xcf3   : > { %v9734_v6 = vpop.f32.mrf.mxu1 }
 0xcf4   : > { %v9735_v15 = vadd.f32 %v9734_v6, %v9696_v13 }
 0xcf6   : > { %v9774_v8 = vadd.f32 %v9773_v21, %v9735_v15 }
 0xcf7   : > { %v9781_v48 = vpop.f32.mrf.mxu2 }
 0xcf8   : > { %v9793_v35 = vmax.f32 %v9774_v8, 0.0 }
 0xcfa   : > { %v9823_v0 = vrot.slane %v9793_v35, 1 }
 0xcfb   : > { %v9737_v39 = vpop.f32.mrf.mxu1 }
 0xcfc   : > { %v9824_v1 = vsel %vm1601_vm0, %v9821_v30, %v9823_v0  ;;  %v9738_v17 = vadd.f32 %v9737_v39, %v9699_v16 }
 0xcfd   : > { %v9851_v49 = vmax.f32 %v9792_v52, %v9824_v1 }
 0xcfe   : > { %v9777_v9 = vadd.f32 %v9776_v20, %v9738_v17 }
 0xcff   : > { %v9861_v36 = vmax.f32 %v9849_v42, %v9851_v49  ;;  %v9783_v31 = vpop.f32.mrf.mxu2 }
 0xd00   : > { %v9794_v5 = vmax.f32 %v9777_v9, 0.0 }
 0xd01   : > { %9871 = vst.msk [vmem:[#allocation5 + $0x20] sm:$0xff] %vm3740_vm10, %v9861_v36 }
 0xd02   : > { %v9825_v40 = vrot.slane %v9794_v5, 1 }
 0xd03   : > { %v9739_v22 = vpop.f32.mrf.mxu1 }
 0xd04   : > { %v9740_v54 = vadd.f32 %v9739_v22, %v9701_v24 }
 0xd06   : > { %v9779_v23 = vadd.f32 %v9778_v32, %v9740_v54 }
 0xd08   : > { %v9795_v45 = vmax.f32 %v9779_v23, 0.0 }
 0xd0a   : > { %v9827_v3 = vrot.slane %v9795_v45, 1 }
 0xd0b   : > { %v9742_v34 = vpop.f32.mrf.mxu1 }
 0xd0c   : > { %v9828_v61 = vsel %vm1601_vm0, %v9825_v40, %v9827_v3  ;;  %v9743_v53 = vadd.f32 %v9742_v34, %v9704_v4 }
 0xd0d   : > { %v9853_v62 = vmax.f32 %v9794_v5, %v9828_v61 }
 0xd0e   : > { %v9782_v59 = vadd.f32 %v9781_v48, %v9743_v53 }
 0xd10   : > { %v9796_v63 = vmax.f32 %v9782_v59, 0.0 }
 0xd12   : > { %v9829_v12 = vrot.slane %v9796_v63, 1 }
 0xd13   : > { %v9744_v51 = vpop.f32.mrf.mxu1 }
 0xd14   : > { %v9830_v58 = vsel %vm1601_vm0, %v9827_v3, %v9829_v12  ;;  %v9745_v19 = vadd.f32 %v9744_v51, %v9706_v46 }
 0xd15   : > { %v9854_v50 = vmax.f32 %v9795_v45, %v9830_v58 }
 0xd16   : > { %v9784_v57 = vadd.f32 %v9783_v31, %v9745_v19 }
 0xd18   : > { %v9797_v11 = vmax.f32 %v9784_v57, 0.0 }
 0xd1a   : > { %v9831_v28 = vrot.slane %v9797_v11, 1 }
 0xd1c   : > { %v9832_v2 = vsel %vm1601_vm0, %v9829_v12, %v9831_v28  ;;  %v9856_v25 = vmax.f32 %v9797_v11, %v9831_v28 }
 0xd1d   : > { %v9855_v60 = vmax.f32 %v9796_v63, %v9832_v2 }
 0xd1e   : > { %v9866_v41 = vmax.f32 %v9854_v50, %v9856_v25 }
 0xd1f   : > { %v9865_v7 = vmax.f32 %v9853_v62, %v9855_v60 }
 0xd20   : > { %9876 = vst.msk [vmem:[#allocation5 + $0x48] sm:$0x7f] %vm5486_vm3, %v9866_v41 }
 0xd21   : > { %9875 = vst.msk [vmem:[#allocation5 + $0x40] sm:$0xff] %vm3740_vm10, %v9865_v7 }
 0xd28   : > { %v9880_v33 = vld [vmem:[#allocation5 + $0x40] ss:$2 sm:$0x1] }
 0xd29   : > { %10916 = vst.msk [vmem:[%s17532_s27 + $0x1] sm:$0x1] %vm5506_vm14, %v9880_v33 }
 0xd2a   : > { %11384 = shalt.err (!%p11381_p3)
}
 0xd2b   : > { %s11430_s23 = smov 1  }
 0xd2c   : > { %11236 = dma.vmem_to_hbm [thread:$0]  (%p11519_p5), %s9896_s25, 32, %s9898_s21, %s9884_s29, %s17660_s22, %s17660_s22, %s11430_s23  }
 0xd2d PF: > { %p11242_p4 = scmp.ge.s32.totalorder %s11419_s12, 2  ;;  %s9912_s0 = sand.u32 1, %s11407_s30  }
 0xd2e   : > { %s9913_s27 = scalar_lea.sflag [#allocation7], %s9912_s0 }
 0xd2f   : > { %p11239_p7 = pnand %p11242_p4, %p11523_p6 }
 0xd31   : > { %p11240_p8 = pneg %p11239_p7 }
 0xd33   : > { %11402 = dma.done.wait (%p11240_p8), %s9913_s27, 32  }
 0xd34   : > { %11404 = vsyncadd (%p11240_p8), %s9913_s27, 4294967264  ;;  %p19_p9 = scmp.ge.s32.totalorder %s11506_s15, 4   ;;  %s17767_s30 = smov %s11411_s10 }
 0xd35   : > { %s17768_s10 = smov %s11415_s11  ;;  %s17769_s11 = smov %s11517_s18 }
 0xd36   : > { %s17770_s12 = smov %s11506_s15  ;;  %21 = sbr.rel (!%p19_p9) target bundleno = 5 (0x5), region = 111 }
 0xd3b   :  { %9919 = vsyncpa [#allocation7], 1 }
 0xd3c   :  { %9921 = vsyncpa [#allocation7 + $0x1], 1 }

</bundles_post_ra>
